<compile_context>
chip_gen: v7x
topology: tpu7x:2x2x1
jax: 0.10.0
libtpu: 0.0.40
codegen_flags: <defaults>
</compile_context>

<pallas_src>
import functools
import math

import jax
import jax.numpy as jnp
from jax.experimental import pallas as pl
from jax.experimental.pallas import tpu as pltpu

# ----------------------------- configuration --------------------------------
ACTION_DIM = 16
RNN_HIDDEN = 128
TTY_ROWS, TTY_COLS = 4, 32
SCREEN_C, SCREEN_H, SCREEN_W = 3, 72, 72

SCREEN_CONVS = [  # (in_ch, out_ch, kernel, stride)
    (3, 32, 8, 4),
    (32, 64, 4, 2),
    (64, 128, 3, 2),
    (128, 128, 3, 2),
]
BOTTOM_CONVS = [(2, 32, 8, 4), (32, 64, 4, 1)]
TOP_HID = 128
BOT_HID = 128
SCR_HID = 512
H_DIM = TOP_HID + BOT_HID + SCR_HID + ACTION_DIM  # prev-action one-hot included


def conv_out(l, k, s):
    return (l - k) // s + 1


def _round_up(x, m):
    return ((x + m - 1) // m) * m


def _pad_to(x, shape):
    pads = [(0, s - d) for d, s in zip(x.shape, shape)]
    if all(p == (0, 0) for p in pads):
        return x
    return jnp.pad(x, pads)


# --------------------------- tiled Pallas GEMM kernel -------------------------
def _matmul_kernel(x_ref, w_ref, b_ref, o_ref, acc_ref, *, act, n_k):
    @pl.when(pl.program_id(2) == 0)
    def _():
        acc_ref[...] = jnp.zeros_like(acc_ref)

    acc_ref[...] += jnp.dot(x_ref[...], w_ref[...], preferred_element_type=jnp.float32)

    @pl.when(pl.program_id(2) == n_k - 1)
    def _():
        y = acc_ref[...] + b_ref[...]
        if act == "elu":
            # ELU in f32; exp(min(y,0)) avoids inf on the (discarded) positive branch.
            y = jnp.where(y > 0.0, y, jnp.exp(jnp.minimum(y, 0.0)) - 1.0)
        o_ref[...] = y.astype(o_ref.dtype)


def _pick_m_tile(M):
    """Big M tiles cut grid steps & deepen DMA overlap, bounded to <=~25% zero-padding."""
    Mp8 = _round_up(max(M, 1), 8)
    if Mp8 < 256:
        return Mp8
    for cand in (1024, 512):
        if (_round_up(M, cand) - M) * 4 <= M:
            return cand
    return 256


def _pick_k_tile(K):
    """Prefer tk=512/256 (pad K up) so the tk=128 fallback never triggers; <=~33% padding."""
    for cand in (512, 256):
        kp = _round_up(K, cand)
        if (kp - K) * 3 <= K:
            return cand, kp
    return 128, _round_up(K, 128)


def linear(x, w, b, act="none", out_dtype=jnp.float32):
    """y = act(x @ w + b).  bf16 MXU operands, f32 accumulation, tiled + pipelined."""
    M, K = x.shape
    Kw, N = w.shape
    assert K == Kw
    x = x.astype(jnp.bfloat16)
    w = w.astype(jnp.bfloat16)
    b = b.astype(jnp.float32)

    tm = _pick_m_tile(M)
    Mp = _round_up(M, tm)

    Np = _round_up(N, 128)
    if Np % 512 == 0 and Np >= 1024:
        tn = 512
    elif Np % 256 == 0:
        tn = 256
    else:
        tn = 128

    tk, Kp = _pick_k_tile(K)
    nk = Kp // tk

    # v7x megacore: guarantee >=2 blocks along a parallel axis when the grid would be (1,1,nk).
    if (Mp // tm) == 1 and (Np // tn) == 1 and Mp % 16 == 0:
        tm = Mp // 2

    xp = _pad_to(x, (Mp, Kp))
    wp = _pad_to(w, (Kp, Np))
    bp = _pad_to(b.reshape(1, N), (1, Np))

    out = pl.pallas_call(
        functools.partial(_matmul_kernel, act=act, n_k=nk),
        out_shape=jax.ShapeDtypeStruct((Mp, Np), out_dtype),
        grid_spec=pltpu.PrefetchScalarGridSpec(
            num_scalar_prefetch=0,
            grid=(Mp // tm, Np // tn, nk),
            in_specs=[
                pl.BlockSpec((tm, tk), lambda i, j, k: (i, k)),
                pl.BlockSpec((tk, tn), lambda i, j, k: (k, j)),
                pl.BlockSpec((1, tn), lambda i, j, k: (0, j)),
            ],
            out_specs=pl.BlockSpec((tm, tn), lambda i, j, k: (i, j)),
            scratch_shapes=[pltpu.VMEM((tm, tn), jnp.float32)],
        ),
        compiler_params=pltpu.CompilerParams(
            dimension_semantics=("parallel", "parallel", "arbitrary")),
    )(xp, wp, bp)
    if (Mp, Np) != (M, N):
        out = out[:M, :N]
    return out


# ------------------------- im2col glue (channels-last) ------------------------
# TODO(synk): im2col is plain-JAX glue (XLA slices/concat); bf16 + channels-last so no
#             transposes, but the patch tensor still amplifies HBM traffic by ~k^2/s^2.
def _im2col2d(x, k, s):
    # x: (N, H, W, C) NHWC -> patches (N*OH*OW, k*k*C) in (kh, kw, C) order.
    n, h, w, c = x.shape
    oh, ow = conv_out(h, k, s), conv_out(w, k, s)
    cols = []
    for di in range(k):
        for dj in range(k):
            cols.append(x[:, di:di + s * (oh - 1) + 1:s, dj:dj + s * (ow - 1) + 1:s, :])
    p = jnp.concatenate(cols, axis=-1)           # (N, OH, OW, k*k*C)
    return p.reshape(n * oh * ow, k * k * c), oh, ow


def conv2d_elu(x, w_flat, b, k, stride):
    # x: (N, H, W, C) bf16; w_flat: (k*k*C, O) bf16.  Output stays NHWC bf16.
    n = x.shape[0]
    patches, oh, ow = _im2col2d(x, k, stride)
    y = linear(patches, w_flat, b, act="elu", out_dtype=jnp.bfloat16)
    return y.reshape(n, oh, ow, w_flat.shape[1])


def _im2col1d(x, k, s):
    # x: (N, L, C) -> (N*OL, k*C) in (tap, C) order.
    n, l, c = x.shape
    ol = conv_out(l, k, s)
    cols = [x[:, d:d + s * (ol - 1) + 1:s, :] for d in range(k)]
    p = jnp.concatenate(cols, axis=-1)           # (N, OL, k*C)
    return p.reshape(n * ol, k * c), ol


def conv1d_elu(x, w_flat, b, k, stride):
    n = x.shape[0]
    patches, ol = _im2col1d(x, k, stride)
    y = linear(patches, w_flat, b, act="elu", out_dtype=jnp.bfloat16)
    return y.reshape(n, ol, w_flat.shape[1])


# ------------------------------ LSTM kernel ----------------------------------
# Batch-major, lane-major layout: xg slab (Bp, U*4H), out slab (Bp, U*H).  Every per-timestep
# access is a static, 128-aligned lane slice (no sublane relayout, no XLA transposes outside).
def _lstm_kernel(xg_ref, whh_ref, out_ref, hn_ref, cn_ref, h_sc, c_sc, *,
                 u, t_total, mask_tail):
    t = pl.program_id(0)

    @pl.when(t == 0)
    def _():
        h_sc[...] = jnp.zeros_like(h_sc)
        c_sc[...] = jnp.zeros_like(c_sc)

    H = whh_ref.shape[0]
    G = 4 * H
    h = h_sc[...]
    c = c_sc[...]
    for i in range(u):                      # U timesteps per grid step (static unroll)
        # W_hh is read from VMEM inside the loop (not hoisted across the unroll): avoids
        # holding a 32-vreg tile live across all U recurrence steps.
        gates = xg_ref[:, i * G:(i + 1) * G].astype(jnp.float32) + jnp.dot(
            h.astype(jnp.bfloat16), whh_ref[...], preferred_element_type=jnp.float32)
        ig = jax.nn.sigmoid(gates[:, 0 * H:1 * H])
        fg = jax.nn.sigmoid(gates[:, 1 * H:2 * H])
        gg = jnp.tanh(gates[:, 2 * H:3 * H])
        og = jax.nn.sigmoid(gates[:, 3 * H:4 * H])
        c_new = fg * c + ig * gg
        h_new = og * jnp.tanh(c_new)
        if mask_tail:
            # Freeze h/c on padded timesteps so U can always be 8.
            keep = ((t * u + i) < t_total).astype(jnp.float32)
            c = keep * c_new + (1.0 - keep) * c
            h = keep * h_new + (1.0 - keep) * h
        else:
            c, h = c_new, h_new
        out_ref[:, i * H:(i + 1) * H] = h.astype(out_ref.dtype)
    h_sc[...] = h
    c_sc[...] = c

    # NOTE: hn/cn use a constant-index output block and are written only on the last grid
    # step; this relies on the (single) grid axis staying "arbitrary" (sequential).
    @pl.when(t == pl.num_programs(0) - 1)
    def _():
        hn_ref[...] = h
        cn_ref[...] = c


def lstm_pallas(xg, whh_t):
    # xg: (B, T, 4H) batch-major bf16 = x @ W_ih^T + b_ih + b_hh.  whh_t: (H, 4H).
    B, T, G = xg.shape
    H = G // 4
    U = 8
    Bp = _round_up(max(B, 8), 8)            # fill sublanes; padded rows are independent
    Tp = _round_up(T, U)
    if Bp != B or Tp != T:
        xg = jnp.pad(xg, ((0, Bp - B), (0, Tp - T), (0, 0)))
    xg2 = xg.reshape(Bp, Tp * G).astype(jnp.bfloat16)

    out, hn, cn = pl.pallas_call(
        functools.partial(_lstm_kernel, u=U, t_total=T, mask_tail=(Tp != T)),
        out_shape=(
            jax.ShapeDtypeStruct((Bp, Tp * H), jnp.bfloat16),
            jax.ShapeDtypeStruct((Bp, H), jnp.float32),
            jax.ShapeDtypeStruct((Bp, H), jnp.float32),
        ),
        grid_spec=pltpu.PrefetchScalarGridSpec(
            num_scalar_prefetch=0,
            grid=(Tp // U,),
            in_specs=[
                pl.BlockSpec((Bp, U * G), lambda t: (0, t)),
                pl.BlockSpec((H, G), lambda t: (0, 0)),
            ],
            out_specs=[
                pl.BlockSpec((Bp, U * H), lambda t: (0, t)),
                pl.BlockSpec((Bp, H), lambda t: (0, 0)),
                pl.BlockSpec((Bp, H), lambda t: (0, 0)),
            ],
            scratch_shapes=[
                pltpu.VMEM((Bp, H), jnp.float32),
                pltpu.VMEM((Bp, H), jnp.float32),
            ],
        ),
        compiler_params=pltpu.CompilerParams(dimension_semantics=("arbitrary",)),
    )(xg2, whh_t.astype(jnp.bfloat16))

    core = out.reshape(Bp, Tp, H)[:B, :T]    # (B, T, H) bf16, batch-major
    return core, hn[:B], cn[:B]


# ------------------------------ parameters -----------------------------------
def init_params(key):
    keys = iter(jax.random.split(key, 64))

    def lin(in_d, out_d, w_dtype=jnp.bfloat16):
        bnd = 1.0 / math.sqrt(in_d)
        w = jax.random.uniform(next(keys), (in_d, out_d), jnp.float32, -bnd, bnd)
        b = jax.random.uniform(next(keys), (out_d,), jnp.float32, -bnd, bnd)
        return w.astype(w_dtype), b

    def conv2d_p(ci, co, k, scale=1.0):
        bnd = 1.0 / math.sqrt(ci * k * k)
        w = jax.random.uniform(next(keys), (co, ci, k, k), jnp.float32, -bnd, bnd)
        b = jax.random.uniform(next(keys), (co,), jnp.float32, -bnd, bnd)
        # torch (O,C,kh,kw) -> NHWC-im2col (kh,kw,C, O); fold the input scale into the weight.
        wf = (w.transpose(2, 3, 1, 0).reshape(k * k * ci, co) * scale).astype(jnp.bfloat16)
        return wf, b

    def conv1d_p(ci, co, k, scale=1.0):
        bnd = 1.0 / math.sqrt(ci * k)
        w = jax.random.uniform(next(keys), (co, ci, k), jnp.float32, -bnd, bnd)
        b = jax.random.uniform(next(keys), (co,), jnp.float32, -bnd, bnd)
        wf = (w.transpose(2, 1, 0).reshape(k * ci, co) * scale).astype(jnp.bfloat16)
        return wf, b

    p = {}
    # TopLineEncoder: one_hot(256) -> Linear -> ELU -> Linear -> ELU
    # (first linear kept f32 as an embedding table; the one-hot GEMM is done as gather+sum)
    p["top_w1"], p["top_b1"] = lin(TTY_COLS * 256, TOP_HID, w_dtype=jnp.float32)
    p["top_w2"], p["top_b2"] = lin(TOP_HID, TOP_HID)
    # BottomLinesEncoder: Conv1d stack -> flatten -> MLP   (/10 folded into first conv weights)
    p["bl_conv"] = [conv1d_p(i, o, k, scale=(0.1 if idx == 0 else 1.0))
                    for idx, (i, o, k, _) in enumerate(BOTTOM_CONVS)]
    l = TTY_COLS
    for (_, _, k, s) in BOTTOM_CONVS:
        l = conv_out(l, k, s)
    p["bl_w1"], p["bl_b1"] = lin(l * BOTTOM_CONVS[-1][1], BOT_HID)
    p["bl_w2"], p["bl_b2"] = lin(BOT_HID, BOT_HID)
    # ScreenEncoder: Conv2d stack -> flatten -> Linear -> ELU  (/255 folded into first conv)
    p["scr_conv"] = [conv2d_p(i, o, k, scale=(1.0 / 255.0 if idx == 0 else 1.0))
                     for idx, (i, o, k, _) in enumerate(SCREEN_CONVS)]
    h, w = SCREEN_H, SCREEN_W
    for (_, _, k, s) in SCREEN_CONVS:
        h, w = conv_out(h, k, s), conv_out(w, k, s)
    p["scr_w"], p["scr_b"] = lin(h * w * SCREEN_CONVS[-1][1], SCR_HID)
    # LSTM (1 layer, batch_first) -- weights stored transposed, bf16 for the MXU
    bnd = 1.0 / math.sqrt(RNN_HIDDEN)
    p["w_ih_t"] = jax.random.uniform(next(keys), (H_DIM, 4 * RNN_HIDDEN),
                                     jnp.float32, -bnd, bnd).astype(jnp.bfloat16)
    p["w_hh_t"] = jax.random.uniform(next(keys), (RNN_HIDDEN, 4 * RNN_HIDDEN),
                                     jnp.float32, -bnd, bnd).astype(jnp.bfloat16)
    p["b_ih"] = jax.random.uniform(next(keys), (4 * RNN_HIDDEN,), jnp.float32, -bnd, bnd)
    p["b_hh"] = jax.random.uniform(next(keys), (4 * RNN_HIDDEN,), jnp.float32, -bnd, bnd)
    # head
    p["head_w"], p["head_b"] = lin(RNN_HIDDEN, ACTION_DIM)
    return p


# ------------------------------- forward -------------------------------------
def actor_forward(params, screen_image, tty_chars, prev_actions):
    B, T, C, H, W = screen_image.shape
    N = B * T

    topline = tty_chars[..., 0, :].reshape(N, TTY_COLS)        # (N, COLS) int
    bottom = tty_chars[..., -2:, :].reshape(N, 2 * TTY_COLS)   # (N, 2*COLS) int

    # --- TopLineEncoder: embedding-gather formulation of one_hot(256) @ W1 (identical math) ---
    flat_idx = (jnp.arange(TTY_COLS, dtype=jnp.int32)[None, :] * 256 + topline).reshape(-1)
    emb = jnp.take(params["top_w1"], flat_idx, axis=0).reshape(N, TTY_COLS, TOP_HID)
    x = emb.sum(axis=1) + params["top_b1"]
    x = jnp.where(x > 0.0, x, jnp.expm1(x))                    # ELU (plain JAX, tiny tensor)
    top_out = linear(x, params["top_w2"], params["top_b2"], act="elu", out_dtype=jnp.bfloat16)

    # --- BottomLinesEncoder (channels-last; /10 already folded into conv weights) ---
    blf = bottom.astype(jnp.float32)
    blf = jnp.where((blf > 44.0) & (blf < 58.0), blf - 47.0, 0.0)   # keep only digits / - . /
    x = blf.reshape(N, 2, TTY_COLS).transpose(0, 2, 1).astype(jnp.bfloat16)  # (N, L, C=2)
    for (wf, b), (_, _, k, s) in zip(params["bl_conv"], BOTTOM_CONVS):
        x = conv1d_elu(x, wf, b, k, s)
    x = x.reshape(N, -1)
    x = linear(x, params["bl_w1"], params["bl_b1"], act="elu", out_dtype=jnp.bfloat16)
    bot_out = linear(x, params["bl_w2"], params["bl_b2"], act="elu", out_dtype=jnp.bfloat16)

    # --- ScreenEncoder (NHWC end-to-end; /255 already folded into first conv weights) ---
    # Cast to bf16 BEFORE the layout transpose: 0..255 is exact in bf16, halves the bytes moved.
    s_img = screen_image.reshape(N, C, H, W).astype(jnp.bfloat16).transpose(0, 2, 3, 1)
    for (wf, b), (_, _, k, st) in zip(params["scr_conv"], SCREEN_CONVS):
        s_img = conv2d_elu(s_img, wf, b, k, st)
    scr_out = linear(s_img.reshape(N, -1), params["scr_w"], params["scr_b"],
                     act="elu", out_dtype=jnp.bfloat16)

    # --- prev-action one-hot ---
    pa = jax.nn.one_hot(prev_actions.reshape(N), ACTION_DIM, dtype=jnp.bfloat16)

    # --- concat (same order as the torch module) ---
    encoded = jnp.concatenate([top_out, bot_out, scr_out, pa], axis=1)   # (N, H_DIM) bf16

    # --- LSTM, batch_first, zero initial state (state=None); everything batch-major ---
    xg = linear(encoded, params["w_ih_t"], params["b_ih"] + params["b_hh"],
                act="none", out_dtype=jnp.bfloat16)                      # (N, 4H) bf16
    xg = xg.reshape(B, T, 4 * RNN_HIDDEN)                                # no transpose
    core, hn, cn = lstm_pallas(xg, params["w_hh_t"])                     # core (B,T,H) bf16

    # --- head (row-wise, runs directly on the batch-major LSTM output) ---
    logits = linear(core.reshape(N, RNN_HIDDEN), params["head_w"], params["head_b"],
                    act="none", out_dtype=jnp.float32)
    logits = logits.reshape(B, T, ACTION_DIM)
    new_state = (hn[None], cn[None])                                     # (num_layers=1, B, H)
    return logits, new_state


# --------------------------------- main ---------------------------------------
if __name__ == "__main__":
    B, T = 2, 4
    key = jax.random.PRNGKey(0)
    pkey, k1, k2, k3 = jax.random.split(key, 4)

    params = init_params(pkey)
    screen_image = jax.random.randint(k1, (B, T, SCREEN_C, SCREEN_H, SCREEN_W), 0, 256,
                                      dtype=jnp.int32)
    tty_chars = jax.random.randint(k2, (B, T, TTY_ROWS, TTY_COLS), 32, 128, dtype=jnp.int32)
    prev_actions = jax.random.randint(k3, (B, T), 0, ACTION_DIM, dtype=jnp.int32)

    fwd = jax.jit(actor_forward)
    logits, (hn, cn) = fwd(params, screen_image, tty_chars, prev_actions)
    jax.block_until_ready((logits, hn, cn))

    assert logits.shape == (B, T, ACTION_DIM)
    assert hn.shape == (1, B, RNN_HIDDEN) and cn.shape == (1, B, RNN_HIDDEN)
    assert bool(jnp.all(jnp.isfinite(logits)))
    print("KERNEL_OK")
</pallas_src>

<mosaic_0001>
module attributes {stable_mosaic.version = 11 : i64} {
  func.func @_matmul_kernel(%arg0: i32, %arg1: i32, %arg2: i32, %arg3: memref<512x256xbf16, #tpu.memory_space<vmem>>, %arg4: memref<256x128xbf16, #tpu.memory_space<vmem>>, %arg5: memref<1x128xf32, #tpu.memory_space<vmem>>, %arg6: memref<512x128xbf16, #tpu.memory_space<vmem>>, %arg7: memref<512x128xf32, #tpu.memory_space<vmem>>) attributes {dimension_semantics = [#tpu.dimension_semantics<parallel>, #tpu.dimension_semantics<parallel>, #tpu.dimension_semantics<arbitrary>], iteration_bounds = array<i64: 5, 1, 1>, scalar_prefetch = 0 : i64, scratch_operands = 1 : i64, tpu.core_type = #tpu.core_type<tc>, window_params = [{transform_indices = @transform_0, window_bounds = array<i64: 512, 256>}, {transform_indices = @transform_1, window_bounds = array<i64: 256, 128>}, {transform_indices = @transform_2, window_bounds = array<i64: 1, 128>}, {transform_indices = @transform_3, window_bounds = array<i64: 512, 128>}]} {
    %c0_i32 = arith.constant 0 : i32
    %0 = arith.cmpi eq, %arg2, %c0_i32 : i32
    %1 = arith.extui %0 : i1 to i32
    %c0_i32_0 = arith.constant 0 : i32
    %2 = arith.cmpi ne, %1, %c0_i32_0 : i32
    scf.if %2 {
      %cst_10 = arith.constant 0.000000e+00 : f32
      %12 = vector.broadcast %cst_10 : f32 to vector<512x128xf32>
      %c0_11 = arith.constant 0 : index
      %c0_12 = arith.constant 0 : index
      %13 = vector.load %arg7[%c0_11, %c0_12] : memref<512x128xf32, #tpu.memory_space<vmem>>, vector<512x128xf32>
      tpu.vector_store %arg7[%c0_11, %c0_12], %12 {strides = array<i32>} : memref<512x128xf32, #tpu.memory_space<vmem>>, vector<512x128xf32>,
    } else {
    }
    %c0 = arith.constant 0 : index
    %c0_1 = arith.constant 0 : index
    %3 = vector.load %arg7[%c0, %c0_1] : memref<512x128xf32, #tpu.memory_space<vmem>>, vector<512x128xf32>
    %c0_2 = arith.constant 0 : index
    %c0_3 = arith.constant 0 : index
    %4 = vector.load %arg3[%c0_2, %c0_3] : memref<512x256xbf16, #tpu.memory_space<vmem>>, vector<512x256xbf16>
    %c0_4 = arith.constant 0 : index
    %c0_5 = arith.constant 0 : index
    %5 = vector.load %arg4[%c0_4, %c0_5] : memref<256x128xbf16, #tpu.memory_space<vmem>>, vector<256x128xbf16>
    %cst = arith.constant dense<0.000000e+00> : vector<512x128xf32>
    %6 = tpu.matmul %4, %5, %cst {dimension_numbers = #tpu.dot_dimension_numbers<[1], [0], [0], [1], [0, 0, 1, 1], [], []>} : vector<512x256xbf16>, vector<256x128xbf16>, vector<512x128xf32> -> vector<512x128xf32>
    %7 = arith.addf %3, %6 : vector<512x128xf32>
    %c0_6 = arith.constant 0 : index
    %c0_7 = arith.constant 0 : index
    %8 = vector.load %arg7[%c0_6, %c0_7] : memref<512x128xf32, #tpu.memory_space<vmem>>, vector<512x128xf32>
    tpu.vector_store %arg7[%c0_6, %c0_7], %7 {strides = array<i32>} : memref<512x128xf32, #tpu.memory_space<vmem>>, vector<512x128xf32>,
    %c0_i32_8 = arith.constant 0 : i32
    %9 = arith.cmpi eq, %arg2, %c0_i32_8 : i32
    %10 = arith.extui %9 : i1 to i32
    %c0_i32_9 = arith.constant 0 : i32
    %11 = arith.cmpi ne, %10, %c0_i32_9 : i32
    scf.if %11 {
      %c0_10 = arith.constant 0 : index
      %c0_11 = arith.constant 0 : index
      %12 = vector.load %arg7[%c0_10, %c0_11] : memref<512x128xf32, #tpu.memory_space<vmem>>, vector<512x128xf32>
      %c0_12 = arith.constant 0 : index
      %c0_13 = arith.constant 0 : index
      %13 = vector.load %arg5[%c0_12, %c0_13] : memref<1x128xf32, #tpu.memory_space<vmem>>, vector<1x128xf32>
      %14 = vector.broadcast %13 : vector<1x128xf32> to vector<512x128xf32>
      %15 = arith.addf %12, %14 : vector<512x128xf32>
      %cst_14 = arith.constant 0.000000e+00 : f32
      %16 = vector.broadcast %cst_14 : f32 to vector<512x128xf32>
      %17 = arith.cmpf ogt, %15, %16 : vector<512x128xf32>
      %cst_15 = arith.constant 0.000000e+00 : f32
      %18 = vector.broadcast %cst_15 : f32 to vector<512x128xf32>
      %19 = arith.minimumf %15, %18 : vector<512x128xf32>
      %20 = math.exp %19 : vector<512x128xf32>
      %cst_16 = arith.constant 1.000000e+00 : f32
      %21 = vector.broadcast %cst_16 : f32 to vector<512x128xf32>
      %22 = arith.subf %20, %21 : vector<512x128xf32>
      %23 = arith.select %17, %15, %22 : vector<512x128xi1>, vector<512x128xf32>
      %24 = arith.truncf %23 : vector<512x128xf32> to vector<512x128xbf16>
      %c0_17 = arith.constant 0 : index
      %c0_18 = arith.constant 0 : index
      %25 = vector.load %arg6[%c0_17, %c0_18] : memref<512x128xbf16, #tpu.memory_space<vmem>>, vector<512x128xbf16>
      tpu.vector_store %arg6[%c0_17, %c0_18], %24 {strides = array<i32>} : memref<512x128xbf16, #tpu.memory_space<vmem>>, vector<512x128xbf16>,
    } else {
    }
    return
  }
  func.func @transform_0(%arg0: i32, %arg1: i32, %arg2: i32) -> (i32, i32) {
    %c0_i32 = arith.constant 0 : i32
    return %arg0, %arg2 : i32, i32
  }
  func.func @transform_1(%arg0: i32, %arg1: i32, %arg2: i32) -> (i32, i32) {
    %c0_i32 = arith.constant 0 : i32
    return %arg2, %arg1 : i32, i32
  }
  func.func @transform_2(%arg0: i32, %arg1: i32, %arg2: i32) -> (i32, i32) {
    %c0_i32 = arith.constant 0 : i32
    %c0_i32_0 = arith.constant 0 : i32
    return %c0_i32, %arg1 : i32, i32
  }
  func.func @transform_3(%arg0: i32, %arg1: i32, %arg2: i32) -> (i32, i32) {
    %c0_i32 = arith.constant 0 : i32
    return %arg0, %arg1 : i32, i32
  }
}

module attributes {stable_mosaic.version = 11 : i64} {
  func.func @_matmul_kernel(%arg0: i32, %arg1: i32, %arg2: i32, %arg3: memref<256x512xbf16, #tpu.memory_space<vmem>>, %arg4: memref<512x128xbf16, #tpu.memory_space<vmem>>, %arg5: memref<1x128xf32, #tpu.memory_space<vmem>>, %arg6: memref<256x128xbf16, #tpu.memory_space<vmem>>, %arg7: memref<256x128xf32, #tpu.memory_space<vmem>>) attributes {dimension_semantics = [#tpu.dimension_semantics<parallel>, #tpu.dimension_semantics<parallel>, #tpu.dimension_semantics<arbitrary>], iteration_bounds = array<i64: 2, 1, 1>, scalar_prefetch = 0 : i64, scratch_operands = 1 : i64, tpu.core_type = #tpu.core_type<tc>, window_params = [{transform_indices = @transform_0, window_bounds = array<i64: 256, 512>}, {transform_indices = @transform_1, window_bounds = array<i64: 512, 128>}, {transform_indices = @transform_2, window_bounds = array<i64: 1, 128>}, {transform_indices = @transform_3, window_bounds = array<i64: 256, 128>}]} {
    %c0_i32 = arith.constant 0 : i32
    %0 = arith.cmpi eq, %arg2, %c0_i32 : i32
    %1 = arith.extui %0 : i1 to i32
    %c0_i32_0 = arith.constant 0 : i32
    %2 = arith.cmpi ne, %1, %c0_i32_0 : i32
    scf.if %2 {
      %cst_10 = arith.constant 0.000000e+00 : f32
      %12 = vector.broadcast %cst_10 : f32 to vector<256x128xf32>
      %c0_11 = arith.constant 0 : index
      %c0_12 = arith.constant 0 : index
      %13 = vector.load %arg7[%c0_11, %c0_12] : memref<256x128xf32, #tpu.memory_space<vmem>>, vector<256x128xf32>
      tpu.vector_store %arg7[%c0_11, %c0_12], %12 {strides = array<i32>} : memref<256x128xf32, #tpu.memory_space<vmem>>, vector<256x128xf32>,
    } else {
    }
    %c0 = arith.constant 0 : index
    %c0_1 = arith.constant 0 : index
    %3 = vector.load %arg7[%c0, %c0_1] : memref<256x128xf32, #tpu.memory_space<vmem>>, vector<256x128xf32>
    %c0_2 = arith.constant 0 : index
    %c0_3 = arith.constant 0 : index
    %4 = vector.load %arg3[%c0_2, %c0_3] : memref<256x512xbf16, #tpu.memory_space<vmem>>, vector<256x512xbf16>
    %c0_4 = arith.constant 0 : index
    %c0_5 = arith.constant 0 : index
    %5 = vector.load %arg4[%c0_4, %c0_5] : memref<512x128xbf16, #tpu.memory_space<vmem>>, vector<512x128xbf16>
    %cst = arith.constant dense<0.000000e+00> : vector<256x128xf32>
    %6 = tpu.matmul %4, %5, %cst {dimension_numbers = #tpu.dot_dimension_numbers<[1], [0], [0], [1], [0, 0, 1, 1], [], []>} : vector<256x512xbf16>, vector<512x128xbf16>, vector<256x128xf32> -> vector<256x128xf32>
    %7 = arith.addf %3, %6 : vector<256x128xf32>
    %c0_6 = arith.constant 0 : index
    %c0_7 = arith.constant 0 : index
    %8 = vector.load %arg7[%c0_6, %c0_7] : memref<256x128xf32, #tpu.memory_space<vmem>>, vector<256x128xf32>
    tpu.vector_store %arg7[%c0_6, %c0_7], %7 {strides = array<i32>} : memref<256x128xf32, #tpu.memory_space<vmem>>, vector<256x128xf32>,
    %c0_i32_8 = arith.constant 0 : i32
    %9 = arith.cmpi eq, %arg2, %c0_i32_8 : i32
    %10 = arith.extui %9 : i1 to i32
    %c0_i32_9 = arith.constant 0 : i32
    %11 = arith.cmpi ne, %10, %c0_i32_9 : i32
    scf.if %11 {
      %c0_10 = arith.constant 0 : index
      %c0_11 = arith.constant 0 : index
      %12 = vector.load %arg7[%c0_10, %c0_11] : memref<256x128xf32, #tpu.memory_space<vmem>>, vector<256x128xf32>
      %c0_12 = arith.constant 0 : index
      %c0_13 = arith.constant 0 : index
      %13 = vector.load %arg5[%c0_12, %c0_13] : memref<1x128xf32, #tpu.memory_space<vmem>>, vector<1x128xf32>
      %14 = vector.broadcast %13 : vector<1x128xf32> to vector<256x128xf32>
      %15 = arith.addf %12, %14 : vector<256x128xf32>
      %cst_14 = arith.constant 0.000000e+00 : f32
      %16 = vector.broadcast %cst_14 : f32 to vector<256x128xf32>
      %17 = arith.cmpf ogt, %15, %16 : vector<256x128xf32>
      %cst_15 = arith.constant 0.000000e+00 : f32
      %18 = vector.broadcast %cst_15 : f32 to vector<256x128xf32>
      %19 = arith.minimumf %15, %18 : vector<256x128xf32>
      %20 = math.exp %19 : vector<256x128xf32>
      %cst_16 = arith.constant 1.000000e+00 : f32
      %21 = vector.broadcast %cst_16 : f32 to vector<256x128xf32>
      %22 = arith.subf %20, %21 : vector<256x128xf32>
      %23 = arith.select %17, %15, %22 : vector<256x128xi1>, vector<256x128xf32>
      %24 = arith.truncf %23 : vector<256x128xf32> to vector<256x128xbf16>
      %c0_17 = arith.constant 0 : index
      %c0_18 = arith.constant 0 : index
      %25 = vector.load %arg6[%c0_17, %c0_18] : memref<256x128xbf16, #tpu.memory_space<vmem>>, vector<256x128xbf16>
      tpu.vector_store %arg6[%c0_17, %c0_18], %24 {strides = array<i32>} : memref<256x128xbf16, #tpu.memory_space<vmem>>, vector<256x128xbf16>,
    } else {
    }
    return
  }
  func.func @transform_0(%arg0: i32, %arg1: i32, %arg2: i32) -> (i32, i32) {
    %c0_i32 = arith.constant 0 : i32
    return %arg0, %arg2 : i32, i32
  }
  func.func @transform_1(%arg0: i32, %arg1: i32, %arg2: i32) -> (i32, i32) {
    %c0_i32 = arith.constant 0 : i32
    return %arg2, %arg1 : i32, i32
  }
  func.func @transform_2(%arg0: i32, %arg1: i32, %arg2: i32) -> (i32, i32) {
    %c0_i32 = arith.constant 0 : i32
    %c0_i32_0 = arith.constant 0 : i32
    return %c0_i32, %arg1 : i32, i32
  }
  func.func @transform_3(%arg0: i32, %arg1: i32, %arg2: i32) -> (i32, i32) {
    %c0_i32 = arith.constant 0 : i32
    return %arg0, %arg1 : i32, i32
  }
}

module attributes {stable_mosaic.version = 11 : i64} {
  func.func @_matmul_kernel(%arg0: i32, %arg1: i32, %arg2: i32, %arg3: memref<72x256xbf16, #tpu.memory_space<vmem>>, %arg4: memref<256x128xbf16, #tpu.memory_space<vmem>>, %arg5: memref<1x128xf32, #tpu.memory_space<vmem>>, %arg6: memref<72x128xbf16, #tpu.memory_space<vmem>>, %arg7: memref<72x128xf32, #tpu.memory_space<vmem>>) attributes {dimension_semantics = [#tpu.dimension_semantics<parallel>, #tpu.dimension_semantics<parallel>, #tpu.dimension_semantics<arbitrary>], iteration_bounds = array<i64: 1, 1, 3>, scalar_prefetch = 0 : i64, scratch_operands = 1 : i64, tpu.core_type = #tpu.core_type<tc>, window_params = [{transform_indices = @transform_0, window_bounds = array<i64: 72, 256>}, {transform_indices = @transform_1, window_bounds = array<i64: 256, 128>}, {transform_indices = @transform_2, window_bounds = array<i64: 1, 128>}, {transform_indices = @transform_3, window_bounds = array<i64: 72, 128>}]} {
    %c0_i32 = arith.constant 0 : i32
    %0 = arith.cmpi eq, %arg2, %c0_i32 : i32
    %1 = arith.extui %0 : i1 to i32
    %c0_i32_0 = arith.constant 0 : i32
    %2 = arith.cmpi ne, %1, %c0_i32_0 : i32
    scf.if %2 {
      %cst_9 = arith.constant 0.000000e+00 : f32
      %12 = vector.broadcast %cst_9 : f32 to vector<72x128xf32>
      %c0_10 = arith.constant 0 : index
      %c0_11 = arith.constant 0 : index
      %13 = vector.load %arg7[%c0_10, %c0_11] : memref<72x128xf32, #tpu.memory_space<vmem>>, vector<72x128xf32>
      tpu.vector_store %arg7[%c0_10, %c0_11], %12 {strides = array<i32>} : memref<72x128xf32, #tpu.memory_space<vmem>>, vector<72x128xf32>,
    } else {
    }
    %c0 = arith.constant 0 : index
    %c0_1 = arith.constant 0 : index
    %3 = vector.load %arg7[%c0, %c0_1] : memref<72x128xf32, #tpu.memory_space<vmem>>, vector<72x128xf32>
    %c0_2 = arith.constant 0 : index
    %c0_3 = arith.constant 0 : index
    %4 = vector.load %arg3[%c0_2, %c0_3] : memref<72x256xbf16, #tpu.memory_space<vmem>>, vector<72x256xbf16>
    %c0_4 = arith.constant 0 : index
    %c0_5 = arith.constant 0 : index
    %5 = vector.load %arg4[%c0_4, %c0_5] : memref<256x128xbf16, #tpu.memory_space<vmem>>, vector<256x128xbf16>
    %cst = arith.constant dense<0.000000e+00> : vector<72x128xf32>
    %6 = tpu.matmul %4, %5, %cst {dimension_numbers = #tpu.dot_dimension_numbers<[1], [0], [0], [1], [0, 0, 1, 1], [], []>} : vector<72x256xbf16>, vector<256x128xbf16>, vector<72x128xf32> -> vector<72x128xf32>
    %7 = arith.addf %3, %6 : vector<72x128xf32>
    %c0_6 = arith.constant 0 : index
    %c0_7 = arith.constant 0 : index
    %8 = vector.load %arg7[%c0_6, %c0_7] : memref<72x128xf32, #tpu.memory_space<vmem>>, vector<72x128xf32>
    tpu.vector_store %arg7[%c0_6, %c0_7], %7 {strides = array<i32>} : memref<72x128xf32, #tpu.memory_space<vmem>>, vector<72x128xf32>,
    %c2_i32 = arith.constant 2 : i32
    %9 = arith.cmpi eq, %arg2, %c2_i32 : i32
    %10 = arith.extui %9 : i1 to i32
    %c0_i32_8 = arith.constant 0 : i32
    %11 = arith.cmpi ne, %10, %c0_i32_8 : i32
    scf.if %11 {
      %c0_9 = arith.constant 0 : index
      %c0_10 = arith.constant 0 : index
      %12 = vector.load %arg7[%c0_9, %c0_10] : memref<72x128xf32, #tpu.memory_space<vmem>>, vector<72x128xf32>
      %c0_11 = arith.constant 0 : index
      %c0_12 = arith.constant 0 : index
      %13 = vector.load %arg5[%c0_11, %c0_12] : memref<1x128xf32, #tpu.memory_space<vmem>>, vector<1x128xf32>
      %14 = vector.broadcast %13 : vector<1x128xf32> to vector<72x128xf32>
      %15 = arith.addf %12, %14 : vector<72x128xf32>
      %cst_13 = arith.constant 0.000000e+00 : f32
      %16 = vector.broadcast %cst_13 : f32 to vector<72x128xf32>
      %17 = arith.cmpf ogt, %15, %16 : vector<72x128xf32>
      %cst_14 = arith.constant 0.000000e+00 : f32
      %18 = vector.broadcast %cst_14 : f32 to vector<72x128xf32>
      %19 = arith.minimumf %15, %18 : vector<72x128xf32>
      %20 = math.exp %19 : vector<72x128xf32>
      %cst_15 = arith.constant 1.000000e+00 : f32
      %21 = vector.broadcast %cst_15 : f32 to vector<72x128xf32>
      %22 = arith.subf %20, %21 : vector<72x128xf32>
      %23 = arith.select %17, %15, %22 : vector<72x128xi1>, vector<72x128xf32>
      %24 = arith.truncf %23 : vector<72x128xf32> to vector<72x128xbf16>
      %c0_16 = arith.constant 0 : index
      %c0_17 = arith.constant 0 : index
      %25 = vector.load %arg6[%c0_16, %c0_17] : memref<72x128xbf16, #tpu.memory_space<vmem>>, vector<72x128xbf16>
      tpu.vector_store %arg6[%c0_16, %c0_17], %24 {strides = array<i32>} : memref<72x128xbf16, #tpu.memory_space<vmem>>, vector<72x128xbf16>,
    } else {
    }
    return
  }
  func.func @transform_0(%arg0: i32, %arg1: i32, %arg2: i32) -> (i32, i32) {
    %c0_i32 = arith.constant 0 : i32
    return %arg0, %arg2 : i32, i32
  }
  func.func @transform_1(%arg0: i32, %arg1: i32, %arg2: i32) -> (i32, i32) {
    %c0_i32 = arith.constant 0 : i32
    return %arg2, %arg1 : i32, i32
  }
  func.func @transform_2(%arg0: i32, %arg1: i32, %arg2: i32) -> (i32, i32) {
    %c0_i32 = arith.constant 0 : i32
    %c0_i32_0 = arith.constant 0 : i32
    return %c0_i32, %arg1 : i32, i32
  }
  func.func @transform_3(%arg0: i32, %arg1: i32, %arg2: i32) -> (i32, i32) {
    %c0_i32 = arith.constant 0 : i32
    return %arg0, %arg1 : i32, i32
  }
}

module attributes {stable_mosaic.version = 11 : i64} {
  func.func @_matmul_kernel(%arg0: i32, %arg1: i32, %arg2: i32, %arg3: memref<8x512xbf16, #tpu.memory_space<vmem>>, %arg4: memref<512x128xbf16, #tpu.memory_space<vmem>>, %arg5: memref<1x128xf32, #tpu.memory_space<vmem>>, %arg6: memref<8x128xbf16, #tpu.memory_space<vmem>>, %arg7: memref<8x128xf32, #tpu.memory_space<vmem>>) attributes {dimension_semantics = [#tpu.dimension_semantics<parallel>, #tpu.dimension_semantics<parallel>, #tpu.dimension_semantics<arbitrary>], iteration_bounds = array<i64: 1, 1, 3>, scalar_prefetch = 0 : i64, scratch_operands = 1 : i64, tpu.core_type = #tpu.core_type<tc>, window_params = [{transform_indices = @transform_0, window_bounds = array<i64: 8, 512>}, {transform_indices = @transform_1, window_bounds = array<i64: 512, 128>}, {transform_indices = @transform_2, window_bounds = array<i64: 1, 128>}, {transform_indices = @transform_3, window_bounds = array<i64: 8, 128>}]} {
    %c0_i32 = arith.constant 0 : i32
    %0 = arith.cmpi eq, %arg2, %c0_i32 : i32
    %1 = arith.extui %0 : i1 to i32
    %c0_i32_0 = arith.constant 0 : i32
    %2 = arith.cmpi ne, %1, %c0_i32_0 : i32
    scf.if %2 {
      %cst_9 = arith.constant 0.000000e+00 : f32
      %12 = vector.broadcast %cst_9 : f32 to vector<8x128xf32>
      %c0_10 = arith.constant 0 : index
      %c0_11 = arith.constant 0 : index
      %13 = vector.load %arg7[%c0_10, %c0_11] : memref<8x128xf32, #tpu.memory_space<vmem>>, vector<8x128xf32>
      tpu.vector_store %arg7[%c0_10, %c0_11], %12 {strides = array<i32>} : memref<8x128xf32, #tpu.memory_space<vmem>>, vector<8x128xf32>,
    } else {
    }
    %c0 = arith.constant 0 : index
    %c0_1 = arith.constant 0 : index
    %3 = vector.load %arg7[%c0, %c0_1] : memref<8x128xf32, #tpu.memory_space<vmem>>, vector<8x128xf32>
    %c0_2 = arith.constant 0 : index
    %c0_3 = arith.constant 0 : index
    %4 = vector.load %arg3[%c0_2, %c0_3] : memref<8x512xbf16, #tpu.memory_space<vmem>>, vector<8x512xbf16>
    %c0_4 = arith.constant 0 : index
    %c0_5 = arith.constant 0 : index
    %5 = vector.load %arg4[%c0_4, %c0_5] : memref<512x128xbf16, #tpu.memory_space<vmem>>, vector<512x128xbf16>
    %cst = arith.constant dense<0.000000e+00> : vector<8x128xf32>
    %6 = tpu.matmul %4, %5, %cst {dimension_numbers = #tpu.dot_dimension_numbers<[1], [0], [0], [1], [0, 0, 1, 1], [], []>} : vector<8x512xbf16>, vector<512x128xbf16>, vector<8x128xf32> -> vector<8x128xf32>
    %7 = arith.addf %3, %6 : vector<8x128xf32>
    %c0_6 = arith.constant 0 : index
    %c0_7 = arith.constant 0 : index
    %8 = vector.load %arg7[%c0_6, %c0_7] : memref<8x128xf32, #tpu.memory_space<vmem>>, vector<8x128xf32>
    tpu.vector_store %arg7[%c0_6, %c0_7], %7 {strides = array<i32>} : memref<8x128xf32, #tpu.memory_space<vmem>>, vector<8x128xf32>,
    %c2_i32 = arith.constant 2 : i32
    %9 = arith.cmpi eq, %arg2, %c2_i32 : i32
    %10 = arith.extui %9 : i1 to i32
    %c0_i32_8 = arith.constant 0 : i32
    %11 = arith.cmpi ne, %10, %c0_i32_8 : i32
    scf.if %11 {
      %c0_9 = arith.constant 0 : index
      %c0_10 = arith.constant 0 : index
      %12 = vector.load %arg7[%c0_9, %c0_10] : memref<8x128xf32, #tpu.memory_space<vmem>>, vector<8x128xf32>
      %c0_11 = arith.constant 0 : index
      %c0_12 = arith.constant 0 : index
      %13 = vector.load %arg5[%c0_11, %c0_12] : memref<1x128xf32, #tpu.memory_space<vmem>>, vector<1x128xf32>
      %14 = vector.broadcast %13 : vector<1x128xf32> to vector<8x128xf32>
      %15 = arith.addf %12, %14 : vector<8x128xf32>
      %cst_13 = arith.constant 0.000000e+00 : f32
      %16 = vector.broadcast %cst_13 : f32 to vector<8x128xf32>
      %17 = arith.cmpf ogt, %15, %16 : vector<8x128xf32>
      %cst_14 = arith.constant 0.000000e+00 : f32
      %18 = vector.broadcast %cst_14 : f32 to vector<8x128xf32>
      %19 = arith.minimumf %15, %18 : vector<8x128xf32>
      %20 = math.exp %19 : vector<8x128xf32>
      %cst_15 = arith.constant 1.000000e+00 : f32
      %21 = vector.broadcast %cst_15 : f32 to vector<8x128xf32>
      %22 = arith.subf %20, %21 : vector<8x128xf32>
      %23 = arith.select %17, %15, %22 : vector<8x128xi1>, vector<8x128xf32>
      %24 = arith.truncf %23 : vector<8x128xf32> to vector<8x128xbf16>
      %c0_16 = arith.constant 0 : index
      %c0_17 = arith.constant 0 : index
      %25 = vector.load %arg6[%c0_16, %c0_17] : memref<8x128xbf16, #tpu.memory_space<vmem>>, vector<8x128xbf16>
      tpu.vector_store %arg6[%c0_16, %c0_17], %24 {strides = array<i32>} : memref<8x128xbf16, #tpu.memory_space<vmem>>, vector<8x128xbf16>,
    } else {
    }
    return
  }
  func.func @transform_0(%arg0: i32, %arg1: i32, %arg2: i32) -> (i32, i32) {
    %c0_i32 = arith.constant 0 : i32
    return %arg0, %arg2 : i32, i32
  }
  func.func @transform_1(%arg0: i32, %arg1: i32, %arg2: i32) -> (i32, i32) {
    %c0_i32 = arith.constant 0 : i32
    return %arg2, %arg1 : i32, i32
  }
  func.func @transform_2(%arg0: i32, %arg1: i32, %arg2: i32) -> (i32, i32) {
    %c0_i32 = arith.constant 0 : i32
    %c0_i32_0 = arith.constant 0 : i32
    return %c0_i32, %arg1 : i32, i32
  }
  func.func @transform_3(%arg0: i32, %arg1: i32, %arg2: i32) -> (i32, i32) {
    %c0_i32 = arith.constant 0 : i32
    return %arg0, %arg1 : i32, i32
  }
}

module attributes {stable_mosaic.version = 11 : i64} {
  func.func @_matmul_kernel(%arg0: i32, %arg1: i32, %arg2: i32, %arg3: memref<8x128xbf16, #tpu.memory_space<vmem>>, %arg4: memref<128x256xbf16, #tpu.memory_space<vmem>>, %arg5: memref<1x256xf32, #tpu.memory_space<vmem>>, %arg6: memref<8x256xbf16, #tpu.memory_space<vmem>>, %arg7: memref<8x256xf32, #tpu.memory_space<vmem>>) attributes {dimension_semantics = [#tpu.dimension_semantics<parallel>, #tpu.dimension_semantics<parallel>, #tpu.dimension_semantics<arbitrary>], iteration_bounds = array<i64: 1, 2, 1>, scalar_prefetch = 0 : i64, scratch_operands = 1 : i64, tpu.core_type = #tpu.core_type<tc>, window_params = [{transform_indices = @transform_0, window_bounds = array<i64: 8, 128>}, {transform_indices = @transform_1, window_bounds = array<i64: 128, 256>}, {transform_indices = @transform_2, window_bounds = array<i64: 1, 256>}, {transform_indices = @transform_3, window_bounds = array<i64: 8, 256>}]} {
    %c0_i32 = arith.constant 0 : i32
    %0 = arith.cmpi eq, %arg2, %c0_i32 : i32
    %1 = arith.extui %0 : i1 to i32
    %c0_i32_0 = arith.constant 0 : i32
    %2 = arith.cmpi ne, %1, %c0_i32_0 : i32
    scf.if %2 {
      %cst_10 = arith.constant 0.000000e+00 : f32
      %12 = vector.broadcast %cst_10 : f32 to vector<8x256xf32>
      %c0_11 = arith.constant 0 : index
      %c0_12 = arith.constant 0 : index
      %13 = vector.load %arg7[%c0_11, %c0_12] : memref<8x256xf32, #tpu.memory_space<vmem>>, vector<8x256xf32>
      tpu.vector_store %arg7[%c0_11, %c0_12], %12 {strides = array<i32>} : memref<8x256xf32, #tpu.memory_space<vmem>>, vector<8x256xf32>,
    } else {
    }
    %c0 = arith.constant 0 : index
    %c0_1 = arith.constant 0 : index
    %3 = vector.load %arg7[%c0, %c0_1] : memref<8x256xf32, #tpu.memory_space<vmem>>, vector<8x256xf32>
    %c0_2 = arith.constant 0 : index
    %c0_3 = arith.constant 0 : index
    %4 = vector.load %arg3[%c0_2, %c0_3] : memref<8x128xbf16, #tpu.memory_space<vmem>>, vector<8x128xbf16>
    %c0_4 = arith.constant 0 : index
    %c0_5 = arith.constant 0 : index
    %5 = vector.load %arg4[%c0_4, %c0_5] : memref<128x256xbf16, #tpu.memory_space<vmem>>, vector<128x256xbf16>
    %cst = arith.constant dense<0.000000e+00> : vector<8x256xf32>
    %6 = tpu.matmul %4, %5, %cst {dimension_numbers = #tpu.dot_dimension_numbers<[1], [0], [0], [1], [0, 0, 1, 1], [], []>} : vector<8x128xbf16>, vector<128x256xbf16>, vector<8x256xf32> -> vector<8x256xf32>
    %7 = arith.addf %3, %6 : vector<8x256xf32>
    %c0_6 = arith.constant 0 : index
    %c0_7 = arith.constant 0 : index
    %8 = vector.load %arg7[%c0_6, %c0_7] : memref<8x256xf32, #tpu.memory_space<vmem>>, vector<8x256xf32>
    tpu.vector_store %arg7[%c0_6, %c0_7], %7 {strides = array<i32>} : memref<8x256xf32, #tpu.memory_space<vmem>>, vector<8x256xf32>,
    %c0_i32_8 = arith.constant 0 : i32
    %9 = arith.cmpi eq, %arg2, %c0_i32_8 : i32
    %10 = arith.extui %9 : i1 to i32
    %c0_i32_9 = arith.constant 0 : i32
    %11 = arith.cmpi ne, %10, %c0_i32_9 : i32
    scf.if %11 {
      %c0_10 = arith.constant 0 : index
      %c0_11 = arith.constant 0 : index
      %12 = vector.load %arg7[%c0_10, %c0_11] : memref<8x256xf32, #tpu.memory_space<vmem>>, vector<8x256xf32>
      %c0_12 = arith.constant 0 : index
      %c0_13 = arith.constant 0 : index
      %13 = vector.load %arg5[%c0_12, %c0_13] : memref<1x256xf32, #tpu.memory_space<vmem>>, vector<1x256xf32>
      %14 = vector.broadcast %13 : vector<1x256xf32> to vector<8x256xf32>
      %15 = arith.addf %12, %14 : vector<8x256xf32>
      %cst_14 = arith.constant 0.000000e+00 : f32
      %16 = vector.broadcast %cst_14 : f32 to vector<8x256xf32>
      %17 = arith.cmpf ogt, %15, %16 : vector<8x256xf32>
      %cst_15 = arith.constant 0.000000e+00 : f32
      %18 = vector.broadcast %cst_15 : f32 to vector<8x256xf32>
      %19 = arith.minimumf %15, %18 : vector<8x256xf32>
      %20 = math.exp %19 : vector<8x256xf32>
      %cst_16 = arith.constant 1.000000e+00 : f32
      %21 = vector.broadcast %cst_16 : f32 to vector<8x256xf32>
      %22 = arith.subf %20, %21 : vector<8x256xf32>
      %23 = arith.select %17, %15, %22 : vector<8x256xi1>, vector<8x256xf32>
      %24 = arith.truncf %23 : vector<8x256xf32> to vector<8x256xbf16>
      %c0_17 = arith.constant 0 : index
      %c0_18 = arith.constant 0 : index
      %25 = vector.load %arg6[%c0_17, %c0_18] : memref<8x256xbf16, #tpu.memory_space<vmem>>, vector<8x256xbf16>
      tpu.vector_store %arg6[%c0_17, %c0_18], %24 {strides = array<i32>} : memref<8x256xbf16, #tpu.memory_space<vmem>>, vector<8x256xbf16>,
    } else {
    }
    return
  }
  func.func @transform_0(%arg0: i32, %arg1: i32, %arg2: i32) -> (i32, i32) {
    %c0_i32 = arith.constant 0 : i32
    return %arg0, %arg2 : i32, i32
  }
  func.func @transform_1(%arg0: i32, %arg1: i32, %arg2: i32) -> (i32, i32) {
    %c0_i32 = arith.constant 0 : i32
    return %arg2, %arg1 : i32, i32
  }
  func.func @transform_2(%arg0: i32, %arg1: i32, %arg2: i32) -> (i32, i32) {
    %c0_i32 = arith.constant 0 : i32
    %c0_i32_0 = arith.constant 0 : i32
    return %c0_i32, %arg1 : i32, i32
  }
  func.func @transform_3(%arg0: i32, %arg1: i32, %arg2: i32) -> (i32, i32) {
    %c0_i32 = arith.constant 0 : i32
    return %arg0, %arg1 : i32, i32
  }
}

module attributes {stable_mosaic.version = 11 : i64} {
  func.func @_matmul_kernel(%arg0: i32, %arg1: i32, %arg2: i32, %arg3: memref<56x128xbf16, #tpu.memory_space<vmem>>, %arg4: memref<128x128xbf16, #tpu.memory_space<vmem>>, %arg5: memref<1x128xf32, #tpu.memory_space<vmem>>, %arg6: memref<56x128xbf16, #tpu.memory_space<vmem>>, %arg7: memref<56x128xf32, #tpu.memory_space<vmem>>) attributes {dimension_semantics = [#tpu.dimension_semantics<parallel>, #tpu.dimension_semantics<parallel>, #tpu.dimension_semantics<arbitrary>], iteration_bounds = array<i64: 1, 1, 1>, scalar_prefetch = 0 : i64, scratch_operands = 1 : i64, tpu.core_type = #tpu.core_type<tc>, window_params = [{transform_indices = @transform_0, window_bounds = array<i64: 56, 128>}, {transform_indices = @transform_1, window_bounds = array<i64: 128, 128>}, {transform_indices = @transform_2, window_bounds = array<i64: 1, 128>}, {transform_indices = @transform_3, window_bounds = array<i64: 56, 128>}]} {
    %c0_i32 = arith.constant 0 : i32
    %0 = arith.cmpi eq, %arg2, %c0_i32 : i32
    %1 = arith.extui %0 : i1 to i32
    %c0_i32_0 = arith.constant 0 : i32
    %2 = arith.cmpi ne, %1, %c0_i32_0 : i32
    scf.if %2 {
      %cst_10 = arith.constant 0.000000e+00 : f32
      %12 = vector.broadcast %cst_10 : f32 to vector<56x128xf32>
      %c0_11 = arith.constant 0 : index
      %c0_12 = arith.constant 0 : index
      %13 = vector.load %arg7[%c0_11, %c0_12] : memref<56x128xf32, #tpu.memory_space<vmem>>, vector<56x128xf32>
      tpu.vector_store %arg7[%c0_11, %c0_12], %12 {strides = array<i32>} : memref<56x128xf32, #tpu.memory_space<vmem>>, vector<56x128xf32>,
    } else {
    }
    %c0 = arith.constant 0 : index
    %c0_1 = arith.constant 0 : index
    %3 = vector.load %arg7[%c0, %c0_1] : memref<56x128xf32, #tpu.memory_space<vmem>>, vector<56x128xf32>
    %c0_2 = arith.constant 0 : index
    %c0_3 = arith.constant 0 : index
    %4 = vector.load %arg3[%c0_2, %c0_3] : memref<56x128xbf16, #tpu.memory_space<vmem>>, vector<56x128xbf16>
    %c0_4 = arith.constant 0 : index
    %c0_5 = arith.constant 0 : index
    %5 = vector.load %arg4[%c0_4, %c0_5] : memref<128x128xbf16, #tpu.memory_space<vmem>>, vector<128x128xbf16>
    %cst = arith.constant dense<0.000000e+00> : vector<56x128xf32>
    %6 = tpu.matmul %4, %5, %cst {dimension_numbers = #tpu.dot_dimension_numbers<[1], [0], [0], [1], [0, 0, 1, 1], [], []>} : vector<56x128xbf16>, vector<128x128xbf16>, vector<56x128xf32> -> vector<56x128xf32>
    %7 = arith.addf %3, %6 : vector<56x128xf32>
    %c0_6 = arith.constant 0 : index
    %c0_7 = arith.constant 0 : index
    %8 = vector.load %arg7[%c0_6, %c0_7] : memref<56x128xf32, #tpu.memory_space<vmem>>, vector<56x128xf32>
    tpu.vector_store %arg7[%c0_6, %c0_7], %7 {strides = array<i32>} : memref<56x128xf32, #tpu.memory_space<vmem>>, vector<56x128xf32>,
    %c0_i32_8 = arith.constant 0 : i32
    %9 = arith.cmpi eq, %arg2, %c0_i32_8 : i32
    %10 = arith.extui %9 : i1 to i32
    %c0_i32_9 = arith.constant 0 : i32
    %11 = arith.cmpi ne, %10, %c0_i32_9 : i32
    scf.if %11 {
      %c0_10 = arith.constant 0 : index
      %c0_11 = arith.constant 0 : index
      %12 = vector.load %arg7[%c0_10, %c0_11] : memref<56x128xf32, #tpu.memory_space<vmem>>, vector<56x128xf32>
      %c0_12 = arith.constant 0 : index
      %c0_13 = arith.constant 0 : index
      %13 = vector.load %arg5[%c0_12, %c0_13] : memref<1x128xf32, #tpu.memory_space<vmem>>, vector<1x128xf32>
      %14 = vector.broadcast %13 : vector<1x128xf32> to vector<56x128xf32>
      %15 = arith.addf %12, %14 : vector<56x128xf32>
      %cst_14 = arith.constant 0.000000e+00 : f32
      %16 = vector.broadcast %cst_14 : f32 to vector<56x128xf32>
      %17 = arith.cmpf ogt, %15, %16 : vector<56x128xf32>
      %cst_15 = arith.constant 0.000000e+00 : f32
      %18 = vector.broadcast %cst_15 : f32 to vector<56x128xf32>
      %19 = arith.minimumf %15, %18 : vector<56x128xf32>
      %20 = math.exp %19 : vector<56x128xf32>
      %cst_16 = arith.constant 1.000000e+00 : f32
      %21 = vector.broadcast %cst_16 : f32 to vector<56x128xf32>
      %22 = arith.subf %20, %21 : vector<56x128xf32>
      %23 = arith.select %17, %15, %22 : vector<56x128xi1>, vector<56x128xf32>
      %24 = arith.truncf %23 : vector<56x128xf32> to vector<56x128xbf16>
      %c0_17 = arith.constant 0 : index
      %c0_18 = arith.constant 0 : index
      %25 = vector.load %arg6[%c0_17, %c0_18] : memref<56x128xbf16, #tpu.memory_space<vmem>>, vector<56x128xbf16>
      tpu.vector_store %arg6[%c0_17, %c0_18], %24 {strides = array<i32>} : memref<56x128xbf16, #tpu.memory_space<vmem>>, vector<56x128xbf16>,
    } else {
    }
    return
  }
  func.func @transform_0(%arg0: i32, %arg1: i32, %arg2: i32) -> (i32, i32) {
    %c0_i32 = arith.constant 0 : i32
    return %arg0, %arg2 : i32, i32
  }
  func.func @transform_1(%arg0: i32, %arg1: i32, %arg2: i32) -> (i32, i32) {
    %c0_i32 = arith.constant 0 : i32
    return %arg2, %arg1 : i32, i32
  }
  func.func @transform_2(%arg0: i32, %arg1: i32, %arg2: i32) -> (i32, i32) {
    %c0_i32 = arith.constant 0 : i32
    %c0_i32_0 = arith.constant 0 : i32
    return %c0_i32, %arg1 : i32, i32
  }
  func.func @transform_3(%arg0: i32, %arg1: i32, %arg2: i32) -> (i32, i32) {
    %c0_i32 = arith.constant 0 : i32
    return %arg0, %arg1 : i32, i32
  }
}

module attributes {stable_mosaic.version = 11 : i64} {
  func.func @_matmul_kernel(%arg0: i32, %arg1: i32, %arg2: i32, %arg3: memref<16x128xbf16, #tpu.memory_space<vmem>>, %arg4: memref<128x128xbf16, #tpu.memory_space<vmem>>, %arg5: memref<1x128xf32, #tpu.memory_space<vmem>>, %arg6: memref<16x128xbf16, #tpu.memory_space<vmem>>, %arg7: memref<16x128xf32, #tpu.memory_space<vmem>>) attributes {dimension_semantics = [#tpu.dimension_semantics<parallel>, #tpu.dimension_semantics<parallel>, #tpu.dimension_semantics<arbitrary>], iteration_bounds = array<i64: 2, 1, 1>, scalar_prefetch = 0 : i64, scratch_operands = 1 : i64, tpu.core_type = #tpu.core_type<tc>, window_params = [{transform_indices = @transform_0, window_bounds = array<i64: 16, 128>}, {transform_indices = @transform_1, window_bounds = array<i64: 128, 128>}, {transform_indices = @transform_2, window_bounds = array<i64: 1, 128>}, {transform_indices = @transform_3, window_bounds = array<i64: 16, 128>}]} {
    %c0_i32 = arith.constant 0 : i32
    %0 = arith.cmpi eq, %arg2, %c0_i32 : i32
    %1 = arith.extui %0 : i1 to i32
    %c0_i32_0 = arith.constant 0 : i32
    %2 = arith.cmpi ne, %1, %c0_i32_0 : i32
    scf.if %2 {
      %cst_10 = arith.constant 0.000000e+00 : f32
      %12 = vector.broadcast %cst_10 : f32 to vector<16x128xf32>
      %c0_11 = arith.constant 0 : index
      %c0_12 = arith.constant 0 : index
      %13 = vector.load %arg7[%c0_11, %c0_12] : memref<16x128xf32, #tpu.memory_space<vmem>>, vector<16x128xf32>
      tpu.vector_store %arg7[%c0_11, %c0_12], %12 {strides = array<i32>} : memref<16x128xf32, #tpu.memory_space<vmem>>, vector<16x128xf32>,
    } else {
    }
    %c0 = arith.constant 0 : index
    %c0_1 = arith.constant 0 : index
    %3 = vector.load %arg7[%c0, %c0_1] : memref<16x128xf32, #tpu.memory_space<vmem>>, vector<16x128xf32>
    %c0_2 = arith.constant 0 : index
    %c0_3 = arith.constant 0 : index
    %4 = vector.load %arg3[%c0_2, %c0_3] : memref<16x128xbf16, #tpu.memory_space<vmem>>, vector<16x128xbf16>
    %c0_4 = arith.constant 0 : index
    %c0_5 = arith.constant 0 : index
    %5 = vector.load %arg4[%c0_4, %c0_5] : memref<128x128xbf16, #tpu.memory_space<vmem>>, vector<128x128xbf16>
    %cst = arith.constant dense<0.000000e+00> : vector<16x128xf32>
    %6 = tpu.matmul %4, %5, %cst {dimension_numbers = #tpu.dot_dimension_numbers<[1], [0], [0], [1], [0, 0, 1, 1], [], []>} : vector<16x128xbf16>, vector<128x128xbf16>, vector<16x128xf32> -> vector<16x128xf32>
    %7 = arith.addf %3, %6 : vector<16x128xf32>
    %c0_6 = arith.constant 0 : index
    %c0_7 = arith.constant 0 : index
    %8 = vector.load %arg7[%c0_6, %c0_7] : memref<16x128xf32, #tpu.memory_space<vmem>>, vector<16x128xf32>
    tpu.vector_store %arg7[%c0_6, %c0_7], %7 {strides = array<i32>} : memref<16x128xf32, #tpu.memory_space<vmem>>, vector<16x128xf32>,
    %c0_i32_8 = arith.constant 0 : i32
    %9 = arith.cmpi eq, %arg2, %c0_i32_8 : i32
    %10 = arith.extui %9 : i1 to i32
    %c0_i32_9 = arith.constant 0 : i32
    %11 = arith.cmpi ne, %10, %c0_i32_9 : i32
    scf.if %11 {
      %c0_10 = arith.constant 0 : index
      %c0_11 = arith.constant 0 : index
      %12 = vector.load %arg7[%c0_10, %c0_11] : memref<16x128xf32, #tpu.memory_space<vmem>>, vector<16x128xf32>
      %c0_12 = arith.constant 0 : index
      %c0_13 = arith.constant 0 : index
      %13 = vector.load %arg5[%c0_12, %c0_13] : memref<1x128xf32, #tpu.memory_space<vmem>>, vector<1x128xf32>
      %14 = vector.broadcast %13 : vector<1x128xf32> to vector<16x128xf32>
      %15 = arith.addf %12, %14 : vector<16x128xf32>
      %cst_14 = arith.constant 0.000000e+00 : f32
      %16 = vector.broadcast %cst_14 : f32 to vector<16x128xf32>
      %17 = arith.cmpf ogt, %15, %16 : vector<16x128xf32>
      %cst_15 = arith.constant 0.000000e+00 : f32
      %18 = vector.broadcast %cst_15 : f32 to vector<16x128xf32>
      %19 = arith.minimumf %15, %18 : vector<16x128xf32>
      %20 = math.exp %19 : vector<16x128xf32>
      %cst_16 = arith.constant 1.000000e+00 : f32
      %21 = vector.broadcast %cst_16 : f32 to vector<16x128xf32>
      %22 = arith.subf %20, %21 : vector<16x128xf32>
      %23 = arith.select %17, %15, %22 : vector<16x128xi1>, vector<16x128xf32>
      %24 = arith.truncf %23 : vector<16x128xf32> to vector<16x128xbf16>
      %c0_17 = arith.constant 0 : index
      %c0_18 = arith.constant 0 : index
      %25 = vector.load %arg6[%c0_17, %c0_18] : memref<16x128xbf16, #tpu.memory_space<vmem>>, vector<16x128xbf16>
      tpu.vector_store %arg6[%c0_17, %c0_18], %24 {strides = array<i32>} : memref<16x128xbf16, #tpu.memory_space<vmem>>, vector<16x128xbf16>,
    } else {
    }
    return
  }
  func.func @transform_0(%arg0: i32, %arg1: i32, %arg2: i32) -> (i32, i32) {
    %c0_i32 = arith.constant 0 : i32
    return %arg0, %arg2 : i32, i32
  }
  func.func @transform_1(%arg0: i32, %arg1: i32, %arg2: i32) -> (i32, i32) {
    %c0_i32 = arith.constant 0 : i32
    return %arg2, %arg1 : i32, i32
  }
  func.func @transform_2(%arg0: i32, %arg1: i32, %arg2: i32) -> (i32, i32) {
    %c0_i32 = arith.constant 0 : i32
    %c0_i32_0 = arith.constant 0 : i32
    return %c0_i32, %arg1 : i32, i32
  }
  func.func @transform_3(%arg0: i32, %arg1: i32, %arg2: i32) -> (i32, i32) {
    %c0_i32 = arith.constant 0 : i32
    return %arg0, %arg1 : i32, i32
  }
}

module attributes {stable_mosaic.version = 11 : i64} {
  func.func @_matmul_kernel(%arg0: i32, %arg1: i32, %arg2: i32, %arg3: memref<8x256xbf16, #tpu.memory_space<vmem>>, %arg4: memref<256x128xbf16, #tpu.memory_space<vmem>>, %arg5: memref<1x128xf32, #tpu.memory_space<vmem>>, %arg6: memref<8x128xbf16, #tpu.memory_space<vmem>>, %arg7: memref<8x128xf32, #tpu.memory_space<vmem>>) attributes {dimension_semantics = [#tpu.dimension_semantics<parallel>, #tpu.dimension_semantics<parallel>, #tpu.dimension_semantics<arbitrary>], iteration_bounds = array<i64: 1, 1, 1>, scalar_prefetch = 0 : i64, scratch_operands = 1 : i64, tpu.core_type = #tpu.core_type<tc>, window_params = [{transform_indices = @transform_0, window_bounds = array<i64: 8, 256>}, {transform_indices = @transform_1, window_bounds = array<i64: 256, 128>}, {transform_indices = @transform_2, window_bounds = array<i64: 1, 128>}, {transform_indices = @transform_3, window_bounds = array<i64: 8, 128>}]} {
    %c0_i32 = arith.constant 0 : i32
    %0 = arith.cmpi eq, %arg2, %c0_i32 : i32
    %1 = arith.extui %0 : i1 to i32
    %c0_i32_0 = arith.constant 0 : i32
    %2 = arith.cmpi ne, %1, %c0_i32_0 : i32
    scf.if %2 {
      %cst_10 = arith.constant 0.000000e+00 : f32
      %12 = vector.broadcast %cst_10 : f32 to vector<8x128xf32>
      %c0_11 = arith.constant 0 : index
      %c0_12 = arith.constant 0 : index
      %13 = vector.load %arg7[%c0_11, %c0_12] : memref<8x128xf32, #tpu.memory_space<vmem>>, vector<8x128xf32>
      tpu.vector_store %arg7[%c0_11, %c0_12], %12 {strides = array<i32>} : memref<8x128xf32, #tpu.memory_space<vmem>>, vector<8x128xf32>,
    } else {
    }
    %c0 = arith.constant 0 : index
    %c0_1 = arith.constant 0 : index
    %3 = vector.load %arg7[%c0, %c0_1] : memref<8x128xf32, #tpu.memory_space<vmem>>, vector<8x128xf32>
    %c0_2 = arith.constant 0 : index
    %c0_3 = arith.constant 0 : index
    %4 = vector.load %arg3[%c0_2, %c0_3] : memref<8x256xbf16, #tpu.memory_space<vmem>>, vector<8x256xbf16>
    %c0_4 = arith.constant 0 : index
    %c0_5 = arith.constant 0 : index
    %5 = vector.load %arg4[%c0_4, %c0_5] : memref<256x128xbf16, #tpu.memory_space<vmem>>, vector<256x128xbf16>
    %cst = arith.constant dense<0.000000e+00> : vector<8x128xf32>
    %6 = tpu.matmul %4, %5, %cst {dimension_numbers = #tpu.dot_dimension_numbers<[1], [0], [0], [1], [0, 0, 1, 1], [], []>} : vector<8x256xbf16>, vector<256x128xbf16>, vector<8x128xf32> -> vector<8x128xf32>
    %7 = arith.addf %3, %6 : vector<8x128xf32>
    %c0_6 = arith.constant 0 : index
    %c0_7 = arith.constant 0 : index
    %8 = vector.load %arg7[%c0_6, %c0_7] : memref<8x128xf32, #tpu.memory_space<vmem>>, vector<8x128xf32>
    tpu.vector_store %arg7[%c0_6, %c0_7], %7 {strides = array<i32>} : memref<8x128xf32, #tpu.memory_space<vmem>>, vector<8x128xf32>,
    %c0_i32_8 = arith.constant 0 : i32
    %9 = arith.cmpi eq, %arg2, %c0_i32_8 : i32
    %10 = arith.extui %9 : i1 to i32
    %c0_i32_9 = arith.constant 0 : i32
    %11 = arith.cmpi ne, %10, %c0_i32_9 : i32
    scf.if %11 {
      %c0_10 = arith.constant 0 : index
      %c0_11 = arith.constant 0 : index
      %12 = vector.load %arg7[%c0_10, %c0_11] : memref<8x128xf32, #tpu.memory_space<vmem>>, vector<8x128xf32>
      %c0_12 = arith.constant 0 : index
      %c0_13 = arith.constant 0 : index
      %13 = vector.load %arg5[%c0_12, %c0_13] : memref<1x128xf32, #tpu.memory_space<vmem>>, vector<1x128xf32>
      %14 = vector.broadcast %13 : vector<1x128xf32> to vector<8x128xf32>
      %15 = arith.addf %12, %14 : vector<8x128xf32>
      %cst_14 = arith.constant 0.000000e+00 : f32
      %16 = vector.broadcast %cst_14 : f32 to vector<8x128xf32>
      %17 = arith.cmpf ogt, %15, %16 : vector<8x128xf32>
      %cst_15 = arith.constant 0.000000e+00 : f32
      %18 = vector.broadcast %cst_15 : f32 to vector<8x128xf32>
      %19 = arith.minimumf %15, %18 : vector<8x128xf32>
      %20 = math.exp %19 : vector<8x128xf32>
      %cst_16 = arith.constant 1.000000e+00 : f32
      %21 = vector.broadcast %cst_16 : f32 to vector<8x128xf32>
      %22 = arith.subf %20, %21 : vector<8x128xf32>
      %23 = arith.select %17, %15, %22 : vector<8x128xi1>, vector<8x128xf32>
      %24 = arith.truncf %23 : vector<8x128xf32> to vector<8x128xbf16>
      %c0_17 = arith.constant 0 : index
      %c0_18 = arith.constant 0 : index
      %25 = vector.load %arg6[%c0_17, %c0_18] : memref<8x128xbf16, #tpu.memory_space<vmem>>, vector<8x128xbf16>
      tpu.vector_store %arg6[%c0_17, %c0_18], %24 {strides = array<i32>} : memref<8x128xbf16, #tpu.memory_space<vmem>>, vector<8x128xbf16>,
    } else {
    }
    return
  }
  func.func @transform_0(%arg0: i32, %arg1: i32, %arg2: i32) -> (i32, i32) {
    %c0_i32 = arith.constant 0 : i32
    return %arg0, %arg2 : i32, i32
  }
  func.func @transform_1(%arg0: i32, %arg1: i32, %arg2: i32) -> (i32, i32) {
    %c0_i32 = arith.constant 0 : i32
    return %arg2, %arg1 : i32, i32
  }
  func.func @transform_2(%arg0: i32, %arg1: i32, %arg2: i32) -> (i32, i32) {
    %c0_i32 = arith.constant 0 : i32
    %c0_i32_0 = arith.constant 0 : i32
    return %c0_i32, %arg1 : i32, i32
  }
  func.func @transform_3(%arg0: i32, %arg1: i32, %arg2: i32) -> (i32, i32) {
    %c0_i32 = arith.constant 0 : i32
    return %arg0, %arg1 : i32, i32
  }
}

module attributes {stable_mosaic.version = 11 : i64} {
  func.func @_matmul_kernel(%arg0: i32, %arg1: i32, %arg2: i32, %arg3: memref<8x128xbf16, #tpu.memory_space<vmem>>, %arg4: memref<128x128xbf16, #tpu.memory_space<vmem>>, %arg5: memref<1x128xf32, #tpu.memory_space<vmem>>, %arg6: memref<8x128xbf16, #tpu.memory_space<vmem>>, %arg7: memref<8x128xf32, #tpu.memory_space<vmem>>) attributes {dimension_semantics = [#tpu.dimension_semantics<parallel>, #tpu.dimension_semantics<parallel>, #tpu.dimension_semantics<arbitrary>], iteration_bounds = array<i64: 1, 1, 1>, scalar_prefetch = 0 : i64, scratch_operands = 1 : i64, tpu.core_type = #tpu.core_type<tc>, window_params = [{transform_indices = @transform_0, window_bounds = array<i64: 8, 128>}, {transform_indices = @transform_1, window_bounds = array<i64: 128, 128>}, {transform_indices = @transform_2, window_bounds = array<i64: 1, 128>}, {transform_indices = @transform_3, window_bounds = array<i64: 8, 128>}]} {
    %c0_i32 = arith.constant 0 : i32
    %0 = arith.cmpi eq, %arg2, %c0_i32 : i32
    %1 = arith.extui %0 : i1 to i32
    %c0_i32_0 = arith.constant 0 : i32
    %2 = arith.cmpi ne, %1, %c0_i32_0 : i32
    scf.if %2 {
      %cst_10 = arith.constant 0.000000e+00 : f32
      %12 = vector.broadcast %cst_10 : f32 to vector<8x128xf32>
      %c0_11 = arith.constant 0 : index
      %c0_12 = arith.constant 0 : index
      %13 = vector.load %arg7[%c0_11, %c0_12] : memref<8x128xf32, #tpu.memory_space<vmem>>, vector<8x128xf32>
      tpu.vector_store %arg7[%c0_11, %c0_12], %12 {strides = array<i32>} : memref<8x128xf32, #tpu.memory_space<vmem>>, vector<8x128xf32>,
    } else {
    }
    %c0 = arith.constant 0 : index
    %c0_1 = arith.constant 0 : index
    %3 = vector.load %arg7[%c0, %c0_1] : memref<8x128xf32, #tpu.memory_space<vmem>>, vector<8x128xf32>
    %c0_2 = arith.constant 0 : index
    %c0_3 = arith.constant 0 : index
    %4 = vector.load %arg3[%c0_2, %c0_3] : memref<8x128xbf16, #tpu.memory_space<vmem>>, vector<8x128xbf16>
    %c0_4 = arith.constant 0 : index
    %c0_5 = arith.constant 0 : index
    %5 = vector.load %arg4[%c0_4, %c0_5] : memref<128x128xbf16, #tpu.memory_space<vmem>>, vector<128x128xbf16>
    %cst = arith.constant dense<0.000000e+00> : vector<8x128xf32>
    %6 = tpu.matmul %4, %5, %cst {dimension_numbers = #tpu.dot_dimension_numbers<[1], [0], [0], [1], [0, 0, 1, 1], [], []>} : vector<8x128xbf16>, vector<128x128xbf16>, vector<8x128xf32> -> vector<8x128xf32>
    %7 = arith.addf %3, %6 : vector<8x128xf32>
    %c0_6 = arith.constant 0 : index
    %c0_7 = arith.constant 0 : index
    %8 = vector.load %arg7[%c0_6, %c0_7] : memref<8x128xf32, #tpu.memory_space<vmem>>, vector<8x128xf32>
    tpu.vector_store %arg7[%c0_6, %c0_7], %7 {strides = array<i32>} : memref<8x128xf32, #tpu.memory_space<vmem>>, vector<8x128xf32>,
    %c0_i32_8 = arith.constant 0 : i32
    %9 = arith.cmpi eq, %arg2, %c0_i32_8 : i32
    %10 = arith.extui %9 : i1 to i32
    %c0_i32_9 = arith.constant 0 : i32
    %11 = arith.cmpi ne, %10, %c0_i32_9 : i32
    scf.if %11 {
      %c0_10 = arith.constant 0 : index
      %c0_11 = arith.constant 0 : index
      %12 = vector.load %arg7[%c0_10, %c0_11] : memref<8x128xf32, #tpu.memory_space<vmem>>, vector<8x128xf32>
      %c0_12 = arith.constant 0 : index
      %c0_13 = arith.constant 0 : index
      %13 = vector.load %arg5[%c0_12, %c0_13] : memref<1x128xf32, #tpu.memory_space<vmem>>, vector<1x128xf32>
      %14 = vector.broadcast %13 : vector<1x128xf32> to vector<8x128xf32>
      %15 = arith.addf %12, %14 : vector<8x128xf32>
      %cst_14 = arith.constant 0.000000e+00 : f32
      %16 = vector.broadcast %cst_14 : f32 to vector<8x128xf32>
      %17 = arith.cmpf ogt, %15, %16 : vector<8x128xf32>
      %cst_15 = arith.constant 0.000000e+00 : f32
      %18 = vector.broadcast %cst_15 : f32 to vector<8x128xf32>
      %19 = arith.minimumf %15, %18 : vector<8x128xf32>
      %20 = math.exp %19 : vector<8x128xf32>
      %cst_16 = arith.constant 1.000000e+00 : f32
      %21 = vector.broadcast %cst_16 : f32 to vector<8x128xf32>
      %22 = arith.subf %20, %21 : vector<8x128xf32>
      %23 = arith.select %17, %15, %22 : vector<8x128xi1>, vector<8x128xf32>
      %24 = arith.truncf %23 : vector<8x128xf32> to vector<8x128xbf16>
      %c0_17 = arith.constant 0 : index
      %c0_18 = arith.constant 0 : index
      %25 = vector.load %arg6[%c0_17, %c0_18] : memref<8x128xbf16, #tpu.memory_space<vmem>>, vector<8x128xbf16>
      tpu.vector_store %arg6[%c0_17, %c0_18], %24 {strides = array<i32>} : memref<8x128xbf16, #tpu.memory_space<vmem>>, vector<8x128xbf16>,
    } else {
    }
    return
  }
  func.func @transform_0(%arg0: i32, %arg1: i32, %arg2: i32) -> (i32, i32) {
    %c0_i32 = arith.constant 0 : i32
    return %arg0, %arg2 : i32, i32
  }
  func.func @transform_1(%arg0: i32, %arg1: i32, %arg2: i32) -> (i32, i32) {
    %c0_i32 = arith.constant 0 : i32
    return %arg2, %arg1 : i32, i32
  }
  func.func @transform_2(%arg0: i32, %arg1: i32, %arg2: i32) -> (i32, i32) {
    %c0_i32 = arith.constant 0 : i32
    %c0_i32_0 = arith.constant 0 : i32
    return %c0_i32, %arg1 : i32, i32
  }
  func.func @transform_3(%arg0: i32, %arg1: i32, %arg2: i32) -> (i32, i32) {
    %c0_i32 = arith.constant 0 : i32
    return %arg0, %arg1 : i32, i32
  }
}

module attributes {stable_mosaic.version = 11 : i64} {
  func.func @_matmul_kernel(%arg0: i32, %arg1: i32, %arg2: i32, %arg3: memref<8x512xbf16, #tpu.memory_space<vmem>>, %arg4: memref<512x256xbf16, #tpu.memory_space<vmem>>, %arg5: memref<1x256xf32, #tpu.memory_space<vmem>>, %arg6: memref<8x256xbf16, #tpu.memory_space<vmem>>, %arg7: memref<8x256xf32, #tpu.memory_space<vmem>>) attributes {dimension_semantics = [#tpu.dimension_semantics<parallel>, #tpu.dimension_semantics<parallel>, #tpu.dimension_semantics<arbitrary>], iteration_bounds = array<i64: 1, 2, 2>, scalar_prefetch = 0 : i64, scratch_operands = 1 : i64, tpu.core_type = #tpu.core_type<tc>, window_params = [{transform_indices = @transform_0, window_bounds = array<i64: 8, 512>}, {transform_indices = @transform_1, window_bounds = array<i64: 512, 256>}, {transform_indices = @transform_2, window_bounds = array<i64: 1, 256>}, {transform_indices = @transform_3, window_bounds = array<i64: 8, 256>}]} {
    %c0_i32 = arith.constant 0 : i32
    %0 = arith.cmpi eq, %arg2, %c0_i32 : i32
    %1 = arith.extui %0 : i1 to i32
    %c0_i32_0 = arith.constant 0 : i32
    %2 = arith.cmpi ne, %1, %c0_i32_0 : i32
    scf.if %2 {
      %cst_9 = arith.constant 0.000000e+00 : f32
      %12 = vector.broadcast %cst_9 : f32 to vector<8x256xf32>
      %c0_10 = arith.constant 0 : index
      %c0_11 = arith.constant 0 : index
      %13 = vector.load %arg7[%c0_10, %c0_11] : memref<8x256xf32, #tpu.memory_space<vmem>>, vector<8x256xf32>
      tpu.vector_store %arg7[%c0_10, %c0_11], %12 {strides = array<i32>} : memref<8x256xf32, #tpu.memory_space<vmem>>, vector<8x256xf32>,
    } else {
    }
    %c0 = arith.constant 0 : index
    %c0_1 = arith.constant 0 : index
    %3 = vector.load %arg7[%c0, %c0_1] : memref<8x256xf32, #tpu.memory_space<vmem>>, vector<8x256xf32>
    %c0_2 = arith.constant 0 : index
    %c0_3 = arith.constant 0 : index
    %4 = vector.load %arg3[%c0_2, %c0_3] : memref<8x512xbf16, #tpu.memory_space<vmem>>, vector<8x512xbf16>
    %c0_4 = arith.constant 0 : index
    %c0_5 = arith.constant 0 : index
    %5 = vector.load %arg4[%c0_4, %c0_5] : memref<512x256xbf16, #tpu.memory_space<vmem>>, vector<512x256xbf16>
    %cst = arith.constant dense<0.000000e+00> : vector<8x256xf32>
    %6 = tpu.matmul %4, %5, %cst {dimension_numbers = #tpu.dot_dimension_numbers<[1], [0], [0], [1], [0, 0, 1, 1], [], []>} : vector<8x512xbf16>, vector<512x256xbf16>, vector<8x256xf32> -> vector<8x256xf32>
    %7 = arith.addf %3, %6 : vector<8x256xf32>
    %c0_6 = arith.constant 0 : index
    %c0_7 = arith.constant 0 : index
    %8 = vector.load %arg7[%c0_6, %c0_7] : memref<8x256xf32, #tpu.memory_space<vmem>>, vector<8x256xf32>
    tpu.vector_store %arg7[%c0_6, %c0_7], %7 {strides = array<i32>} : memref<8x256xf32, #tpu.memory_space<vmem>>, vector<8x256xf32>,
    %c1_i32 = arith.constant 1 : i32
    %9 = arith.cmpi eq, %arg2, %c1_i32 : i32
    %10 = arith.extui %9 : i1 to i32
    %c0_i32_8 = arith.constant 0 : i32
    %11 = arith.cmpi ne, %10, %c0_i32_8 : i32
    scf.if %11 {
      %c0_9 = arith.constant 0 : index
      %c0_10 = arith.constant 0 : index
      %12 = vector.load %arg7[%c0_9, %c0_10] : memref<8x256xf32, #tpu.memory_space<vmem>>, vector<8x256xf32>
      %c0_11 = arith.constant 0 : index
      %c0_12 = arith.constant 0 : index
      %13 = vector.load %arg5[%c0_11, %c0_12] : memref<1x256xf32, #tpu.memory_space<vmem>>, vector<1x256xf32>
      %14 = vector.broadcast %13 : vector<1x256xf32> to vector<8x256xf32>
      %15 = arith.addf %12, %14 : vector<8x256xf32>
      %16 = arith.truncf %15 : vector<8x256xf32> to vector<8x256xbf16>
      %c0_13 = arith.constant 0 : index
      %c0_14 = arith.constant 0 : index
      %17 = vector.load %arg6[%c0_13, %c0_14] : memref<8x256xbf16, #tpu.memory_space<vmem>>, vector<8x256xbf16>
      tpu.vector_store %arg6[%c0_13, %c0_14], %16 {strides = array<i32>} : memref<8x256xbf16, #tpu.memory_space<vmem>>, vector<8x256xbf16>,
    } else {
    }
    return
  }
  func.func @transform_0(%arg0: i32, %arg1: i32, %arg2: i32) -> (i32, i32) {
    %c0_i32 = arith.constant 0 : i32
    return %arg0, %arg2 : i32, i32
  }
  func.func @transform_1(%arg0: i32, %arg1: i32, %arg2: i32) -> (i32, i32) {
    %c0_i32 = arith.constant 0 : i32
    return %arg2, %arg1 : i32, i32
  }
  func.func @transform_2(%arg0: i32, %arg1: i32, %arg2: i32) -> (i32, i32) {
    %c0_i32 = arith.constant 0 : i32
    %c0_i32_0 = arith.constant 0 : i32
    return %c0_i32, %arg1 : i32, i32
  }
  func.func @transform_3(%arg0: i32, %arg1: i32, %arg2: i32) -> (i32, i32) {
    %c0_i32 = arith.constant 0 : i32
    return %arg0, %arg1 : i32, i32
  }
}

module attributes {stable_mosaic.version = 11 : i64} {
  func.func @_lstm_kernel(%arg0: i32, %arg1: memref<8x4096xbf16, #tpu.memory_space<vmem>>, %arg2: memref<128x512xbf16, #tpu.memory_space<vmem>>, %arg3: memref<8x1024xbf16, #tpu.memory_space<vmem>>, %arg4: memref<8x128xf32, #tpu.memory_space<vmem>>, %arg5: memref<8x128xf32, #tpu.memory_space<vmem>>, %arg6: memref<8x128xf32, #tpu.memory_space<vmem>>, %arg7: memref<8x128xf32, #tpu.memory_space<vmem>>) attributes {dimension_semantics = [#tpu.dimension_semantics<arbitrary>], iteration_bounds = array<i64: 1>, scalar_prefetch = 0 : i64, scratch_operands = 2 : i64, tpu.core_type = #tpu.core_type<tc>, window_params = [{transform_indices = @transform_0, window_bounds = array<i64: 8, 4096>}, {pipeline_mode = #tpu.pipeline_mode<synchronous>, transform_indices = @transform_1, window_bounds = array<i64: 128, 512>}, {transform_indices = @transform_2, window_bounds = array<i64: 8, 1024>}, {pipeline_mode = #tpu.pipeline_mode<synchronous>, transform_indices = @transform_3, window_bounds = array<i64: 8, 128>}, {pipeline_mode = #tpu.pipeline_mode<synchronous>, transform_indices = @transform_4, window_bounds = array<i64: 8, 128>}]} {
    %c0_i32 = arith.constant 0 : i32
    %0 = arith.cmpi eq, %arg0, %c0_i32 : i32
    %1 = arith.extui %0 : i1 to i32
    %c0_i32_0 = arith.constant 0 : i32
    %2 = arith.cmpi ne, %1, %c0_i32_0 : i32
    scf.if %2 {
      %cst_108 = arith.constant 0.000000e+00 : f32
      %410 = vector.broadcast %cst_108 : f32 to vector<8x128xf32>
      %c0_109 = arith.constant 0 : index
      %c0_110 = arith.constant 0 : index
      %411 = vector.load %arg6[%c0_109, %c0_110] : memref<8x128xf32, #tpu.memory_space<vmem>>, vector<8x128xf32>
      tpu.vector_store %arg6[%c0_109, %c0_110], %410 {strides = array<i32>} : memref<8x128xf32, #tpu.memory_space<vmem>>, vector<8x128xf32>,
      %cst_111 = arith.constant 0.000000e+00 : f32
      %412 = vector.broadcast %cst_111 : f32 to vector<8x128xf32>
      %c0_112 = arith.constant 0 : index
      %c0_113 = arith.constant 0 : index
      %413 = vector.load %arg7[%c0_112, %c0_113] : memref<8x128xf32, #tpu.memory_space<vmem>>, vector<8x128xf32>
      tpu.vector_store %arg7[%c0_112, %c0_113], %412 {strides = array<i32>} : memref<8x128xf32, #tpu.memory_space<vmem>>, vector<8x128xf32>,
    } else {
    }
    %c0 = arith.constant 0 : index
    %c0_1 = arith.constant 0 : index
    %3 = vector.load %arg6[%c0, %c0_1] : memref<8x128xf32, #tpu.memory_space<vmem>>, vector<8x128xf32>
    %c0_2 = arith.constant 0 : index
    %c0_3 = arith.constant 0 : index
    %4 = vector.load %arg7[%c0_2, %c0_3] : memref<8x128xf32, #tpu.memory_space<vmem>>, vector<8x128xf32>
    %c0_4 = arith.constant 0 : index
    %c0_5 = arith.constant 0 : index
    %5 = vector.load %arg1[%c0_4, %c0_5] : memref<8x4096xbf16, #tpu.memory_space<vmem>>, vector<8x512xbf16>
    %6 = arith.extf %5 : vector<8x512xbf16> to vector<8x512xf32>
    %7 = arith.truncf %3 : vector<8x128xf32> to vector<8x128xbf16>
    %c0_6 = arith.constant 0 : index
    %c0_7 = arith.constant 0 : index
    %8 = vector.load %arg2[%c0_6, %c0_7] : memref<128x512xbf16, #tpu.memory_space<vmem>>, vector<128x512xbf16>
    %cst = arith.constant dense<0.000000e+00> : vector<8x512xf32>
    %9 = tpu.matmul %7, %8, %cst {dimension_numbers = #tpu.dot_dimension_numbers<[1], [0], [0], [1], [0, 0, 1, 1], [], []>} : vector<8x128xbf16>, vector<128x512xbf16>, vector<8x512xf32> -> vector<8x512xf32>
    %10 = arith.addf %6, %9 : vector<8x512xf32>
    %11 = vector.extract_strided_slice %10 {offsets = [0, 0], sizes = [8, 128], strides = [1, 1]} : vector<8x512xf32> to vector<8x128xf32>
    %12 = arith.negf %11 : vector<8x128xf32>
    %13 = math.exp %12 : vector<8x128xf32>
    %cst_8 = arith.constant 1.000000e+00 : f32
    %14 = vector.broadcast %cst_8 : f32 to vector<8x128xf32>
    %15 = arith.addf %14, %13 : vector<8x128xf32>
    %16 = arith.divf %14, %15 : vector<8x128xf32>
    %17 = vector.extract_strided_slice %10 {offsets = [0, 128], sizes = [8, 128], strides = [1, 1]} : vector<8x512xf32> to vector<8x128xf32>
    %18 = arith.negf %17 : vector<8x128xf32>
    %19 = math.exp %18 : vector<8x128xf32>
    %cst_9 = arith.constant 1.000000e+00 : f32
    %20 = vector.broadcast %cst_9 : f32 to vector<8x128xf32>
    %21 = arith.addf %20, %19 : vector<8x128xf32>
    %22 = arith.divf %20, %21 : vector<8x128xf32>
    %23 = vector.extract_strided_slice %10 {offsets = [0, 256], sizes = [8, 128], strides = [1, 1]} : vector<8x512xf32> to vector<8x128xf32>
    %24 = math.tanh %23 : vector<8x128xf32>
    %25 = vector.extract_strided_slice %10 {offsets = [0, 384], sizes = [8, 128], strides = [1, 1]} : vector<8x512xf32> to vector<8x128xf32>
    %26 = arith.negf %25 : vector<8x128xf32>
    %27 = math.exp %26 : vector<8x128xf32>
    %cst_10 = arith.constant 1.000000e+00 : f32
    %28 = vector.broadcast %cst_10 : f32 to vector<8x128xf32>
    %29 = arith.addf %28, %27 : vector<8x128xf32>
    %30 = arith.divf %28, %29 : vector<8x128xf32>
    %31 = arith.mulf %22, %4 : vector<8x128xf32>
    %32 = arith.mulf %16, %24 : vector<8x128xf32>
    %33 = arith.addf %31, %32 : vector<8x128xf32>
    %34 = math.tanh %33 : vector<8x128xf32>
    %35 = arith.mulf %30, %34 : vector<8x128xf32>
    %c8_i32 = arith.constant 8 : i32
    %36 = arith.muli %arg0, %c8_i32 : i32
    %c0_i32_11 = arith.constant 0 : i32
    %37 = arith.addi %36, %c0_i32_11 : i32
    %c4_i32 = arith.constant 4 : i32
    %38 = arith.cmpi slt, %37, %c4_i32 : i32
    %39 = arith.extui %38 : i1 to i32
    %40 = arith.sitofp %39 : i32 to f32
    %41 = vector.broadcast %40 : f32 to vector<8x128xf32>
    %42 = arith.mulf %41, %33 : vector<8x128xf32>
    %cst_12 = arith.constant 1.000000e+00 : f32
    %43 = arith.subf %cst_12, %40 : f32
    %44 = vector.broadcast %43 : f32 to vector<8x128xf32>
    %45 = arith.mulf %44, %4 : vector<8x128xf32>
    %46 = arith.addf %42, %45 : vector<8x128xf32>
    %47 = vector.broadcast %40 : f32 to vector<8x128xf32>
    %48 = arith.mulf %47, %35 : vector<8x128xf32>
    %cst_13 = arith.constant 1.000000e+00 : f32
    %49 = arith.subf %cst_13, %40 : f32
    %50 = vector.broadcast %49 : f32 to vector<8x128xf32>
    %51 = arith.mulf %50, %3 : vector<8x128xf32>
    %52 = arith.addf %48, %51 : vector<8x128xf32>
    %53 = arith.truncf %52 : vector<8x128xf32> to vector<8x128xbf16>
    %c0_14 = arith.constant 0 : index
    %c0_15 = arith.constant 0 : index
    %54 = vector.load %arg3[%c0_14, %c0_15] : memref<8x1024xbf16, #tpu.memory_space<vmem>>, vector<8x128xbf16>
    tpu.vector_store %arg3[%c0_14, %c0_15], %53 {strides = array<i32>} : memref<8x1024xbf16, #tpu.memory_space<vmem>>, vector<8x128xbf16>,
    %c0_16 = arith.constant 0 : index
    %c512 = arith.constant 512 : index
    %55 = vector.load %arg1[%c0_16, %c512] : memref<8x4096xbf16, #tpu.memory_space<vmem>>, vector<8x512xbf16>
    %56 = arith.extf %55 : vector<8x512xbf16> to vector<8x512xf32>
    %57 = arith.truncf %52 : vector<8x128xf32> to vector<8x128xbf16>
    %c0_17 = arith.constant 0 : index
    %c0_18 = arith.constant 0 : index
    %58 = vector.load %arg2[%c0_17, %c0_18] : memref<128x512xbf16, #tpu.memory_space<vmem>>, vector<128x512xbf16>
    %cst_19 = arith.constant dense<0.000000e+00> : vector<8x512xf32>
    %59 = tpu.matmul %57, %58, %cst_19 {dimension_numbers = #tpu.dot_dimension_numbers<[1], [0], [0], [1], [0, 0, 1, 1], [], []>} : vector<8x128xbf16>, vector<128x512xbf16>, vector<8x512xf32> -> vector<8x512xf32>
    %60 = arith.addf %56, %59 : vector<8x512xf32>
    %61 = vector.extract_strided_slice %60 {offsets = [0, 0], sizes = [8, 128], strides = [1, 1]} : vector<8x512xf32> to vector<8x128xf32>
    %62 = arith.negf %61 : vector<8x128xf32>
    %63 = math.exp %62 : vector<8x128xf32>
    %cst_20 = arith.constant 1.000000e+00 : f32
    %64 = vector.broadcast %cst_20 : f32 to vector<8x128xf32>
    %65 = arith.addf %64, %63 : vector<8x128xf32>
    %66 = arith.divf %64, %65 : vector<8x128xf32>
    %67 = vector.extract_strided_slice %60 {offsets = [0, 128], sizes = [8, 128], strides = [1, 1]} : vector<8x512xf32> to vector<8x128xf32>
    %68 = arith.negf %67 : vector<8x128xf32>
    %69 = math.exp %68 : vector<8x128xf32>
    %cst_21 = arith.constant 1.000000e+00 : f32
    %70 = vector.broadcast %cst_21 : f32 to vector<8x128xf32>
    %71 = arith.addf %70, %69 : vector<8x128xf32>
    %72 = arith.divf %70, %71 : vector<8x128xf32>
    %73 = vector.extract_strided_slice %60 {offsets = [0, 256], sizes = [8, 128], strides = [1, 1]} : vector<8x512xf32> to vector<8x128xf32>
    %74 = math.tanh %73 : vector<8x128xf32>
    %75 = vector.extract_strided_slice %60 {offsets = [0, 384], sizes = [8, 128], strides = [1, 1]} : vector<8x512xf32> to vector<8x128xf32>
    %76 = arith.negf %75 : vector<8x128xf32>
    %77 = math.exp %76 : vector<8x128xf32>
    %cst_22 = arith.constant 1.000000e+00 : f32
    %78 = vector.broadcast %cst_22 : f32 to vector<8x128xf32>
    %79 = arith.addf %78, %77 : vector<8x128xf32>
    %80 = arith.divf %78, %79 : vector<8x128xf32>
    %81 = arith.mulf %72, %46 : vector<8x128xf32>
    %82 = arith.mulf %66, %74 : vector<8x128xf32>
    %83 = arith.addf %81, %82 : vector<8x128xf32>
    %84 = math.tanh %83 : vector<8x128xf32>
    %85 = arith.mulf %80, %84 : vector<8x128xf32>
    %c8_i32_23 = arith.constant 8 : i32
    %86 = arith.muli %arg0, %c8_i32_23 : i32
    %c1_i32 = arith.constant 1 : i32
    %87 = arith.addi %86, %c1_i32 : i32
    %c4_i32_24 = arith.constant 4 : i32
    %88 = arith.cmpi slt, %87, %c4_i32_24 : i32
    %89 = arith.extui %88 : i1 to i32
    %90 = arith.sitofp %89 : i32 to f32
    %91 = vector.broadcast %90 : f32 to vector<8x128xf32>
    %92 = arith.mulf %91, %83 : vector<8x128xf32>
    %cst_25 = arith.constant 1.000000e+00 : f32
    %93 = arith.subf %cst_25, %90 : f32
    %94 = vector.broadcast %93 : f32 to vector<8x128xf32>
    %95 = arith.mulf %94, %46 : vector<8x128xf32>
    %96 = arith.addf %92, %95 : vector<8x128xf32>
    %97 = vector.broadcast %90 : f32 to vector<8x128xf32>
    %98 = arith.mulf %97, %85 : vector<8x128xf32>
    %cst_26 = arith.constant 1.000000e+00 : f32
    %99 = arith.subf %cst_26, %90 : f32
    %100 = vector.broadcast %99 : f32 to vector<8x128xf32>
    %101 = arith.mulf %100, %52 : vector<8x128xf32>
    %102 = arith.addf %98, %101 : vector<8x128xf32>
    %103 = arith.truncf %102 : vector<8x128xf32> to vector<8x128xbf16>
    %c0_27 = arith.constant 0 : index
    %c128 = arith.constant 128 : index
    %104 = vector.load %arg3[%c0_27, %c128] : memref<8x1024xbf16, #tpu.memory_space<vmem>>, vector<8x128xbf16>
    tpu.vector_store %arg3[%c0_27, %c128], %103 {strides = array<i32>} : memref<8x1024xbf16, #tpu.memory_space<vmem>>, vector<8x128xbf16>,
    %c0_28 = arith.constant 0 : index
    %c1024 = arith.constant 1024 : index
    %105 = vector.load %arg1[%c0_28, %c1024] : memref<8x4096xbf16, #tpu.memory_space<vmem>>, vector<8x512xbf16>
    %106 = arith.extf %105 : vector<8x512xbf16> to vector<8x512xf32>
    %107 = arith.truncf %102 : vector<8x128xf32> to vector<8x128xbf16>
    %c0_29 = arith.constant 0 : index
    %c0_30 = arith.constant 0 : index
    %108 = vector.load %arg2[%c0_29, %c0_30] : memref<128x512xbf16, #tpu.memory_space<vmem>>, vector<128x512xbf16>
    %cst_31 = arith.constant dense<0.000000e+00> : vector<8x512xf32>
    %109 = tpu.matmul %107, %108, %cst_31 {dimension_numbers = #tpu.dot_dimension_numbers<[1], [0], [0], [1], [0, 0, 1, 1], [], []>} : vector<8x128xbf16>, vector<128x512xbf16>, vector<8x512xf32> -> vector<8x512xf32>
    %110 = arith.addf %106, %109 : vector<8x512xf32>
    %111 = vector.extract_strided_slice %110 {offsets = [0, 0], sizes = [8, 128], strides = [1, 1]} : vector<8x512xf32> to vector<8x128xf32>
    %112 = arith.negf %111 : vector<8x128xf32>
    %113 = math.exp %112 : vector<8x128xf32>
    %cst_32 = arith.constant 1.000000e+00 : f32
    %114 = vector.broadcast %cst_32 : f32 to vector<8x128xf32>
    %115 = arith.addf %114, %113 : vector<8x128xf32>
    %116 = arith.divf %114, %115 : vector<8x128xf32>
    %117 = vector.extract_strided_slice %110 {offsets = [0, 128], sizes = [8, 128], strides = [1, 1]} : vector<8x512xf32> to vector<8x128xf32>
    %118 = arith.negf %117 : vector<8x128xf32>
    %119 = math.exp %118 : vector<8x128xf32>
    %cst_33 = arith.constant 1.000000e+00 : f32
    %120 = vector.broadcast %cst_33 : f32 to vector<8x128xf32>
    %121 = arith.addf %120, %119 : vector<8x128xf32>
    %122 = arith.divf %120, %121 : vector<8x128xf32>
    %123 = vector.extract_strided_slice %110 {offsets = [0, 256], sizes = [8, 128], strides = [1, 1]} : vector<8x512xf32> to vector<8x128xf32>
    %124 = math.tanh %123 : vector<8x128xf32>
    %125 = vector.extract_strided_slice %110 {offsets = [0, 384], sizes = [8, 128], strides = [1, 1]} : vector<8x512xf32> to vector<8x128xf32>
    %126 = arith.negf %125 : vector<8x128xf32>
    %127 = math.exp %126 : vector<8x128xf32>
    %cst_34 = arith.constant 1.000000e+00 : f32
    %128 = vector.broadcast %cst_34 : f32 to vector<8x128xf32>
    %129 = arith.addf %128, %127 : vector<8x128xf32>
    %130 = arith.divf %128, %129 : vector<8x128xf32>
    %131 = arith.mulf %122, %96 : vector<8x128xf32>
    %132 = arith.mulf %116, %124 : vector<8x128xf32>
    %133 = arith.addf %131, %132 : vector<8x128xf32>
    %134 = math.tanh %133 : vector<8x128xf32>
    %135 = arith.mulf %130, %134 : vector<8x128xf32>
    %c8_i32_35 = arith.constant 8 : i32
    %136 = arith.muli %arg0, %c8_i32_35 : i32
    %c2_i32 = arith.constant 2 : i32
    %137 = arith.addi %136, %c2_i32 : i32
    %c4_i32_36 = arith.constant 4 : i32
    %138 = arith.cmpi slt, %137, %c4_i32_36 : i32
    %139 = arith.extui %138 : i1 to i32
    %140 = arith.sitofp %139 : i32 to f32
    %141 = vector.broadcast %140 : f32 to vector<8x128xf32>
    %142 = arith.mulf %141, %133 : vector<8x128xf32>
    %cst_37 = arith.constant 1.000000e+00 : f32
    %143 = arith.subf %cst_37, %140 : f32
    %144 = vector.broadcast %143 : f32 to vector<8x128xf32>
    %145 = arith.mulf %144, %96 : vector<8x128xf32>
    %146 = arith.addf %142, %145 : vector<8x128xf32>
    %147 = vector.broadcast %140 : f32 to vector<8x128xf32>
    %148 = arith.mulf %147, %135 : vector<8x128xf32>
    %cst_38 = arith.constant 1.000000e+00 : f32
    %149 = arith.subf %cst_38, %140 : f32
    %150 = vector.broadcast %149 : f32 to vector<8x128xf32>
    %151 = arith.mulf %150, %102 : vector<8x128xf32>
    %152 = arith.addf %148, %151 : vector<8x128xf32>
    %153 = arith.truncf %152 : vector<8x128xf32> to vector<8x128xbf16>
    %c0_39 = arith.constant 0 : index
    %c256 = arith.constant 256 : index
    %154 = vector.load %arg3[%c0_39, %c256] : memref<8x1024xbf16, #tpu.memory_space<vmem>>, vector<8x128xbf16>
    tpu.vector_store %arg3[%c0_39, %c256], %153 {strides = array<i32>} : memref<8x1024xbf16, #tpu.memory_space<vmem>>, vector<8x128xbf16>,
    %c0_40 = arith.constant 0 : index
    %c1536 = arith.constant 1536 : index
    %155 = vector.load %arg1[%c0_40, %c1536] : memref<8x4096xbf16, #tpu.memory_space<vmem>>, vector<8x512xbf16>
    %156 = arith.extf %155 : vector<8x512xbf16> to vector<8x512xf32>
    %157 = arith.truncf %152 : vector<8x128xf32> to vector<8x128xbf16>
    %c0_41 = arith.constant 0 : index
    %c0_42 = arith.constant 0 : index
    %158 = vector.load %arg2[%c0_41, %c0_42] : memref<128x512xbf16, #tpu.memory_space<vmem>>, vector<128x512xbf16>
    %cst_43 = arith.constant dense<0.000000e+00> : vector<8x512xf32>
    %159 = tpu.matmul %157, %158, %cst_43 {dimension_numbers = #tpu.dot_dimension_numbers<[1], [0], [0], [1], [0, 0, 1, 1], [], []>} : vector<8x128xbf16>, vector<128x512xbf16>, vector<8x512xf32> -> vector<8x512xf32>
    %160 = arith.addf %156, %159 : vector<8x512xf32>
    %161 = vector.extract_strided_slice %160 {offsets = [0, 0], sizes = [8, 128], strides = [1, 1]} : vector<8x512xf32> to vector<8x128xf32>
    %162 = arith.negf %161 : vector<8x128xf32>
    %163 = math.exp %162 : vector<8x128xf32>
    %cst_44 = arith.constant 1.000000e+00 : f32
    %164 = vector.broadcast %cst_44 : f32 to vector<8x128xf32>
    %165 = arith.addf %164, %163 : vector<8x128xf32>
    %166 = arith.divf %164, %165 : vector<8x128xf32>
    %167 = vector.extract_strided_slice %160 {offsets = [0, 128], sizes = [8, 128], strides = [1, 1]} : vector<8x512xf32> to vector<8x128xf32>
    %168 = arith.negf %167 : vector<8x128xf32>
    %169 = math.exp %168 : vector<8x128xf32>
    %cst_45 = arith.constant 1.000000e+00 : f32
    %170 = vector.broadcast %cst_45 : f32 to vector<8x128xf32>
    %171 = arith.addf %170, %169 : vector<8x128xf32>
    %172 = arith.divf %170, %171 : vector<8x128xf32>
    %173 = vector.extract_strided_slice %160 {offsets = [0, 256], sizes = [8, 128], strides = [1, 1]} : vector<8x512xf32> to vector<8x128xf32>
    %174 = math.tanh %173 : vector<8x128xf32>
    %175 = vector.extract_strided_slice %160 {offsets = [0, 384], sizes = [8, 128], strides = [1, 1]} : vector<8x512xf32> to vector<8x128xf32>
    %176 = arith.negf %175 : vector<8x128xf32>
    %177 = math.exp %176 : vector<8x128xf32>
    %cst_46 = arith.constant 1.000000e+00 : f32
    %178 = vector.broadcast %cst_46 : f32 to vector<8x128xf32>
    %179 = arith.addf %178, %177 : vector<8x128xf32>
    %180 = arith.divf %178, %179 : vector<8x128xf32>
    %181 = arith.mulf %172, %146 : vector<8x128xf32>
    %182 = arith.mulf %166, %174 : vector<8x128xf32>
    %183 = arith.addf %181, %182 : vector<8x128xf32>
    %184 = math.tanh %183 : vector<8x128xf32>
    %185 = arith.mulf %180, %184 : vector<8x128xf32>
    %c8_i32_47 = arith.constant 8 : i32
    %186 = arith.muli %arg0, %c8_i32_47 : i32
    %c3_i32 = arith.constant 3 : i32
    %187 = arith.addi %186, %c3_i32 : i32
    %c4_i32_48 = arith.constant 4 : i32
    %188 = arith.cmpi slt, %187, %c4_i32_48 : i32
    %189 = arith.extui %188 : i1 to i32
    %190 = arith.sitofp %189 : i32 to f32
    %191 = vector.broadcast %190 : f32 to vector<8x128xf32>
    %192 = arith.mulf %191, %183 : vector<8x128xf32>
    %cst_49 = arith.constant 1.000000e+00 : f32
    %193 = arith.subf %cst_49, %190 : f32
    %194 = vector.broadcast %193 : f32 to vector<8x128xf32>
    %195 = arith.mulf %194, %146 : vector<8x128xf32>
    %196 = arith.addf %192, %195 : vector<8x128xf32>
    %197 = vector.broadcast %190 : f32 to vector<8x128xf32>
    %198 = arith.mulf %197, %185 : vector<8x128xf32>
    %cst_50 = arith.constant 1.000000e+00 : f32
    %199 = arith.subf %cst_50, %190 : f32
    %200 = vector.broadcast %199 : f32 to vector<8x128xf32>
    %201 = arith.mulf %200, %152 : vector<8x128xf32>
    %202 = arith.addf %198, %201 : vector<8x128xf32>
    %203 = arith.truncf %202 : vector<8x128xf32> to vector<8x128xbf16>
    %c0_51 = arith.constant 0 : index
    %c384 = arith.constant 384 : index
    %204 = vector.load %arg3[%c0_51, %c384] : memref<8x1024xbf16, #tpu.memory_space<vmem>>, vector<8x128xbf16>
    tpu.vector_store %arg3[%c0_51, %c384], %203 {strides = array<i32>} : memref<8x1024xbf16, #tpu.memory_space<vmem>>, vector<8x128xbf16>,
    %c0_52 = arith.constant 0 : index
    %c2048 = arith.constant 2048 : index
    %205 = vector.load %arg1[%c0_52, %c2048] : memref<8x4096xbf16, #tpu.memory_space<vmem>>, vector<8x512xbf16>
    %206 = arith.extf %205 : vector<8x512xbf16> to vector<8x512xf32>
    %207 = arith.truncf %202 : vector<8x128xf32> to vector<8x128xbf16>
    %c0_53 = arith.constant 0 : index
    %c0_54 = arith.constant 0 : index
    %208 = vector.load %arg2[%c0_53, %c0_54] : memref<128x512xbf16, #tpu.memory_space<vmem>>, vector<128x512xbf16>
    %cst_55 = arith.constant dense<0.000000e+00> : vector<8x512xf32>
    %209 = tpu.matmul %207, %208, %cst_55 {dimension_numbers = #tpu.dot_dimension_numbers<[1], [0], [0], [1], [0, 0, 1, 1], [], []>} : vector<8x128xbf16>, vector<128x512xbf16>, vector<8x512xf32> -> vector<8x512xf32>
    %210 = arith.addf %206, %209 : vector<8x512xf32>
    %211 = vector.extract_strided_slice %210 {offsets = [0, 0], sizes = [8, 128], strides = [1, 1]} : vector<8x512xf32> to vector<8x128xf32>
    %212 = arith.negf %211 : vector<8x128xf32>
    %213 = math.exp %212 : vector<8x128xf32>
    %cst_56 = arith.constant 1.000000e+00 : f32
    %214 = vector.broadcast %cst_56 : f32 to vector<8x128xf32>
    %215 = arith.addf %214, %213 : vector<8x128xf32>
    %216 = arith.divf %214, %215 : vector<8x128xf32>
    %217 = vector.extract_strided_slice %210 {offsets = [0, 128], sizes = [8, 128], strides = [1, 1]} : vector<8x512xf32> to vector<8x128xf32>
    %218 = arith.negf %217 : vector<8x128xf32>
    %219 = math.exp %218 : vector<8x128xf32>
    %cst_57 = arith.constant 1.000000e+00 : f32
    %220 = vector.broadcast %cst_57 : f32 to vector<8x128xf32>
    %221 = arith.addf %220, %219 : vector<8x128xf32>
    %222 = arith.divf %220, %221 : vector<8x128xf32>
    %223 = vector.extract_strided_slice %210 {offsets = [0, 256], sizes = [8, 128], strides = [1, 1]} : vector<8x512xf32> to vector<8x128xf32>
    %224 = math.tanh %223 : vector<8x128xf32>
    %225 = vector.extract_strided_slice %210 {offsets = [0, 384], sizes = [8, 128], strides = [1, 1]} : vector<8x512xf32> to vector<8x128xf32>
    %226 = arith.negf %225 : vector<8x128xf32>
    %227 = math.exp %226 : vector<8x128xf32>
    %cst_58 = arith.constant 1.000000e+00 : f32
    %228 = vector.broadcast %cst_58 : f32 to vector<8x128xf32>
    %229 = arith.addf %228, %227 : vector<8x128xf32>
    %230 = arith.divf %228, %229 : vector<8x128xf32>
    %231 = arith.mulf %222, %196 : vector<8x128xf32>
    %232 = arith.mulf %216, %224 : vector<8x128xf32>
    %233 = arith.addf %231, %232 : vector<8x128xf32>
    %234 = math.tanh %233 : vector<8x128xf32>
    %235 = arith.mulf %230, %234 : vector<8x128xf32>
    %c8_i32_59 = arith.constant 8 : i32
    %236 = arith.muli %arg0, %c8_i32_59 : i32
    %c4_i32_60 = arith.constant 4 : i32
    %237 = arith.addi %236, %c4_i32_60 : i32
    %c4_i32_61 = arith.constant 4 : i32
    %238 = arith.cmpi slt, %237, %c4_i32_61 : i32
    %239 = arith.extui %238 : i1 to i32
    %240 = arith.sitofp %239 : i32 to f32
    %241 = vector.broadcast %240 : f32 to vector<8x128xf32>
    %242 = arith.mulf %241, %233 : vector<8x128xf32>
    %cst_62 = arith.constant 1.000000e+00 : f32
    %243 = arith.subf %cst_62, %240 : f32
    %244 = vector.broadcast %243 : f32 to vector<8x128xf32>
    %245 = arith.mulf %244, %196 : vector<8x128xf32>
    %246 = arith.addf %242, %245 : vector<8x128xf32>
    %247 = vector.broadcast %240 : f32 to vector<8x128xf32>
    %248 = arith.mulf %247, %235 : vector<8x128xf32>
    %cst_63 = arith.constant 1.000000e+00 : f32
    %249 = arith.subf %cst_63, %240 : f32
    %250 = vector.broadcast %249 : f32 to vector<8x128xf32>
    %251 = arith.mulf %250, %202 : vector<8x128xf32>
    %252 = arith.addf %248, %251 : vector<8x128xf32>
    %253 = arith.truncf %252 : vector<8x128xf32> to vector<8x128xbf16>
    %c0_64 = arith.constant 0 : index
    %c512_65 = arith.constant 512 : index
    %254 = vector.load %arg3[%c0_64, %c512_65] : memref<8x1024xbf16, #tpu.memory_space<vmem>>, vector<8x128xbf16>
    tpu.vector_store %arg3[%c0_64, %c512_65], %253 {strides = array<i32>} : memref<8x1024xbf16, #tpu.memory_space<vmem>>, vector<8x128xbf16>,
    %c0_66 = arith.constant 0 : index
    %c2560 = arith.constant 2560 : index
    %255 = vector.load %arg1[%c0_66, %c2560] : memref<8x4096xbf16, #tpu.memory_space<vmem>>, vector<8x512xbf16>
    %256 = arith.extf %255 : vector<8x512xbf16> to vector<8x512xf32>
    %257 = arith.truncf %252 : vector<8x128xf32> to vector<8x128xbf16>
    %c0_67 = arith.constant 0 : index
    %c0_68 = arith.constant 0 : index
    %258 = vector.load %arg2[%c0_67, %c0_68] : memref<128x512xbf16, #tpu.memory_space<vmem>>, vector<128x512xbf16>
    %cst_69 = arith.constant dense<0.000000e+00> : vector<8x512xf32>
    %259 = tpu.matmul %257, %258, %cst_69 {dimension_numbers = #tpu.dot_dimension_numbers<[1], [0], [0], [1], [0, 0, 1, 1], [], []>} : vector<8x128xbf16>, vector<128x512xbf16>, vector<8x512xf32> -> vector<8x512xf32>
    %260 = arith.addf %256, %259 : vector<8x512xf32>
    %261 = vector.extract_strided_slice %260 {offsets = [0, 0], sizes = [8, 128], strides = [1, 1]} : vector<8x512xf32> to vector<8x128xf32>
    %262 = arith.negf %261 : vector<8x128xf32>
    %263 = math.exp %262 : vector<8x128xf32>
    %cst_70 = arith.constant 1.000000e+00 : f32
    %264 = vector.broadcast %cst_70 : f32 to vector<8x128xf32>
    %265 = arith.addf %264, %263 : vector<8x128xf32>
    %266 = arith.divf %264, %265 : vector<8x128xf32>
    %267 = vector.extract_strided_slice %260 {offsets = [0, 128], sizes = [8, 128], strides = [1, 1]} : vector<8x512xf32> to vector<8x128xf32>
    %268 = arith.negf %267 : vector<8x128xf32>
    %269 = math.exp %268 : vector<8x128xf32>
    %cst_71 = arith.constant 1.000000e+00 : f32
    %270 = vector.broadcast %cst_71 : f32 to vector<8x128xf32>
    %271 = arith.addf %270, %269 : vector<8x128xf32>
    %272 = arith.divf %270, %271 : vector<8x128xf32>
    %273 = vector.extract_strided_slice %260 {offsets = [0, 256], sizes = [8, 128], strides = [1, 1]} : vector<8x512xf32> to vector<8x128xf32>
    %274 = math.tanh %273 : vector<8x128xf32>
    %275 = vector.extract_strided_slice %260 {offsets = [0, 384], sizes = [8, 128], strides = [1, 1]} : vector<8x512xf32> to vector<8x128xf32>
    %276 = arith.negf %275 : vector<8x128xf32>
    %277 = math.exp %276 : vector<8x128xf32>
    %cst_72 = arith.constant 1.000000e+00 : f32
    %278 = vector.broadcast %cst_72 : f32 to vector<8x128xf32>
    %279 = arith.addf %278, %277 : vector<8x128xf32>
    %280 = arith.divf %278, %279 : vector<8x128xf32>
    %281 = arith.mulf %272, %246 : vector<8x128xf32>
    %282 = arith.mulf %266, %274 : vector<8x128xf32>
    %283 = arith.addf %281, %282 : vector<8x128xf32>
    %284 = math.tanh %283 : vector<8x128xf32>
    %285 = arith.mulf %280, %284 : vector<8x128xf32>
    %c8_i32_73 = arith.constant 8 : i32
    %286 = arith.muli %arg0, %c8_i32_73 : i32
    %c5_i32 = arith.constant 5 : i32
    %287 = arith.addi %286, %c5_i32 : i32
    %c4_i32_74 = arith.constant 4 : i32
    %288 = arith.cmpi slt, %287, %c4_i32_74 : i32
    %289 = arith.extui %288 : i1 to i32
    %290 = arith.sitofp %289 : i32 to f32
    %291 = vector.broadcast %290 : f32 to vector<8x128xf32>
    %292 = arith.mulf %291, %283 : vector<8x128xf32>
    %cst_75 = arith.constant 1.000000e+00 : f32
    %293 = arith.subf %cst_75, %290 : f32
    %294 = vector.broadcast %293 : f32 to vector<8x128xf32>
    %295 = arith.mulf %294, %246 : vector<8x128xf32>
    %296 = arith.addf %292, %295 : vector<8x128xf32>
    %297 = vector.broadcast %290 : f32 to vector<8x128xf32>
    %298 = arith.mulf %297, %285 : vector<8x128xf32>
    %cst_76 = arith.constant 1.000000e+00 : f32
    %299 = arith.subf %cst_76, %290 : f32
    %300 = vector.broadcast %299 : f32 to vector<8x128xf32>
    %301 = arith.mulf %300, %252 : vector<8x128xf32>
    %302 = arith.addf %298, %301 : vector<8x128xf32>
    %303 = arith.truncf %302 : vector<8x128xf32> to vector<8x128xbf16>
    %c0_77 = arith.constant 0 : index
    %c640 = arith.constant 640 : index
    %304 = vector.load %arg3[%c0_77, %c640] : memref<8x1024xbf16, #tpu.memory_space<vmem>>, vector<8x128xbf16>
    tpu.vector_store %arg3[%c0_77, %c640], %303 {strides = array<i32>} : memref<8x1024xbf16, #tpu.memory_space<vmem>>, vector<8x128xbf16>,
    %c0_78 = arith.constant 0 : index
    %c3072 = arith.constant 3072 : index
    %305 = vector.load %arg1[%c0_78, %c3072] : memref<8x4096xbf16, #tpu.memory_space<vmem>>, vector<8x512xbf16>
    %306 = arith.extf %305 : vector<8x512xbf16> to vector<8x512xf32>
    %307 = arith.truncf %302 : vector<8x128xf32> to vector<8x128xbf16>
    %c0_79 = arith.constant 0 : index
    %c0_80 = arith.constant 0 : index
    %308 = vector.load %arg2[%c0_79, %c0_80] : memref<128x512xbf16, #tpu.memory_space<vmem>>, vector<128x512xbf16>
    %cst_81 = arith.constant dense<0.000000e+00> : vector<8x512xf32>
    %309 = tpu.matmul %307, %308, %cst_81 {dimension_numbers = #tpu.dot_dimension_numbers<[1], [0], [0], [1], [0, 0, 1, 1], [], []>} : vector<8x128xbf16>, vector<128x512xbf16>, vector<8x512xf32> -> vector<8x512xf32>
    %310 = arith.addf %306, %309 : vector<8x512xf32>
    %311 = vector.extract_strided_slice %310 {offsets = [0, 0], sizes = [8, 128], strides = [1, 1]} : vector<8x512xf32> to vector<8x128xf32>
    %312 = arith.negf %311 : vector<8x128xf32>
    %313 = math.exp %312 : vector<8x128xf32>
    %cst_82 = arith.constant 1.000000e+00 : f32
    %314 = vector.broadcast %cst_82 : f32 to vector<8x128xf32>
    %315 = arith.addf %314, %313 : vector<8x128xf32>
    %316 = arith.divf %314, %315 : vector<8x128xf32>
    %317 = vector.extract_strided_slice %310 {offsets = [0, 128], sizes = [8, 128], strides = [1, 1]} : vector<8x512xf32> to vector<8x128xf32>
    %318 = arith.negf %317 : vector<8x128xf32>
    %319 = math.exp %318 : vector<8x128xf32>
    %cst_83 = arith.constant 1.000000e+00 : f32
    %320 = vector.broadcast %cst_83 : f32 to vector<8x128xf32>
    %321 = arith.addf %320, %319 : vector<8x128xf32>
    %322 = arith.divf %320, %321 : vector<8x128xf32>
    %323 = vector.extract_strided_slice %310 {offsets = [0, 256], sizes = [8, 128], strides = [1, 1]} : vector<8x512xf32> to vector<8x128xf32>
    %324 = math.tanh %323 : vector<8x128xf32>
    %325 = vector.extract_strided_slice %310 {offsets = [0, 384], sizes = [8, 128], strides = [1, 1]} : vector<8x512xf32> to vector<8x128xf32>
    %326 = arith.negf %325 : vector<8x128xf32>
    %327 = math.exp %326 : vector<8x128xf32>
    %cst_84 = arith.constant 1.000000e+00 : f32
    %328 = vector.broadcast %cst_84 : f32 to vector<8x128xf32>
    %329 = arith.addf %328, %327 : vector<8x128xf32>
    %330 = arith.divf %328, %329 : vector<8x128xf32>
    %331 = arith.mulf %322, %296 : vector<8x128xf32>
    %332 = arith.mulf %316, %324 : vector<8x128xf32>
    %333 = arith.addf %331, %332 : vector<8x128xf32>
    %334 = math.tanh %333 : vector<8x128xf32>
    %335 = arith.mulf %330, %334 : vector<8x128xf32>
    %c8_i32_85 = arith.constant 8 : i32
    %336 = arith.muli %arg0, %c8_i32_85 : i32
    %c6_i32 = arith.constant 6 : i32
    %337 = arith.addi %336, %c6_i32 : i32
    %c4_i32_86 = arith.constant 4 : i32
    %338 = arith.cmpi slt, %337, %c4_i32_86 : i32
    %339 = arith.extui %338 : i1 to i32
    %340 = arith.sitofp %339 : i32 to f32
    %341 = vector.broadcast %340 : f32 to vector<8x128xf32>
    %342 = arith.mulf %341, %333 : vector<8x128xf32>
    %cst_87 = arith.constant 1.000000e+00 : f32
    %343 = arith.subf %cst_87, %340 : f32
    %344 = vector.broadcast %343 : f32 to vector<8x128xf32>
    %345 = arith.mulf %344, %296 : vector<8x128xf32>
    %346 = arith.addf %342, %345 : vector<8x128xf32>
    %347 = vector.broadcast %340 : f32 to vector<8x128xf32>
    %348 = arith.mulf %347, %335 : vector<8x128xf32>
    %cst_88 = arith.constant 1.000000e+00 : f32
    %349 = arith.subf %cst_88, %340 : f32
    %350 = vector.broadcast %349 : f32 to vector<8x128xf32>
    %351 = arith.mulf %350, %302 : vector<8x128xf32>
    %352 = arith.addf %348, %351 : vector<8x128xf32>
    %353 = arith.truncf %352 : vector<8x128xf32> to vector<8x128xbf16>
    %c0_89 = arith.constant 0 : index
    %c768 = arith.constant 768 : index
    %354 = vector.load %arg3[%c0_89, %c768] : memref<8x1024xbf16, #tpu.memory_space<vmem>>, vector<8x128xbf16>
    tpu.vector_store %arg3[%c0_89, %c768], %353 {strides = array<i32>} : memref<8x1024xbf16, #tpu.memory_space<vmem>>, vector<8x128xbf16>,
    %c0_90 = arith.constant 0 : index
    %c3584 = arith.constant 3584 : index
    %355 = vector.load %arg1[%c0_90, %c3584] : memref<8x4096xbf16, #tpu.memory_space<vmem>>, vector<8x512xbf16>
    %356 = arith.extf %355 : vector<8x512xbf16> to vector<8x512xf32>
    %357 = arith.truncf %352 : vector<8x128xf32> to vector<8x128xbf16>
    %c0_91 = arith.constant 0 : index
    %c0_92 = arith.constant 0 : index
    %358 = vector.load %arg2[%c0_91, %c0_92] : memref<128x512xbf16, #tpu.memory_space<vmem>>, vector<128x512xbf16>
    %cst_93 = arith.constant dense<0.000000e+00> : vector<8x512xf32>
    %359 = tpu.matmul %357, %358, %cst_93 {dimension_numbers = #tpu.dot_dimension_numbers<[1], [0], [0], [1], [0, 0, 1, 1], [], []>} : vector<8x128xbf16>, vector<128x512xbf16>, vector<8x512xf32> -> vector<8x512xf32>
    %360 = arith.addf %356, %359 : vector<8x512xf32>
    %361 = vector.extract_strided_slice %360 {offsets = [0, 0], sizes = [8, 128], strides = [1, 1]} : vector<8x512xf32> to vector<8x128xf32>
    %362 = arith.negf %361 : vector<8x128xf32>
    %363 = math.exp %362 : vector<8x128xf32>
    %cst_94 = arith.constant 1.000000e+00 : f32
    %364 = vector.broadcast %cst_94 : f32 to vector<8x128xf32>
    %365 = arith.addf %364, %363 : vector<8x128xf32>
    %366 = arith.divf %364, %365 : vector<8x128xf32>
    %367 = vector.extract_strided_slice %360 {offsets = [0, 128], sizes = [8, 128], strides = [1, 1]} : vector<8x512xf32> to vector<8x128xf32>
    %368 = arith.negf %367 : vector<8x128xf32>
    %369 = math.exp %368 : vector<8x128xf32>
    %cst_95 = arith.constant 1.000000e+00 : f32
    %370 = vector.broadcast %cst_95 : f32 to vector<8x128xf32>
    %371 = arith.addf %370, %369 : vector<8x128xf32>
    %372 = arith.divf %370, %371 : vector<8x128xf32>
    %373 = vector.extract_strided_slice %360 {offsets = [0, 256], sizes = [8, 128], strides = [1, 1]} : vector<8x512xf32> to vector<8x128xf32>
    %374 = math.tanh %373 : vector<8x128xf32>
    %375 = vector.extract_strided_slice %360 {offsets = [0, 384], sizes = [8, 128], strides = [1, 1]} : vector<8x512xf32> to vector<8x128xf32>
    %376 = arith.negf %375 : vector<8x128xf32>
    %377 = math.exp %376 : vector<8x128xf32>
    %cst_96 = arith.constant 1.000000e+00 : f32
    %378 = vector.broadcast %cst_96 : f32 to vector<8x128xf32>
    %379 = arith.addf %378, %377 : vector<8x128xf32>
    %380 = arith.divf %378, %379 : vector<8x128xf32>
    %381 = arith.mulf %372, %346 : vector<8x128xf32>
    %382 = arith.mulf %366, %374 : vector<8x128xf32>
    %383 = arith.addf %381, %382 : vector<8x128xf32>
    %384 = math.tanh %383 : vector<8x128xf32>
    %385 = arith.mulf %380, %384 : vector<8x128xf32>
    %c8_i32_97 = arith.constant 8 : i32
    %386 = arith.muli %arg0, %c8_i32_97 : i32
    %c7_i32 = arith.constant 7 : i32
    %387 = arith.addi %386, %c7_i32 : i32
    %c4_i32_98 = arith.constant 4 : i32
    %388 = arith.cmpi slt, %387, %c4_i32_98 : i32
    %389 = arith.extui %388 : i1 to i32
    %390 = arith.sitofp %389 : i32 to f32
    %391 = vector.broadcast %390 : f32 to vector<8x128xf32>
    %392 = arith.mulf %391, %383 : vector<8x128xf32>
    %cst_99 = arith.constant 1.000000e+00 : f32
    %393 = arith.subf %cst_99, %390 : f32
    %394 = vector.broadcast %393 : f32 to vector<8x128xf32>
    %395 = arith.mulf %394, %346 : vector<8x128xf32>
    %396 = arith.addf %392, %395 : vector<8x128xf32>
    %397 = vector.broadcast %390 : f32 to vector<8x128xf32>
    %398 = arith.mulf %397, %385 : vector<8x128xf32>
    %cst_100 = arith.constant 1.000000e+00 : f32
    %399 = arith.subf %cst_100, %390 : f32
    %400 = vector.broadcast %399 : f32 to vector<8x128xf32>
    %401 = arith.mulf %400, %352 : vector<8x128xf32>
    %402 = arith.addf %398, %401 : vector<8x128xf32>
    %403 = arith.truncf %402 : vector<8x128xf32> to vector<8x128xbf16>
    %c0_101 = arith.constant 0 : index
    %c896 = arith.constant 896 : index
    %404 = vector.load %arg3[%c0_101, %c896] : memref<8x1024xbf16, #tpu.memory_space<vmem>>, vector<8x128xbf16>
    tpu.vector_store %arg3[%c0_101, %c896], %403 {strides = array<i32>} : memref<8x1024xbf16, #tpu.memory_space<vmem>>, vector<8x128xbf16>,
    %c0_102 = arith.constant 0 : index
    %c0_103 = arith.constant 0 : index
    %405 = vector.load %arg6[%c0_102, %c0_103] : memref<8x128xf32, #tpu.memory_space<vmem>>, vector<8x128xf32>
    tpu.vector_store %arg6[%c0_102, %c0_103], %402 {strides = array<i32>} : memref<8x128xf32, #tpu.memory_space<vmem>>, vector<8x128xf32>,
    %c0_104 = arith.constant 0 : index
    %c0_105 = arith.constant 0 : index
    %406 = vector.load %arg7[%c0_104, %c0_105] : memref<8x128xf32, #tpu.memory_space<vmem>>, vector<8x128xf32>
    tpu.vector_store %arg7[%c0_104, %c0_105], %396 {strides = array<i32>} : memref<8x128xf32, #tpu.memory_space<vmem>>, vector<8x128xf32>,
    %c0_i32_106 = arith.constant 0 : i32
    %407 = arith.cmpi eq, %arg0, %c0_i32_106 : i32
    %408 = arith.extui %407 : i1 to i32
    %c0_i32_107 = arith.constant 0 : i32
    %409 = arith.cmpi ne, %408, %c0_i32_107 : i32
    scf.if %409 {
      %c0_108 = arith.constant 0 : index
      %c0_109 = arith.constant 0 : index
      %410 = vector.load %arg4[%c0_108, %c0_109] : memref<8x128xf32, #tpu.memory_space<vmem>>, vector<8x128xf32>
      tpu.vector_store %arg4[%c0_108, %c0_109], %402 {strides = array<i32>} : memref<8x128xf32, #tpu.memory_space<vmem>>, vector<8x128xf32>,
      %c0_110 = arith.constant 0 : index
      %c0_111 = arith.constant 0 : index
      %411 = vector.load %arg5[%c0_110, %c0_111] : memref<8x128xf32, #tpu.memory_space<vmem>>, vector<8x128xf32>
      tpu.vector_store %arg5[%c0_110, %c0_111], %396 {strides = array<i32>} : memref<8x128xf32, #tpu.memory_space<vmem>>, vector<8x128xf32>,
    } else {
    }
    return
  }
  func.func @transform_0(%arg0: i32) -> (i32, i32) {
    %c0_i32 = arith.constant 0 : i32
    %c0_i32_0 = arith.constant 0 : i32
    return %c0_i32, %arg0 : i32, i32
  }
  func.func @transform_1(%arg0: i32) -> (i32, i32) {
    %c0_i32 = arith.constant 0 : i32
    %c0_i32_0 = arith.constant 0 : i32
    %c0_i32_1 = arith.constant 0 : i32
    return %c0_i32, %c0_i32_0 : i32, i32
  }
  func.func @transform_2(%arg0: i32) -> (i32, i32) {
    %c0_i32 = arith.constant 0 : i32
    %c0_i32_0 = arith.constant 0 : i32
    return %c0_i32, %arg0 : i32, i32
  }
  func.func @transform_3(%arg0: i32) -> (i32, i32) {
    %c0_i32 = arith.constant 0 : i32
    %c0_i32_0 = arith.constant 0 : i32
    %c0_i32_1 = arith.constant 0 : i32
    return %c0_i32, %c0_i32_0 : i32, i32
  }
  func.func @transform_4(%arg0: i32) -> (i32, i32) {
    %c0_i32 = arith.constant 0 : i32
    %c0_i32_0 = arith.constant 0 : i32
    %c0_i32_1 = arith.constant 0 : i32
    return %c0_i32, %c0_i32_0 : i32, i32
  }
}

module attributes {stable_mosaic.version = 11 : i64} {
  func.func @_matmul_kernel(%arg0: i32, %arg1: i32, %arg2: i32, %arg3: memref<8x128xbf16, #tpu.memory_space<vmem>>, %arg4: memref<128x128xbf16, #tpu.memory_space<vmem>>, %arg5: memref<1x128xf32, #tpu.memory_space<vmem>>, %arg6: memref<8x128xf32, #tpu.memory_space<vmem>>, %arg7: memref<8x128xf32, #tpu.memory_space<vmem>>) attributes {dimension_semantics = [#tpu.dimension_semantics<parallel>, #tpu.dimension_semantics<parallel>, #tpu.dimension_semantics<arbitrary>], iteration_bounds = array<i64: 1, 1, 1>, scalar_prefetch = 0 : i64, scratch_operands = 1 : i64, tpu.core_type = #tpu.core_type<tc>, window_params = [{transform_indices = @transform_0, window_bounds = array<i64: 8, 128>}, {transform_indices = @transform_1, window_bounds = array<i64: 128, 128>}, {transform_indices = @transform_2, window_bounds = array<i64: 1, 128>}, {transform_indices = @transform_3, window_bounds = array<i64: 8, 128>}]} {
    %c0_i32 = arith.constant 0 : i32
    %0 = arith.cmpi eq, %arg2, %c0_i32 : i32
    %1 = arith.extui %0 : i1 to i32
    %c0_i32_0 = arith.constant 0 : i32
    %2 = arith.cmpi ne, %1, %c0_i32_0 : i32
    scf.if %2 {
      %cst_10 = arith.constant 0.000000e+00 : f32
      %12 = vector.broadcast %cst_10 : f32 to vector<8x128xf32>
      %c0_11 = arith.constant 0 : index
      %c0_12 = arith.constant 0 : index
      %13 = vector.load %arg7[%c0_11, %c0_12] : memref<8x128xf32, #tpu.memory_space<vmem>>, vector<8x128xf32>
      tpu.vector_store %arg7[%c0_11, %c0_12], %12 {strides = array<i32>} : memref<8x128xf32, #tpu.memory_space<vmem>>, vector<8x128xf32>,
    } else {
    }
    %c0 = arith.constant 0 : index
    %c0_1 = arith.constant 0 : index
    %3 = vector.load %arg7[%c0, %c0_1] : memref<8x128xf32, #tpu.memory_space<vmem>>, vector<8x128xf32>
    %c0_2 = arith.constant 0 : index
    %c0_3 = arith.constant 0 : index
    %4 = vector.load %arg3[%c0_2, %c0_3] : memref<8x128xbf16, #tpu.memory_space<vmem>>, vector<8x128xbf16>
    %c0_4 = arith.constant 0 : index
    %c0_5 = arith.constant 0 : index
    %5 = vector.load %arg4[%c0_4, %c0_5] : memref<128x128xbf16, #tpu.memory_space<vmem>>, vector<128x128xbf16>
    %cst = arith.constant dense<0.000000e+00> : vector<8x128xf32>
    %6 = tpu.matmul %4, %5, %cst {dimension_numbers = #tpu.dot_dimension_numbers<[1], [0], [0], [1], [0, 0, 1, 1], [], []>} : vector<8x128xbf16>, vector<128x128xbf16>, vector<8x128xf32> -> vector<8x128xf32>
    %7 = arith.addf %3, %6 : vector<8x128xf32>
    %c0_6 = arith.constant 0 : index
    %c0_7 = arith.constant 0 : index
    %8 = vector.load %arg7[%c0_6, %c0_7] : memref<8x128xf32, #tpu.memory_space<vmem>>, vector<8x128xf32>
    tpu.vector_store %arg7[%c0_6, %c0_7], %7 {strides = array<i32>} : memref<8x128xf32, #tpu.memory_space<vmem>>, vector<8x128xf32>,
    %c0_i32_8 = arith.constant 0 : i32
    %9 = arith.cmpi eq, %arg2, %c0_i32_8 : i32
    %10 = arith.extui %9 : i1 to i32
    %c0_i32_9 = arith.constant 0 : i32
    %11 = arith.cmpi ne, %10, %c0_i32_9 : i32
    scf.if %11 {
      %c0_10 = arith.constant 0 : index
      %c0_11 = arith.constant 0 : index
      %12 = vector.load %arg7[%c0_10, %c0_11] : memref<8x128xf32, #tpu.memory_space<vmem>>, vector<8x128xf32>
      %c0_12 = arith.constant 0 : index
      %c0_13 = arith.constant 0 : index
      %13 = vector.load %arg5[%c0_12, %c0_13] : memref<1x128xf32, #tpu.memory_space<vmem>>, vector<1x128xf32>
      %14 = vector.broadcast %13 : vector<1x128xf32> to vector<8x128xf32>
      %15 = arith.addf %12, %14 : vector<8x128xf32>
      %c0_14 = arith.constant 0 : index
      %c0_15 = arith.constant 0 : index
      %16 = vector.load %arg6[%c0_14, %c0_15] : memref<8x128xf32, #tpu.memory_space<vmem>>, vector<8x128xf32>
      tpu.vector_store %arg6[%c0_14, %c0_15], %15 {strides = array<i32>} : memref<8x128xf32, #tpu.memory_space<vmem>>, vector<8x128xf32>,
    } else {
    }
    return
  }
  func.func @transform_0(%arg0: i32, %arg1: i32, %arg2: i32) -> (i32, i32) {
    %c0_i32 = arith.constant 0 : i32
    return %arg0, %arg2 : i32, i32
  }
  func.func @transform_1(%arg0: i32, %arg1: i32, %arg2: i32) -> (i32, i32) {
    %c0_i32 = arith.constant 0 : i32
    return %arg2, %arg1 : i32, i32
  }
  func.func @transform_2(%arg0: i32, %arg1: i32, %arg2: i32) -> (i32, i32) {
    %c0_i32 = arith.constant 0 : i32
    %c0_i32_0 = arith.constant 0 : i32
    return %c0_i32, %arg1 : i32, i32
  }
  func.func @transform_3(%arg0: i32, %arg1: i32, %arg2: i32) -> (i32, i32) {
    %c0_i32 = arith.constant 0 : i32
    return %arg0, %arg1 : i32, i32
  }
}

</mosaic_0001>

<bundles_post_ra>
// kernel: actor_forward.18
= control target key start
LH: loop header
LB: loop body
LE: loop exit
PB: predicated region body
PF: predicated region fallthrough
CT: control target
= control target key end

     0   :  { %s3107_s12 = smov 0   ;;  %s3109_s13 = smov 0   ;;  %s3736_s0 = inlined_call_operand.vmem [shape: bf16[2560,256], index: 0, kind: input, shape index: {}]   ;;  %s3737_s1 = inlined_call_operand.vmem [shape: bf16[256,128], index: 1, kind: input, shape index: {}]   ;;  %s3738_s2 = inlined_call_operand.vmem [shape: f32[1,128], index: 2, kind: input, shape index: {}]   ;;  %s3739_s3 = inlined_call_operand.vmem [shape: bf16[2560,128], index: 3, kind: output, shape index: {}]  }
   0x1   :  { %s3111_s14 = smov 0  }
   0x2 LB: > { %s32_s15 = sadd.s32 1, %s3080_s13  ;;  %p2291_p0 = scmp.ge.s32.totalorder %s3084_s14, 1  ;;  %s3084_s14 = sphi %s3111_s14, %s13_s14   ;;  %s3080_s13 = sphi %s3109_s13, %s3741_s13   ;;  %s3076_s12 = sphi %s3107_s12, %s3740_s12  }
   0x3   : > { %p34_p1 = scmp.ge.s32.totalorder %s32_s15, 5  ;;  %p191_p2 = scmp.lt.s32.totalorder %s3084_s14, 6 }
   0x5   : > { %s3743_s15 = smov (%p34_p1, %s32_s15), 0  ;;  %p192_p3 = pnand %p2291_p0, %p191_p2 }
   0x6   : > { %v2821_v0 = vld [vmem:[%s3737_s1] sm:$0xff] (!%p192_p3)   ;;  %v3086_v1 = vmov (!%p192_p3), 0   ;;  %s2292_s18 = sshll.u32 (!%p192_p3), %s3076_s12, 6  ;;  %v2822_v2 = vld [vmem:[%s3737_s1 + $0x8] sm:$0xff] (!%p192_p3)   ;;  %v2823_v3 = vld [vmem:[%s3737_s1 + $0x10] sm:$0xff] (!%p192_p3)  }
   0x7   : > { %195 = sbr.rel (%p192_p3) target bundleno = 430 (0x1ae), region = 32  ;;  %912 = vmatprep.subr.bf16.mxu0 (!%p192_p3), %v3086_v1  ;;  %2764 = vmatprep.subr.bf16.mxu1 (!%p192_p3), %v3086_v1  ;;  %p236_p4 = scmp.lt.s32.totalorder (!%p192_p3), %s2292_s18, 319  ;;  %v2824_v4 = vld [vmem:[%s3737_s1 + $0x18] sm:$0xff] (!%p192_p3)   ;;  %v2825_v5 = vld [vmem:[%s3737_s1 + $0x20] sm:$0xff] (!%p192_p3)   ;;  %v2826_v7 = vld [vmem:[%s3737_s1 + $0x28] sm:$0xff] (!%p192_p3)  }
   0x8   : > { %913 = vmatpush1.bf16.msra.mxu0 (!%p192_p3), %v2821_v0  ;;  %2780 = vmatpush1.bf16.msra.mxu1 (!%p192_p3), %v2821_v0  ;;  %v2827_v9 = vld [vmem:[%s3737_s1 + $0x30] sm:$0xff] (!%p192_p3)   ;;  %v2828_v10 = vld [vmem:[%s3737_s1 + $0x38] sm:$0xff] (!%p192_p3)   ;;  %v2829_v11 = vld [vmem:[%s3737_s1 + $0x40] sm:$0xff] (!%p192_p3)  }
   0x9   : > { %914 = vmatprep.subr.bf16.mxu0 (!%p192_p3), %v3086_v1  ;;  %2765 = vmatprep.subr.bf16.mxu1 (!%p192_p3), %v3086_v1  ;;  %v2830_v12 = vld [vmem:[%s3737_s1 + $0x48] sm:$0xff] (!%p192_p3)   ;;  %v2831_v13 = vld [vmem:[%s3737_s1 + $0x50] sm:$0xff] (!%p192_p3)   ;;  %v2832_v14 = vld [vmem:[%s3737_s1 + $0x58] sm:$0xff] (!%p192_p3)  }
   0xa   : > { %v2833_v15 = vld [vmem:[%s3737_s1 + $0x60] sm:$0xff] (!%p192_p3)   ;;  %v2834_v16 = vld [vmem:[%s3737_s1 + $0x68] sm:$0xff] (!%p192_p3)   ;;  %v2835_v17 = vld [vmem:[%s3737_s1 + $0x70] sm:$0xff] (!%p192_p3)  }
   0xb   : > { %v2836_v18 = vld [vmem:[%s3737_s1 + $0x78] sm:$0xff] (!%p192_p3)  }
   0xc   : > { %915 = vmatpush1.bf16.msra.mxu0 (!%p192_p3), %v2822_v2  ;;  %2781 = vmatpush1.bf16.msra.mxu1 (!%p192_p3), %v2822_v2 }
   0xd   : > { %916 = vmatprep.subr.bf16.mxu0 (!%p192_p3), %v3086_v1  ;;  %2766 = vmatprep.subr.bf16.mxu1 (!%p192_p3), %v3086_v1 }
   0xe   : > { %s3745_s18 = smov (!%p236_p4, %s2292_s18), 319 }
   0xf   : > { %s2508_s25 = sshll.u32 %s3745_s18, 3 }
  0x10   : > { %917 = vmatpush1.bf16.msra.mxu0 %v2823_v3  ;;  %2782 = vmatpush1.bf16.msra.mxu1 %v2823_v3  ;;  %s3154_s30 = scalar_lea.vmem %s3736_s0, %s2508_s25 }
  0x11   : > { %918 = vmatprep.subr.bf16.mxu0 %v3086_v1  ;;  %2767 = vmatprep.subr.bf16.mxu1 %v3086_v1  ;;  %v2839_v6 = vld [vmem:[%s3154_s30 + $0x4] ss:$8 sps:$4 sm:$0xff]   ;;  %v2837_v19 = vld [vmem:[%s3154_s30] ss:$8 sps:$4 sm:$0xff]   ;;  %v2843_v21 = vld [vmem:[%s3154_s30 + $0x14] ss:$8 sps:$4 sm:$0xff]  }
  0x12   : > { %v2842_v8 = vld [vmem:[%s3154_s30 + $0x104] ss:$8 sps:$4 sm:$0xff]   ;;  %944 = vmatprep.mubr.bf16.mxu0 %v2839_v6  ;;  %v2840_v20 = vld [vmem:[%s3154_s30 + $0x100] ss:$8 sps:$4 sm:$0xff]   ;;  %v2845_v22 = vld [vmem:[%s3154_s30 + $0x114] ss:$8 sps:$4 sm:$0xff]  }
  0x13   : > { %1072 = vmatprep.mubr.bf16.mxu1 %v2842_v8  ;;  %v2847_v23 = vld [vmem:[%s3154_s30 + $0x10] ss:$8 sps:$4 sm:$0xff]   ;;  %v2849_v25 = vld [vmem:[%s3154_s30 + $0x24] ss:$8 sps:$4 sm:$0xff]   ;;  %v2853_v27 = vld [vmem:[%s3154_s30 + $0x20] ss:$8 sps:$4 sm:$0xff]  }
  0x14   : > { %919 = vmatpush1.bf16.msra.mxu0 %v2824_v4  ;;  %2783 = vmatpush1.bf16.msra.mxu1 %v2824_v4  ;;  %v2848_v24 = vld [vmem:[%s3154_s30 + $0x110] ss:$8 sps:$4 sm:$0xff]   ;;  %v2851_v26 = vld [vmem:[%s3154_s30 + $0x124] ss:$8 sps:$4 sm:$0xff]   ;;  %v2854_v28 = vld [vmem:[%s3154_s30 + $0x120] ss:$8 sps:$4 sm:$0xff]  }
  0x15   : > { %920 = vmatprep.subr.bf16.mxu0 %v3086_v1  ;;  %2768 = vmatprep.subr.bf16.mxu1 %v3086_v1  ;;  %v2855_v29 = vld [vmem:[%s3154_s30 + $0x34] ss:$8 sps:$4 sm:$0xff]   ;;  %v2859_v31 = vld [vmem:[%s3154_s30 + $0x30] ss:$8 sps:$4 sm:$0xff]   ;;  %v2861_v33 = vld [vmem:[%s3154_s30 + $0x44] ss:$8 sps:$4 sm:$0xff]  }
  0x16   : > { %v2857_v30 = vld [vmem:[%s3154_s30 + $0x134] ss:$8 sps:$4 sm:$0xff]   ;;  %v2860_v32 = vld [vmem:[%s3154_s30 + $0x130] ss:$8 sps:$4 sm:$0xff]   ;;  %v2863_v34 = vld [vmem:[%s3154_s30 + $0x144] ss:$8 sps:$4 sm:$0xff]  }
  0x17   : > { %v2865_v35 = vld [vmem:[%s3154_s30 + $0x40] ss:$8 sps:$4 sm:$0xff]   ;;  %v2867_v37 = vld [vmem:[%s3154_s30 + $0x54] ss:$8 sps:$4 sm:$0xff]   ;;  %v2871_v39 = vld [vmem:[%s3154_s30 + $0x50] ss:$8 sps:$4 sm:$0xff]  }
  0x18   : > { %921 = vmatpush1.bf16.msra.mxu0 %v2825_v5  ;;  %2784 = vmatpush1.bf16.msra.mxu1 %v2825_v5  ;;  %v2866_v36 = vld [vmem:[%s3154_s30 + $0x140] ss:$8 sps:$4 sm:$0xff]   ;;  %v2869_v38 = vld [vmem:[%s3154_s30 + $0x154] ss:$8 sps:$4 sm:$0xff]   ;;  %v2872_v40 = vld [vmem:[%s3154_s30 + $0x150] ss:$8 sps:$4 sm:$0xff]  }
  0x19   : > { %922 = vmatprep.subr.bf16.mxu0 %v3086_v1  ;;  %2769 = vmatprep.subr.bf16.mxu1 %v3086_v1  ;;  %v2873_v41 = vld [vmem:[%s3154_s30 + $0x64] ss:$8 sps:$4 sm:$0xff]   ;;  %v2877_v43 = vld [vmem:[%s3154_s30 + $0x60] ss:$8 sps:$4 sm:$0xff]   ;;  %v2879_v45 = vld [vmem:[%s3154_s30 + $0x74] ss:$8 sps:$4 sm:$0xff]  }
  0x1a   : > { %v2875_v42 = vld [vmem:[%s3154_s30 + $0x164] ss:$8 sps:$4 sm:$0xff]   ;;  %v2878_v44 = vld [vmem:[%s3154_s30 + $0x160] ss:$8 sps:$4 sm:$0xff]   ;;  %v2881_v46 = vld [vmem:[%s3154_s30 + $0x174] ss:$8 sps:$4 sm:$0xff]  }
  0x1b   : > { %v2883_v47 = vld [vmem:[%s3154_s30 + $0x70] ss:$8 sps:$4 sm:$0xff]   ;;  %v2885_v49 = vld [vmem:[%s3154_s30 + $0x84] ss:$8 sps:$4 sm:$0xff]   ;;  %v2889_v51 = vld [vmem:[%s3154_s30 + $0x80] ss:$8 sps:$4 sm:$0xff]  }
  0x1c   : > { %923 = vmatpush1.bf16.msra.mxu0 %v2826_v7  ;;  %2785 = vmatpush1.bf16.msra.mxu1 %v2826_v7  ;;  %v2884_v48 = vld [vmem:[%s3154_s30 + $0x170] ss:$8 sps:$4 sm:$0xff]   ;;  %v2887_v50 = vld [vmem:[%s3154_s30 + $0x184] ss:$8 sps:$4 sm:$0xff]   ;;  %v2890_v52 = vld [vmem:[%s3154_s30 + $0x180] ss:$8 sps:$4 sm:$0xff]  }
  0x1d   : > { %924 = vmatprep.subr.bf16.mxu0 %v3086_v1  ;;  %2770 = vmatprep.subr.bf16.mxu1 %v3086_v1  ;;  %v2891_v53 = vld [vmem:[%s3154_s30 + $0x94] ss:$8 sps:$4 sm:$0xff]   ;;  %v2895_v55 = vld [vmem:[%s3154_s30 + $0x90] ss:$8 sps:$4 sm:$0xff]   ;;  %v2897_v57 = vld [vmem:[%s3154_s30 + $0xa4] ss:$8 sps:$4 sm:$0xff]  }
  0x1e   : > { %v2893_v54 = vld [vmem:[%s3154_s30 + $0x194] ss:$8 sps:$4 sm:$0xff]   ;;  %v2896_v56 = vld [vmem:[%s3154_s30 + $0x190] ss:$8 sps:$4 sm:$0xff]   ;;  %v2899_v58 = vld [vmem:[%s3154_s30 + $0x1a4] ss:$8 sps:$4 sm:$0xff]  }
  0x1f   : > { %v2901_v59 = vld [vmem:[%s3154_s30 + $0xa0] ss:$8 sps:$4 sm:$0xff]   ;;  %v2903_v61 = vld [vmem:[%s3154_s30 + $0xb4] ss:$8 sps:$4 sm:$0xff]   ;;  %v2907_v63 = vld [vmem:[%s3154_s30 + $0xb0] ss:$8 sps:$4 sm:$0xff]  }
  0x20   : > { %925 = vmatpush1.bf16.msra.mxu0 %v2827_v9  ;;  %2786 = vmatpush1.bf16.msra.mxu1 %v2827_v9  ;;  %v2902_v60 = vld [vmem:[%s3154_s30 + $0x1a0] ss:$8 sps:$4 sm:$0xff]   ;;  %v2905_v62 = vld [vmem:[%s3154_s30 + $0x1b4] ss:$8 sps:$4 sm:$0xff]   ;;  %v2908_v0 = vld [vmem:[%s3154_s30 + $0x1b0] ss:$8 sps:$4 sm:$0xff]  }
  0x21   : > { %926 = vmatprep.subr.bf16.mxu0 %v3086_v1  ;;  %2771 = vmatprep.subr.bf16.mxu1 %v3086_v1  ;;  %v2911_v2 = vld [vmem:[%s3154_s30 + $0x1c4] ss:$8 sps:$4 sm:$0xff]   ;;  %v2913_v3 = vld [vmem:[%s3154_s30 + $0xc0] ss:$8 sps:$4 sm:$0xff]   ;;  %v2915_v5 = vld [vmem:[%s3154_s30 + $0xd4] ss:$8 sps:$4 sm:$0xff]  }
  0x22   : > { %v2914_v4 = vld [vmem:[%s3154_s30 + $0x1c0] ss:$8 sps:$4 sm:$0xff]   ;;  %v2917_v6 = vld [vmem:[%s3154_s30 + $0x1d4] ss:$8 sps:$4 sm:$0xff]   ;;  %v2919_v7 = vld [vmem:[%s3154_s30 + $0xd0] ss:$8 sps:$4 sm:$0xff]  }
  0x23   : > { %v2920_v8 = vld [vmem:[%s3154_s30 + $0x1d0] ss:$8 sps:$4 sm:$0xff]   ;;  %v2921_v9 = vld [vmem:[%s3154_s30 + $0xe4] ss:$8 sps:$4 sm:$0xff]  }
  0x24   : > { %927 = vmatpush1.bf16.msra.mxu0 %v2828_v10  ;;  %2787 = vmatpush1.bf16.msra.mxu1 %v2828_v10  ;;  %v2923_v10 = vld [vmem:[%s3154_s30 + $0x1e4] ss:$8 sps:$4 sm:$0xff]  }
  0x25   : > { %928 = vmatprep.subr.bf16.mxu0 %v3086_v1  ;;  %2772 = vmatprep.subr.bf16.mxu1 %v3086_v1 }
  0x28   : > { %929 = vmatpush1.bf16.msra.mxu0 %v2829_v11  ;;  %2788 = vmatpush1.bf16.msra.mxu1 %v2829_v11  ;;  %v2925_v11 = vld [vmem:[%s3154_s30 + $0xe0] ss:$8 sps:$4 sm:$0xff]  }
  0x29   : > { %930 = vmatprep.subr.bf16.mxu0 %v3086_v1  ;;  %2773 = vmatprep.subr.bf16.mxu1 %v3086_v1 }
  0x2c   : > { %931 = vmatpush1.bf16.msra.mxu0 %v2830_v12  ;;  %2789 = vmatpush1.bf16.msra.mxu1 %v2830_v12  ;;  %v2926_v12 = vld [vmem:[%s3154_s30 + $0x1e0] ss:$8 sps:$4 sm:$0xff]  }
  0x2d   : > { %932 = vmatprep.subr.bf16.mxu0 %v3086_v1  ;;  %2774 = vmatprep.subr.bf16.mxu1 %v3086_v1 }
  0x30   : > { %933 = vmatpush1.bf16.msra.mxu0 %v2831_v13  ;;  %2790 = vmatpush1.bf16.msra.mxu1 %v2831_v13  ;;  %v2927_v13 = vld [vmem:[%s3154_s30 + $0xf4] ss:$8 sps:$4 sm:$0xff]  }
  0x31   : > { %934 = vmatprep.subr.bf16.mxu0 %v3086_v1  ;;  %2775 = vmatprep.subr.bf16.mxu1 %v3086_v1 }
  0x34   : > { %935 = vmatpush1.bf16.msra.mxu0 %v2832_v14  ;;  %2791 = vmatpush1.bf16.msra.mxu1 %v2832_v14  ;;  %v2929_v14 = vld [vmem:[%s3154_s30 + $0x1f4] ss:$8 sps:$4 sm:$0xff]  }
  0x35   : > { %936 = vmatprep.subr.bf16.mxu0 %v3086_v1  ;;  %2776 = vmatprep.subr.bf16.mxu1 %v3086_v1 }
  0x38   : > { %937 = vmatpush1.bf16.msra.mxu0 %v2833_v15  ;;  %2792 = vmatpush1.bf16.msra.mxu1 %v2833_v15  ;;  %v2931_v15 = vld [vmem:[%s3154_s30 + $0xf0] ss:$8 sps:$4 sm:$0xff]  }
  0x39   : > { %938 = vmatprep.subr.bf16.mxu0 %v3086_v1  ;;  %2777 = vmatprep.subr.bf16.mxu1 %v3086_v1 }
  0x3c   : > { %939 = vmatpush1.bf16.msra.mxu0 %v2834_v16  ;;  %2793 = vmatpush1.bf16.msra.mxu1 %v2834_v16  ;;  %v2932_v16 = vld [vmem:[%s3154_s30 + $0x1f0] ss:$8 sps:$4 sm:$0xff]  }
  0x3d   : > { %940 = vmatprep.subr.bf16.mxu0 %v3086_v1  ;;  %2778 = vmatprep.subr.bf16.mxu1 %v3086_v1 }
  0x40   : > { %941 = vmatpush1.bf16.msra.mxu0 %v2835_v17  ;;  %2794 = vmatpush1.bf16.msra.mxu1 %v2835_v17  ;;  %v3280_v17 = vld [vmem:[%s3738_s2] ss:$0 sm:$0xff] }
  0x41   : > { %942 = vmatprep.subr.bf16.mxu0 %v3086_v1  ;;  %2779 = vmatprep.subr.bf16.mxu1 %v3086_v1  ;;  %v2909_v1 = vld [vmem:[%s3154_s30 + $0xc4] ss:$8 sps:$4 sm:$0xff]   ;;  %s2296_s30 = sshll.u32 %s3745_s18, 2 }
  0x42   : > { %s3341_s7 = scalar_lea.vmem %s3739_s3, %s2296_s30 }
  0x44   : > { %943 = vmatpush1.bf16.msra.mxu0 %v2836_v18  ;;  %2795 = vmatpush1.bf16.msra.mxu1 %v2836_v18 }
  0x47   : > { %945 = vmatmul.mubr.bf16.vlgmr.msra.gmra.mrb[0].mxu0 %v2837_v19  ;;  %1073 = vmatmul.mubr.bf16.vlgmr.msra.gmra.mrb[0].mxu1 %v2840_v20 }
  0x48   : > { %952 = vmatprep.mubr.bf16.mxu0 %v2843_v21  ;;  %1080 = vmatprep.mubr.bf16.mxu1 %v2845_v22 }
  0x4f   : > { %953 = vmatmul.mubr.bf16.gmra.mrb[4].mxu0 %v2847_v23  ;;  %1081 = vmatmul.mubr.bf16.gmra.mrb[4].mxu1 %v2848_v24 }
  0x50   : > { %960 = vmatprep.mubr.bf16.mxu0 %v2849_v25  ;;  %1088 = vmatprep.mubr.bf16.mxu1 %v2851_v26 }
  0x57   : > { %961 = vmatmul.mubr.bf16.gmra.mrb[8].mxu0 %v2853_v27  ;;  %1089 = vmatmul.mubr.bf16.gmra.mrb[8].mxu1 %v2854_v28 }
  0x58   : > { %968 = vmatprep.mubr.bf16.mxu0 %v2855_v29  ;;  %1096 = vmatprep.mubr.bf16.mxu1 %v2857_v30 }
  0x5f   : > { %969 = vmatmul.mubr.bf16.gmra.mrb[12].mxu0 %v2859_v31  ;;  %1097 = vmatmul.mubr.bf16.gmra.mrb[12].mxu1 %v2860_v32 }
  0x60   : > { %976 = vmatprep.mubr.bf16.mxu0 %v2861_v33  ;;  %1104 = vmatprep.mubr.bf16.mxu1 %v2863_v34 }
  0x67   : > { %977 = vmatmul.mubr.bf16.gmra.mrb[16].mxu0 %v2865_v35  ;;  %1105 = vmatmul.mubr.bf16.gmra.mrb[16].mxu1 %v2866_v36 }
  0x68   : > { %984 = vmatprep.mubr.bf16.mxu0 %v2867_v37  ;;  %1112 = vmatprep.mubr.bf16.mxu1 %v2869_v38 }
  0x6f   : > { %985 = vmatmul.mubr.bf16.gmra.mrb[20].mxu0 %v2871_v39  ;;  %1113 = vmatmul.mubr.bf16.gmra.mrb[20].mxu1 %v2872_v40 }
  0x70   : > { %992 = vmatprep.mubr.bf16.mxu0 %v2873_v41  ;;  %1120 = vmatprep.mubr.bf16.mxu1 %v2875_v42 }
  0x77   : > { %993 = vmatmul.mubr.bf16.gmra.mrb[24].mxu0 %v2877_v43  ;;  %1121 = vmatmul.mubr.bf16.gmra.mrb[24].mxu1 %v2878_v44 }
  0x78   : > { %1000 = vmatprep.mubr.bf16.mxu0 %v2879_v45  ;;  %1128 = vmatprep.mubr.bf16.mxu1 %v2881_v46 }
  0x7f   : > { %1001 = vmatmul.mubr.bf16.gmra.mrb[28].mxu0 %v2883_v47  ;;  %1129 = vmatmul.mubr.bf16.gmra.mrb[28].mxu1 %v2884_v48 }
  0x80   : > { %1008 = vmatprep.mubr.bf16.mxu0 %v2885_v49  ;;  %1136 = vmatprep.mubr.bf16.mxu1 %v2887_v50 }
  0x87   : > { %1009 = vmatmul.mubr.bf16.gmra.mrb[32].mxu0 %v2889_v51  ;;  %1137 = vmatmul.mubr.bf16.gmra.mrb[32].mxu1 %v2890_v52 }
  0x88   : > { %1016 = vmatprep.mubr.bf16.mxu0 %v2891_v53  ;;  %1144 = vmatprep.mubr.bf16.mxu1 %v2893_v54 }
  0x8f   : > { %1017 = vmatmul.mubr.bf16.gmra.mrb[36].mxu0 %v2895_v55  ;;  %1145 = vmatmul.mubr.bf16.gmra.mrb[36].mxu1 %v2896_v56 }
  0x90   : > { %1024 = vmatprep.mubr.bf16.mxu0 %v2897_v57  ;;  %1152 = vmatprep.mubr.bf16.mxu1 %v2899_v58 }
  0x97   : > { %1025 = vmatmul.mubr.bf16.gmra.mrb[40].mxu0 %v2901_v59  ;;  %1153 = vmatmul.mubr.bf16.gmra.mrb[40].mxu1 %v2902_v60 }
  0x98   : > { %1032 = vmatprep.mubr.bf16.mxu0 %v2903_v61  ;;  %1160 = vmatprep.mubr.bf16.mxu1 %v2905_v62 }
  0x9f   : > { %1033 = vmatmul.mubr.bf16.gmra.mrb[44].mxu0 %v2907_v63  ;;  %1161 = vmatmul.mubr.bf16.gmra.mrb[44].mxu1 %v2908_v0 }
  0xa0   : > { %1040 = vmatprep.mubr.bf16.mxu0 %v2909_v1  ;;  %1168 = vmatprep.mubr.bf16.mxu1 %v2911_v2 }
  0xa7   : > { %1041 = vmatmul.mubr.bf16.gmra.mrb[48].mxu0 %v2913_v3  ;;  %1169 = vmatmul.mubr.bf16.gmra.mrb[48].mxu1 %v2914_v4 }
  0xa8   : > { %1048 = vmatprep.mubr.bf16.mxu0 %v2915_v5  ;;  %1176 = vmatprep.mubr.bf16.mxu1 %v2917_v6 }
  0xaf   : > { %1049 = vmatmul.mubr.bf16.gmra.mrb[52].mxu0 %v2919_v7  ;;  %1177 = vmatmul.mubr.bf16.gmra.mrb[52].mxu1 %v2920_v8 }
  0xb0   : > { %1056 = vmatprep.mubr.bf16.mxu0 %v2921_v9  ;;  %1184 = vmatprep.mubr.bf16.mxu1 %v2923_v10 }
  0xb7   : > { %1057 = vmatmul.mubr.bf16.gmra.mrb[56].mxu0 %v2925_v11  ;;  %1185 = vmatmul.mubr.bf16.gmra.mrb[56].mxu1 %v2926_v12 }
  0xb8   : > { %1064 = vmatprep.mubr.bf16.mxu0 %v2927_v13  ;;  %1192 = vmatprep.mubr.bf16.mxu1 %v2929_v14 }
  0xbf   : > { %1065 = vmatmul.mubr.bf16.gmra.mrb[60].mxu0 %v2931_v15  ;;  %1193 = vmatmul.mubr.bf16.gmra.mrb[60].mxu1 %v2932_v16 }
 0x11a   : > { %v946_v18 = vpop.f32.mrb[0].mxu0  ;;  %v1074_v19 = vpop.f32.mrb[0].mxu1 }
 0x11b   : > { %v3283_v20 = vadd.f32 %v3280_v17, %v946_v18  ;;  %v3286_v21 = vadd.f32 %v3280_v17, %v1074_v19  ;;  %v948_v22 = vpop.f32.mrb[1].mxu0  ;;  %v1076_v23 = vpop.f32.mrb[1].mxu1 }
 0x11c   : > { %v949_v24 = vpop.f32.mrb[2].mxu0  ;;  %v1077_v25 = vpop.f32.mrb[2].mxu1 }
 0x11d   : > { %v1531_v26 = vmin.f32 %v3283_v20, 0.0  ;;  %v1563_v27 = vmin.f32 %v3286_v21, 0.0  ;;  %v951_v28 = vpop.f32.mrb[3].mxu0  ;;  %v1079_v29 = vpop.f32.mrb[3].mxu1  ;;  %v3291_v30 = vadd.f32 %v3280_v17, %v949_v24  ;;  %v3294_v31 = vadd.f32 %v3280_v17, %v1077_v25 }
 0x11e   : > { %vm1467_vm0 = vcmp.gt.f32.partialorder %v3283_v20, 0.0  ;;  %vm1499_vm1 = vcmp.gt.f32.partialorder %v3286_v21, 0.0 }
 0x11f   : > { %v1595_v32 = vmul.f32 1.442695, %v1531_v26  ;;  %v1659_v33 = vmul.f32 1.442695, %v1563_v27  ;;  %v1532_v34 = vmin.f32 %v3291_v30, 0.0  ;;  %v1564_v35 = vmin.f32 %v3294_v31, 0.0 }
 0x120   : > { %vm1468_vm2 = vcmp.gt.f32.partialorder %v3291_v30, 0.0  ;;  %vm1500_vm3 = vcmp.gt.f32.partialorder %v3294_v31, 0.0 }
 0x121   : > { %2933 = vpow2.f32 %v1595_v32  ;;  %v1597_v36 = vmul.f32 1.442695, %v1532_v34  ;;  %v1661_v37 = vmul.f32 1.442695, %v1564_v35 }
 0x122   : > { %2935 = vpow2.f32 %v1659_v33  ;;  %v954_v38 = vpop.f32.mrb[4].mxu0  ;;  %v1082_v39 = vpop.f32.mrb[4].mxu1 }
 0x123   : > { %v3299_v40 = vadd.f32 %v3280_v17, %v954_v38  ;;  %v3302_v41 = vadd.f32 %v3280_v17, %v1082_v39  ;;  %v956_v42 = vpop.f32.mrb[5].mxu0  ;;  %v1084_v43 = vpop.f32.mrb[5].mxu1  ;;  %2937 = vpow2.f32 %v1597_v36 }
 0x124   : > { %v957_v44 = vpop.f32.mrb[6].mxu0  ;;  %v1085_v45 = vpop.f32.mrb[6].mxu1  ;;  %2939 = vpow2.f32 %v1661_v37 }
 0x125   : > { %v1533_v46 = vmin.f32 %v3299_v40, 0.0  ;;  %v959_v47 = vpop.f32.mrb[7].mxu0  ;;  %v1087_v48 = vpop.f32.mrb[7].mxu1  ;;  %v1565_v49 = vmin.f32 %v3302_v41, 0.0  ;;  %v3307_v50 = vadd.f32 %v3280_v17, %v957_v44  ;;  %v3310_v51 = vadd.f32 %v3280_v17, %v1085_v45 }
 0x126   : > { %vm1469_vm4 = vcmp.gt.f32.partialorder %v3299_v40, 0.0  ;;  %vm1501_vm5 = vcmp.gt.f32.partialorder %v3302_v41, 0.0 }
 0x127   : > { %v1599_v52 = vmul.f32 1.442695, %v1533_v46  ;;  %v1663_v53 = vmul.f32 1.442695, %v1565_v49  ;;  %v1534_v54 = vmin.f32 %v3307_v50, 0.0  ;;  %v1566_v55 = vmin.f32 %v3310_v51, 0.0 }
 0x128   : > { %vm1470_vm6 = vcmp.gt.f32.partialorder %v3307_v50, 0.0  ;;  %vm1502_vm7 = vcmp.gt.f32.partialorder %v3310_v51, 0.0 }
 0x129   : > { %2941 = vpow2.f32 %v1599_v52  ;;  %v1601_v56 = vmul.f32 1.442695, %v1534_v54  ;;  %v1665_v60 = vmul.f32 1.442695, %v1566_v55 }
 0x12a   : > { %2943 = vpow2.f32 %v1663_v53  ;;  %v962_v57 = vpop.f32.mrb[8].mxu0  ;;  %v1090_v58 = vpop.f32.mrb[8].mxu1 }
 0x12b   : > { %v2934_v59 = vpop.eup %2933  ;;  %v3315_v61 = vadd.f32 %v3280_v17, %v962_v57  ;;  %v3318_v62 = vadd.f32 %v3280_v17, %v1090_v58  ;;  %v964_v63 = vpop.f32.mrb[9].mxu0  ;;  %2945 = vpow2.f32 %v1601_v56 }
 0x12c   : > { %v1092_v0 = vpop.f32.mrb[9].mxu1  ;;  %v2936_v1 = vpop.eup %2935  ;;  %v2378_v2 = vadd.f32 -1.0, %v2934_v59  ;;  %2947 = vpow2.f32 %v1665_v60 }
 0x12d   : > { %v965_v3 = vpop.f32.mrb[10].mxu0  ;;  %v1093_v4 = vpop.f32.mrb[10].mxu1  ;;  %v2410_v5 = vadd.f32 -1.0, %v2936_v1  ;;  %v1535_v6 = vmin.f32 %v3315_v61, 0.0  ;;  %v1567_v10 = vmin.f32 %v3318_v62, 0.0  ;;  %vm1471_vm8 = vcmp.gt.f32.partialorder %v3315_v61, 0.0 }
 0x12e   : > { %v967_v7 = vpop.f32.mrb[11].mxu0  ;;  %v1095_v8 = vpop.f32.mrb[11].mxu1  ;;  %v3327_v11 = vadd.f32 %v3280_v17, %v965_v3  ;;  %v3331_v15 = vadd.f32 %v3280_v17, %v1093_v4  ;;  %v1787_v16 = vsel %vm1467_vm0, %v3283_v20, %v2378_v2  ;;  %vm1503_vm9 = vcmp.gt.f32.partialorder %v3318_v62, 0.0 }
 0x12f   : > { %v2938_v9 = vpop.eup %2937  ;;  %v1603_v14 = vmul.f32 1.442695, %v1535_v6  ;;  %v1667_v19 = vmul.f32 1.442695, %v1567_v10  ;;  %v1819_v23 = vsel %vm1499_vm1, %v3286_v21, %v2410_v5 }
 0x130   : > { %v2940_v12 = vpop.eup %2939  ;;  %v2379_v13 = vadd.f32 -1.0, %v2938_v9  ;;  %v1536_v22 = vmin.f32 %v3327_v11, 0.0  ;;  %v1568_v25 = vmin.f32 %v3331_v15, 0.0  ;;  %vm1472_vm10 = vcmp.gt.f32.partialorder %v3327_v11, 0.0 }
 0x131   : > { %v2411_v18 = vadd.f32 -1.0, %v2940_v12  ;;  %2949 = vpow2.f32 %v1603_v14  ;;  %vm1504_vm11 = vcmp.gt.f32.partialorder %v3331_v15, 0.0 }
 0x132   : > { %v1788_v24 = vsel %vm1468_vm2, %v3291_v30, %v2379_v13  ;;  %2951 = vpow2.f32 %v1667_v19  ;;  %v1605_v27 = vmul.f32 1.442695, %v1536_v22  ;;  %v970_v28 = vpop.f32.mrb[12].mxu0  ;;  %v1098_v29 = vpop.f32.mrb[12].mxu1  ;;  %v1669_v33 = vmul.f32 1.442695, %v1568_v25 }
 0x133   : > { %v2576_v26 = vpack.c.bf16 %v1788_v24, %v1787_v16  ;;  %v1820_v20 = vsel %vm1500_vm3, %v3294_v31, %v2411_v18  ;;  %v2942_v21 = vpop.eup %2941  ;;  %v3347_v34 = vadd.f32 %v3280_v17, %v970_v28  ;;  %v3350_v30 = vadd.f32 %v3280_v17, %v1098_v29  ;;  %v972_v35 = vpop.f32.mrb[13].mxu0 }
 0x134   : > { %v2656_v32 = vpack.c.bf16 %v1820_v20, %v1819_v23  ;;  %v1100_v36 = vpop.f32.mrb[13].mxu1  ;;  %v2944_v37 = vpop.eup %2943  ;;  %v2380_v38 = vadd.f32 -1.0, %v2942_v21  ;;  %2953 = vpow2.f32 %v1605_v27 }
 0x135   : > { %2577 = vst [vmem:[%s3341_s7] sm:$0xff] %v2576_v26   ;;  %v973_v31 = vpop.f32.mrb[14].mxu0  ;;  %v1101_v39 = vpop.f32.mrb[14].mxu1  ;;  %v2412_v42 = vadd.f32 -1.0, %v2944_v37  ;;  %2955 = vpow2.f32 %v1669_v33  ;;  %v1537_v43 = vmin.f32 %v3347_v34, 0.0  ;;  %v1569_v47 = vmin.f32 %v3350_v30, 0.0 }
 0x136   : > { %2748 = vst [vmem:[%s3341_s7 + $0x80] sm:$0xff] %v2656_v32   ;;  %v975_v44 = vpop.f32.mrb[15].mxu0  ;;  %v1103_v45 = vpop.f32.mrb[15].mxu1  ;;  %v3360_v48 = vadd.f32 %v3280_v17, %v973_v31  ;;  %v3364_v54 = vadd.f32 %v3280_v17, %v1101_v39  ;;  %v1789_v55 = vsel %vm1469_vm4, %v3299_v40, %v2380_v38  ;;  %vm1473_vm12 = vcmp.gt.f32.partialorder %v3347_v34, 0.0 }
 0x137   : > { %v2946_v46 = vpop.eup %2945  ;;  %v1607_v53 = vmul.f32 1.442695, %v1537_v43  ;;  %v1671_v57 = vmul.f32 1.442695, %v1569_v47  ;;  %v1821_v59 = vsel %vm1501_vm5, %v3302_v41, %v2412_v42  ;;  %vm1505_vm13 = vcmp.gt.f32.partialorder %v3350_v30, 0.0 }
 0x138   : > { %v2948_v49 = vpop.eup %2947  ;;  %v2381_v52 = vadd.f32 -1.0, %v2946_v46  ;;  %v1538_v58 = vmin.f32 %v3360_v48, 0.0  ;;  %v1570_v63 = vmin.f32 %v3364_v54, 0.0  ;;  %vm1474_vm14 = vcmp.gt.f32.partialorder %v3360_v48, 0.0 }
 0x139   : > { %v2413_v56 = vadd.f32 -1.0, %v2948_v49  ;;  %2957 = vpow2.f32 %v1607_v53  ;;  %vm1506_vm15 = vcmp.gt.f32.partialorder %v3364_v54, 0.0 }
 0x13a   : > { %v1790_v60 = vsel %vm1470_vm6, %v3307_v50, %v2381_v52  ;;  %2959 = vpow2.f32 %v1671_v57  ;;  %v1609_v2 = vmul.f32 1.442695, %v1538_v58  ;;  %v978_v3 = vpop.f32.mrb[16].mxu0  ;;  %v1106_v40 = vpop.f32.mrb[16].mxu1  ;;  %v1673_v6 = vmul.f32 1.442695, %v1570_v63 }
 0x13b   : > { %v2581_v0 = vpack.c.bf16 %v1790_v60, %v1789_v55  ;;  %v1822_v1 = vsel %vm1502_vm7, %v3310_v51, %v2413_v56  ;;  %v2950_v4 = vpop.eup %2949  ;;  %v3375_v7 = vadd.f32 %v3280_v17, %v978_v3  ;;  %v3378_v41 = vadd.f32 %v3280_v17, %v1106_v40  ;;  %v980_v50 = vpop.f32.mrb[17].mxu0 }
 0x13c   : > { %v2661_v5 = vpack.c.bf16 %v1822_v1, %v1821_v59  ;;  %v1108_v8 = vpop.f32.mrb[17].mxu1  ;;  %v2952_v9 = vpop.eup %2951  ;;  %v2382_v10 = vadd.f32 -1.0, %v2950_v4  ;;  %2961 = vpow2.f32 %v1609_v2 }
 0x13d   : > { %2733 = vst [vmem:[%s3341_s7 + $0x8] sm:$0xff] %v2581_v0   ;;  %v981_v51 = vpop.f32.mrb[18].mxu0  ;;  %v1109_v12 = vpop.f32.mrb[18].mxu1  ;;  %v2414_v13 = vadd.f32 -1.0, %v2952_v9  ;;  %2963 = vpow2.f32 %v1673_v6  ;;  %v1539_v14 = vmin.f32 %v3375_v7, 0.0  ;;  %v1571_v22 = vmin.f32 %v3378_v41, 0.0 }
 0x13e   : > { %2749 = vst [vmem:[%s3341_s7 + $0x88] sm:$0xff] %v2661_v5   ;;  %v983_v16 = vpop.f32.mrb[19].mxu0  ;;  %v1111_v18 = vpop.f32.mrb[19].mxu1  ;;  %v3388_v23 = vadd.f32 %v3280_v17, %v981_v51  ;;  %v3392_v20 = vadd.f32 %v3280_v17, %v1109_v12  ;;  %v1791_v27 = vsel %vm1471_vm8, %v3315_v61, %v2382_v10  ;;  %vm1475_vm0 = vcmp.gt.f32.partialorder %v3375_v7, 0.0 }
 0x13f   : > { %v2954_v19 = vpop.eup %2953  ;;  %v1611_v26 = vmul.f32 1.442695, %v1539_v14  ;;  %v1675_v29 = vmul.f32 1.442695, %v1571_v22  ;;  %v1823_v32 = vsel %vm1503_vm9, %v3318_v62, %v2414_v13  ;;  %vm1507_vm1 = vcmp.gt.f32.partialorder %v3378_v41, 0.0 }
 0x140   : > { %v2956_v24 = vpop.eup %2955  ;;  %v2383_v25 = vadd.f32 -1.0, %v2954_v19  ;;  %v1540_v21 = vmin.f32 %v3388_v23, 0.0  ;;  %v1572_v35 = vmin.f32 %v3392_v20, 0.0  ;;  %vm1476_vm2 = vcmp.gt.f32.partialorder %v3388_v23, 0.0 }
 0x141   : > { %v2415_v28 = vadd.f32 -1.0, %v2956_v24  ;;  %2965 = vpow2.f32 %v1611_v26  ;;  %vm1508_vm3 = vcmp.gt.f32.partialorder %v3392_v20, 0.0 }
 0x142   : > { %v1792_v33 = vsel %vm1472_vm10, %v3327_v11, %v2383_v25  ;;  %2967 = vpow2.f32 %v1675_v29  ;;  %v1613_v38 = vmul.f32 1.442695, %v1540_v21  ;;  %v986_v31 = vpop.f32.mrb[20].mxu0  ;;  %v1114_v61 = vpop.f32.mrb[20].mxu1  ;;  %v1677_v43 = vmul.f32 1.442695, %v1572_v35 }
 0x143   : > { %v2586_v36 = vpack.c.bf16 %v1792_v33, %v1791_v27  ;;  %v1824_v37 = vsel %vm1504_vm11, %v3331_v15, %v2415_v28  ;;  %v2958_v39 = vpop.eup %2957  ;;  %v3403_v44 = vadd.f32 %v3280_v17, %v986_v31  ;;  %v3406_v62 = vadd.f32 %v3280_v17, %v1114_v61  ;;  %v988_v11 = vpop.f32.mrb[21].mxu0 }
 0x144   : > { %v2666_v42 = vpack.c.bf16 %v1824_v37, %v1823_v32  ;;  %v1116_v45 = vpop.f32.mrb[21].mxu1  ;;  %v2960_v46 = vpop.eup %2959  ;;  %v2384_v47 = vadd.f32 -1.0, %v2958_v39  ;;  %2969 = vpow2.f32 %v1613_v38 }
 0x145   : > { %2734 = vst [vmem:[%s3341_s7 + $0x10] sm:$0xff] %v2586_v36   ;;  %v989_v15 = vpop.f32.mrb[22].mxu0  ;;  %v1117_v49 = vpop.f32.mrb[22].mxu1  ;;  %v2416_v52 = vadd.f32 -1.0, %v2960_v46  ;;  %2971 = vpow2.f32 %v1677_v43  ;;  %v1541_v53 = vmin.f32 %v3403_v44, 0.0  ;;  %v1573_v58 = vmin.f32 %v3406_v62, 0.0 }
 0x146   : > { %2750 = vst [vmem:[%s3341_s7 + $0x90] sm:$0xff] %v2666_v42   ;;  %v991_v55 = vpop.f32.mrb[23].mxu0  ;;  %v1119_v56 = vpop.f32.mrb[23].mxu1  ;;  %v3416_v59 = vadd.f32 %v3280_v17, %v989_v15  ;;  %v3420_v1 = vadd.f32 %v3280_v17, %v1117_v49  ;;  %v1793_v2 = vsel %vm1473_vm12, %v3347_v34, %v2384_v47  ;;  %vm1477_vm4 = vcmp.gt.f32.partialorder %v3403_v44, 0.0 }
 0x147   : > { %v2962_v57 = vpop.eup %2961  ;;  %v1615_v0 = vmul.f32 1.442695, %v1541_v53  ;;  %v1679_v40 = vmul.f32 1.442695, %v1573_v58  ;;  %v1825_v5 = vsel %vm1505_vm13, %v3350_v30, %v2416_v52  ;;  %vm1509_vm5 = vcmp.gt.f32.partialorder %v3406_v62, 0.0 }
 0x148   : > { %v2964_v60 = vpop.eup %2963  ;;  %v2385_v63 = vadd.f32 -1.0, %v2962_v57  ;;  %v1542_v4 = vmin.f32 %v3416_v59, 0.0  ;;  %v1574_v50 = vmin.f32 %v3420_v1, 0.0  ;;  %vm1478_vm6 = vcmp.gt.f32.partialorder %v3416_v59, 0.0 }
 0x149   : > { %v2417_v3 = vadd.f32 -1.0, %v2964_v60  ;;  %2973 = vpow2.f32 %v1615_v0  ;;  %vm1510_vm7 = vcmp.gt.f32.partialorder %v3420_v1, 0.0 }
 0x14a   : > { %v1794_v6 = vsel %vm1474_vm14, %v3360_v48, %v2385_v63  ;;  %2975 = vpow2.f32 %v1679_v40  ;;  %v1617_v10 = vmul.f32 1.442695, %v1542_v4  ;;  %v994_v51 = vpop.f32.mrb[24].mxu0  ;;  %v1122_v34 = vpop.f32.mrb[24].mxu1  ;;  %v1681_v14 = vmul.f32 1.442695, %v1574_v50 }
 0x14b   : > { %v2591_v8 = vpack.c.bf16 %v1794_v6, %v1793_v2  ;;  %v1826_v9 = vsel %vm1506_vm15, %v3364_v54, %v2417_v3  ;;  %v2966_v12 = vpop.eup %2965  ;;  %v3431_v16 = vadd.f32 %v3280_v17, %v994_v51  ;;  %v3434_v30 = vadd.f32 %v3280_v17, %v1122_v34  ;;  %v996_v48 = vpop.f32.mrb[25].mxu0 }
 0x14c   : > { %v2671_v13 = vpack.c.bf16 %v1826_v9, %v1825_v5  ;;  %v1124_v18 = vpop.f32.mrb[25].mxu1  ;;  %v2968_v19 = vpop.eup %2967  ;;  %v2386_v22 = vadd.f32 -1.0, %v2966_v12  ;;  %2977 = vpow2.f32 %v1617_v10 }
 0x14d   : > { %2735 = vst [vmem:[%s3341_s7 + $0x18] sm:$0xff] %v2591_v8   ;;  %v997_v54 = vpop.f32.mrb[26].mxu0  ;;  %v1125_v24 = vpop.f32.mrb[26].mxu1  ;;  %v2418_v25 = vadd.f32 -1.0, %v2968_v19  ;;  %2979 = vpow2.f32 %v1681_v14  ;;  %v1543_v26 = vmin.f32 %v3431_v16, 0.0  ;;  %v1575_v21 = vmin.f32 %v3434_v30, 0.0 }
 0x14e   : > { %2751 = vst [vmem:[%s3341_s7 + $0x98] sm:$0xff] %v2671_v13   ;;  %v999_v27 = vpop.f32.mrb[27].mxu0  ;;  %v1127_v28 = vpop.f32.mrb[27].mxu1  ;;  %v3444_v32 = vadd.f32 %v3280_v17, %v997_v54  ;;  %v3448_v37 = vadd.f32 %v3280_v17, %v1125_v24  ;;  %v1795_v38 = vsel %vm1475_vm0, %v3375_v7, %v2386_v22  ;;  %vm1479_vm8 = vcmp.gt.f32.partialorder %v3431_v16, 0.0 }
 0x14f   : > { %v2970_v29 = vpop.eup %2969  ;;  %v1619_v36 = vmul.f32 1.442695, %v1543_v26  ;;  %v1683_v61 = vmul.f32 1.442695, %v1575_v21  ;;  %v1827_v42 = vsel %vm1507_vm1, %v3378_v41, %v2418_v25  ;;  %vm1511_vm9 = vcmp.gt.f32.partialorder %v3434_v30, 0.0 }
 0x150   : > { %v2972_v33 = vpop.eup %2971  ;;  %v2387_v35 = vadd.f32 -1.0, %v2970_v29  ;;  %v1544_v39 = vmin.f32 %v3444_v32, 0.0  ;;  %v1576_v11 = vmin.f32 %v3448_v37, 0.0  ;;  %vm1480_vm10 = vcmp.gt.f32.partialorder %v3444_v32, 0.0 }
 0x151   : > { %v2419_v31 = vadd.f32 -1.0, %v2972_v33  ;;  %2981 = vpow2.f32 %v1619_v36  ;;  %vm1512_vm11 = vcmp.gt.f32.partialorder %v3448_v37, 0.0 }
 0x152   : > { %v1796_v43 = vsel %vm1476_vm2, %v3388_v23, %v2387_v35  ;;  %2983 = vpow2.f32 %v1683_v61  ;;  %v1621_v47 = vmul.f32 1.442695, %v1544_v39  ;;  %v1002_v15 = vpop.f32.mrb[28].mxu0  ;;  %v1130_v7 = vpop.f32.mrb[28].mxu1  ;;  %v1685_v53 = vmul.f32 1.442695, %v1576_v11 }
 0x153   : > { %v2596_v45 = vpack.c.bf16 %v1796_v43, %v1795_v38  ;;  %v1828_v46 = vsel %vm1508_vm3, %v3392_v20, %v2419_v31  ;;  %v2974_v49 = vpop.eup %2973  ;;  %v3459_v55 = vadd.f32 %v3280_v17, %v1002_v15  ;;  %v3462_v41 = vadd.f32 %v3280_v17, %v1130_v7  ;;  %v1004_v23 = vpop.f32.mrb[29].mxu0 }
 0x154   : > { %v2676_v52 = vpack.c.bf16 %v1828_v46, %v1827_v42  ;;  %v1132_v56 = vpop.f32.mrb[29].mxu1  ;;  %v2976_v57 = vpop.eup %2975  ;;  %v2388_v58 = vadd.f32 -1.0, %v2974_v49  ;;  %2985 = vpow2.f32 %v1621_v47 }
 0x155   : > { %2736 = vst [vmem:[%s3341_s7 + $0x20] sm:$0xff] %v2596_v45   ;;  %v1005_v20 = vpop.f32.mrb[30].mxu0  ;;  %v1133_v60 = vpop.f32.mrb[30].mxu1  ;;  %v2420_v63 = vadd.f32 -1.0, %v2976_v57  ;;  %2987 = vpow2.f32 %v1685_v53  ;;  %v1545_v0 = vmin.f32 %v3459_v55, 0.0  ;;  %v1577_v4 = vmin.f32 %v3462_v41, 0.0 }
 0x156   : > { %2752 = vst [vmem:[%s3341_s7 + $0xa0] sm:$0xff] %v2676_v52   ;;  %v1007_v2 = vpop.f32.mrb[31].mxu0  ;;  %v1135_v3 = vpop.f32.mrb[31].mxu1  ;;  %v3472_v5 = vadd.f32 %v3280_v17, %v1005_v20  ;;  %v3476_v9 = vadd.f32 %v3280_v17, %v1133_v60  ;;  %v1797_v10 = vsel %vm1477_vm4, %v3403_v44, %v2388_v58  ;;  %vm1481_vm12 = vcmp.gt.f32.partialorder %v3459_v55, 0.0 }
 0x157   : > { %v2978_v40 = vpop.eup %2977  ;;  %v1623_v8 = vmul.f32 1.442695, %v1545_v0  ;;  %v1687_v34 = vmul.f32 1.442695, %v1577_v4  ;;  %v1829_v13 = vsel %vm1509_vm5, %v3406_v62, %v2420_v63  ;;  %vm1513_vm13 = vcmp.gt.f32.partialorder %v3462_v41, 0.0 }
 0x158   : > { %v2980_v6 = vpop.eup %2979  ;;  %v2389_v50 = vadd.f32 -1.0, %v2978_v40  ;;  %v1546_v12 = vmin.f32 %v3472_v5, 0.0  ;;  %v1578_v48 = vmin.f32 %v3476_v9, 0.0  ;;  %vm1482_vm14 = vcmp.gt.f32.partialorder %v3472_v5, 0.0 }
 0x159   : > { %v2421_v51 = vadd.f32 -1.0, %v2980_v6  ;;  %2989 = vpow2.f32 %v1623_v8  ;;  %vm1514_vm15 = vcmp.gt.f32.partialorder %v3476_v9, 0.0 }
 0x15a   : > { %v1798_v14 = vsel %vm1478_vm6, %v3416_v59, %v2389_v50  ;;  %2991 = vpow2.f32 %v1687_v34  ;;  %v1625_v22 = vmul.f32 1.442695, %v1546_v12  ;;  %v1010_v54 = vpop.f32.mrb[32].mxu0  ;;  %v1138_v44 = vpop.f32.mrb[32].mxu1  ;;  %v1689_v26 = vmul.f32 1.442695, %v1578_v48 }
 0x15b   : > { %v2601_v18 = vpack.c.bf16 %v1798_v14, %v1797_v10  ;;  %v1830_v19 = vsel %vm1510_vm7, %v3420_v1, %v2421_v51  ;;  %v2982_v24 = vpop.eup %2981  ;;  %v3487_v27 = vadd.f32 %v3280_v17, %v1010_v54  ;;  %v3490_v62 = vadd.f32 %v3280_v17, %v1138_v44  ;;  %v1012_v59 = vpop.f32.mrb[33].mxu0 }
 0x15c   : > { %v2681_v25 = vpack.c.bf16 %v1830_v19, %v1829_v13  ;;  %v1140_v28 = vpop.f32.mrb[33].mxu1  ;;  %v2984_v29 = vpop.eup %2983  ;;  %v2390_v21 = vadd.f32 -1.0, %v2982_v24  ;;  %2993 = vpow2.f32 %v1625_v22 }
 0x15d   : > { %2737 = vst [vmem:[%s3341_s7 + $0x28] sm:$0xff] %v2601_v18   ;;  %v1013_v1 = vpop.f32.mrb[34].mxu0  ;;  %v1141_v33 = vpop.f32.mrb[34].mxu1  ;;  %v2422_v35 = vadd.f32 -1.0, %v2984_v29  ;;  %2995 = vpow2.f32 %v1689_v26  ;;  %v1547_v36 = vmin.f32 %v3487_v27, 0.0  ;;  %v1579_v39 = vmin.f32 %v3490_v62, 0.0 }
 0x15e   : > { %2753 = vst [vmem:[%s3341_s7 + $0xa8] sm:$0xff] %v2681_v25   ;;  %v1015_v38 = vpop.f32.mrb[35].mxu0  ;;  %v1143_v31 = vpop.f32.mrb[35].mxu1  ;;  %v3500_v42 = vadd.f32 %v3280_v17, %v1013_v1  ;;  %v3504_v46 = vadd.f32 %v3280_v17, %v1141_v33  ;;  %v1799_v47 = vsel %vm1479_vm8, %v3431_v16, %v2390_v21  ;;  %vm1483_vm0 = vcmp.gt.f32.partialorder %v3487_v27, 0.0 }
 0x15f   : > { %v2986_v61 = vpop.eup %2985  ;;  %v1627_v45 = vmul.f32 1.442695, %v1547_v36  ;;  %v1691_v7 = vmul.f32 1.442695, %v1579_v39  ;;  %v1831_v52 = vsel %vm1511_vm9, %v3434_v30, %v2422_v35  ;;  %vm1515_vm1 = vcmp.gt.f32.partialorder %v3490_v62, 0.0 }
 0x160   : > { %v2988_v43 = vpop.eup %2987  ;;  %v2391_v11 = vadd.f32 -1.0, %v2986_v61  ;;  %v1548_v49 = vmin.f32 %v3500_v42, 0.0  ;;  %v1580_v23 = vmin.f32 %v3504_v46, 0.0  ;;  %vm1484_vm2 = vcmp.gt.f32.partialorder %v3500_v42, 0.0 }
 0x161   : > { %v2423_v15 = vadd.f32 -1.0, %v2988_v43  ;;  %2997 = vpow2.f32 %v1627_v45  ;;  %vm1516_vm3 = vcmp.gt.f32.partialorder %v3504_v46, 0.0 }
 0x162   : > { %v1800_v53 = vsel %vm1480_vm10, %v3444_v32, %v2391_v11  ;;  %2999 = vpow2.f32 %v1691_v7  ;;  %v1629_v58 = vmul.f32 1.442695, %v1548_v49  ;;  %v1018_v20 = vpop.f32.mrb[36].mxu0  ;;  %v1146_v16 = vpop.f32.mrb[36].mxu1  ;;  %v1693_v0 = vmul.f32 1.442695, %v1580_v23 }
 0x163   : > { %v2606_v56 = vpack.c.bf16 %v1800_v53, %v1799_v47  ;;  %v1832_v57 = vsel %vm1512_vm11, %v3448_v37, %v2423_v15  ;;  %v2990_v60 = vpop.eup %2989  ;;  %v3515_v2 = vadd.f32 %v3280_v17, %v1018_v20  ;;  %v3518_v30 = vadd.f32 %v3280_v17, %v1146_v16  ;;  %v1020_v32 = vpop.f32.mrb[37].mxu0 }
 0x164   : > { %v2686_v63 = vpack.c.bf16 %v1832_v57, %v1831_v52  ;;  %v1148_v3 = vpop.f32.mrb[37].mxu1  ;;  %v2992_v40 = vpop.eup %2991  ;;  %v2392_v4 = vadd.f32 -1.0, %v2990_v60  ;;  %3001 = vpow2.f32 %v1629_v58 }
 0x165   : > { %2738 = vst [vmem:[%s3341_s7 + $0x30] sm:$0xff] %v2606_v56   ;;  %v1021_v37 = vpop.f32.mrb[38].mxu0  ;;  %v1149_v6 = vpop.f32.mrb[38].mxu1  ;;  %v2424_v50 = vadd.f32 -1.0, %v2992_v40  ;;  %3003 = vpow2.f32 %v1693_v0  ;;  %v1549_v8 = vmin.f32 %v3515_v2, 0.0  ;;  %v1581_v12 = vmin.f32 %v3518_v30, 0.0 }
 0x166   : > { %2754 = vst [vmem:[%s3341_s7 + $0xb0] sm:$0xff] %v2686_v63   ;;  %v1023_v10 = vpop.f32.mrb[39].mxu0  ;;  %v1151_v51 = vpop.f32.mrb[39].mxu1  ;;  %v3528_v13 = vadd.f32 %v3280_v17, %v1021_v37  ;;  %v3532_v19 = vadd.f32 %v3280_v17, %v1149_v6  ;;  %v1801_v22 = vsel %vm1481_vm12, %v3459_v55, %v2392_v4  ;;  %vm1485_vm4 = vcmp.gt.f32.partialorder %v3515_v2, 0.0 }
 0x167   : > { %v2994_v34 = vpop.eup %2993  ;;  %v1631_v18 = vmul.f32 1.442695, %v1549_v8  ;;  %v1695_v44 = vmul.f32 1.442695, %v1581_v12  ;;  %v1833_v25 = vsel %vm1513_vm13, %v3462_v41, %v2424_v50  ;;  %vm1517_vm5 = vcmp.gt.f32.partialorder %v3518_v30, 0.0 }
 0x168   : > { %v2996_v14 = vpop.eup %2995  ;;  %v2393_v48 = vadd.f32 -1.0, %v2994_v34  ;;  %v1550_v24 = vmin.f32 %v3528_v13, 0.0  ;;  %v1582_v59 = vmin.f32 %v3532_v19, 0.0  ;;  %vm1486_vm6 = vcmp.gt.f32.partialorder %v3528_v13, 0.0 }
 0x169   : > { %v2425_v54 = vadd.f32 -1.0, %v2996_v14  ;;  %3005 = vpow2.f32 %v1631_v18  ;;  %vm1518_vm7 = vcmp.gt.f32.partialorder %v3532_v19, 0.0 }
 0x16a   : > { %v1802_v26 = vsel %vm1482_vm14, %v3472_v5, %v2393_v48  ;;  %3007 = vpow2.f32 %v1695_v44  ;;  %v1633_v21 = vmul.f32 1.442695, %v1550_v24  ;;  %v1026_v1 = vpop.f32.mrb[40].mxu0  ;;  %v1154_v55 = vpop.f32.mrb[40].mxu1  ;;  %v1697_v36 = vmul.f32 1.442695, %v1582_v59 }
 0x16b   : > { %v2611_v28 = vpack.c.bf16 %v1802_v26, %v1801_v22  ;;  %v1834_v29 = vsel %vm1514_vm15, %v3476_v9, %v2425_v54  ;;  %v2998_v33 = vpop.eup %2997  ;;  %v3543_v38 = vadd.f32 %v3280_v17, %v1026_v1  ;;  %v3546_v41 = vadd.f32 %v3280_v17, %v1154_v55  ;;  %v1028_v5 = vpop.f32.mrb[41].mxu0 }
 0x16c   : > { %v2691_v35 = vpack.c.bf16 %v1834_v29, %v1833_v25  ;;  %v1156_v31 = vpop.f32.mrb[41].mxu1  ;;  %v3000_v61 = vpop.eup %2999  ;;  %v2394_v39 = vadd.f32 -1.0, %v2998_v33  ;;  %3009 = vpow2.f32 %v1633_v21 }
 0x16d   : > { %2739 = vst [vmem:[%s3341_s7 + $0x38] sm:$0xff] %v2611_v28   ;;  %v1029_v9 = vpop.f32.mrb[42].mxu0  ;;  %v1157_v43 = vpop.f32.mrb[42].mxu1  ;;  %v2426_v11 = vadd.f32 -1.0, %v3000_v61  ;;  %3011 = vpow2.f32 %v1697_v36  ;;  %v1551_v45 = vmin.f32 %v3543_v38, 0.0  ;;  %v1583_v49 = vmin.f32 %v3546_v41, 0.0 }
 0x16e   : > { %2755 = vst [vmem:[%s3341_s7 + $0xb8] sm:$0xff] %v2691_v35   ;;  %v1031_v47 = vpop.f32.mrb[43].mxu0  ;;  %v1159_v15 = vpop.f32.mrb[43].mxu1  ;;  %v3556_v52 = vadd.f32 %v3280_v17, %v1029_v9  ;;  %v3560_v57 = vadd.f32 %v3280_v17, %v1157_v43  ;;  %v1803_v58 = vsel %vm1483_vm0, %v3487_v27, %v2394_v39  ;;  %vm1487_vm8 = vcmp.gt.f32.partialorder %v3543_v38, 0.0 }
 0x16f   : > { %v3002_v7 = vpop.eup %3001  ;;  %v1635_v56 = vmul.f32 1.442695, %v1551_v45  ;;  %v1699_v16 = vmul.f32 1.442695, %v1583_v49  ;;  %v1835_v63 = vsel %vm1515_vm1, %v3490_v62, %v2426_v11  ;;  %vm1519_vm9 = vcmp.gt.f32.partialorder %v3546_v41, 0.0 }
 0x170   : > { %v3004_v53 = vpop.eup %3003  ;;  %v2395_v23 = vadd.f32 -1.0, %v3002_v7  ;;  %v1552_v60 = vmin.f32 %v3556_v52, 0.0  ;;  %v1584_v32 = vmin.f32 %v3560_v57, 0.0  ;;  %vm1488_vm10 = vcmp.gt.f32.partialorder %v3556_v52, 0.0 }
 0x171   : > { %v2427_v20 = vadd.f32 -1.0, %v3004_v53  ;;  %3013 = vpow2.f32 %v1635_v56  ;;  %vm1520_vm11 = vcmp.gt.f32.partialorder %v3560_v57, 0.0 }
 0x172   : > { %v1804_v0 = vsel %vm1484_vm2, %v3500_v42, %v2395_v23  ;;  %3015 = vpow2.f32 %v1699_v16  ;;  %v1637_v4 = vmul.f32 1.442695, %v1552_v60  ;;  %v1034_v37 = vpop.f32.mrb[44].mxu0  ;;  %v1162_v27 = vpop.f32.mrb[44].mxu1  ;;  %v1701_v8 = vmul.f32 1.442695, %v1584_v32 }
 0x173   : > { %v2616_v3 = vpack.c.bf16 %v1804_v0, %v1803_v58  ;;  %v1836_v40 = vsel %vm1516_vm3, %v3504_v46, %v2427_v20  ;;  %v3006_v6 = vpop.eup %3005  ;;  %v3571_v10 = vadd.f32 %v3280_v17, %v1034_v37  ;;  %v3574_v62 = vadd.f32 %v3280_v17, %v1162_v27  ;;  %v1036_v42 = vpop.f32.mrb[45].mxu0 }
 0x174   : > { %v2696_v50 = vpack.c.bf16 %v1836_v40, %v1835_v63  ;;  %v1164_v51 = vpop.f32.mrb[45].mxu1  ;;  %v3008_v34 = vpop.eup %3007  ;;  %v2396_v12 = vadd.f32 -1.0, %v3006_v6  ;;  %3017 = vpow2.f32 %v1637_v4  ;;  %v3618_v40 = vld [vmem:[%s3738_s2] ss:$0 sm:$0xff] }
 0x175   : > { %2740 = vst [vmem:[%s3341_s7 + $0x40] sm:$0xff] %v2616_v3   ;;  %v1037_v46 = vpop.f32.mrb[46].mxu0  ;;  %v1165_v14 = vpop.f32.mrb[46].mxu1  ;;  %v2428_v48 = vadd.f32 -1.0, %v3008_v34  ;;  %3019 = vpow2.f32 %v1701_v8  ;;  %v1553_v18 = vmin.f32 %v3571_v10, 0.0  ;;  %v1585_v24 = vmin.f32 %v3574_v62, 0.0 }
 0x176   : > { %2756 = vst [vmem:[%s3341_s7 + $0xc0] sm:$0xff] %v2696_v50   ;;  %v1039_v22 = vpop.f32.mrb[47].mxu0  ;;  %v1167_v54 = vpop.f32.mrb[47].mxu1  ;;  %v3584_v25 = vadd.f32 %v3280_v17, %v1037_v46  ;;  %v3588_v29 = vadd.f32 %v3280_v17, %v1165_v14  ;;  %v1805_v21 = vsel %vm1485_vm4, %v3515_v2, %v2396_v12  ;;  %vm1489_vm12 = vcmp.gt.f32.partialorder %v3571_v10, 0.0 }
 0x177   : > { %v3010_v44 = vpop.eup %3009  ;;  %v1639_v28 = vmul.f32 1.442695, %v1553_v18  ;;  %v1703_v55 = vmul.f32 1.442695, %v1585_v24  ;;  %v1837_v35 = vsel %vm1517_vm5, %v3518_v30, %v2428_v48  ;;  %vm1521_vm13 = vcmp.gt.f32.partialorder %v3574_v62, 0.0 }
 0x178   : > { %v3012_v26 = vpop.eup %3011  ;;  %v2397_v59 = vadd.f32 -1.0, %v3010_v44  ;;  %v1554_v33 = vmin.f32 %v3584_v25, 0.0  ;;  %v1586_v5 = vmin.f32 %v3588_v29, 0.0  ;;  %vm1490_vm14 = vcmp.gt.f32.partialorder %v3584_v25, 0.0 }
 0x179   : > { %v2429_v1 = vadd.f32 -1.0, %v3012_v26  ;;  %3021 = vpow2.f32 %v1639_v28  ;;  %vm1522_vm15 = vcmp.gt.f32.partialorder %v3588_v29, 0.0 }
 0x17a   : > { %v1806_v36 = vsel %vm1486_vm6, %v3528_v13, %v2397_v59  ;;  %3023 = vpow2.f32 %v1703_v55  ;;  %v1641_v39 = vmul.f32 1.442695, %v1554_v33  ;;  %v1042_v9 = vpop.f32.mrb[48].mxu0  ;;  %v1170_v2 = vpop.f32.mrb[48].mxu1  ;;  %v1705_v45 = vmul.f32 1.442695, %v1586_v5 }
 0x17b   : > { %v2621_v31 = vpack.c.bf16 %v1806_v36, %v1805_v21  ;;  %v1838_v61 = vsel %vm1518_vm7, %v3532_v19, %v2429_v1  ;;  %v3014_v43 = vpop.eup %3013  ;;  %v3599_v47 = vadd.f32 %v3280_v17, %v1042_v9  ;;  %v3602_v30 = vadd.f32 %v3280_v17, %v1170_v2  ;;  %v1044_v13 = vpop.f32.mrb[49].mxu0 }
 0x17c   : > { %v2701_v11 = vpack.c.bf16 %v1838_v61, %v1837_v35  ;;  %v1172_v15 = vpop.f32.mrb[49].mxu1  ;;  %v3016_v7 = vpop.eup %3015  ;;  %v2398_v49 = vadd.f32 -1.0, %v3014_v43  ;;  %3025 = vpow2.f32 %v1641_v39 }
 0x17d   : > { %2741 = vst [vmem:[%s3341_s7 + $0x48] sm:$0xff] %v2621_v31   ;;  %v1045_v19 = vpop.f32.mrb[50].mxu0  ;;  %v1173_v53 = vpop.f32.mrb[50].mxu1  ;;  %v2430_v23 = vadd.f32 -1.0, %v3016_v7  ;;  %3027 = vpow2.f32 %v1705_v45  ;;  %v1555_v56 = vmin.f32 %v3599_v47, 0.0  ;;  %v1587_v60 = vmin.f32 %v3602_v30, 0.0 }
 0x17e   : > { %2757 = vst [vmem:[%s3341_s7 + $0xc8] sm:$0xff] %v2701_v11   ;;  %v1047_v58 = vpop.f32.mrb[51].mxu0  ;;  %v1175_v20 = vpop.f32.mrb[51].mxu1  ;;  %v3612_v63 = vadd.f32 %v3280_v17, %v1045_v19  ;;  %v3621_v4 = vadd.f32 %v3618_v40, %v1173_v53  ;;  %v1807_v37 = vsel %vm1487_vm8, %v3543_v38, %v2398_v49  ;;  %vm1491_vm0 = vcmp.gt.f32.partialorder %v3599_v47, 0.0 }
 0x17f   : > { %v3018_v16 = vpop.eup %3017  ;;  %v1643_v3 = vmul.f32 1.442695, %v1555_v56  ;;  %v1707_v17 = vmul.f32 1.442695, %v1587_v60  ;;  %v1839_v50 = vsel %vm1519_vm9, %v3546_v41, %v2430_v23  ;;  %vm1523_vm1 = vcmp.gt.f32.partialorder %v3602_v30, 0.0 }
 0x180   : > { %v3020_v0 = vpop.eup %3019  ;;  %v2399_v32 = vadd.f32 -1.0, %v3018_v16  ;;  %v1556_v6 = vmin.f32 %v3612_v63, 0.0  ;;  %v1588_v42 = vmin.f32 %v3621_v4, 0.0  ;;  %vm1492_vm2 = vcmp.gt.f32.partialorder %v3612_v63, 0.0 }
 0x181   : > { %v2431_v27 = vadd.f32 -1.0, %v3020_v0  ;;  %3029 = vpow2.f32 %v1643_v3  ;;  %vm1524_vm3 = vcmp.gt.f32.partialorder %v3621_v4, 0.0 }
 0x182   : > { %v1808_v8 = vsel %vm1488_vm10, %v3556_v52, %v2399_v32  ;;  %3031 = vpow2.f32 %v1707_v17  ;;  %v1645_v12 = vmul.f32 1.442695, %v1556_v6  ;;  %v1050_v46 = vpop.f32.mrb[52].mxu0  ;;  %v1178_v38 = vpop.f32.mrb[52].mxu1  ;;  %v1709_v18 = vmul.f32 1.442695, %v1588_v42 }
 0x183   : > { %v2626_v51 = vpack.c.bf16 %v1808_v8, %v1807_v37  ;;  %v1840_v34 = vsel %vm1520_vm11, %v3560_v57, %v2431_v27  ;;  %v3022_v14 = vpop.eup %3021  ;;  %v3632_v22 = vadd.f32 %v3618_v40, %v1050_v46  ;;  %v3635_v41 = vadd.f32 %v3618_v40, %v1178_v38  ;;  %v1052_v52 = vpop.f32.mrb[53].mxu0 }
 0x184   : > { %v2706_v48 = vpack.c.bf16 %v1840_v34, %v1839_v50  ;;  %v1180_v54 = vpop.f32.mrb[53].mxu1  ;;  %v3024_v44 = vpop.eup %3023  ;;  %v2400_v24 = vadd.f32 -1.0, %v3022_v14  ;;  %3033 = vpow2.f32 %v1645_v12 }
 0x185   : > { %2742 = vst [vmem:[%s3341_s7 + $0x50] sm:$0xff] %v2626_v51   ;;  %v1053_v57 = vpop.f32.mrb[54].mxu0  ;;  %v1181_v26 = vpop.f32.mrb[54].mxu1  ;;  %v2432_v59 = vadd.f32 -1.0, %v3024_v44  ;;  %3035 = vpow2.f32 %v1709_v18  ;;  %v1557_v28 = vmin.f32 %v3632_v22, 0.0  ;;  %v1589_v33 = vmin.f32 %v3635_v41, 0.0 }
 0x186   : > { %2758 = vst [vmem:[%s3341_s7 + $0xd0] sm:$0xff] %v2706_v48   ;;  %v1055_v21 = vpop.f32.mrb[55].mxu0  ;;  %v1183_v1 = vpop.f32.mrb[55].mxu1  ;;  %v3645_v35 = vadd.f32 %v3618_v40, %v1053_v57  ;;  %v3649_v61 = vadd.f32 %v3618_v40, %v1181_v26  ;;  %v1809_v39 = vsel %vm1489_vm12, %v3571_v10, %v2400_v24  ;;  %vm1493_vm4 = vcmp.gt.f32.partialorder %v3632_v22, 0.0 }
 0x187   : > { %v3026_v55 = vpop.eup %3025  ;;  %v1647_v31 = vmul.f32 1.442695, %v1557_v28  ;;  %v1711_v2 = vmul.f32 1.442695, %v1589_v33  ;;  %v1841_v11 = vsel %vm1521_vm13, %v3574_v62, %v2432_v59  ;;  %vm1525_vm5 = vcmp.gt.f32.partialorder %v3635_v41, 0.0 }
 0x188   : > { %v3028_v36 = vpop.eup %3027  ;;  %v2401_v5 = vadd.f32 -1.0, %v3026_v55  ;;  %v1558_v43 = vmin.f32 %v3645_v35, 0.0  ;;  %v1590_v13 = vmin.f32 %v3649_v61, 0.0  ;;  %vm1494_vm6 = vcmp.gt.f32.partialorder %v3645_v35, 0.0 }
 0x189   : > { %v2433_v9 = vadd.f32 -1.0, %v3028_v36  ;;  %3037 = vpow2.f32 %v1647_v31  ;;  %vm1526_vm7 = vcmp.gt.f32.partialorder %v3649_v61, 0.0 }
 0x18a   : > { %v1810_v45 = vsel %vm1490_vm14, %v3584_v25, %v2401_v5  ;;  %3039 = vpow2.f32 %v1711_v2  ;;  %v1649_v49 = vmul.f32 1.442695, %v1558_v43  ;;  %v1058_v19 = vpop.f32.mrb[56].mxu0  ;;  %v1186_v10 = vpop.f32.mrb[56].mxu1  ;;  %v1713_v56 = vmul.f32 1.442695, %v1590_v13 }
 0x18b   : > { %v2631_v15 = vpack.c.bf16 %v1810_v45, %v1809_v39  ;;  %v1842_v7 = vsel %vm1522_vm15, %v3588_v29, %v2433_v9  ;;  %v3030_v53 = vpop.eup %3029  ;;  %v3660_v58 = vadd.f32 %v3618_v40, %v1058_v19  ;;  %v3663_v62 = vadd.f32 %v3618_v40, %v1186_v10  ;;  %v1060_v25 = vpop.f32.mrb[57].mxu0 }
 0x18c   : > { %v2711_v23 = vpack.c.bf16 %v1842_v7, %v1841_v11  ;;  %v1188_v20 = vpop.f32.mrb[57].mxu1  ;;  %v3032_v16 = vpop.eup %3031  ;;  %v2402_v60 = vadd.f32 -1.0, %v3030_v53  ;;  %3041 = vpow2.f32 %v1649_v49 }
 0x18d   : > { %2743 = vst [vmem:[%s3341_s7 + $0x58] sm:$0xff] %v2631_v15   ;;  %v1061_v29 = vpop.f32.mrb[58].mxu0  ;;  %v1189_v0 = vpop.f32.mrb[58].mxu1  ;;  %v2434_v32 = vadd.f32 -1.0, %v3032_v16  ;;  %3043 = vpow2.f32 %v1713_v56  ;;  %v1559_v3 = vmin.f32 %v3660_v58, 0.0  ;;  %v1591_v6 = vmin.f32 %v3663_v62, 0.0 }
 0x18e   : > { %2759 = vst [vmem:[%s3341_s7 + $0xd8] sm:$0xff] %v2711_v23   ;;  %v1063_v37 = vpop.f32.mrb[59].mxu0  ;;  %v1191_v27 = vpop.f32.mrb[59].mxu1  ;;  %v3673_v50 = vadd.f32 %v3618_v40, %v1061_v29  ;;  %v3677_v34 = vadd.f32 %v3618_v40, %v1189_v0  ;;  %v1811_v12 = vsel %vm1491_vm0, %v3599_v47, %v2402_v60  ;;  %vm1495_vm8 = vcmp.gt.f32.partialorder %v3660_v58, 0.0 }
 0x18f   : > { %v3034_v17 = vpop.eup %3033  ;;  %v1651_v51 = vmul.f32 1.442695, %v1559_v3  ;;  %v1715_v38 = vmul.f32 1.442695, %v1591_v6  ;;  %v1843_v48 = vsel %vm1523_vm1, %v3602_v30, %v2434_v32  ;;  %vm1527_vm10 = vcmp.gt.f32.partialorder %v3663_v62, 0.0 }
 0x190   : > { %v3036_v8 = vpop.eup %3035  ;;  %v2403_v42 = vadd.f32 -1.0, %v3034_v17  ;;  %v1560_v14 = vmin.f32 %v3673_v50, 0.0  ;;  %v1592_v52 = vmin.f32 %v3677_v34, 0.0  ;;  %vm1496_vm9 = vcmp.gt.f32.partialorder %v3673_v50, 0.0 }
 0x191   : > { %v2435_v46 = vadd.f32 -1.0, %v3036_v8  ;;  %3045 = vpow2.f32 %v1651_v51  ;;  %vm1528_vm11 = vcmp.gt.f32.partialorder %v3677_v34, 0.0 }
 0x192   : > { %v1812_v18 = vsel %vm1492_vm2, %v3612_v63, %v2403_v42  ;;  %3047 = vpow2.f32 %v1715_v38  ;;  %v1653_v24 = vmul.f32 1.442695, %v1560_v14  ;;  %v1066_v57 = vpop.f32.mrb[60].mxu0  ;;  %v1194_v47 = vpop.f32.mrb[60].mxu1  ;;  %v1717_v28 = vmul.f32 1.442695, %v1592_v52 }
 0x193   : > { %v2636_v54 = vpack.c.bf16 %v1812_v18, %v1811_v12  ;;  %v1844_v44 = vsel %vm1524_vm3, %v3621_v4, %v2435_v46  ;;  %v3038_v26 = vpop.eup %3037  ;;  %v3688_v21 = vadd.f32 %v3618_v40, %v1066_v57  ;;  %v3691_v30 = vadd.f32 %v3618_v40, %v1194_v47  ;;  %v1068_v63 = vpop.f32.mrb[61].mxu0 }
 0x194   : > { %v2716_v59 = vpack.c.bf16 %v1844_v44, %v1843_v48  ;;  %v1196_v1 = vpop.f32.mrb[61].mxu1  ;;  %v3040_v55 = vpop.eup %3039  ;;  %v2404_v33 = vadd.f32 -1.0, %v3038_v26  ;;  %3049 = vpow2.f32 %v1653_v24 }
 0x195   : > { %2744 = vst [vmem:[%s3341_s7 + $0x60] sm:$0xff] %v2636_v54   ;;  %v1069_v4 = vpop.f32.mrb[62].mxu0  ;;  %v1197_v36 = vpop.f32.mrb[62].mxu1  ;;  %v2436_v5 = vadd.f32 -1.0, %v3040_v55  ;;  %3051 = vpow2.f32 %v1717_v28  ;;  %v1561_v31 = vmin.f32 %v3688_v21, 0.0  ;;  %v1593_v43 = vmin.f32 %v3691_v30, 0.0 }
 0x196   : > { %2760 = vst [vmem:[%s3341_s7 + $0xe0] sm:$0xff] %v2716_v59   ;;  %v1071_v39 = vpop.f32.mrb[63].mxu0  ;;  %v1199_v9 = vpop.f32.mrb[63].mxu1  ;;  %v1434_v11 = vadd.f32 %v3618_v40, %v1069_v4  ;;  %v1466_v7 = vadd.f32 %v3618_v40, %v1197_v36  ;;  %v1813_v49 = vsel %vm1493_vm4, %v3632_v22, %v2404_v33  ;;  %vm1497_vm12 = vcmp.gt.f32.partialorder %v3688_v21, 0.0 }
 0x197   : > { %v3042_v2 = vpop.eup %3041  ;;  %v1655_v15 = vmul.f32 1.442695, %v1561_v31  ;;  %v1719_v10 = vmul.f32 1.442695, %v1593_v43  ;;  %v1845_v23 = vsel %vm1525_vm5, %v3635_v41, %v2436_v5  ;;  %vm1529_vm14 = vcmp.gt.f32.partialorder %v3691_v30, 0.0 }
 0x198   : > { %v3044_v45 = vpop.eup %3043  ;;  %v2405_v13 = vadd.f32 -1.0, %v3042_v2  ;;  %v1562_v53 = vmin.f32 %v1434_v11, 0.0  ;;  %v1594_v25 = vmin.f32 %v1466_v7, 0.0  ;;  %vm1498_vm13 = vcmp.gt.f32.partialorder %v1434_v11, 0.0 }
 0x199   : > { %v2437_v19 = vadd.f32 -1.0, %v3044_v45  ;;  %3053 = vpow2.f32 %v1655_v15  ;;  %vm1530_vm15 = vcmp.gt.f32.partialorder %v1466_v7, 0.0 }
 0x19a   : > { %v1814_v56 = vsel %vm1494_vm6, %v3645_v35, %v2405_v13  ;;  %3055 = vpow2.f32 %v1719_v10  ;;  %v1657_v40 = vmul.f32 1.442695, %v1562_v53  ;;  %v1721_v0 = vmul.f32 1.442695, %v1594_v25 }
 0x19b   : > { %v2641_v20 = vpack.c.bf16 %v1814_v56, %v1813_v49  ;;  %v1846_v16 = vsel %vm1526_vm7, %v3649_v61, %v2437_v19  ;;  %v3046_v60 = vpop.eup %3045 }
 0x19c   : > { %v2721_v29 = vpack.c.bf16 %v1846_v16, %v1845_v23  ;;  %v3048_v22 = vpop.eup %3047  ;;  %3057 = vpow2.f32 %v1657_v40  ;;  %v2406_v32 = vadd.f32 -1.0, %v3046_v60 }
 0x19d   : > { %2745 = vst [vmem:[%s3341_s7 + $0x68] sm:$0xff] %v2641_v20   ;;  %3059 = vpow2.f32 %v1721_v0  ;;  %v2438_v41 = vadd.f32 -1.0, %v3048_v22 }
 0x19e   : > { %2761 = vst [vmem:[%s3341_s7 + $0xe8] sm:$0xff] %v2721_v29   ;;  %v3050_v3 = vpop.eup %3049  ;;  %v1815_v27 = vsel %vm1495_vm8, %v3660_v58, %v2406_v32 }
 0x19f   : > { %v3052_v35 = vpop.eup %3051  ;;  %v2407_v37 = vadd.f32 -1.0, %v3050_v3  ;;  %v1847_v6 = vsel %vm1527_vm10, %v3663_v62, %v2438_v41 }
 0x1a0   : > { %v2439_v61 = vadd.f32 -1.0, %v3052_v35 }
 0x1a1   : > { %v1816_v17 = vsel %vm1496_vm9, %v3673_v50, %v2407_v37 }
 0x1a2   : > { %v2646_v8 = vpack.c.bf16 %v1816_v17, %v1815_v27  ;;  %v1848_v42 = vsel %vm1528_vm11, %v3677_v34, %v2439_v61 }
 0x1a3   : > { %v3054_v51 = vpop.eup %3053  ;;  %v2726_v12 = vpack.c.bf16 %v1848_v42, %v1847_v6 }
 0x1a4   : > { %v3056_v46 = vpop.eup %3055  ;;  %2746 = vst [vmem:[%s3341_s7 + $0x70] sm:$0xff] %v2646_v8   ;;  %v2408_v38 = vadd.f32 -1.0, %v3054_v51 }
 0x1a5   : > { %2762 = vst [vmem:[%s3341_s7 + $0xf0] sm:$0xff] %v2726_v12   ;;  %v2440_v58 = vadd.f32 -1.0, %v3056_v46 }
 0x1a6   : > { %v3058_v14 = vpop.eup %3057  ;;  %v1817_v62 = vsel %vm1497_vm12, %v3688_v21, %v2408_v38 }
 0x1a7   : > { %v3060_v48 = vpop.eup %3059  ;;  %v2409_v18 = vadd.f32 -1.0, %v3058_v14  ;;  %v1849_v52 = vsel %vm1529_vm14, %v3691_v30, %v2440_v58 }
 0x1a8   : > { %v2441_v50 = vadd.f32 -1.0, %v3060_v48 }
 0x1a9   : > { %v1818_v34 = vsel %vm1498_vm13, %v1434_v11, %v2409_v18 }
 0x1aa   : > { %v2651_v54 = vpack.c.bf16 %v1818_v34, %v1817_v62  ;;  %v1850_v44 = vsel %vm1530_vm15, %v1466_v7, %v2441_v50 }
 0x1ab   : > { %v2731_v24 = vpack.c.bf16 %v1850_v44, %v1849_v52 }
 0x1ac   : > { %2747 = vst [vmem:[%s3341_s7 + $0x78] sm:$0xff] %v2651_v54  }
 0x1ad   : > { %2763 = vst [vmem:[%s3341_s7 + $0xf8] sm:$0xff] %v2731_v24  }
 0x1ae PF: > { %s13_s14 = sadd.s32 1, %s3084_s14   ;;  %s3740_s12 = smov %s3080_s13 }
 0x1af   : > { %p10_p5 = scmp.ge.s32.totalorder %s13_s14, 7   ;;  %s3741_s13 = smov %s3743_s15 }
 0x1b1   :  { %12 = sbr.rel (!%p10_p5) target bundleno = 2 (0x2), region = 76 }

// kernel: actor_forward.19
= control target key start
LH: loop header
LB: loop body
LE: loop exit
PB: predicated region body
PF: predicated region fallthrough
CT: control target
= control target key end

     0   :  { %s2689_s12 = smov 0   ;;  %s2691_s13 = smov 0   ;;  %s3086_s0 = inlined_call_operand.vmem [shape: bf16[512,512], index: 0, kind: input, shape index: {}]   ;;  %s3087_s1 = inlined_call_operand.vmem [shape: bf16[512,128], index: 1, kind: input, shape index: {}]   ;;  %s3088_s2 = inlined_call_operand.vmem [shape: f32[1,128], index: 2, kind: input, shape index: {}]   ;;  %s3089_s3 = inlined_call_operand.vmem [shape: bf16[512,128], index: 3, kind: output, shape index: {}]  }
   0x1   :  { %s2693_s14 = smov 0  }
   0x2 LB: > { %s32_s15 = sadd.s32 1, %s2663_s13  ;;  %p1908_p0 = scmp.ge.s32.totalorder %s2667_s14, 1  ;;  %s2667_s14 = sphi %s2693_s14, %s13_s14   ;;  %s2663_s13 = sphi %s2691_s13, %s3091_s13   ;;  %s2659_s12 = sphi %s2689_s12, %s3090_s12  }
   0x3   : > { %p34_p1 = scmp.ge.s32.totalorder %s32_s15, 2  ;;  %p191_p2 = scmp.lt.s32.totalorder %s2667_s14, 3 }
   0x5   : > { %s3093_s15 = smov (%p34_p1, %s32_s15), 0  ;;  %p192_p3 = pnand %p1908_p0, %p191_p2 }
   0x6   : > { %v2453_v0 = vld [vmem:[%s3087_s1 + $0x40] sm:$0xff] (!%p192_p3)   ;;  %v2457_v4 = vld [vmem:[%s3087_s1 + $0x48] sm:$0xff] (!%p192_p3)   ;;  %v2461_v8 = vld [vmem:[%s3087_s1 + $0x50] sm:$0xff] (!%p192_p3)   ;;  %s1909_s25 = sshll.u32 (!%p192_p3), %s2659_s12, 5 }
   0x7   : > { %195 = sbr.rel (%p192_p3) target bundleno = 404 (0x194), region = 32  ;;  %v2454_v1 = vld [vmem:[%s3087_s1 + $0xc0] sm:$0xff] (!%p192_p3)   ;;  %2205 = vmatprep.subr.bf16.mxu0 (!%p192_p3), %v2453_v0  ;;  %v2458_v5 = vld [vmem:[%s3087_s1 + $0xc8] sm:$0xff] (!%p192_p3)   ;;  %v2462_v9 = vld [vmem:[%s3087_s1 + $0xd0] sm:$0xff] (!%p192_p3)   ;;  %p236_p4 = scmp.lt.s32.totalorder (!%p192_p3), %s1909_s25, 63 }
   0x8   : > { %v2455_v2 = vld [vmem:[%s3087_s1] sm:$0xff] (!%p192_p3)   ;;  %2317 = vmatprep.subr.bf16.mxu1 (!%p192_p3), %v2454_v1  ;;  %v2459_v6 = vld [vmem:[%s3087_s1 + $0x8] sm:$0xff] (!%p192_p3)   ;;  %v2463_v10 = vld [vmem:[%s3087_s1 + $0x10] sm:$0xff] (!%p192_p3)  }
   0x9   : > { %v2456_v3 = vld [vmem:[%s3087_s1 + $0x80] sm:$0xff] (!%p192_p3)   ;;  %2206 = vmatpush3.bf16.msra.mxu0 (!%p192_p3), %v2455_v2  ;;  %v2460_v7 = vld [vmem:[%s3087_s1 + $0x88] sm:$0xff] (!%p192_p3)   ;;  %v2464_v11 = vld [vmem:[%s3087_s1 + $0x90] sm:$0xff] (!%p192_p3)  }
   0xa   : > { %2318 = vmatpush3.bf16.msra.mxu1 (!%p192_p3), %v2456_v3  ;;  %2207 = vmatprep.subr.bf16.mxu0 (!%p192_p3), %v2457_v4  ;;  %v2465_v12 = vld [vmem:[%s3087_s1 + $0x58] sm:$0xff] (!%p192_p3)   ;;  %v2469_v16 = vld [vmem:[%s3087_s1 + $0x60] sm:$0xff] (!%p192_p3)   ;;  %v2473_v20 = vld [vmem:[%s3087_s1 + $0x68] sm:$0xff] (!%p192_p3)  }
   0xb   : > { %2319 = vmatprep.subr.bf16.mxu1 (!%p192_p3), %v2458_v5  ;;  %v2466_v13 = vld [vmem:[%s3087_s1 + $0xd8] sm:$0xff] (!%p192_p3)   ;;  %v2470_v17 = vld [vmem:[%s3087_s1 + $0xe0] sm:$0xff] (!%p192_p3)   ;;  %v2474_v21 = vld [vmem:[%s3087_s1 + $0xe8] sm:$0xff] (!%p192_p3)  }
   0xc   : > { %v2467_v14 = vld [vmem:[%s3087_s1 + $0x18] sm:$0xff] (!%p192_p3)   ;;  %v2471_v18 = vld [vmem:[%s3087_s1 + $0x20] sm:$0xff] (!%p192_p3)   ;;  %v2475_v22 = vld [vmem:[%s3087_s1 + $0x28] sm:$0xff] (!%p192_p3)  }
   0xd   : > { %2208 = vmatpush3.bf16.msra.mxu0 (!%p192_p3), %v2459_v6  ;;  %v2468_v15 = vld [vmem:[%s3087_s1 + $0x98] sm:$0xff] (!%p192_p3)   ;;  %v2472_v19 = vld [vmem:[%s3087_s1 + $0xa0] sm:$0xff] (!%p192_p3)   ;;  %v2476_v23 = vld [vmem:[%s3087_s1 + $0xa8] sm:$0xff] (!%p192_p3)  }
   0xe   : > { %2320 = vmatpush3.bf16.msra.mxu1 %v2460_v7  ;;  %2209 = vmatprep.subr.bf16.mxu0 %v2461_v8  ;;  %s3095_s25 = smov (!%p236_p4, %s1909_s25), 63  ;;  %v2477_v24 = vld [vmem:[%s3087_s1 + $0x70] sm:$0xff]   ;;  %v2481_v28 = vld [vmem:[%s3087_s1 + $0x78] sm:$0xff]  }
   0xf   : > { %2321 = vmatprep.subr.bf16.mxu1 %v2462_v9  ;;  %v2478_v25 = vld [vmem:[%s3087_s1 + $0xf0] sm:$0xff]   ;;  %s2077_s24 = sshll.u32 %s3095_s25, 4  ;;  %v2482_v29 = vld [vmem:[%s3087_s1 + $0xf8] sm:$0xff]   ;;  %s1913_s17 = sshll.u32 %s3095_s25, 2 }
  0x10   : > { %v2479_v26 = vld [vmem:[%s3087_s1 + $0x30] sm:$0xff]   ;;  %s2806_s12 = scalar_lea.vmem %s3086_s0, %s2077_s24  ;;  %v2483_v30 = vld [vmem:[%s3087_s1 + $0x38] sm:$0xff]   ;;  %s2914_s19 = scalar_lea.vmem %s3089_s3, %s1913_s17 }
  0x11   : > { %2210 = vmatpush3.bf16.msra.mxu0 %v2463_v10  ;;  %v2480_v27 = vld [vmem:[%s3087_s1 + $0xb0] sm:$0xff]   ;;  %v2484_v31 = vld [vmem:[%s3087_s1 + $0xb8] sm:$0xff]  }
  0x12   : > { %2322 = vmatpush3.bf16.msra.mxu1 %v2464_v11  ;;  %2211 = vmatprep.subr.bf16.mxu0 %v2465_v12  ;;  %v2485_v32 = vld [vmem:[%s2806_s12] ss:$16 sps:$4 sm:$0xff]   ;;  %v2487_v33 = vld [vmem:[%s2806_s12 + $0x4] ss:$16 sps:$4 sm:$0xff]   ;;  %v2488_v34 = vld [vmem:[%s2806_s12 + $0x8] ss:$16 sps:$4 sm:$0xff]  }
  0x13   : > { %2323 = vmatprep.subr.bf16.mxu1 %v2466_v13  ;;  %v2490_v35 = vld [vmem:[%s2806_s12 + $0xc] ss:$16 sps:$4 sm:$0xff]   ;;  %1008 = vmatprep.mubr.bf16.mxu0 %v2487_v33  ;;  %v2491_v36 = vld [vmem:[%s2806_s12 + $0x24] ss:$16 sps:$4 sm:$0xff]   ;;  %v2495_v38 = vld [vmem:[%s2806_s12 + $0x20] ss:$16 sps:$4 sm:$0xff]  }
  0x14   : > { %1169 = vmatprep.mubr.bf16.mxu1 %v2490_v35  ;;  %v2493_v37 = vld [vmem:[%s2806_s12 + $0x2c] ss:$16 sps:$4 sm:$0xff]   ;;  %v2496_v39 = vld [vmem:[%s2806_s12 + $0x28] ss:$16 sps:$4 sm:$0xff]   ;;  %v2497_v40 = vld [vmem:[%s2806_s12 + $0x44] ss:$16 sps:$4 sm:$0xff]  }
  0x15   : > { %2212 = vmatpush3.bf16.msra.mxu0 %v2467_v14  ;;  %v2499_v41 = vld [vmem:[%s2806_s12 + $0x4c] ss:$16 sps:$4 sm:$0xff]   ;;  %v2501_v42 = vld [vmem:[%s2806_s12 + $0x40] ss:$16 sps:$4 sm:$0xff]   ;;  %v2502_v43 = vld [vmem:[%s2806_s12 + $0x48] ss:$16 sps:$4 sm:$0xff]  }
  0x16   : > { %2324 = vmatpush3.bf16.msra.mxu1 %v2468_v15  ;;  %2213 = vmatprep.subr.bf16.mxu0 %v2469_v16  ;;  %v2503_v44 = vld [vmem:[%s2806_s12 + $0x64] ss:$16 sps:$4 sm:$0xff]   ;;  %v2505_v45 = vld [vmem:[%s2806_s12 + $0x6c] ss:$16 sps:$4 sm:$0xff]   ;;  %v2507_v46 = vld [vmem:[%s2806_s12 + $0x60] ss:$16 sps:$4 sm:$0xff]  }
  0x17   : > { %2325 = vmatprep.subr.bf16.mxu1 %v2470_v17  ;;  %v2508_v47 = vld [vmem:[%s2806_s12 + $0x68] ss:$16 sps:$4 sm:$0xff]   ;;  %v2509_v48 = vld [vmem:[%s2806_s12 + $0x84] ss:$16 sps:$4 sm:$0xff]   ;;  %v2511_v49 = vld [vmem:[%s2806_s12 + $0x8c] ss:$16 sps:$4 sm:$0xff]  }
  0x18   : > { %v2513_v50 = vld [vmem:[%s2806_s12 + $0x80] ss:$16 sps:$4 sm:$0xff]   ;;  %v2514_v51 = vld [vmem:[%s2806_s12 + $0x88] ss:$16 sps:$4 sm:$0xff]   ;;  %v2515_v52 = vld [vmem:[%s2806_s12 + $0xa4] ss:$16 sps:$4 sm:$0xff]  }
  0x19   : > { %2214 = vmatpush3.bf16.msra.mxu0 %v2471_v18  ;;  %v2517_v53 = vld [vmem:[%s2806_s12 + $0xac] ss:$16 sps:$4 sm:$0xff]   ;;  %v2519_v54 = vld [vmem:[%s2806_s12 + $0xa0] ss:$16 sps:$4 sm:$0xff]   ;;  %v2520_v55 = vld [vmem:[%s2806_s12 + $0xa8] ss:$16 sps:$4 sm:$0xff]  }
  0x1a   : > { %2326 = vmatpush3.bf16.msra.mxu1 %v2472_v19  ;;  %2215 = vmatprep.subr.bf16.mxu0 %v2473_v20  ;;  %v2521_v56 = vld [vmem:[%s2806_s12 + $0xc4] ss:$16 sps:$4 sm:$0xff]   ;;  %v2523_v57 = vld [vmem:[%s2806_s12 + $0xcc] ss:$16 sps:$4 sm:$0xff]   ;;  %v2525_v58 = vld [vmem:[%s2806_s12 + $0xc0] ss:$16 sps:$4 sm:$0xff]  }
  0x1b   : > { %2327 = vmatprep.subr.bf16.mxu1 %v2474_v21  ;;  %v2526_v59 = vld [vmem:[%s2806_s12 + $0xc8] ss:$16 sps:$4 sm:$0xff]   ;;  %v2527_v60 = vld [vmem:[%s2806_s12 + $0xe4] ss:$16 sps:$4 sm:$0xff]   ;;  %v2529_v61 = vld [vmem:[%s2806_s12 + $0xec] ss:$16 sps:$4 sm:$0xff]  }
  0x1c   : > { %v2531_v62 = vld [vmem:[%s2806_s12 + $0xe0] ss:$16 sps:$4 sm:$0xff]   ;;  %v2532_v63 = vld [vmem:[%s2806_s12 + $0xe8] ss:$16 sps:$4 sm:$0xff]   ;;  %v2533_v0 = vld [vmem:[%s2806_s12 + $0x104] ss:$16 sps:$4 sm:$0xff]  }
  0x1d   : > { %2216 = vmatpush3.bf16.msra.mxu0 %v2475_v22  ;;  %v2535_v1 = vld [vmem:[%s2806_s12 + $0x10c] ss:$16 sps:$4 sm:$0xff]   ;;  %v2537_v2 = vld [vmem:[%s2806_s12 + $0x100] ss:$16 sps:$4 sm:$0xff]   ;;  %v2538_v3 = vld [vmem:[%s2806_s12 + $0x108] ss:$16 sps:$4 sm:$0xff]  }
  0x1e   : > { %2328 = vmatpush3.bf16.msra.mxu1 %v2476_v23  ;;  %2217 = vmatprep.subr.bf16.mxu0 %v2477_v24  ;;  %v2539_v4 = vld [vmem:[%s2806_s12 + $0x124] ss:$16 sps:$4 sm:$0xff]   ;;  %v2541_v5 = vld [vmem:[%s2806_s12 + $0x12c] ss:$16 sps:$4 sm:$0xff]   ;;  %v2543_v6 = vld [vmem:[%s2806_s12 + $0x120] ss:$16 sps:$4 sm:$0xff]  }
  0x1f   : > { %2329 = vmatprep.subr.bf16.mxu1 %v2478_v25  ;;  %v2544_v7 = vld [vmem:[%s2806_s12 + $0x128] ss:$16 sps:$4 sm:$0xff]   ;;  %v2545_v8 = vld [vmem:[%s2806_s12 + $0x144] ss:$16 sps:$4 sm:$0xff]   ;;  %v2547_v9 = vld [vmem:[%s2806_s12 + $0x14c] ss:$16 sps:$4 sm:$0xff]  }
  0x20   : > { %v2549_v10 = vld [vmem:[%s2806_s12 + $0x140] ss:$16 sps:$4 sm:$0xff]   ;;  %v2550_v11 = vld [vmem:[%s2806_s12 + $0x148] ss:$16 sps:$4 sm:$0xff]   ;;  %v2551_v12 = vld [vmem:[%s2806_s12 + $0x164] ss:$16 sps:$4 sm:$0xff]  }
  0x21   : > { %2218 = vmatpush3.bf16.msra.mxu0 %v2479_v26  ;;  %v2553_v13 = vld [vmem:[%s2806_s12 + $0x16c] ss:$16 sps:$4 sm:$0xff]   ;;  %v2555_v14 = vld [vmem:[%s2806_s12 + $0x160] ss:$16 sps:$4 sm:$0xff]   ;;  %v2556_v15 = vld [vmem:[%s2806_s12 + $0x168] ss:$16 sps:$4 sm:$0xff]  }
  0x22   : > { %2330 = vmatpush3.bf16.msra.mxu1 %v2480_v27  ;;  %2219 = vmatprep.subr.bf16.mxu0 %v2481_v28  ;;  %v2557_v16 = vld [vmem:[%s2806_s12 + $0x184] ss:$16 sps:$4 sm:$0xff]   ;;  %v2559_v17 = vld [vmem:[%s2806_s12 + $0x18c] ss:$16 sps:$4 sm:$0xff]   ;;  %v2561_v18 = vld [vmem:[%s2806_s12 + $0x180] ss:$16 sps:$4 sm:$0xff]  }
  0x23   : > { %2331 = vmatprep.subr.bf16.mxu1 %v2482_v29  ;;  %v2562_v19 = vld [vmem:[%s2806_s12 + $0x188] ss:$16 sps:$4 sm:$0xff]   ;;  %v2563_v20 = vld [vmem:[%s2806_s12 + $0x1a4] ss:$16 sps:$4 sm:$0xff]   ;;  %v2565_v21 = vld [vmem:[%s2806_s12 + $0x1ac] ss:$16 sps:$4 sm:$0xff]  }
  0x24   : > { %v2567_v22 = vld [vmem:[%s2806_s12 + $0x1a0] ss:$16 sps:$4 sm:$0xff]   ;;  %v2568_v23 = vld [vmem:[%s2806_s12 + $0x1a8] ss:$16 sps:$4 sm:$0xff]   ;;  %v2569_v24 = vld [vmem:[%s2806_s12 + $0x1c4] ss:$16 sps:$4 sm:$0xff]  }
  0x25   : > { %2220 = vmatpush3.bf16.msra.mxu0 %v2483_v30  ;;  %v2571_v25 = vld [vmem:[%s2806_s12 + $0x1cc] ss:$16 sps:$4 sm:$0xff]   ;;  %v2573_v26 = vld [vmem:[%s2806_s12 + $0x1c0] ss:$16 sps:$4 sm:$0xff]   ;;  %v2574_v27 = vld [vmem:[%s2806_s12 + $0x1c8] ss:$16 sps:$4 sm:$0xff]  }
  0x26   : > { %2332 = vmatpush3.bf16.msra.mxu1 %v2484_v31  ;;  %v2575_v28 = vld [vmem:[%s2806_s12 + $0x1e4] ss:$16 sps:$4 sm:$0xff]   ;;  %v2577_v29 = vld [vmem:[%s2806_s12 + $0x1ec] ss:$16 sps:$4 sm:$0xff]   ;;  %v2579_v30 = vld [vmem:[%s2806_s12 + $0x1e0] ss:$16 sps:$4 sm:$0xff]  }
  0x27   : > { %v2580_v31 = vld [vmem:[%s2806_s12 + $0x1e8] ss:$16 sps:$4 sm:$0xff]  }
  0x28   : > { %1009 = vmatmul.mubr.bf16.vlgmr.msra.gmra.mrb[0].mxu0 %v2485_v32 }
  0x29   : > { %1170 = vmatmul.mubr.bf16.vlgmr.msra.gmra.mrb[0].mxu1 %v2488_v34  ;;  %1016 = vmatprep.mubr.bf16.mxu0 %v2491_v36 }
  0x2a   : > { %1177 = vmatprep.mubr.bf16.mxu1 %v2493_v37 }
  0x30   : > { %1017 = vmatmul.mubr.bf16.gmra.mrb[4].mxu0 %v2495_v38 }
  0x31   : > { %1178 = vmatmul.mubr.bf16.gmra.mrb[4].mxu1 %v2496_v39  ;;  %1024 = vmatprep.mubr.bf16.mxu0 %v2497_v40 }
  0x32   : > { %1185 = vmatprep.mubr.bf16.mxu1 %v2499_v41  ;;  %v2881_v41 = vld [vmem:[%s3088_s2] ss:$0 sm:$0xff] }
  0x38   : > { %1025 = vmatmul.mubr.bf16.gmra.mrb[8].mxu0 %v2501_v42 }
  0x39   : > { %1186 = vmatmul.mubr.bf16.gmra.mrb[8].mxu1 %v2502_v43  ;;  %1032 = vmatprep.mubr.bf16.mxu0 %v2503_v44 }
  0x3a   : > { %1193 = vmatprep.mubr.bf16.mxu1 %v2505_v45 }
  0x40   : > { %1033 = vmatmul.mubr.bf16.gmra.mrb[12].mxu0 %v2507_v46 }
  0x41   : > { %1194 = vmatmul.mubr.bf16.gmra.mrb[12].mxu1 %v2508_v47  ;;  %1040 = vmatprep.mubr.bf16.mxu0 %v2509_v48 }
  0x42   : > { %1201 = vmatprep.mubr.bf16.mxu1 %v2511_v49 }
  0x48   : > { %1041 = vmatmul.mubr.bf16.gmra.mrb[16].mxu0 %v2513_v50 }
  0x49   : > { %1202 = vmatmul.mubr.bf16.gmra.mrb[16].mxu1 %v2514_v51  ;;  %1048 = vmatprep.mubr.bf16.mxu0 %v2515_v52 }
  0x4a   : > { %1209 = vmatprep.mubr.bf16.mxu1 %v2517_v53 }
  0x50   : > { %1049 = vmatmul.mubr.bf16.gmra.mrb[20].mxu0 %v2519_v54 }
  0x51   : > { %1210 = vmatmul.mubr.bf16.gmra.mrb[20].mxu1 %v2520_v55  ;;  %1056 = vmatprep.mubr.bf16.mxu0 %v2521_v56 }
  0x52   : > { %1217 = vmatprep.mubr.bf16.mxu1 %v2523_v57 }
  0x58   : > { %1057 = vmatmul.mubr.bf16.gmra.mrb[24].mxu0 %v2525_v58 }
  0x59   : > { %1218 = vmatmul.mubr.bf16.gmra.mrb[24].mxu1 %v2526_v59  ;;  %1064 = vmatprep.mubr.bf16.mxu0 %v2527_v60 }
  0x5a   : > { %1225 = vmatprep.mubr.bf16.mxu1 %v2529_v61 }
  0x60   : > { %1065 = vmatmul.mubr.bf16.gmra.mrb[28].mxu0 %v2531_v62 }
  0x61   : > { %1226 = vmatmul.mubr.bf16.gmra.mrb[28].mxu1 %v2532_v63  ;;  %1072 = vmatprep.mubr.bf16.mxu0 %v2533_v0 }
  0x62   : > { %1233 = vmatprep.mubr.bf16.mxu1 %v2535_v1 }
  0x68   : > { %1073 = vmatmul.mubr.bf16.gmra.mrb[32].mxu0 %v2537_v2 }
  0x69   : > { %1234 = vmatmul.mubr.bf16.gmra.mrb[32].mxu1 %v2538_v3  ;;  %1080 = vmatprep.mubr.bf16.mxu0 %v2539_v4 }
  0x6a   : > { %1241 = vmatprep.mubr.bf16.mxu1 %v2541_v5 }
  0x70   : > { %1081 = vmatmul.mubr.bf16.gmra.mrb[36].mxu0 %v2543_v6 }
  0x71   : > { %1242 = vmatmul.mubr.bf16.gmra.mrb[36].mxu1 %v2544_v7  ;;  %1088 = vmatprep.mubr.bf16.mxu0 %v2545_v8 }
  0x72   : > { %1249 = vmatprep.mubr.bf16.mxu1 %v2547_v9 }
  0x78   : > { %1089 = vmatmul.mubr.bf16.gmra.mrb[40].mxu0 %v2549_v10 }
  0x79   : > { %1250 = vmatmul.mubr.bf16.gmra.mrb[40].mxu1 %v2550_v11  ;;  %1096 = vmatprep.mubr.bf16.mxu0 %v2551_v12 }
  0x7a   : > { %1257 = vmatprep.mubr.bf16.mxu1 %v2553_v13 }
  0x80   : > { %1097 = vmatmul.mubr.bf16.gmra.mrb[44].mxu0 %v2555_v14 }
  0x81   : > { %1258 = vmatmul.mubr.bf16.gmra.mrb[44].mxu1 %v2556_v15  ;;  %1104 = vmatprep.mubr.bf16.mxu0 %v2557_v16 }
  0x82   : > { %1265 = vmatprep.mubr.bf16.mxu1 %v2559_v17 }
  0x88   : > { %1105 = vmatmul.mubr.bf16.gmra.mrb[48].mxu0 %v2561_v18 }
  0x89   : > { %1266 = vmatmul.mubr.bf16.gmra.mrb[48].mxu1 %v2562_v19  ;;  %1112 = vmatprep.mubr.bf16.mxu0 %v2563_v20 }
  0x8a   : > { %1273 = vmatprep.mubr.bf16.mxu1 %v2565_v21 }
  0x90   : > { %1113 = vmatmul.mubr.bf16.gmra.mrb[52].mxu0 %v2567_v22 }
  0x91   : > { %1274 = vmatmul.mubr.bf16.gmra.mrb[52].mxu1 %v2568_v23  ;;  %1120 = vmatprep.mubr.bf16.mxu0 %v2569_v24 }
  0x92   : > { %1281 = vmatprep.mubr.bf16.mxu1 %v2571_v25 }
  0x98   : > { %1121 = vmatmul.mubr.bf16.gmra.mrb[56].mxu0 %v2573_v26 }
  0x99   : > { %1282 = vmatmul.mubr.bf16.gmra.mrb[56].mxu1 %v2574_v27  ;;  %1128 = vmatprep.mubr.bf16.mxu0 %v2575_v28 }
  0x9a   : > { %1289 = vmatprep.mubr.bf16.mxu1 %v2577_v29 }
  0xa0   : > { %1129 = vmatmul.mubr.bf16.gmra.mrb[60].mxu0 %v2579_v30 }
  0xa1   : > { %1290 = vmatmul.mubr.bf16.gmra.mrb[60].mxu1 %v2580_v31 }
  0xfb   : > { %v2221_v32 = vpop.f32.mrb[0].mxu0 }
  0xfc   : > { %v2333_v33 = vpop.f32.mrb[0].mxu1  ;;  %v2222_v34 = vpop.f32.mrb[1].mxu0 }
  0xfd   : > { %v2223_v35 = vadd.f32 %v2222_v34, %v2221_v32  ;;  %v2334_v36 = vpop.f32.mrb[1].mxu1  ;;  %v2224_v37 = vpop.f32.mrb[2].mxu0 }
  0xfe   : > { %v2335_v38 = vadd.f32 %v2334_v36, %v2333_v33  ;;  %v2336_v39 = vpop.f32.mrb[2].mxu1  ;;  %v2225_v40 = vpop.f32.mrb[3].mxu0 }
  0xff   : > { %v2226_v42 = vadd.f32 %v2225_v40, %v2224_v37  ;;  %v2337_v43 = vpop.f32.mrb[3].mxu1 }
 0x100   : > { %v1172_v44 = vadd.f32 %v2335_v38, %v2223_v35  ;;  %v2338_v45 = vadd.f32 %v2337_v43, %v2336_v39 }
 0x102   : > { %v2884_v46 = vadd.f32 %v2881_v41, %v1172_v44  ;;  %v1175_v47 = vadd.f32 %v2338_v45, %v2226_v42 }
 0x103   : > { %v2227_v48 = vpop.f32.mrb[4].mxu0 }
 0x104   : > { %v1468_v49 = vmin.f32 %v2884_v46, 0.0  ;;  %v2888_v50 = vadd.f32 %v2881_v41, %v1175_v47  ;;  %v2339_v51 = vpop.f32.mrb[4].mxu1  ;;  %v2228_v52 = vpop.f32.mrb[5].mxu0  ;;  %vm1436_vm0 = vcmp.gt.f32.partialorder %v2884_v46, 0.0 }
 0x105   : > { %v2229_v53 = vadd.f32 %v2228_v52, %v2227_v48  ;;  %v2340_v54 = vpop.f32.mrb[5].mxu1  ;;  %v2230_v55 = vpop.f32.mrb[6].mxu0 }
 0x106   : > { %v1500_v56 = vmul.f32 1.442695, %v1468_v49  ;;  %v1469_v57 = vmin.f32 %v2888_v50, 0.0  ;;  %v2341_v58 = vadd.f32 %v2340_v54, %v2339_v51  ;;  %v2342_v59 = vpop.f32.mrb[6].mxu1  ;;  %v2231_v60 = vpop.f32.mrb[7].mxu0  ;;  %vm1437_vm1 = vcmp.gt.f32.partialorder %v2888_v50, 0.0 }
 0x107   : > { %v2232_v61 = vadd.f32 %v2231_v60, %v2230_v55  ;;  %v2343_v62 = vpop.f32.mrb[7].mxu1 }
 0x108   : > { %2581 = vpow2.f32 %v1500_v56  ;;  %v1502_v63 = vmul.f32 1.442695, %v1469_v57  ;;  %v1180_v0 = vadd.f32 %v2341_v58, %v2229_v53  ;;  %v2344_v1 = vadd.f32 %v2343_v62, %v2342_v59 }
 0x10a   : > { %2583 = vpow2.f32 %v1502_v63  ;;  %v2892_v2 = vadd.f32 %v2881_v41, %v1180_v0  ;;  %v1183_v3 = vadd.f32 %v2344_v1, %v2232_v61 }
 0x10b   : > { %v2233_v4 = vpop.f32.mrb[8].mxu0 }
 0x10c   : > { %v1470_v5 = vmin.f32 %v2892_v2, 0.0  ;;  %v2896_v6 = vadd.f32 %v2881_v41, %v1183_v3  ;;  %v2345_v7 = vpop.f32.mrb[8].mxu1  ;;  %v2234_v8 = vpop.f32.mrb[9].mxu0  ;;  %vm1438_vm2 = vcmp.gt.f32.partialorder %v2892_v2, 0.0 }
 0x10d   : > { %v2235_v9 = vadd.f32 %v2234_v8, %v2233_v4  ;;  %v2346_v10 = vpop.f32.mrb[9].mxu1  ;;  %v2236_v11 = vpop.f32.mrb[10].mxu0 }
 0x10e   : > { %v1504_v12 = vmul.f32 1.442695, %v1470_v5  ;;  %v1471_v13 = vmin.f32 %v2896_v6, 0.0  ;;  %v2347_v14 = vadd.f32 %v2346_v10, %v2345_v7  ;;  %v2348_v15 = vpop.f32.mrb[10].mxu1  ;;  %v2237_v16 = vpop.f32.mrb[11].mxu0  ;;  %vm1439_vm3 = vcmp.gt.f32.partialorder %v2896_v6, 0.0 }
 0x10f   : > { %v2238_v17 = vadd.f32 %v2237_v16, %v2236_v11  ;;  %v2349_v18 = vpop.f32.mrb[11].mxu1 }
 0x110   : > { %2585 = vpow2.f32 %v1504_v12  ;;  %v1506_v19 = vmul.f32 1.442695, %v1471_v13  ;;  %v1188_v20 = vadd.f32 %v2347_v14, %v2235_v9  ;;  %v2350_v21 = vadd.f32 %v2349_v18, %v2348_v15 }
 0x112   : > { %v2582_v22 = vpop.eup %2581  ;;  %2587 = vpow2.f32 %v1506_v19  ;;  %v2900_v23 = vadd.f32 %v2881_v41, %v1188_v20  ;;  %v1191_v24 = vadd.f32 %v2350_v21, %v2238_v17 }
 0x113   : > { %v2011_v25 = vadd.f32 -1.0, %v2582_v22  ;;  %v2239_v26 = vpop.f32.mrb[12].mxu0 }
 0x114   : > { %v2584_v27 = vpop.eup %2583  ;;  %v1472_v28 = vmin.f32 %v2900_v23, 0.0  ;;  %v2905_v29 = vadd.f32 %v2881_v41, %v1191_v24  ;;  %v2351_v30 = vpop.f32.mrb[12].mxu1  ;;  %vm1440_vm4 = vcmp.gt.f32.partialorder %v2900_v23, 0.0 }
 0x115   : > { %v2240_v31 = vpop.f32.mrb[13].mxu0  ;;  %v2012_v32 = vadd.f32 -1.0, %v2584_v27  ;;  %v2352_v34 = vpop.f32.mrb[13].mxu1  ;;  %v1596_v42 = vsel %vm1436_vm0, %v2884_v46, %v2011_v25 }
 0x116   : > { %v2241_v33 = vadd.f32 %v2240_v31, %v2239_v26  ;;  %v2242_v35 = vpop.f32.mrb[14].mxu0  ;;  %v1508_v36 = vmul.f32 1.442695, %v1472_v28  ;;  %v1473_v37 = vmin.f32 %v2905_v29, 0.0  ;;  %v2353_v38 = vadd.f32 %v2352_v34, %v2351_v30  ;;  %v2354_v39 = vpop.f32.mrb[14].mxu1 }
 0x117   : > { %v2243_v40 = vpop.f32.mrb[15].mxu0  ;;  %v1597_v43 = vsel %vm1437_vm1, %v2888_v50, %v2012_v32  ;;  %v2355_v45 = vpop.f32.mrb[15].mxu1  ;;  %vm1441_vm5 = vcmp.gt.f32.partialorder %v2905_v29, 0.0 }
 0x118   : > { %v2244_v44 = vadd.f32 %v2243_v40, %v2242_v35  ;;  %v2113_v47 = vpack.c.bf16 %v1597_v43, %v1596_v42  ;;  %2589 = vpow2.f32 %v1508_v36  ;;  %v1510_v48 = vmul.f32 1.442695, %v1473_v37 }
 0x119   : > { %v1196_v49 = vadd.f32 %v2353_v38, %v2241_v33  ;;  %v2356_v51 = vadd.f32 %v2355_v45, %v2354_v39 }
 0x11a   : > { %v2586_v52 = vpop.eup %2585  ;;  %2114 = vst [vmem:[%s2914_s19] sm:$0xff] %v2113_v47   ;;  %2591 = vpow2.f32 %v1510_v48 }
 0x11b   : > { %v2919_v46 = vadd.f32 %v2881_v41, %v1196_v49  ;;  %v2013_v53 = vadd.f32 -1.0, %v2586_v52  ;;  %v1199_v54 = vadd.f32 %v2356_v51, %v2244_v44  ;;  %v2245_v55 = vpop.f32.mrb[16].mxu0 }
 0x11c   : > { %v2588_v56 = vpop.eup %2587  ;;  %v2357_v50 = vpop.f32.mrb[16].mxu1 }
 0x11d   : > { %v1474_v57 = vmin.f32 %v2919_v46, 0.0  ;;  %v2246_v58 = vpop.f32.mrb[17].mxu0  ;;  %v2014_v59 = vadd.f32 -1.0, %v2588_v56  ;;  %v2923_v60 = vadd.f32 %v2881_v41, %v1199_v54  ;;  %v2358_v62 = vpop.f32.mrb[17].mxu1  ;;  %v1598_v5 = vsel %vm1438_vm2, %v2892_v2, %v2013_v53 }
 0x11e   : > { %v2247_v61 = vadd.f32 %v2246_v58, %v2245_v55  ;;  %v2248_v63 = vpop.f32.mrb[18].mxu0  ;;  %v2359_v1 = vadd.f32 %v2358_v62, %v2357_v50  ;;  %v2360_v3 = vpop.f32.mrb[18].mxu1  ;;  %vm1442_vm6 = vcmp.gt.f32.partialorder %v2919_v46, 0.0 }
 0x11f   : > { %v1512_v0 = vmul.f32 1.442695, %v1474_v57  ;;  %v2249_v4 = vpop.f32.mrb[19].mxu0  ;;  %v1599_v7 = vsel %vm1439_vm3, %v2896_v6, %v2014_v59  ;;  %v1475_v8 = vmin.f32 %v2923_v60, 0.0  ;;  %v2361_v10 = vpop.f32.mrb[19].mxu1  ;;  %vm1443_vm7 = vcmp.gt.f32.partialorder %v2923_v60, 0.0 }
 0x120   : > { %v2250_v9 = vadd.f32 %v2249_v4, %v2248_v63  ;;  %v2118_v11 = vpack.c.bf16 %v1599_v7, %v1598_v5  ;;  %v1204_v12 = vadd.f32 %v2359_v1, %v2247_v61  ;;  %v2362_v13 = vadd.f32 %v2361_v10, %v2360_v3 }
 0x121   : > { %2593 = vpow2.f32 %v1512_v0  ;;  %v1514_v14 = vmul.f32 1.442695, %v1475_v8 }
 0x122   : > { %v2590_v15 = vpop.eup %2589  ;;  %2190 = vst [vmem:[%s2914_s19 + $0x8] sm:$0xff] %v2118_v11   ;;  %v2932_v16 = vadd.f32 %v2881_v41, %v1204_v12  ;;  %v1207_v17 = vadd.f32 %v2362_v13, %v2250_v9 }
 0x123   : > { %v2015_v18 = vadd.f32 -1.0, %v2590_v15  ;;  %2595 = vpow2.f32 %v1514_v14  ;;  %v2251_v2 = vpop.f32.mrb[20].mxu0 }
 0x124   : > { %v2592_v19 = vpop.eup %2591  ;;  %v1476_v6 = vmin.f32 %v2932_v16, 0.0  ;;  %v2936_v20 = vadd.f32 %v2881_v41, %v1207_v17  ;;  %v2363_v21 = vpop.f32.mrb[20].mxu1  ;;  %vm1444_vm8 = vcmp.gt.f32.partialorder %v2932_v16, 0.0 }
 0x125   : > { %v2252_v22 = vpop.f32.mrb[21].mxu0  ;;  %v2016_v24 = vadd.f32 -1.0, %v2592_v19  ;;  %v2364_v26 = vpop.f32.mrb[21].mxu1  ;;  %v1600_v34 = vsel %vm1440_vm4, %v2900_v23, %v2015_v18 }
 0x126   : > { %v2253_v25 = vadd.f32 %v2252_v22, %v2251_v2  ;;  %v2254_v27 = vpop.f32.mrb[22].mxu0  ;;  %v1516_v28 = vmul.f32 1.442695, %v1476_v6  ;;  %v1477_v30 = vmin.f32 %v2936_v20, 0.0  ;;  %v2365_v31 = vadd.f32 %v2364_v26, %v2363_v21  ;;  %v2366_v32 = vpop.f32.mrb[22].mxu1 }
 0x127   : > { %v2255_v33 = vpop.f32.mrb[23].mxu0  ;;  %v1601_v35 = vsel %vm1441_vm5, %v2905_v29, %v2016_v24  ;;  %v2367_v37 = vpop.f32.mrb[23].mxu1  ;;  %vm1445_vm9 = vcmp.gt.f32.partialorder %v2936_v20, 0.0 }
 0x128   : > { %v2256_v36 = vadd.f32 %v2255_v33, %v2254_v27  ;;  %v2123_v38 = vpack.c.bf16 %v1601_v35, %v1600_v34  ;;  %2597 = vpow2.f32 %v1516_v28  ;;  %v1518_v39 = vmul.f32 1.442695, %v1477_v30 }
 0x129   : > { %v1212_v40 = vadd.f32 %v2365_v31, %v2253_v25  ;;  %v2368_v42 = vadd.f32 %v2367_v37, %v2366_v32 }
 0x12a   : > { %2191 = vst [vmem:[%s2914_s19 + $0x10] sm:$0xff] %v2123_v38   ;;  %2599 = vpow2.f32 %v1518_v39 }
 0x12b   : > { %v2594_v43 = vpop.eup %2593  ;;  %v2945_v44 = vadd.f32 %v2881_v41, %v1212_v40  ;;  %v1215_v47 = vadd.f32 %v2368_v42, %v2256_v36  ;;  %v2257_v48 = vpop.f32.mrb[24].mxu0 }
 0x12c   : > { %v2017_v45 = vadd.f32 -1.0, %v2594_v43  ;;  %v2369_v49 = vpop.f32.mrb[24].mxu1  ;;  %v2258_v29 = vpop.f32.mrb[25].mxu0 }
 0x12d   : > { %v1478_v23 = vmin.f32 %v2945_v44, 0.0  ;;  %v2596_v51 = vpop.eup %2595  ;;  %v2949_v52 = vadd.f32 %v2881_v41, %v1215_v47  ;;  %v2259_v53 = vadd.f32 %v2258_v29, %v2257_v48  ;;  %v2370_v54 = vpop.f32.mrb[25].mxu1  ;;  %vm1446_vm10 = vcmp.gt.f32.partialorder %v2945_v44, 0.0 }
 0x12e   : > { %v2260_v55 = vpop.f32.mrb[26].mxu0  ;;  %v2018_v56 = vadd.f32 -1.0, %v2596_v51  ;;  %v2371_v50 = vadd.f32 %v2370_v54, %v2369_v49  ;;  %v2372_v58 = vpop.f32.mrb[26].mxu1  ;;  %v1602_v61 = vsel %vm1442_vm6, %v2919_v46, %v2017_v45 }
 0x12f   : > { %v1520_v57 = vmul.f32 1.442695, %v1478_v23  ;;  %v2261_v59 = vpop.f32.mrb[27].mxu0  ;;  %v1479_v62 = vmin.f32 %v2949_v52, 0.0  ;;  %v2373_v0 = vpop.f32.mrb[27].mxu1  ;;  %vm1447_vm11 = vcmp.gt.f32.partialorder %v2949_v52, 0.0 }
 0x130   : > { %v2262_v63 = vadd.f32 %v2261_v59, %v2260_v55  ;;  %v1603_v1 = vsel %vm1443_vm7, %v2923_v60, %v2018_v56  ;;  %v1220_v3 = vadd.f32 %v2371_v50, %v2259_v53  ;;  %v2374_v4 = vadd.f32 %v2373_v0, %v2372_v58 }
 0x131   : > { %2601 = vpow2.f32 %v1520_v57  ;;  %v2128_v5 = vpack.c.bf16 %v1603_v1, %v1602_v61  ;;  %v1522_v7 = vmul.f32 1.442695, %v1479_v62 }
 0x132   : > { %v2598_v8 = vpop.eup %2597  ;;  %v2957_v9 = vadd.f32 %v2881_v41, %v1220_v3  ;;  %v1223_v10 = vadd.f32 %v2374_v4, %v2262_v63 }
 0x133   : > { %2192 = vst [vmem:[%s2914_s19 + $0x18] sm:$0xff] %v2128_v5   ;;  %v2019_v46 = vadd.f32 -1.0, %v2598_v8  ;;  %2603 = vpow2.f32 %v1522_v7  ;;  %v2263_v11 = vpop.f32.mrb[28].mxu0 }
 0x134   : > { %v2600_v12 = vpop.eup %2599  ;;  %v1480_v13 = vmin.f32 %v2957_v9, 0.0  ;;  %v2962_v14 = vadd.f32 %v2881_v41, %v1223_v10  ;;  %v2375_v60 = vpop.f32.mrb[28].mxu1  ;;  %vm1448_vm12 = vcmp.gt.f32.partialorder %v2957_v9, 0.0 }
 0x135   : > { %v2264_v15 = vpop.f32.mrb[29].mxu0  ;;  %v2020_v17 = vadd.f32 -1.0, %v2600_v12  ;;  %v2376_v2 = vpop.f32.mrb[29].mxu1  ;;  %v1604_v26 = vsel %vm1444_vm8, %v2932_v16, %v2019_v46 }
 0x136   : > { %v2265_v18 = vadd.f32 %v2264_v15, %v2263_v11  ;;  %v2266_v19 = vpop.f32.mrb[30].mxu0  ;;  %v1524_v6 = vmul.f32 1.442695, %v1480_v13  ;;  %v1481_v21 = vmin.f32 %v2962_v14, 0.0  ;;  %v2377_v22 = vadd.f32 %v2376_v2, %v2375_v60  ;;  %v2378_v24 = vpop.f32.mrb[30].mxu1 }
 0x137   : > { %v2267_v25 = vpop.f32.mrb[31].mxu0  ;;  %v1605_v27 = vsel %vm1445_vm9, %v2936_v20, %v2020_v17  ;;  %v2379_v30 = vpop.f32.mrb[31].mxu1  ;;  %vm1449_vm13 = vcmp.gt.f32.partialorder %v2962_v14, 0.0 }
 0x138   : > { %v2268_v28 = vadd.f32 %v2267_v25, %v2266_v19  ;;  %v2133_v31 = vpack.c.bf16 %v1605_v27, %v1604_v26  ;;  %2605 = vpow2.f32 %v1524_v6  ;;  %v1526_v32 = vmul.f32 1.442695, %v1481_v21 }
 0x139   : > { %v1228_v33 = vadd.f32 %v2377_v22, %v2265_v18  ;;  %v2380_v34 = vadd.f32 %v2379_v30, %v2378_v24 }
 0x13a   : > { %2193 = vst [vmem:[%s2914_s19 + $0x20] sm:$0xff] %v2133_v31   ;;  %2607 = vpow2.f32 %v1526_v32 }
 0x13b   : > { %v2602_v35 = vpop.eup %2601  ;;  %v2971_v36 = vadd.f32 %v2881_v41, %v1228_v33  ;;  %v1231_v38 = vadd.f32 %v2380_v34, %v2268_v28  ;;  %v2269_v39 = vpop.f32.mrb[32].mxu0 }
 0x13c   : > { %v2021_v37 = vadd.f32 -1.0, %v2602_v35  ;;  %v2381_v40 = vpop.f32.mrb[32].mxu1  ;;  %v2270_v20 = vpop.f32.mrb[33].mxu0 }
 0x13d   : > { %v1482_v16 = vmin.f32 %v2971_v36, 0.0  ;;  %v2604_v42 = vpop.eup %2603  ;;  %v2975_v43 = vadd.f32 %v2881_v41, %v1231_v38  ;;  %v2271_v45 = vadd.f32 %v2270_v20, %v2269_v39  ;;  %v2382_v47 = vpop.f32.mrb[33].mxu1  ;;  %vm1450_vm14 = vcmp.gt.f32.partialorder %v2971_v36, 0.0 }
 0x13e   : > { %v2272_v48 = vpop.f32.mrb[34].mxu0  ;;  %v2022_v23 = vadd.f32 -1.0, %v2604_v42  ;;  %v2383_v29 = vadd.f32 %v2382_v47, %v2381_v40  ;;  %v2384_v51 = vpop.f32.mrb[34].mxu1  ;;  %v1606_v54 = vsel %vm1446_vm10, %v2945_v44, %v2021_v37 }
 0x13f   : > { %v1528_v49 = vmul.f32 1.442695, %v1482_v16  ;;  %v2273_v53 = vpop.f32.mrb[35].mxu0  ;;  %v1483_v55 = vmin.f32 %v2975_v43, 0.0  ;;  %v2385_v57 = vpop.f32.mrb[35].mxu1  ;;  %vm1451_vm15 = vcmp.gt.f32.partialorder %v2975_v43, 0.0 }
 0x140   : > { %v2274_v56 = vadd.f32 %v2273_v53, %v2272_v48  ;;  %v1607_v50 = vsel %vm1447_vm11, %v2949_v52, %v2022_v23  ;;  %v1236_v58 = vadd.f32 %v2383_v29, %v2271_v45  ;;  %v2386_v59 = vadd.f32 %v2385_v57, %v2384_v51 }
 0x141   : > { %2609 = vpow2.f32 %v1528_v49  ;;  %v2138_v61 = vpack.c.bf16 %v1607_v50, %v1606_v54  ;;  %v1530_v62 = vmul.f32 1.442695, %v1483_v55 }
 0x142   : > { %v2606_v63 = vpop.eup %2605  ;;  %v2983_v0 = vadd.f32 %v2881_v41, %v1236_v58  ;;  %v1239_v1 = vadd.f32 %v2386_v59, %v2274_v56 }
 0x143   : > { %2194 = vst [vmem:[%s2914_s19 + $0x28] sm:$0xff] %v2138_v61   ;;  %v2023_v44 = vadd.f32 -1.0, %v2606_v63  ;;  %2611 = vpow2.f32 %v1530_v62  ;;  %v2275_v3 = vpop.f32.mrb[36].mxu0 }
 0x144   : > { %v2608_v4 = vpop.eup %2607  ;;  %v1484_v5 = vmin.f32 %v2983_v0, 0.0  ;;  %v2988_v7 = vadd.f32 %v2881_v41, %v1239_v1  ;;  %v2387_v52 = vpop.f32.mrb[36].mxu1  ;;  %vm1452_vm0 = vcmp.gt.f32.partialorder %v2983_v0, 0.0 }
 0x145   : > { %v2276_v8 = vpop.f32.mrb[37].mxu0  ;;  %v2024_v10 = vadd.f32 -1.0, %v2608_v4  ;;  %v2388_v11 = vpop.f32.mrb[37].mxu1  ;;  %v1608_v2 = vsel %vm1448_vm12, %v2957_v9, %v2023_v44 }
 0x146   : > { %v2277_v46 = vadd.f32 %v2276_v8, %v2275_v3  ;;  %v2278_v12 = vpop.f32.mrb[38].mxu0  ;;  %v1532_v13 = vmul.f32 1.442695, %v1484_v5  ;;  %v1485_v60 = vmin.f32 %v2988_v7, 0.0  ;;  %v2389_v15 = vadd.f32 %v2388_v11, %v2387_v52  ;;  %v2390_v17 = vpop.f32.mrb[38].mxu1 }
 0x147   : > { %v2279_v18 = vpop.f32.mrb[39].mxu0  ;;  %v1609_v19 = vsel %vm1449_vm13, %v2962_v14, %v2024_v10  ;;  %v2391_v21 = vpop.f32.mrb[39].mxu1  ;;  %vm1453_vm1 = vcmp.gt.f32.partialorder %v2988_v7, 0.0 }
 0x148   : > { %v2280_v6 = vadd.f32 %v2279_v18, %v2278_v12  ;;  %v2143_v22 = vpack.c.bf16 %v1609_v19, %v1608_v2  ;;  %2613 = vpow2.f32 %v1532_v13  ;;  %v1534_v24 = vmul.f32 1.442695, %v1485_v60 }
 0x149   : > { %v1244_v25 = vadd.f32 %v2389_v15, %v2277_v46  ;;  %v2392_v26 = vadd.f32 %v2391_v21, %v2390_v17 }
 0x14a   : > { %2195 = vst [vmem:[%s2914_s19 + $0x30] sm:$0xff] %v2143_v22   ;;  %2615 = vpow2.f32 %v1534_v24 }
 0x14b   : > { %v2610_v27 = vpop.eup %2609  ;;  %v2997_v28 = vadd.f32 %v2881_v41, %v1244_v25  ;;  %v1247_v31 = vadd.f32 %v2392_v26, %v2280_v6  ;;  %v2281_v32 = vpop.f32.mrb[40].mxu0 }
 0x14c   : > { %v2025_v30 = vadd.f32 -1.0, %v2610_v27  ;;  %v2393_v33 = vpop.f32.mrb[40].mxu1  ;;  %v2282_v14 = vpop.f32.mrb[41].mxu0 }
 0x14d   : > { %v1486_v9 = vmin.f32 %v2997_v28, 0.0  ;;  %v2612_v34 = vpop.eup %2611  ;;  %v3001_v35 = vadd.f32 %v2881_v41, %v1247_v31  ;;  %v2283_v37 = vadd.f32 %v2282_v14, %v2281_v32  ;;  %v2394_v38 = vpop.f32.mrb[41].mxu1  ;;  %vm1454_vm2 = vcmp.gt.f32.partialorder %v2997_v28, 0.0 }
 0x14e   : > { %v2284_v39 = vpop.f32.mrb[42].mxu0  ;;  %v2026_v16 = vadd.f32 -1.0, %v2612_v34  ;;  %v2395_v20 = vadd.f32 %v2394_v38, %v2393_v33  ;;  %v2396_v42 = vpop.f32.mrb[42].mxu1  ;;  %v1610_v47 = vsel %vm1450_vm14, %v2971_v36, %v2025_v30 }
 0x14f   : > { %v1536_v40 = vmul.f32 1.442695, %v1486_v9  ;;  %v2285_v45 = vpop.f32.mrb[43].mxu0  ;;  %v1487_v48 = vmin.f32 %v3001_v35, 0.0  ;;  %v2397_v49 = vpop.f32.mrb[43].mxu1  ;;  %vm1455_vm3 = vcmp.gt.f32.partialorder %v3001_v35, 0.0 }
 0x150   : > { %v2286_v23 = vadd.f32 %v2285_v45, %v2284_v39  ;;  %v1611_v29 = vsel %vm1451_vm15, %v2975_v43, %v2026_v16  ;;  %v1252_v51 = vadd.f32 %v2395_v20, %v2283_v37  ;;  %v2398_v53 = vadd.f32 %v2397_v49, %v2396_v42 }
 0x151   : > { %2617 = vpow2.f32 %v1536_v40  ;;  %v2148_v54 = vpack.c.bf16 %v1611_v29, %v1610_v47  ;;  %v1538_v55 = vmul.f32 1.442695, %v1487_v48 }
 0x152   : > { %v2614_v56 = vpop.eup %2613  ;;  %v3009_v57 = vadd.f32 %v2881_v41, %v1252_v51  ;;  %v1255_v50 = vadd.f32 %v2398_v53, %v2286_v23 }
 0x153   : > { %2196 = vst [vmem:[%s2914_s19 + $0x38] sm:$0xff] %v2148_v54   ;;  %v2027_v36 = vadd.f32 -1.0, %v2614_v56  ;;  %2619 = vpow2.f32 %v1538_v55  ;;  %v2287_v58 = vpop.f32.mrb[44].mxu0 }
 0x154   : > { %v2616_v59 = vpop.eup %2615  ;;  %v1488_v61 = vmin.f32 %v3009_v57, 0.0  ;;  %v3014_v62 = vadd.f32 %v2881_v41, %v1255_v50  ;;  %v2399_v43 = vpop.f32.mrb[44].mxu1  ;;  %vm1456_vm4 = vcmp.gt.f32.partialorder %v3009_v57, 0.0 }
 0x155   : > { %v2288_v63 = vpop.f32.mrb[45].mxu0  ;;  %v2028_v1 = vadd.f32 -1.0, %v2616_v59  ;;  %v2400_v3 = vpop.f32.mrb[45].mxu1  ;;  %v1612_v11 = vsel %vm1452_vm0, %v2983_v0, %v2027_v36 }
 0x156   : > { %v2289_v44 = vadd.f32 %v2288_v63, %v2287_v58  ;;  %v2290_v4 = vpop.f32.mrb[46].mxu0  ;;  %v1540_v5 = vmul.f32 1.442695, %v1488_v61  ;;  %v1489_v52 = vmin.f32 %v3014_v62, 0.0  ;;  %v2401_v8 = vadd.f32 %v2400_v3, %v2399_v43  ;;  %v2402_v10 = vpop.f32.mrb[46].mxu1 }
 0x157   : > { %v2291_v46 = vpop.f32.mrb[47].mxu0  ;;  %v1613_v12 = vsel %vm1453_vm1, %v2988_v7, %v2028_v1  ;;  %v2403_v60 = vpop.f32.mrb[47].mxu1  ;;  %vm1457_vm5 = vcmp.gt.f32.partialorder %v3014_v62, 0.0 }
 0x158   : > { %v2292_v13 = vadd.f32 %v2291_v46, %v2290_v4  ;;  %v2153_v15 = vpack.c.bf16 %v1613_v12, %v1612_v11  ;;  %2621 = vpow2.f32 %v1540_v5  ;;  %v1542_v17 = vmul.f32 1.442695, %v1489_v52 }
 0x159   : > { %v1260_v18 = vadd.f32 %v2401_v8, %v2289_v44  ;;  %v2404_v2 = vadd.f32 %v2403_v60, %v2402_v10 }
 0x15a   : > { %2197 = vst [vmem:[%s2914_s19 + $0x40] sm:$0xff] %v2153_v15   ;;  %2623 = vpow2.f32 %v1542_v17 }
 0x15b   : > { %v2618_v19 = vpop.eup %2617  ;;  %v3023_v6 = vadd.f32 %v2881_v41, %v1260_v18  ;;  %v1263_v22 = vadd.f32 %v2404_v2, %v2292_v13  ;;  %v2293_v24 = vpop.f32.mrb[48].mxu0 }
 0x15c   : > { %v2029_v21 = vadd.f32 -1.0, %v2618_v19  ;;  %v2405_v25 = vpop.f32.mrb[48].mxu1  ;;  %v2294_v7 = vpop.f32.mrb[49].mxu0 }
 0x15d   : > { %v1490_v0 = vmin.f32 %v3023_v6, 0.0  ;;  %v2620_v26 = vpop.eup %2619  ;;  %v3027_v27 = vadd.f32 %v2881_v41, %v1263_v22  ;;  %v2295_v30 = vadd.f32 %v2294_v7, %v2293_v24  ;;  %v2406_v31 = vpop.f32.mrb[49].mxu1  ;;  %vm1458_vm6 = vcmp.gt.f32.partialorder %v3023_v6, 0.0 }
 0x15e   : > { %v2296_v32 = vpop.f32.mrb[50].mxu0  ;;  %v2030_v9 = vadd.f32 -1.0, %v2620_v26  ;;  %v2407_v14 = vadd.f32 %v2406_v31, %v2405_v25  ;;  %v2408_v34 = vpop.f32.mrb[50].mxu1  ;;  %v1614_v38 = vsel %vm1454_vm2, %v2997_v28, %v2029_v21 }
 0x15f   : > { %v1544_v33 = vmul.f32 1.442695, %v1490_v0  ;;  %v2297_v37 = vpop.f32.mrb[51].mxu0  ;;  %v1491_v39 = vmin.f32 %v3027_v27, 0.0  ;;  %v2409_v40 = vpop.f32.mrb[51].mxu1  ;;  %vm1459_vm7 = vcmp.gt.f32.partialorder %v3027_v27, 0.0 }
 0x160   : > { %v2298_v16 = vadd.f32 %v2297_v37, %v2296_v32  ;;  %v1615_v20 = vsel %vm1455_vm3, %v3001_v35, %v2030_v9  ;;  %v1268_v42 = vadd.f32 %v2407_v14, %v2295_v30  ;;  %v2410_v45 = vadd.f32 %v2409_v40, %v2408_v34 }
 0x161   : > { %2625 = vpow2.f32 %v1544_v33  ;;  %v2158_v47 = vpack.c.bf16 %v1615_v20, %v1614_v38  ;;  %v1546_v48 = vmul.f32 1.442695, %v1491_v39 }
 0x162   : > { %v2622_v23 = vpop.eup %2621  ;;  %v3035_v49 = vadd.f32 %v2881_v41, %v1268_v42  ;;  %v1271_v29 = vadd.f32 %v2410_v45, %v2298_v16 }
 0x163   : > { %2198 = vst [vmem:[%s2914_s19 + $0x48] sm:$0xff] %v2158_v47   ;;  %v2031_v28 = vadd.f32 -1.0, %v2622_v23  ;;  %2627 = vpow2.f32 %v1546_v48  ;;  %v2299_v51 = vpop.f32.mrb[52].mxu0 }
 0x164   : > { %v2624_v53 = vpop.eup %2623  ;;  %v1492_v54 = vmin.f32 %v3035_v49, 0.0  ;;  %v3040_v55 = vadd.f32 %v2881_v41, %v1271_v29  ;;  %v2411_v35 = vpop.f32.mrb[52].mxu1  ;;  %vm1460_vm8 = vcmp.gt.f32.partialorder %v3035_v49, 0.0 }
 0x165   : > { %v2300_v56 = vpop.f32.mrb[53].mxu0  ;;  %v2032_v50 = vadd.f32 -1.0, %v2624_v53  ;;  %v2412_v58 = vpop.f32.mrb[53].mxu1  ;;  %v1616_v3 = vsel %vm1456_vm4, %v3009_v57, %v2031_v28 }
 0x166   : > { %v2301_v36 = vadd.f32 %v2300_v56, %v2299_v51  ;;  %v2302_v59 = vpop.f32.mrb[54].mxu0  ;;  %v1548_v61 = vmul.f32 1.442695, %v1492_v54  ;;  %v1493_v43 = vmin.f32 %v3040_v55, 0.0  ;;  %v2413_v63 = vadd.f32 %v2412_v58, %v2411_v35  ;;  %v2414_v1 = vpop.f32.mrb[54].mxu1 }
 0x167   : > { %v2303_v44 = vpop.f32.mrb[55].mxu0  ;;  %v1617_v4 = vsel %vm1457_vm5, %v3014_v62, %v2032_v50  ;;  %v2415_v52 = vpop.f32.mrb[55].mxu1  ;;  %vm1461_vm9 = vcmp.gt.f32.partialorder %v3040_v55, 0.0 }
 0x168   : > { %v2304_v5 = vadd.f32 %v2303_v44, %v2302_v59  ;;  %v2163_v8 = vpack.c.bf16 %v1617_v4, %v1616_v3  ;;  %2629 = vpow2.f32 %v1548_v61  ;;  %v1550_v10 = vmul.f32 1.442695, %v1493_v43 }
 0x169   : > { %v1276_v46 = vadd.f32 %v2413_v63, %v2301_v36  ;;  %v2416_v11 = vadd.f32 %v2415_v52, %v2414_v1 }
 0x16a   : > { %2199 = vst [vmem:[%s2914_s19 + $0x50] sm:$0xff] %v2163_v8   ;;  %2631 = vpow2.f32 %v1550_v10 }
 0x16b   : > { %v2626_v12 = vpop.eup %2625  ;;  %v3049_v13 = vadd.f32 %v2881_v41, %v1276_v46  ;;  %v1279_v15 = vadd.f32 %v2416_v11, %v2304_v5  ;;  %v2305_v17 = vpop.f32.mrb[56].mxu0 }
 0x16c   : > { %v2033_v60 = vadd.f32 -1.0, %v2626_v12  ;;  %v2417_v18 = vpop.f32.mrb[56].mxu1  ;;  %v2306_v62 = vpop.f32.mrb[57].mxu0 }
 0x16d   : > { %v1494_v57 = vmin.f32 %v3049_v13, 0.0  ;;  %v2628_v2 = vpop.eup %2627  ;;  %v3053_v19 = vadd.f32 %v2881_v41, %v1279_v15  ;;  %v2307_v21 = vadd.f32 %v2306_v62, %v2305_v17  ;;  %v2418_v22 = vpop.f32.mrb[57].mxu1  ;;  %vm1462_vm10 = vcmp.gt.f32.partialorder %v3049_v13, 0.0 }
 0x16e   : > { %v2308_v24 = vpop.f32.mrb[58].mxu0  ;;  %v2034_v0 = vadd.f32 -1.0, %v2628_v2  ;;  %v2419_v7 = vadd.f32 %v2418_v22, %v2417_v18  ;;  %v2420_v26 = vpop.f32.mrb[58].mxu1  ;;  %v1618_v31 = vsel %vm1458_vm6, %v3023_v6, %v2033_v60 }
 0x16f   : > { %v1552_v25 = vmul.f32 1.442695, %v1494_v57  ;;  %v2309_v30 = vpop.f32.mrb[59].mxu0  ;;  %v1495_v32 = vmin.f32 %v3053_v19, 0.0  ;;  %v2421_v33 = vpop.f32.mrb[59].mxu1  ;;  %vm1463_vm11 = vcmp.gt.f32.partialorder %v3053_v19, 0.0 }
 0x170   : > { %v2310_v9 = vadd.f32 %v2309_v30, %v2308_v24  ;;  %v1619_v14 = vsel %vm1459_vm7, %v3027_v27, %v2034_v0  ;;  %v1284_v34 = vadd.f32 %v2419_v7, %v2307_v21  ;;  %v2422_v37 = vadd.f32 %v2421_v33, %v2420_v26 }
 0x171   : > { %2633 = vpow2.f32 %v1552_v25  ;;  %v2168_v38 = vpack.c.bf16 %v1619_v14, %v1618_v31  ;;  %v1554_v39 = vmul.f32 1.442695, %v1495_v32 }
 0x172   : > { %v2630_v16 = vpop.eup %2629  ;;  %v1432_v40 = vadd.f32 %v2881_v41, %v1284_v34  ;;  %v1287_v20 = vadd.f32 %v2422_v37, %v2310_v9 }
 0x173   : > { %2200 = vst [vmem:[%s2914_s19 + $0x58] sm:$0xff] %v2168_v38   ;;  %v2035_v42 = vadd.f32 -1.0, %v2630_v16  ;;  %2635 = vpow2.f32 %v1554_v39  ;;  %v2311_v6 = vpop.f32.mrb[60].mxu0 }
 0x174   : > { %v2632_v45 = vpop.eup %2631  ;;  %v1496_v47 = vmin.f32 %v1432_v40, 0.0  ;;  %v1433_v48 = vadd.f32 %v2881_v41, %v1287_v20  ;;  %v2423_v23 = vpop.f32.mrb[60].mxu1  ;;  %vm1464_vm12 = vcmp.gt.f32.partialorder %v1432_v40, 0.0 }
 0x175   : > { %v2312_v29 = vpop.f32.mrb[61].mxu0  ;;  %v2036_v27 = vadd.f32 -1.0, %v2632_v45  ;;  %v2424_v51 = vpop.f32.mrb[61].mxu1  ;;  %v1620_v58 = vsel %vm1460_vm8, %v3035_v49, %v2035_v42 }
 0x176   : > { %v2313_v28 = vadd.f32 %v2312_v29, %v2311_v6  ;;  %v2314_v53 = vpop.f32.mrb[62].mxu0  ;;  %v1556_v54 = vmul.f32 1.442695, %v1496_v47  ;;  %v1497_v35 = vmin.f32 %v1433_v48, 0.0  ;;  %v2425_v56 = vadd.f32 %v2424_v51, %v2423_v23  ;;  %v2426_v50 = vpop.f32.mrb[62].mxu1 }
 0x177   : > { %v2315_v36 = vpop.f32.mrb[63].mxu0  ;;  %v1621_v59 = vsel %vm1461_vm9, %v3040_v55, %v2036_v27  ;;  %v2427_v43 = vpop.f32.mrb[63].mxu1  ;;  %vm1465_vm13 = vcmp.gt.f32.partialorder %v1433_v48, 0.0 }
 0x178   : > { %v2316_v61 = vadd.f32 %v2315_v36, %v2314_v53  ;;  %v2173_v63 = vpack.c.bf16 %v1621_v59, %v1620_v58  ;;  %2637 = vpow2.f32 %v1556_v54  ;;  %v1558_v1 = vmul.f32 1.442695, %v1497_v35 }
 0x179   : > { %v1292_v44 = vadd.f32 %v2425_v56, %v2313_v28  ;;  %v2428_v3 = vadd.f32 %v2427_v43, %v2426_v50 }
 0x17a   : > { %2201 = vst [vmem:[%s2914_s19 + $0x60] sm:$0xff] %v2173_v63   ;;  %2639 = vpow2.f32 %v1558_v1 }
 0x17b   : > { %v2634_v4 = vpop.eup %2633  ;;  %v1434_v5 = vadd.f32 %v2881_v41, %v1292_v44  ;;  %v1295_v52 = vadd.f32 %v2428_v3, %v2316_v61 }
 0x17c   : > { %v2037_v8 = vadd.f32 -1.0, %v2634_v4 }
 0x17d   : > { %v1498_v10 = vmin.f32 %v1434_v5, 0.0  ;;  %v2636_v46 = vpop.eup %2635  ;;  %v1435_v49 = vadd.f32 %v2881_v41, %v1295_v52  ;;  %vm1466_vm14 = vcmp.gt.f32.partialorder %v1434_v5, 0.0 }
 0x17e   : > { %v2038_v55 = vadd.f32 -1.0, %v2636_v46  ;;  %v1622_v60 = vsel %vm1462_vm10, %v3049_v13, %v2037_v8 }
 0x17f   : > { %v1560_v11 = vmul.f32 1.442695, %v1498_v10  ;;  %v1499_v12 = vmin.f32 %v1435_v49, 0.0  ;;  %vm1467_vm15 = vcmp.gt.f32.partialorder %v1435_v49, 0.0 }
 0x180   : > { %v1623_v15 = vsel %vm1463_vm11, %v3053_v19, %v2038_v55 }
 0x181   : > { %2641 = vpow2.f32 %v1560_v11  ;;  %v2178_v17 = vpack.c.bf16 %v1623_v15, %v1622_v60  ;;  %v1562_v57 = vmul.f32 1.442695, %v1499_v12 }
 0x182   : > { %v2638_v18 = vpop.eup %2637 }
 0x183   : > { %2202 = vst [vmem:[%s2914_s19 + $0x68] sm:$0xff] %v2178_v17   ;;  %v2039_v62 = vadd.f32 -1.0, %v2638_v18  ;;  %2643 = vpow2.f32 %v1562_v57 }
 0x184   : > { %v2640_v41 = vpop.eup %2639 }
 0x185   : > { %v2040_v2 = vadd.f32 -1.0, %v2640_v41  ;;  %v1624_v21 = vsel %vm1464_vm12, %v1432_v40, %v2039_v62 }
 0x187   : > { %v1625_v22 = vsel %vm1465_vm13, %v1433_v48, %v2040_v2 }
 0x188   : > { %v2183_v24 = vpack.c.bf16 %v1625_v22, %v1624_v21 }
 0x18a   : > { %2203 = vst [vmem:[%s2914_s19 + $0x70] sm:$0xff] %v2183_v24  }
 0x18b   : > { %v2642_v0 = vpop.eup %2641 }
 0x18c   : > { %v2041_v13 = vadd.f32 -1.0, %v2642_v0 }
 0x18d   : > { %v2644_v19 = vpop.eup %2643 }
 0x18e   : > { %v2042_v25 = vadd.f32 -1.0, %v2644_v19  ;;  %v1626_v7 = vsel %vm1466_vm14, %v1434_v5, %v2041_v13 }
 0x190   : > { %v1627_v26 = vsel %vm1467_vm15, %v1435_v49, %v2042_v25 }
 0x191   : > { %v2188_v30 = vpack.c.bf16 %v1627_v26, %v1626_v7 }
 0x193   : > { %2204 = vst [vmem:[%s2914_s19 + $0x78] sm:$0xff] %v2188_v30  }
 0x194 PF: > { %s13_s14 = sadd.s32 1, %s2667_s14   ;;  %s3090_s12 = smov %s2663_s13 }
 0x195   : > { %p10_p5 = scmp.ge.s32.totalorder %s13_s14, 4   ;;  %s3091_s13 = smov %s3093_s15 }
 0x197   :  { %12 = sbr.rel (!%p10_p5) target bundleno = 2 (0x2), region = 76 }

// kernel: actor_forward.20
= control target key start
LH: loop header
LB: loop body
LE: loop exit
PB: predicated region body
PF: predicated region fallthrough
CT: control target
= control target key end

     0   :  { %s1164_s12 = smov 0   ;;  %s1166_s13 = smov 0   ;;  %s1283_s0 = inlined_call_operand.vmem [shape: bf16[72,768], index: 0, kind: input, shape index: {}]   ;;  %s1284_s1 = inlined_call_operand.vmem [shape: bf16[768,128], index: 1, kind: input, shape index: {}]   ;;  %s1285_s2 = inlined_call_operand.vmem [shape: f32[1,128], index: 2, kind: input, shape index: {}]   ;;  %s1286_s3 = inlined_call_operand.vmem [shape: bf16[72,128], index: 3, kind: output, shape index: {}]  }
   0x1   :  { %s1168_s14 = smov 0   ;;  %s1170_s15 = smov 0  }
   0x2   :  { %s1172_s16 = smov 0  }
   0x3 LB: > { %s25_s17 = sadd.s32 1, %s1137_s15  ;;  %p48_p1 = scmp.ne.s32.totalorder %s1129_s13, %s1125_s12  ;;  %s1141_s16 = sphi %s1172_s16, %s13_s16   ;;  %s1137_s15 = sphi %s1170_s15, %s1290_s15   ;;  %s1133_s14 = sphi %s1168_s14, %s1289_s14   ;;  %s1129_s13 = sphi %s1166_s13, %s1288_s13   ;;  %s1125_s12 = sphi %s1164_s12, %s1287_s12  }
   0x4   : > { %p26_p0 = scmp.ge.s32.totalorder %s25_s17, 3  ;;  %p49_p2 = scmp.eq.s32.totalorder %s1141_s16, 0 }
   0x5   : > { %s41_s19 = sadd.s32 1, %s1129_s13  ;;  %p860_p5 = scmp.ge.s32.totalorder %s1141_s16, 3 }
   0x6   : > { %s1292_s17 = smov (%p26_p0, %s25_s17), 0  ;;  %p50_p3 = por %p49_p2, %p48_p1 }
   0x7   : > { %s37_s18 = ssub.s32 %s1137_s15, %s1292_s17  ;;  %162 = sbr.rel (%p860_p5) target bundleno = 23 (0x17), region = 20 }
   0x8   : > { %p39_p4 = scmp.eq.s32.totalorder %s37_s18, 0 }
   0xa   : > { %s1199_s20 = scalar_select %p39_p4, %s1129_s13, %s41_s19  }
   0xe   : > { %165 = sbr.rel (!%p50_p3) target bundleno = 23 (0x17), region = 24  ;;  %s167_s21 = sand.u32 (%p50_p3), 1, %s1129_s13  }
   0xf   : > { %s917_s22 = sshll.u32 (%p50_p3), %s1137_s15, 3  ;;  %s1012_s23 = smul.u32 (%p50_p3), 72, %s167_s21 }
  0x10   : > { %s175_s26 = scalar_lea.vmem (%p50_p3), %s1283_s0, %s917_s22 }
  0x11   : > { %v219_v0 = vld [vmem:[%s175_s26] sm:$0xff] (%p50_p3)  ;;  %v221_v1 = vld [vmem:[%s175_s26 + $0x18] sm:$0xff] (%p50_p3)  ;;  %v223_v2 = vld [vmem:[%s175_s26 + $0x30] sm:$0xff] (%p50_p3)  ;;  %s169_s27 = scalar_lea.vmem (%p50_p3), [#allocation3], %s1012_s23 }
  0x12   : > { %v225_v3 = vld [vmem:[%s175_s26 + $0x48] sm:$0xff] (%p50_p3)  ;;  %v227_v4 = vld [vmem:[%s175_s26 + $0x60] sm:$0xff] (%p50_p3)  ;;  %v229_v5 = vld [vmem:[%s175_s26 + $0x78] sm:$0xff] (%p50_p3)  ;;  %220 = vst [vmem:[%s169_s27] sm:$0xff] (%p50_p3), %v219_v0 }
  0x13   : > { %222 = vst [vmem:[%s169_s27 + $0x8] sm:$0xff] (%p50_p3), %v221_v1  ;;  %224 = vst [vmem:[%s169_s27 + $0x10] sm:$0xff] (%p50_p3), %v223_v2  ;;  %v231_v6 = vld [vmem:[%s175_s26 + $0x90] sm:$0xff] (%p50_p3)  ;;  %v233_v7 = vld [vmem:[%s175_s26 + $0xa8] sm:$0xff] (%p50_p3) }
  0x14   : > { %226 = vst [vmem:[%s169_s27 + $0x18] sm:$0xff] (%p50_p3), %v225_v3  ;;  %228 = vst [vmem:[%s169_s27 + $0x20] sm:$0xff] (%p50_p3), %v227_v4  ;;  %v235_v8 = vld [vmem:[%s175_s26 + $0xc0] sm:$0xff] (%p50_p3) }
  0x15   : > { %230 = vst [vmem:[%s169_s27 + $0x28] sm:$0xff] %v229_v5  ;;  %232 = vst [vmem:[%s169_s27 + $0x30] sm:$0xff] %v231_v6 }
  0x16   : > { %234 = vst [vmem:[%s169_s27 + $0x38] sm:$0xff] %v233_v7  ;;  %236 = vst [vmem:[%s169_s27 + $0x40] sm:$0xff] %v235_v8 }
  0x17 PF: > { %p863_p6 = scmp.ge.s32.totalorder %s1141_s16, 1  ;;  %p253_p7 = scmp.lt.s32.totalorder %s1141_s16, 4 }
  0x19   : > { %p254_p8 = pnand %p863_p6, %p253_p7 }
  0x1a   : > { %s260_s28 = sand.u32 (!%p254_p8), 1, %s1125_s12   ;;  %s864_s29 = sshll.u32 (!%p254_p8), %s1133_s14, 5 }
  0x1b   : > { %257 = sbr.rel (%p254_p8) target bundleno = 343 (0x157), region = 66  ;;  %p300_p9 = scmp.lt.s32.totalorder (!%p254_p8), %s864_s29, 95 }
  0x1c   : > { %s1013_s30 = smul.u32 (!%p254_p8), 72, %s260_s28  ;;  %p866_p10 = scmp.ne.s32.totalorder (!%p254_p8), %s1133_s14, 0 }
  0x1e   : > { %s1216_s8 = scalar_lea.vmem (!%p254_p8), [#allocation3], %s1013_s30 }
  0x22   : > { %s1294_s29 = smov (!%p300_p9, %s864_s29), 95  ;;  %324 = sbr.rel (%p866_p10) target bundleno = 41 (0x29), region = 74 }
  0x23   : > { %s865_s4 = sshll.u32 %s1294_s29, 2  ;;  %v1143_v9 = vmov (!%p866_p10), 0.0  }
  0x24   : > { %s1214_s7 = scalar_lea.vmem %s1284_s1, %s865_s4  ;;  %325 = vst [vmem:[#allocation2] sm:$0xff] (!%p866_p10), %v1143_v9  ;;  %326 = vst [vmem:[#allocation2 + $0x8] sm:$0xff] (!%p866_p10), %v1143_v9 }
  0x25   : > { %327 = vst [vmem:[#allocation2 + $0x10] sm:$0xff] (!%p866_p10), %v1143_v9  ;;  %328 = vst [vmem:[#allocation2 + $0x18] sm:$0xff] (!%p866_p10), %v1143_v9 }
  0x26   : > { %329 = vst [vmem:[#allocation2 + $0x20] sm:$0xff] (!%p866_p10), %v1143_v9  ;;  %330 = vst [vmem:[#allocation2 + $0x28] sm:$0xff] (!%p866_p10), %v1143_v9 }
  0x27   : > { %331 = vst [vmem:[#allocation2 + $0x30] sm:$0xff] (!%p866_p10), %v1143_v9  ;;  %332 = vst [vmem:[#allocation2 + $0x38] sm:$0xff] (!%p866_p10), %v1143_v9 }
  0x28   : > { %333 = vst [vmem:[#allocation2 + $0x40] sm:$0xff] (!%p866_p10), %v1143_v9 }
  0x29 PF: > { %v1055_v10 = vld [vmem:[%s1214_s7 + $0x40] sm:$0xff]   ;;  %v1057_v12 = vld [vmem:[%s1214_s7 + $0x48] sm:$0xff]   ;;  %v1059_v14 = vld [vmem:[%s1214_s7 + $0x50] sm:$0xff]   ;;  %p893_p11 = scmp.ne.s32.totalorder %s1133_s14, 2 }
  0x2a   : > { %v1056_v11 = vld [vmem:[%s1214_s7] sm:$0xff]   ;;  %950 = vmatprep.subr.bf16.mxu0 %v1055_v10  ;;  %996 = vmatprep.subr.bf16.mxu1 %v1055_v10  ;;  %v1058_v13 = vld [vmem:[%s1214_s7 + $0x8] sm:$0xff]   ;;  %v1060_v15 = vld [vmem:[%s1214_s7 + $0x10] sm:$0xff]  }
  0x2b   : > { %951 = vmatpush3.bf16.msra.mxu0 %v1056_v11  ;;  %1004 = vmatpush3.bf16.msra.mxu1 %v1056_v11  ;;  %v1061_v16 = vld [vmem:[%s1214_s7 + $0x58] sm:$0xff]   ;;  %v1063_v18 = vld [vmem:[%s1214_s7 + $0x60] sm:$0xff]   ;;  %v1065_v20 = vld [vmem:[%s1214_s7 + $0x68] sm:$0xff]  }
  0x2c   : > { %952 = vmatprep.subr.bf16.mxu0 %v1057_v12  ;;  %997 = vmatprep.subr.bf16.mxu1 %v1057_v12  ;;  %v1062_v17 = vld [vmem:[%s1214_s7 + $0x18] sm:$0xff]   ;;  %v1064_v19 = vld [vmem:[%s1214_s7 + $0x20] sm:$0xff]   ;;  %v1066_v23 = vld [vmem:[%s1214_s7 + $0x28] sm:$0xff]  }
  0x2d   : > { %v1073_v21 = vld [vmem:[%s1216_s8 + $0x4] ss:$8 sps:$4 sm:$0xff]   ;;  %v1076_v22 = vld [vmem:[%s1216_s8 + $0x34] ss:$8 sps:$4 sm:$0xff]   ;;  %v1071_v29 = vld [vmem:[%s1216_s8] ss:$8 sps:$4 sm:$0xff]  }
  0x2e   : > { %v1067_v24 = vld [vmem:[%s1214_s7 + $0x70] sm:$0xff]   ;;  %559 = vmatprep.mubr.bf16.mxu0 %v1073_v21  ;;  %583 = vmatprep.mubr.bf16.mxu1 %v1076_v22  ;;  %v1069_v26 = vld [vmem:[%s1214_s7 + $0x78] sm:$0xff]   ;;  %v334_v39 = vld [vmem:[#allocation2] sm:$0xff] }
  0x2f   : > { %953 = vmatpush3.bf16.msra.mxu0 %v1058_v13  ;;  %1005 = vmatpush3.bf16.msra.mxu1 %v1058_v13  ;;  %v1068_v25 = vld [vmem:[%s1214_s7 + $0x30] sm:$0xff]   ;;  %v1070_v27 = vld [vmem:[%s1214_s7 + $0x38] sm:$0xff]   ;;  %v335_v47 = vld [vmem:[#allocation2 + $0x8] sm:$0xff] }
  0x30   : > { %954 = vmatprep.subr.bf16.mxu0 %v1059_v14  ;;  %998 = vmatprep.subr.bf16.mxu1 %v1059_v14  ;;  %v351_v28 = vld [vmem:[%s1216_s8 + $0x40] sm:$0xff]  ;;  %v1074_v30 = vld [vmem:[%s1216_s8 + $0x30] ss:$8 sps:$4 sm:$0xff]   ;;  %v1077_v31 = vld [vmem:[%s1216_s8 + $0x14] ss:$8 sps:$4 sm:$0xff]  }
  0x31   : > { %v876_v32 = vcombine.high %v351_v28, %v351_v28  ;;  %v1079_v33 = vld [vmem:[%s1216_s8 + $0x10] ss:$8 sps:$4 sm:$0xff]   ;;  %v875_v34 = vcombine.low %v351_v28, %v351_v28  ;;  %v1081_v35 = vld [vmem:[%s1216_s8 + $0x24] ss:$8 sps:$4 sm:$0xff]   ;;  %v1084_v36 = vld [vmem:[%s1216_s8 + $0x20] ss:$8 sps:$4 sm:$0xff]  }
  0x32   : > { %v340_v41 = vld [vmem:[#allocation2 + $0x30] sm:$0xff]  ;;  %v341_v49 = vld [vmem:[#allocation2 + $0x38] sm:$0xff]  ;;  %v342_v61 = vld [vmem:[#allocation2 + $0x40] sm:$0xff] }
  0x33   : > { %955 = vmatpush3.bf16.msra.mxu0 %v1060_v15  ;;  %1006 = vmatpush3.bf16.msra.mxu1 %v1060_v15  ;;  %v336_v59 = vld [vmem:[#allocation2 + $0x10] sm:$0xff]  ;;  %v337_v3 = vld [vmem:[#allocation2 + $0x18] sm:$0xff]  ;;  %v338_v11 = vld [vmem:[#allocation2 + $0x20] sm:$0xff] }
  0x34   : > { %956 = vmatprep.subr.bf16.mxu0 %v1061_v16  ;;  %999 = vmatprep.subr.bf16.mxu1 %v1061_v16  ;;  %v339_v15 = vld [vmem:[#allocation2 + $0x28] sm:$0xff]  ;;  %v894_v22 = vld [vmem:[%s1285_s2] ss:$0 sm:$0xff] (!%p893_p11) }
  0x37   : > { %957 = vmatpush3.bf16.msra.mxu0 %v1062_v17  ;;  %1007 = vmatpush3.bf16.msra.mxu1 %v1062_v17 }
  0x38   : > { %958 = vmatprep.subr.bf16.mxu0 %v1063_v18  ;;  %1000 = vmatprep.subr.bf16.mxu1 %v1063_v18 }
  0x3b   : > { %959 = vmatpush3.bf16.msra.mxu0 %v1064_v19  ;;  %1008 = vmatpush3.bf16.msra.mxu1 %v1064_v19 }
  0x3c   : > { %960 = vmatprep.subr.bf16.mxu0 %v1065_v20  ;;  %1001 = vmatprep.subr.bf16.mxu1 %v1065_v20 }
  0x3f   : > { %961 = vmatpush3.bf16.msra.mxu0 %v1066_v23  ;;  %1009 = vmatpush3.bf16.msra.mxu1 %v1066_v23 }
  0x40   : > { %962 = vmatprep.subr.bf16.mxu0 %v1067_v24  ;;  %1002 = vmatprep.subr.bf16.mxu1 %v1067_v24 }
  0x43   : > { %963 = vmatpush3.bf16.msra.mxu0 %v1068_v25  ;;  %1010 = vmatpush3.bf16.msra.mxu1 %v1068_v25 }
  0x44   : > { %964 = vmatprep.subr.bf16.mxu0 %v1069_v26  ;;  %1003 = vmatprep.subr.bf16.mxu1 %v1069_v26 }
  0x47   : > { %965 = vmatpush3.bf16.msra.mxu0 %v1070_v27  ;;  %1011 = vmatpush3.bf16.msra.mxu1 %v1070_v27 }
  0x4a   : > { %560 = vmatmul.mubr.bf16.vlgmr.msra.gmra.mrb[0].mxu0 %v1071_v29  ;;  %584 = vmatmul.mubr.bf16.vlgmr.msra.gmra.mrb[0].mxu1 %v1074_v30 }
  0x4b   : > { %567 = vmatprep.mubr.bf16.mxu0 %v1077_v31  ;;  %591 = vmatprep.mubr.bf16.mxu1 %v876_v32 }
  0x52   : > { %568 = vmatmul.mubr.bf16.gmra.mrb[4].mxu0 %v1079_v33  ;;  %592 = vmatmul.mubr.bf16.gmra.mrb[4].mxu1 %v875_v34 }
  0x53   : > { %575 = vmatprep.mubr.bf16.mxu0 %v1081_v35 }
  0x5a   : > { %576 = vmatmul.mubr.bf16.gmra.mrb[8].mxu0 %v1084_v36 }
 0x11d   : > { %v966_v37 = vpop.f32.mrb[0].mxu0  ;;  %v984_v38 = vpop.f32.mrb[0].mxu1 }
 0x11e   : > { %v967_v40 = vpop.f32.mrb[1].mxu0  ;;  %v985_v42 = vpop.f32.mrb[1].mxu1 }
 0x11f   : > { %v968_v43 = vadd.f32 %v967_v40, %v966_v37  ;;  %v969_v44 = vpop.f32.mrb[2].mxu0  ;;  %v986_v45 = vadd.f32 %v985_v42, %v984_v38  ;;  %v987_v46 = vpop.f32.mrb[2].mxu1 }
 0x120   : > { %v970_v48 = vpop.f32.mrb[3].mxu0  ;;  %v988_v50 = vpop.f32.mrb[3].mxu1 }
 0x121   : > { %v599_v51 = vadd.f32 %v968_v43, %v334_v39  ;;  %v971_v52 = vadd.f32 %v970_v48, %v969_v44  ;;  %v605_v53 = vadd.f32 %v986_v45, %v340_v41  ;;  %v989_v54 = vadd.f32 %v988_v50, %v987_v46 }
 0x123   : > { %608 = vst [vmem:[#allocation2] sm:$0xff] %v599_v51  ;;  %v600_v55 = vadd.f32 %v971_v52, %v335_v47  ;;  %614 = vst [vmem:[#allocation2 + $0x30] sm:$0xff] %v605_v53  ;;  %v606_v56 = vadd.f32 %v989_v54, %v341_v49 }
 0x125   : > { %609 = vst [vmem:[#allocation2 + $0x8] sm:$0xff] %v600_v55  ;;  %v972_v57 = vpop.f32.mrb[4].mxu0  ;;  %615 = vst [vmem:[#allocation2 + $0x38] sm:$0xff] %v606_v56  ;;  %v990_v58 = vpop.f32.mrb[4].mxu1 }
 0x126   : > { %v973_v60 = vpop.f32.mrb[5].mxu0  ;;  %v991_v62 = vpop.f32.mrb[5].mxu1 }
 0x127   : > { %v974_v63 = vadd.f32 %v973_v60, %v972_v57  ;;  %v975_v0 = vpop.f32.mrb[6].mxu0  ;;  %v992_v1 = vadd.f32 %v991_v62, %v990_v58  ;;  %v993_v2 = vpop.f32.mrb[6].mxu1 }
 0x128   : > { %v976_v4 = vpop.f32.mrb[7].mxu0  ;;  %v994_v5 = vpop.f32.mrb[7].mxu1 }
 0x129   : > { %v601_v6 = vadd.f32 %v974_v63, %v336_v59  ;;  %v977_v7 = vadd.f32 %v976_v4, %v975_v0  ;;  %v607_v8 = vadd.f32 %v992_v1, %v342_v61 }
 0x12a   : > { %v621_v20 = vld [vmem:[#allocation2] sm:$0xff] (!%p893_p11)  ;;  %v627_v34 = vld [vmem:[#allocation2 + $0x30] sm:$0xff] (!%p893_p11) }
 0x12b   : > { %610 = vst [vmem:[#allocation2 + $0x10] sm:$0xff] %v601_v6  ;;  %v602_v9 = vadd.f32 %v977_v7, %v337_v3  ;;  %616 = vst [vmem:[#allocation2 + $0x40] sm:$0xff] %v607_v8  ;;  %v637_v23 = vadd.f32 (!%p893_p11), %v894_v22, %v621_v20  ;;  %v643_v44 = vadd.f32 (!%p893_p11), %v894_v22, %v627_v34 }
 0x12c   : > { %v622_v21 = vld [vmem:[#allocation2 + $0x8] sm:$0xff] (!%p893_p11)  ;;  %v628_v37 = vld [vmem:[#allocation2 + $0x38] sm:$0xff] (!%p893_p11) }
 0x12d   : > { %611 = vst [vmem:[#allocation2 + $0x18] sm:$0xff] %v602_v9  ;;  %v978_v10 = vpop.f32.mrb[8].mxu0  ;;  %v638_v24 = vadd.f32 (!%p893_p11), %v894_v22, %v622_v21  ;;  %v655_v32 = vmin.f32 (!%p893_p11), %v637_v23, 0.0  ;;  %v644_v46 = vadd.f32 (!%p893_p11), %v894_v22, %v628_v37  ;;  %v661_v49 = vmin.f32 (!%p893_p11), %v643_v44, 0.0 }
 0x12e   : > { %v979_v12 = vpop.f32.mrb[9].mxu0  ;;  %vm646_vm0 = vcmp.gt.f32.partialorder (!%p893_p11), %v637_v23, 0.0  ;;  %vm652_vm6 = vcmp.gt.f32.partialorder (!%p893_p11), %v643_v44, 0.0 }
 0x12f   : > { %v980_v13 = vadd.f32 %v979_v12, %v978_v10  ;;  %v981_v14 = vpop.f32.mrb[10].mxu0  ;;  %620 = sbr.rel (%p893_p11) target bundleno = 343 (0x157), region = 78  ;;  %v656_v33 = vmin.f32 (!%p893_p11), %v638_v24, 0.0  ;;  %v664_v38 = vmul.f32 (!%p893_p11), 1.442695, %v655_v32  ;;  %v662_v51 = vmin.f32 (!%p893_p11), %v644_v46, 0.0 }
 0x130   : > { %v982_v16 = vpop.f32.mrb[11].mxu0  ;;  %v676_v52 = vmul.f32 (!%p893_p11), 1.442695, %v661_v49  ;;  %vm647_vm1 = vcmp.gt.f32.partialorder (!%p893_p11), %v638_v24, 0.0  ;;  %vm653_vm7 = vcmp.gt.f32.partialorder (!%p893_p11), %v644_v46, 0.0 }
 0x131   : > { %v603_v17 = vadd.f32 %v980_v13, %v338_v11  ;;  %v983_v18 = vadd.f32 %v982_v16, %v981_v14  ;;  %v666_v39 = vmul.f32 (!%p893_p11), 1.442695, %v656_v33  ;;  %1085 = vpow2.f32 (!%p893_p11), %v664_v38 }
 0x132   : > { %v623_v25 = vld [vmem:[#allocation2 + $0x10] sm:$0xff] (!%p893_p11)  ;;  %v629_v47 = vld [vmem:[#allocation2 + $0x40] sm:$0xff] (!%p893_p11)  ;;  %v678_v54 = vmul.f32 (!%p893_p11), 1.442695, %v662_v51 }
 0x133   : > { %612 = vst [vmem:[#allocation2 + $0x20] sm:$0xff] %v603_v17  ;;  %v604_v19 = vadd.f32 %v983_v18, %v339_v15  ;;  %v639_v28 = vadd.f32 (!%p893_p11), %v894_v22, %v623_v25  ;;  %1087 = vpow2.f32 (!%p893_p11), %v666_v39  ;;  %v645_v53 = vadd.f32 (!%p893_p11), %v894_v22, %v629_v47 }
 0x134   : > { %v624_v26 = vld [vmem:[#allocation2 + $0x18] sm:$0xff] (!%p893_p11) }
 0x135   : > { %613 = vst [vmem:[#allocation2 + $0x28] sm:$0xff] %v604_v19  ;;  %v640_v29 = vadd.f32 (!%p893_p11), %v894_v22, %v624_v26  ;;  %v657_v35 = vmin.f32 (!%p893_p11), %v639_v28, 0.0  ;;  %v663_v55 = vmin.f32 (!%p893_p11), %v645_v53, 0.0  ;;  %vm648_vm2 = vcmp.gt.f32.partialorder (!%p893_p11), %v639_v28, 0.0 }
 0x136   : > { %vm654_vm8 = vcmp.gt.f32.partialorder %v645_v53, 0.0 }
 0x137   : > { %v658_v36 = vmin.f32 %v640_v29, 0.0  ;;  %v668_v41 = vmul.f32 1.442695, %v657_v35  ;;  %v680_v56 = vmul.f32 1.442695, %v663_v55  ;;  %vm649_vm3 = vcmp.gt.f32.partialorder %v640_v29, 0.0 }
 0x139   : > { %v670_v42 = vmul.f32 1.442695, %v658_v36  ;;  %1089 = vpow2.f32 %v668_v41 }
 0x13a   : > { %v625_v27 = vld [vmem:[#allocation2 + $0x20] sm:$0xff] }
 0x13b   : > { %v1248_v31 = vadd.f32 %v894_v22, %v625_v27  ;;  %1091 = vpow2.f32 %v670_v42  ;;  %v1086_v57 = vpop.eup %1085 }
 0x13c   : > { %v626_v30 = vld [vmem:[#allocation2 + $0x28] sm:$0xff]  ;;  %v895_v59 = vadd.f32 -1.0, %v1086_v57 }
 0x13d   : > { %v642_v40 = vadd.f32 %v894_v22, %v626_v30  ;;  %v659_v43 = vmin.f32 %v1248_v31, 0.0  ;;  %v1088_v58 = vpop.eup %1087  ;;  %vm650_vm4 = vcmp.gt.f32.partialorder %v1248_v31, 0.0 }
 0x13e   : > { %v896_v61 = vadd.f32 -1.0, %v1088_v58  ;;  %v691_v63 = vsel %vm646_vm0, %v637_v23, %v895_v59 }
 0x13f   : > { %v660_v45 = vmin.f32 %v642_v40, 0.0  ;;  %v672_v48 = vmul.f32 1.442695, %v659_v43  ;;  %vm651_vm5 = vcmp.gt.f32.partialorder %v642_v40, 0.0 }
 0x140   : > { %v692_v2 = vsel %vm647_vm1, %v638_v24, %v896_v61 }
 0x141   : > { %v674_v50 = vmul.f32 1.442695, %v660_v45  ;;  %1093 = vpow2.f32 %v672_v48  ;;  %v930_v5 = vpack.c.bf16 %v692_v2, %v691_v63 }
 0x143   : > { %1095 = vpow2.f32 %v674_v50  ;;  %v1090_v60 = vpop.eup %1089  ;;  %931 = vst [vmem:[%s1286_s3] sm:$0xff] %v930_v5  }
 0x144   : > { %1097 = vpow2.f32 %v676_v52  ;;  %v897_v0 = vadd.f32 -1.0, %v1090_v60 }
 0x145   : > { %1099 = vpow2.f32 %v678_v54  ;;  %v1092_v62 = vpop.eup %1091 }
 0x146   : > { %1101 = vpow2.f32 %v680_v56  ;;  %v898_v3 = vadd.f32 -1.0, %v1092_v62  ;;  %v693_v6 = vsel %vm648_vm2, %v639_v28, %v897_v0 }
 0x148   : > { %v694_v9 = vsel %vm649_vm3, %v640_v29, %v898_v3 }
 0x149   : > { %v935_v12 = vpack.c.bf16 %v694_v9, %v693_v6 }
 0x14b   : > { %v1094_v1 = vpop.eup %1093  ;;  %947 = vst [vmem:[%s1286_s3 + $0x8] sm:$0xff] %v935_v12  }
 0x14c   : > { %v899_v7 = vadd.f32 -1.0, %v1094_v1 }
 0x14d   : > { %v1096_v4 = vpop.eup %1095 }
 0x14e   : > { %v1098_v8 = vpop.eup %1097  ;;  %v900_v10 = vadd.f32 -1.0, %v1096_v4  ;;  %v695_v13 = vsel %vm650_vm4, %v1248_v31, %v899_v7 }
 0x14f   : > { %v1100_v11 = vpop.eup %1099  ;;  %v901_v14 = vadd.f32 -1.0, %v1098_v8 }
 0x150   : > { %v696_v15 = vsel %vm651_vm5, %v642_v40, %v900_v10  ;;  %v902_v16 = vadd.f32 -1.0, %v1100_v11  ;;  %v1102_v17 = vpop.eup %1101 }
 0x151   : > { %v940_v18 = vpack.c.bf16 %v696_v15, %v695_v13  ;;  %v697_v19 = vsel %vm652_vm6, %v643_v44, %v901_v14  ;;  %v903_v21 = vadd.f32 -1.0, %v1102_v17 }
 0x152   : > { %v698_v20 = vsel %vm653_vm7, %v644_v46, %v902_v16 }
 0x153   : > { %948 = vst [vmem:[%s1286_s3 + $0x10] sm:$0xff] %v940_v18   ;;  %v945_v22 = vpack.c.bf16 %v698_v20, %v697_v19  ;;  %v699_v23 = vsel %vm654_vm8, %v645_v53, %v903_v21 }
 0x154   : > { %v926_v24 = vpack.c.bf16 %v699_v23, %v699_v23 }
 0x155   : > { %949 = vst [vmem:[%s1286_s3 + $0x18] sm:$0xff] %v945_v22  }
 0x156   : > { %745 = vst [vmem:[%s1286_s3 + $0x20] sm:$0xf] %v926_v24 }
 0x157 PF: > { %s13_s16 = sadd.s32 1, %s1141_s16   ;;  %s1287_s12 = smov %s1129_s13 }
 0x158   : > { %p10_p12 = scmp.ge.s32.totalorder %s13_s16, 5   ;;  %s1288_s13 = smov %s1199_s20 }
 0x159   : > { %s1289_s14 = smov %s1137_s15  ;;  %s1290_s15 = smov %s1292_s17 }
 0x15a   :  { %12 = sbr.rel (!%p10_p12) target bundleno = 3 (0x3), region = 119 }

// kernel: actor_forward.21
= control target key start
LH: loop header
LB: loop body
LE: loop exit
PB: predicated region body
PF: predicated region fallthrough
CT: control target
= control target key end

     0   :  { %s950_s12 = smov 0   ;;  %s952_s13 = smov 0   ;;  %s1033_s0 = inlined_call_operand.vmem [shape: bf16[8,1536], index: 0, kind: input, shape index: {}]   ;;  %s1034_s1 = inlined_call_operand.vmem [shape: bf16[1536,128], index: 1, kind: input, shape index: {}]   ;;  %s1035_s2 = inlined_call_operand.vmem [shape: f32[1,128], index: 2, kind: input, shape index: {}]   ;;  %s1036_s3 = inlined_call_operand.vmem [shape: bf16[8,128], index: 3, kind: output, shape index: {}]  }
   0x1   :  { %s954_s14 = smov 0  }
   0x2 LB: > { %s25_s15 = sadd.s32 1, %s923_s13  ;;  %p750_p0 = scmp.ge.s32.totalorder %s927_s14, 1  ;;  %s927_s14 = sphi %s954_s14, %s13_s14   ;;  %s923_s13 = sphi %s952_s13, %s1038_s13   ;;  %s919_s12 = sphi %s950_s12, %s1037_s12  }
   0x3   : > { %p26_p1 = scmp.ge.s32.totalorder %s25_s15, 3  ;;  %p189_p2 = scmp.lt.s32.totalorder %s927_s14, 4 }
   0x5   : > { %s1040_s15 = smov (%p26_p1, %s25_s15), 0  ;;  %p190_p3 = pnand %p750_p0, %p189_p2 }
   0x6   : > { %s751_s16 = sshll.u32 (!%p190_p3), %s919_s12, 2  ;;  %s753_s17 = sshll.u32 (!%p190_p3), %s919_s12, 6 }
   0x7   : > { %193 = sbr.rel (%p190_p3) target bundleno = 309 (0x135), region = 32  ;;  %p233_p4 = scmp.lt.s32.totalorder (!%p190_p3), %s751_s16, 11 }
   0x8   : > { %p241_p5 = scmp.lt.s32.totalorder (!%p190_p3), %s753_s17, 191  ;;  %p755_p6 = scmp.ne.s32.totalorder (!%p190_p3), %s919_s12, 0 }
   0xe   : > { %s1042_s16 = smov (!%p233_p4, %s751_s16), 11  ;;  %s1044_s17 = smov (!%p241_p5, %s753_s17), 191 }
   0xf   : > { %s752_s18 = sshll.u32 %s1042_s16, 2  ;;  %s754_s22 = sshll.u32 %s1044_s17, 2  ;;  %v929_v0 = vmov (!%p755_p6), 0.0  }
  0x10   : > { %s975_s21 = scalar_lea.vmem %s1033_s0, %s752_s18  ;;  %s980_s25 = scalar_lea.vmem %s1034_s1, %s754_s22  ;;  %264 = vst [vmem:[#allocation2] sm:$0xff] (!%p755_p6), %v929_v0 }
  0x11   : > { %263 = sbr.rel (%p755_p6) target bundleno = 24 (0x18), region = 36 }
  0x18 PF: > { %v867_v1 = vld [vmem:[%s980_s25 + $0x40] sm:$0xff]   ;;  %v871_v5 = vld [vmem:[%s980_s25 + $0x48] sm:$0xff]   ;;  %v875_v9 = vld [vmem:[%s980_s25 + $0x50] sm:$0xff]   ;;  %p792_p7 = scmp.ne.s32.totalorder %s919_s12, 2 }
  0x19   : > { %v868_v2 = vld [vmem:[%s980_s25 + $0xc0] sm:$0xff]   ;;  %798 = vmatprep.subr.bf16.mxu0 %v867_v1  ;;  %v872_v6 = vld [vmem:[%s980_s25 + $0xc8] sm:$0xff]   ;;  %v876_v10 = vld [vmem:[%s980_s25 + $0xd0] sm:$0xff]  }
  0x1a   : > { %v869_v3 = vld [vmem:[%s980_s25] sm:$0xff]   ;;  %820 = vmatprep.subr.bf16.mxu1 %v868_v2  ;;  %v873_v7 = vld [vmem:[%s980_s25 + $0x8] sm:$0xff]   ;;  %v877_v11 = vld [vmem:[%s980_s25 + $0x10] sm:$0xff]  }
  0x1b   : > { %v870_v4 = vld [vmem:[%s980_s25 + $0x80] sm:$0xff]   ;;  %799 = vmatpush3.bf16.msra.mxu0 %v869_v3  ;;  %v874_v8 = vld [vmem:[%s980_s25 + $0x88] sm:$0xff]   ;;  %v878_v12 = vld [vmem:[%s980_s25 + $0x90] sm:$0xff]  }
  0x1c   : > { %821 = vmatpush3.bf16.msra.mxu1 %v870_v4  ;;  %800 = vmatprep.subr.bf16.mxu0 %v871_v5  ;;  %v879_v13 = vld [vmem:[%s980_s25 + $0x58] sm:$0xff]   ;;  %v883_v17 = vld [vmem:[%s980_s25 + $0x60] sm:$0xff]   ;;  %v887_v21 = vld [vmem:[%s980_s25 + $0x68] sm:$0xff]  }
  0x1d   : > { %822 = vmatprep.subr.bf16.mxu1 %v872_v6  ;;  %v880_v14 = vld [vmem:[%s980_s25 + $0xd8] sm:$0xff]   ;;  %v884_v18 = vld [vmem:[%s980_s25 + $0xe0] sm:$0xff]   ;;  %v888_v22 = vld [vmem:[%s980_s25 + $0xe8] sm:$0xff]  }
  0x1e   : > { %v881_v15 = vld [vmem:[%s980_s25 + $0x18] sm:$0xff]   ;;  %v885_v19 = vld [vmem:[%s980_s25 + $0x20] sm:$0xff]   ;;  %v889_v23 = vld [vmem:[%s980_s25 + $0x28] sm:$0xff]  }
  0x1f   : > { %801 = vmatpush3.bf16.msra.mxu0 %v873_v7  ;;  %v882_v16 = vld [vmem:[%s980_s25 + $0x98] sm:$0xff]   ;;  %v886_v20 = vld [vmem:[%s980_s25 + $0xa0] sm:$0xff]   ;;  %v890_v24 = vld [vmem:[%s980_s25 + $0xa8] sm:$0xff]  }
  0x20   : > { %823 = vmatpush3.bf16.msra.mxu1 %v874_v8  ;;  %802 = vmatprep.subr.bf16.mxu0 %v875_v9  ;;  %v891_v25 = vld [vmem:[%s980_s25 + $0x70] sm:$0xff]   ;;  %v895_v29 = vld [vmem:[%s980_s25 + $0x78] sm:$0xff]   ;;  %v266_v33 = vld [vmem:[%s975_s21] sm:$0xff] }
  0x21   : > { %824 = vmatprep.subr.bf16.mxu1 %v876_v10  ;;  %v892_v26 = vld [vmem:[%s980_s25 + $0xf0] sm:$0xff]   ;;  %v896_v30 = vld [vmem:[%s980_s25 + $0xf8] sm:$0xff]   ;;  %v267_v34 = vld [vmem:[%s975_s21 + $0x8] sm:$0xff]  ;;  %v756_v35 = vcombine.low %v266_v33, %v266_v33  ;;  %v757_v36 = vcombine.high %v266_v33, %v266_v33 }
  0x22   : > { %v893_v27 = vld [vmem:[%s980_s25 + $0x30] sm:$0xff]   ;;  %v897_v31 = vld [vmem:[%s980_s25 + $0x38] sm:$0xff]   ;;  %v758_v37 = vcombine.low %v267_v34, %v267_v34  ;;  %v759_v38 = vcombine.high %v267_v34, %v267_v34  ;;  %v265_v47 = vld [vmem:[#allocation2] sm:$0xff] }
  0x23   : > { %803 = vmatpush3.bf16.msra.mxu0 %v877_v11  ;;  %v894_v28 = vld [vmem:[%s980_s25 + $0xb0] sm:$0xff]   ;;  %v898_v32 = vld [vmem:[%s980_s25 + $0xb8] sm:$0xff]   ;;  %570 = vmatprep.mubr.bf16.mxu0 %v757_v36  ;;  %v793_v53 = vld [vmem:[%s1035_s2] ss:$0 sm:$0xff] (!%p792_p7) }
  0x24   : > { %825 = vmatpush3.bf16.msra.mxu1 %v878_v12  ;;  %804 = vmatprep.subr.bf16.mxu0 %v879_v13 }
  0x25   : > { %826 = vmatprep.subr.bf16.mxu1 %v880_v14  ;;  %610 = vmatprep.mubr.bf16.mxu1 %v759_v38 }
  0x27   : > { %805 = vmatpush3.bf16.msra.mxu0 %v881_v15 }
  0x28   : > { %827 = vmatpush3.bf16.msra.mxu1 %v882_v16  ;;  %806 = vmatprep.subr.bf16.mxu0 %v883_v17 }
  0x29   : > { %828 = vmatprep.subr.bf16.mxu1 %v884_v18 }
  0x2b   : > { %807 = vmatpush3.bf16.msra.mxu0 %v885_v19 }
  0x2c   : > { %829 = vmatpush3.bf16.msra.mxu1 %v886_v20  ;;  %808 = vmatprep.subr.bf16.mxu0 %v887_v21 }
  0x2d   : > { %830 = vmatprep.subr.bf16.mxu1 %v888_v22 }
  0x2f   : > { %809 = vmatpush3.bf16.msra.mxu0 %v889_v23 }
  0x30   : > { %831 = vmatpush3.bf16.msra.mxu1 %v890_v24  ;;  %810 = vmatprep.subr.bf16.mxu0 %v891_v25 }
  0x31   : > { %832 = vmatprep.subr.bf16.mxu1 %v892_v26 }
  0x33   : > { %811 = vmatpush3.bf16.msra.mxu0 %v893_v27 }
  0x34   : > { %833 = vmatpush3.bf16.msra.mxu1 %v894_v28  ;;  %812 = vmatprep.subr.bf16.mxu0 %v895_v29 }
  0x35   : > { %834 = vmatprep.subr.bf16.mxu1 %v896_v30 }
  0x37   : > { %813 = vmatpush3.bf16.msra.mxu0 %v897_v31 }
  0x38   : > { %835 = vmatpush3.bf16.msra.mxu1 %v898_v32 }
  0x3a   : > { %571 = vmatmul.mubr.bf16.vlgmr.msra.gmra.mrb[0].mxu0 %v756_v35 }
  0x3b   : > { %611 = vmatmul.mubr.bf16.vlgmr.msra.gmra.mrb[0].mxu1 %v758_v37 }
 0x10d   : > { %v814_v39 = vpop.f32.mrb[0].mxu0 }
 0x10e   : > { %v836_v40 = vpop.f32.mrb[0].mxu1  ;;  %v815_v41 = vpop.f32.mrb[1].mxu0 }
 0x10f   : > { %v837_v42 = vpop.f32.mrb[1].mxu1  ;;  %v816_v43 = vadd.f32 %v815_v41, %v814_v39  ;;  %v817_v45 = vpop.f32.mrb[2].mxu0 }
 0x110   : > { %v838_v44 = vadd.f32 %v837_v42, %v836_v40  ;;  %v839_v46 = vpop.f32.mrb[2].mxu1  ;;  %v818_v48 = vpop.f32.mrb[3].mxu0  ;;  %623 = sbr.rel (%p792_p7) target bundleno = 309 (0x135), region = 40 }
 0x111   : > { %v840_v49 = vpop.f32.mrb[3].mxu1 }
 0x112   : > { %v613_v50 = vadd.f32 %v838_v44, %v816_v43 }
 0x114   : > { %v618_v51 = vadd.f32 %v613_v50, %v265_v47 }
 0x116   : > { %619 = vst [vmem:[#allocation2] sm:$0xff] %v618_v51 }
 0x11d   : > { %v624_v52 = vld [vmem:[#allocation2] sm:$0xff] }
 0x11e   : > { %v632_v54 = vadd.f32 %v793_v53, %v624_v52 }
 0x120   : > { %v634_v55 = vmin.f32 %v632_v54, 0.0  ;;  %vm633_vm0 = vcmp.gt.f32.partialorder %v632_v54, 0.0 }
 0x122   : > { %v635_v56 = vmul.f32 1.442695, %v634_v55 }
 0x124   : > { %903 = vpow2.f32 %v635_v56 }
 0x12e   : > { %v904_v57 = vpop.eup %903 }
 0x12f   : > { %v794_v58 = vadd.f32 -1.0, %v904_v57 }
 0x131   : > { %v638_v59 = vsel %vm633_vm0, %v632_v54, %v794_v58 }
 0x132   : > { %v639_v60 = vpack.c.bf16 %v638_v59, %v638_v59 }
 0x134   : > { %640 = vst [vmem:[%s1036_s3] sm:$0xf] %v639_v60 }
 0x135 PF: > { %s13_s14 = sadd.s32 1, %s927_s14   ;;  %s1037_s12 = smov %s923_s13 }
 0x136   : > { %p10_p8 = scmp.ge.s32.totalorder %s13_s14, 5   ;;  %s1038_s13 = smov %s1040_s15 }
 0x138   :  { %12 = sbr.rel (!%p10_p8) target bundleno = 2 (0x2), region = 76 }

// kernel: actor_forward.22
= control target key start
LH: loop header
LB: loop body
LE: loop exit
PB: predicated region body
PF: predicated region fallthrough
CT: control target
= control target key end

     0   :  { %s827_s12 = smov 0   ;;  %s829_s13 = smov 0   ;;  %s920_s0 = inlined_call_operand.vmem [shape: bf16[8,128], index: 0, kind: input, shape index: {}]   ;;  %s921_s1 = inlined_call_operand.vmem [shape: bf16[128,512], index: 1, kind: input, shape index: {}]   ;;  %s922_s2 = inlined_call_operand.vmem [shape: f32[1,512], index: 2, kind: input, shape index: {}]   ;;  %s923_s3 = inlined_call_operand.vmem [shape: bf16[8,512], index: 3, kind: output, shape index: {}]  }
   0x1   :  { %s831_s14 = smov 0   ;;  %s833_s15 = smov 0  }
   0x2   :  { %s835_s16 = smov 0  }
   0x3 LB: > { %s28_s17 = sadd.s32 1, %s800_s15  ;;  %p76_p1 = scmp.ne.s32.totalorder %s792_s13, %s788_s12  ;;  %s804_s16 = sphi %s835_s16, %s13_s16   ;;  %s800_s15 = sphi %s833_s15, %s927_s15   ;;  %s796_s14 = sphi %s831_s14, %s926_s14   ;;  %s792_s13 = sphi %s829_s13, %s925_s13   ;;  %s788_s12 = sphi %s827_s12, %s924_s12  }
   0x4   : > { %p30_p0 = scmp.ge.s32.totalorder %s28_s17, 2  ;;  %p77_p2 = scmp.eq.s32.totalorder %s804_s16, 0 }
   0x5   : > { %s69_s19 = sadd.s32 1, %s792_s13  ;;  %p665_p5 = scmp.ge.s32.totalorder %s804_s16, 2 }
   0x6   : > { %s929_s17 = smov (%p30_p0, %s28_s17), 0  ;;  %p78_p3 = por %p77_p2, %p76_p1 }
   0x7   : > { %s65_s18 = ssub.s32 %s800_s15, %s929_s17  ;;  %166 = sbr.rel (%p665_p5) target bundleno = 26 (0x1a), region = 20 }
   0x8   : > { %p67_p4 = scmp.eq.s32.totalorder %s65_s18, 0 }
   0xa   : > { %s862_s20 = scalar_select %p67_p4, %s792_s13, %s69_s19  }
   0xe   : > { %169 = sbr.rel (!%p78_p3) target bundleno = 26 (0x1a), region = 24  ;;  %s171_s21 = sand.u32 (%p78_p3), 1, %s792_s13  }
   0xf   : > { %s695_s22 = sshll.u32 (%p78_p3), %s800_s15, 3  ;;  %s666_s23 = sshll.u32 (%p78_p3), %s171_s21, 7 }
  0x10   : > { %s870_s26 = scalar_lea.vmem (%p78_p3), %s921_s1, %s695_s22  ;;  %s173_s27 = scalar_lea.vmem (%p78_p3), [#allocation3], %s666_s23 }
  0x11   : > { %v237_v0 = vld [vmem:[%s870_s26] sm:$0xff] (%p78_p3)  ;;  %v239_v1 = vld [vmem:[%s870_s26 + $0x10] sm:$0xff] (%p78_p3) }
  0x12   : > { %v241_v2 = vld [vmem:[%s870_s26 + $0x20] sm:$0xff] (%p78_p3)  ;;  %238 = vst [vmem:[%s173_s27] sm:$0xff] (%p78_p3), %v237_v0  ;;  %240 = vst [vmem:[%s173_s27 + $0x8] sm:$0xff] (%p78_p3), %v239_v1  ;;  %v243_v3 = vld [vmem:[%s870_s26 + $0x30] sm:$0xff] (%p78_p3) }
  0x13   : > { %242 = vst [vmem:[%s173_s27 + $0x10] sm:$0xff] (%p78_p3), %v241_v2  ;;  %v245_v4 = vld [vmem:[%s870_s26 + $0x40] sm:$0xff] (%p78_p3)  ;;  %v247_v5 = vld [vmem:[%s870_s26 + $0x50] sm:$0xff] (%p78_p3)  ;;  %244 = vst [vmem:[%s173_s27 + $0x18] sm:$0xff] (%p78_p3), %v243_v3 }
  0x14   : > { %246 = vst [vmem:[%s173_s27 + $0x20] sm:$0xff] (%p78_p3), %v245_v4  ;;  %248 = vst [vmem:[%s173_s27 + $0x28] sm:$0xff] (%p78_p3), %v247_v5  ;;  %v249_v6 = vld [vmem:[%s870_s26 + $0x60] sm:$0xff] (%p78_p3)  ;;  %v251_v7 = vld [vmem:[%s870_s26 + $0x70] sm:$0xff] (%p78_p3) }
  0x15   : > { %v253_v8 = vld [vmem:[%s870_s26 + $0x80] sm:$0xff]  ;;  %250 = vst [vmem:[%s173_s27 + $0x30] sm:$0xff] %v249_v6  ;;  %252 = vst [vmem:[%s173_s27 + $0x38] sm:$0xff] %v251_v7  ;;  %v255_v9 = vld [vmem:[%s870_s26 + $0x90] sm:$0xff] }
  0x16   : > { %254 = vst [vmem:[%s173_s27 + $0x40] sm:$0xff] %v253_v8  ;;  %v257_v10 = vld [vmem:[%s870_s26 + $0xa0] sm:$0xff]  ;;  %v259_v11 = vld [vmem:[%s870_s26 + $0xb0] sm:$0xff]  ;;  %256 = vst [vmem:[%s173_s27 + $0x48] sm:$0xff] %v255_v9 }
  0x17   : > { %258 = vst [vmem:[%s173_s27 + $0x50] sm:$0xff] %v257_v10  ;;  %260 = vst [vmem:[%s173_s27 + $0x58] sm:$0xff] %v259_v11  ;;  %v261_v12 = vld [vmem:[%s870_s26 + $0xc0] sm:$0xff]  ;;  %v263_v13 = vld [vmem:[%s870_s26 + $0xd0] sm:$0xff] }
  0x18   : > { %v265_v14 = vld [vmem:[%s870_s26 + $0xe0] sm:$0xff]  ;;  %262 = vst [vmem:[%s173_s27 + $0x60] sm:$0xff] %v261_v12  ;;  %264 = vst [vmem:[%s173_s27 + $0x68] sm:$0xff] %v263_v13  ;;  %v267_v15 = vld [vmem:[%s870_s26 + $0xf0] sm:$0xff] }
  0x19   : > { %266 = vst [vmem:[%s173_s27 + $0x70] sm:$0xff] %v265_v14  ;;  %268 = vst [vmem:[%s173_s27 + $0x78] sm:$0xff] %v267_v15 }
  0x1a PF: > { %p669_p6 = scmp.ge.s32.totalorder %s804_s16, 1  ;;  %p281_p7 = scmp.lt.s32.totalorder %s804_s16, 3 }
  0x1c   : > { %p282_p8 = pnand %p669_p6, %p281_p7 }
  0x1d   : > { %s288_s28 = sand.u32 (!%p282_p8), 1, %s788_s12   ;;  %v806_v16 = vmov (!%p282_p8), 0   ;;  %v359_v33 = vld [vmem:[%s920_s0] sm:$0xf] (!%p282_p8)  ;;  %s671_s6 = sshll.u32 (!%p282_p8), %s796_s14, 1  ;;  %v508_v34 = vlaneseq (!%p282_p8) }
  0x1e   : > { %285 = sbr.rel (%p282_p8) target bundleno = 301 (0x12d), region = 66  ;;  %s670_s29 = sshll.u32 (!%p282_p8), %s288_s28, 7  ;;  %488 = vmatprep.mubr.bf16.mxu0 (!%p282_p8), %v806_v16 }
  0x1f   : > { %s290_s30 = scalar_lea.vmem (!%p282_p8), [#allocation3], %s670_s29  ;;  %p336_p9 = scmp.lt.s32.totalorder (!%p282_p8), %s671_s6, 3  ;;  %v509_v35 = vshrl.u32 (!%p282_p8), %v508_v34, 7 }
  0x20   : > { %v738_v17 = vld [vmem:[%s290_s30 + $0x4] ss:$8 sps:$4 sm:$0xff] (!%p282_p8)   ;;  %v740_v18 = vld [vmem:[%s290_s30] ss:$8 sps:$4 sm:$0xff] (!%p282_p8)   ;;  %v741_v19 = vld [vmem:[%s290_s30 + $0x14] ss:$8 sps:$4 sm:$0xff] (!%p282_p8)  }
  0x21   : > { %456 = vmatprep.subr.bf16.mxu0 (!%p282_p8), %v738_v17  ;;  %v743_v20 = vld [vmem:[%s290_s30 + $0x10] ss:$8 sps:$4 sm:$0xff] (!%p282_p8)   ;;  %v744_v21 = vld [vmem:[%s290_s30 + $0x24] ss:$8 sps:$4 sm:$0xff] (!%p282_p8)   ;;  %v746_v22 = vld [vmem:[%s290_s30 + $0x20] ss:$8 sps:$4 sm:$0xff] (!%p282_p8)  }
  0x22   : > { %457 = vmatpush1.bf16.msra.mxu0 (!%p282_p8), %v740_v18  ;;  %v747_v23 = vld [vmem:[%s290_s30 + $0x34] ss:$8 sps:$4 sm:$0xff] (!%p282_p8)   ;;  %v749_v24 = vld [vmem:[%s290_s30 + $0x30] ss:$8 sps:$4 sm:$0xff] (!%p282_p8)   ;;  %v750_v25 = vld [vmem:[%s290_s30 + $0x44] ss:$8 sps:$4 sm:$0xff] (!%p282_p8)  }
  0x23   : > { %458 = vmatprep.subr.bf16.mxu0 (!%p282_p8), %v741_v19  ;;  %v752_v26 = vld [vmem:[%s290_s30 + $0x40] ss:$8 sps:$4 sm:$0xff] (!%p282_p8)   ;;  %v753_v27 = vld [vmem:[%s290_s30 + $0x54] ss:$8 sps:$4 sm:$0xff] (!%p282_p8)   ;;  %v755_v28 = vld [vmem:[%s290_s30 + $0x50] ss:$8 sps:$4 sm:$0xff] (!%p282_p8)  }
  0x24   : > { %v756_v29 = vld [vmem:[%s290_s30 + $0x64] ss:$8 sps:$4 sm:$0xff] (!%p282_p8)   ;;  %v758_v30 = vld [vmem:[%s290_s30 + $0x60] ss:$8 sps:$4 sm:$0xff] (!%p282_p8)   ;;  %v759_v31 = vld [vmem:[%s290_s30 + $0x74] ss:$8 sps:$4 sm:$0xff] (!%p282_p8)  }
  0x25   : > { %v761_v32 = vld [vmem:[%s290_s30 + $0x70] ss:$8 sps:$4 sm:$0xff]   ;;  %s931_s6 = smov (!%p336_p9, %s671_s6), 3  ;;  %v510_v36 = vsub.s32 0, %v509_v35  ;;  %v514_v38 = vsub.s32 1, %v509_v35 }
  0x26   : > { %459 = vmatpush1.bf16.msra.mxu0 %v743_v20  ;;  %s338_s9 = scalar_lea.vmem %s922_s2, %s931_s6  ;;  %s673_s10 = sshll.u32 %s931_s6, 2 }
  0x27   : > { %460 = vmatprep.subr.bf16.mxu0 %v744_v21  ;;  %v506_v37 = vld [vmem:[%s338_s9] sm:$0x3]  ;;  %s348_s14 = scalar_lea.vmem %s923_s3, %s673_s10 }
  0x28   : > { %v511_v39 = vrot.slane %v506_v37, %v510_v36  ;;  %v515_v40 = vrot.slane %v506_v37, %v514_v38 }
  0x2a   : > { %461 = vmatpush1.bf16.msra.mxu0 %v746_v22 }
  0x2b   : > { %462 = vmatprep.subr.bf16.mxu0 %v747_v23 }
  0x2e   : > { %463 = vmatpush1.bf16.msra.mxu0 %v749_v24 }
  0x2f   : > { %464 = vmatprep.subr.bf16.mxu0 %v750_v25 }
  0x32   : > { %465 = vmatpush1.bf16.msra.mxu0 %v752_v26 }
  0x33   : > { %466 = vmatprep.subr.bf16.mxu0 %v753_v27 }
  0x36   : > { %467 = vmatpush1.bf16.msra.mxu0 %v755_v28 }
  0x37   : > { %468 = vmatprep.subr.bf16.mxu0 %v756_v29 }
  0x3a   : > { %469 = vmatpush1.bf16.msra.mxu0 %v758_v30 }
  0x3b   : > { %470 = vmatprep.subr.bf16.mxu0 %v759_v31 }
  0x3e   : > { %471 = vmatpush1.bf16.msra.mxu0 %v761_v32 }
  0x41   : > { %489 = vmatmul.mubr.bf16.vlgmr.msra.gmra.mrb[0].mxu0 %v359_v33 }
 0x114   : > { %v490_v41 = vpop.f32.mrb[0].mxu0 }
 0x115   : > { %v518_v42 = vadd.f32 %v511_v39, %v490_v41  ;;  %v492_v43 = vpop.f32.mrb[1].mxu0 }
 0x116   : > { %v519_v44 = vadd.f32 %v515_v40, %v492_v43  ;;  %v494_v45 = vpop.f32.mrb[2].mxu0 }
 0x117   : > { %v522_v46 = vmin.f32 %v518_v42, 0.0  ;;  %v495_v47 = vpop.f32.mrb[3].mxu0  ;;  %vm520_vm0 = vcmp.gt.f32.partialorder %v518_v42, 0.0 }
 0x118   : > { %v523_v48 = vmin.f32 %v519_v44, 0.0  ;;  %vm521_vm1 = vcmp.gt.f32.partialorder %v519_v44, 0.0 }
 0x119   : > { %v524_v49 = vmul.f32 1.442695, %v522_v46 }
 0x11a   : > { %v526_v50 = vmul.f32 1.442695, %v523_v48 }
 0x11b   : > { %762 = vpow2.f32 %v524_v49 }
 0x11c   : > { %764 = vpow2.f32 %v526_v50 }
 0x125   : > { %v763_v51 = vpop.eup %762 }
 0x126   : > { %v765_v52 = vpop.eup %764  ;;  %v690_v53 = vadd.f32 -1.0, %v763_v51 }
 0x127   : > { %v691_v54 = vadd.f32 -1.0, %v765_v52 }
 0x128   : > { %v530_v55 = vsel %vm520_vm0, %v518_v42, %v690_v53 }
 0x129   : > { %v531_v56 = vsel %vm521_vm1, %v519_v44, %v691_v54 }
 0x12a   : > { %v696_v57 = vpack.c.bf16 %v531_v56, %v530_v55 }
 0x12c   : > { %540 = vst [vmem:[%s348_s14] sm:$0xff] %v696_v57 }
 0x12d PF: > { %s13_s16 = sadd.s32 1, %s804_s16   ;;  %s924_s12 = smov %s792_s13 }
 0x12e   : > { %p10_p10 = scmp.ge.s32.totalorder %s13_s16, 4   ;;  %s925_s13 = smov %s862_s20 }
 0x12f   : > { %s926_s14 = smov %s800_s15  ;;  %s927_s15 = smov %s929_s17 }
 0x130   :  { %12 = sbr.rel (!%p10_p10) target bundleno = 3 (0x3), region = 119 }

// kernel: actor_forward.14
= control target key start
LH: loop header
LB: loop body
LE: loop exit
PB: predicated region body
PF: predicated region fallthrough
CT: control target
= control target key end

     0   :  { %s510_s1 = inlined_call_operand.vmem [shape: bf16[128,128], index: 1, kind: input, shape index: {}]   ;;  %s511_s0 = inlined_call_operand.vmem [shape: bf16[56,128], index: 0, kind: input, shape index: {}]   ;;  %s512_s2 = inlined_call_operand.vmem [shape: f32[1,128], index: 2, kind: input, shape index: {}]   ;;  %s513_s3 = inlined_call_operand.vmem [shape: bf16[56,128], index: 3, kind: output, shape index: {}]  }
   0x1   :  { %v413_v0 = vld [vmem:[%s510_s1] sm:$0xff]   ;;  %v414_v1 = vld [vmem:[%s510_s1 + $0x8] sm:$0xff]   ;;  %v415_v2 = vld [vmem:[%s510_s1 + $0x10] sm:$0xff]  }
   0x2   :  { %373 = vmatprep.subr.bf16.mxu0 %v413_v0  ;;  %397 = vmatprep.subr.bf16.mxu1 %v413_v0  ;;  %v416_v3 = vld [vmem:[%s510_s1 + $0x18] sm:$0xff]   ;;  %v421_v4 = vld [vmem:[%s511_s0] sm:$0xff]   ;;  %v422_v5 = vld [vmem:[%s511_s0 + $0x10] sm:$0xff]  }
   0x3   :  { %374 = vmatpush3.bf16.msra.mxu0 %v413_v0  ;;  %405 = vmatpush3.bf16.msra.mxu1 %v413_v0  ;;  %v417_v6 = vld [vmem:[%s510_s1 + $0x20] sm:$0xff]   ;;  %v418_v7 = vld [vmem:[%s510_s1 + $0x28] sm:$0xff]   ;;  %v419_v8 = vld [vmem:[%s510_s1 + $0x30] sm:$0xff]  }
   0x4   :  { %375 = vmatprep.subr.bf16.mxu0 %v414_v1  ;;  %398 = vmatprep.subr.bf16.mxu1 %v414_v1  ;;  %v420_v9 = vld [vmem:[%s510_s1 + $0x38] sm:$0xff]   ;;  %v423_v10 = vld [vmem:[%s511_s0 + $0x8] sm:$0xff]   ;;  %v322_v12 = vld [vmem:[%s512_s2] ss:$0 sm:$0xff] }
   0x5   :  { %389 = vmatprep.mubr.bf16.mxu0 %v421_v4  ;;  %393 = vmatprep.mubr.bf16.mxu1 %v422_v5  ;;  %v424_v11 = vld [vmem:[%s511_s0 + $0x18] ss:$0 sps:$4 sm:$0xff]  }
   0x7   :  { %376 = vmatpush3.bf16.msra.mxu0 %v414_v1  ;;  %406 = vmatpush3.bf16.msra.mxu1 %v414_v1 }
   0x8   :  { %377 = vmatprep.subr.bf16.mxu0 %v415_v2  ;;  %399 = vmatprep.subr.bf16.mxu1 %v415_v2 }
   0xb   :  { %378 = vmatpush3.bf16.msra.mxu0 %v415_v2  ;;  %407 = vmatpush3.bf16.msra.mxu1 %v415_v2 }
   0xc   :  { %379 = vmatprep.subr.bf16.mxu0 %v416_v3  ;;  %400 = vmatprep.subr.bf16.mxu1 %v416_v3 }
   0xf   :  { %380 = vmatpush3.bf16.msra.mxu0 %v416_v3  ;;  %408 = vmatpush3.bf16.msra.mxu1 %v416_v3 }
  0x10   :  { %381 = vmatprep.subr.bf16.mxu0 %v417_v6  ;;  %401 = vmatprep.subr.bf16.mxu1 %v417_v6 }
  0x13   :  { %382 = vmatpush3.bf16.msra.mxu0 %v417_v6  ;;  %409 = vmatpush3.bf16.msra.mxu1 %v417_v6 }
  0x14   :  { %383 = vmatprep.subr.bf16.mxu0 %v418_v7  ;;  %402 = vmatprep.subr.bf16.mxu1 %v418_v7 }
  0x17   :  { %384 = vmatpush3.bf16.msra.mxu0 %v418_v7  ;;  %410 = vmatpush3.bf16.msra.mxu1 %v418_v7 }
  0x18   :  { %385 = vmatprep.subr.bf16.mxu0 %v419_v8  ;;  %403 = vmatprep.subr.bf16.mxu1 %v419_v8 }
  0x1b   :  { %386 = vmatpush3.bf16.msra.mxu0 %v419_v8  ;;  %411 = vmatpush3.bf16.msra.mxu1 %v419_v8 }
  0x1c   :  { %387 = vmatprep.subr.bf16.mxu0 %v420_v9  ;;  %404 = vmatprep.subr.bf16.mxu1 %v420_v9 }
  0x1f   :  { %388 = vmatpush3.bf16.msra.mxu0 %v420_v9  ;;  %412 = vmatpush3.bf16.msra.mxu1 %v420_v9 }
  0x22   :  { %390 = vmatmul.mubr.bf16.vlgmr.msra.gmra.mrb[0].mxu0 %v423_v10  ;;  %394 = vmatmul.mubr.bf16.vlgmr.msra.gmra.mrb[0].mxu1 %v424_v11 }
  0xf5   :  { %v391_v13 = vpop.f32.mrb[0].mxu0  ;;  %v395_v14 = vpop.f32.mrb[0].mxu1 }
  0xf6   :  { %v223_v15 = vadd.f32 %v391_v13, %v322_v12  ;;  %v227_v16 = vadd.f32 %v395_v14, %v322_v12  ;;  %v160_v17 = vpop.f32.mrb[1].mxu0  ;;  %v176_v18 = vpop.f32.mrb[1].mxu1 }
  0xf7   :  { %v221_v19 = vadd.f32 %v322_v12, %v160_v17  ;;  %v225_v20 = vadd.f32 %v322_v12, %v176_v18  ;;  %v392_v21 = vpop.f32.mrb[2].mxu0  ;;  %v396_v22 = vpop.f32.mrb[2].mxu1 }
  0xf8   :  { %v237_v23 = vmin.f32 %v223_v15, 0.0  ;;  %v241_v24 = vmin.f32 %v227_v16, 0.0  ;;  %v163_v25 = vpop.f32.mrb[3].mxu0  ;;  %v179_v26 = vpop.f32.mrb[3].mxu1  ;;  %v224_v31 = vadd.f32 %v392_v21, %v322_v12  ;;  %vm234_vm0 = vcmp.gt.f32.partialorder %v227_v16, 0.0 }
  0xf9   :  { %v235_v27 = vmin.f32 %v221_v19, 0.0  ;;  %v239_v28 = vmin.f32 %v225_v20, 0.0  ;;  %v222_v32 = vadd.f32 %v322_v12, %v163_v25  ;;  %v226_v35 = vadd.f32 %v322_v12, %v179_v26 }
  0xfa   :  { %v246_v29 = vmul.f32 1.442695, %v237_v23  ;;  %v254_v30 = vmul.f32 1.442695, %v241_v24  ;;  %v238_v36 = vmin.f32 %v224_v31, 0.0  ;;  %vm230_vm1 = vcmp.gt.f32.partialorder %v223_v15, 0.0 }
  0xfb   :  { %v242_v33 = vmul.f32 1.442695, %v235_v27  ;;  %v250_v34 = vmul.f32 1.442695, %v239_v28  ;;  %v236_v37 = vmin.f32 %v222_v32, 0.0  ;;  %v240_v38 = vmin.f32 %v226_v35, 0.0 }
  0xfc   :  { %425 = vpow2.f32 %v246_v29  ;;  %v248_v39 = vmul.f32 1.442695, %v238_v36  ;;  %vm228_vm2 = vcmp.gt.f32.partialorder %v221_v19, 0.0  ;;  %vm232_vm3 = vcmp.gt.f32.partialorder %v225_v20, 0.0 }
  0xfd   :  { %427 = vpow2.f32 %v254_v30  ;;  %v244_v40 = vmul.f32 1.442695, %v236_v37  ;;  %v252_v41 = vmul.f32 1.442695, %v240_v38  ;;  %vm231_vm4 = vcmp.gt.f32.partialorder %v224_v31, 0.0 }
  0xfe   :  { %429 = vpow2.f32 %v242_v33  ;;  %vm229_vm5 = vcmp.gt.f32.partialorder %v222_v32, 0.0  ;;  %vm233_vm6 = vcmp.gt.f32.partialorder %v226_v35, 0.0 }
  0xff   :  { %431 = vpow2.f32 %v250_v34 }
 0x100   :  { %433 = vpow2.f32 %v248_v39 }
 0x101   :  { %435 = vpow2.f32 %v244_v40 }
 0x102   :  { %437 = vpow2.f32 %v252_v41 }
 0x106   :  { %v426_v42 = vpop.eup %425 }
 0x107   :  { %v428_v43 = vpop.eup %427  ;;  %v325_v47 = vadd.f32 -1.0, %v426_v42 }
 0x108   :  { %v430_v44 = vpop.eup %429  ;;  %v329_v45 = vadd.f32 -1.0, %v428_v43 }
 0x109   :  { %v432_v46 = vpop.eup %431  ;;  %v323_v50 = vadd.f32 -1.0, %v430_v44  ;;  %v265_v57 = vsel %vm230_vm1, %v223_v15, %v325_v47 }
 0x10a   :  { %v434_v48 = vpop.eup %433  ;;  %v269_v49 = vsel %vm234_vm0, %v227_v16, %v329_v45  ;;  %v327_v53 = vadd.f32 -1.0, %v432_v46 }
 0x10b   :  { %v436_v51 = vpop.eup %435  ;;  %v343_v52 = vpack.c.bf16 %v269_v49, %v269_v49  ;;  %v326_v54 = vadd.f32 -1.0, %v434_v48  ;;  %v263_v60 = vsel %vm228_vm2, %v221_v19, %v323_v50 }
 0x10c   :  { %v438_v55 = vpop.eup %437  ;;  %v324_v56 = vadd.f32 -1.0, %v436_v51  ;;  %v267_v63 = vsel %vm232_vm3, %v225_v20, %v327_v53 }
 0x10d   :  { %305 = vst [vmem:[%s513_s3 + $0x18] sm:$0xf] %v343_v52  ;;  %v266_v58 = vsel %vm231_vm4, %v224_v31, %v326_v54  ;;  %v328_v59 = vadd.f32 -1.0, %v438_v55 }
 0x10e   :  { %v352_v61 = vpack.c.bf16 %v266_v58, %v265_v57  ;;  %v264_v62 = vsel %vm229_vm5, %v222_v32, %v324_v56 }
 0x10f   :  { %v347_v0 = vpack.c.bf16 %v264_v62, %v263_v60  ;;  %v268_v1 = vsel %vm233_vm6, %v226_v35, %v328_v59 }
 0x110   :  { %359 = vst [vmem:[%s513_s3 + $0x8] sm:$0xff] %v352_v61   ;;  %v357_v2 = vpack.c.bf16 %v268_v1, %v267_v63 }
 0x111   :  { %348 = vst [vmem:[%s513_s3] sm:$0xff] %v347_v0  }
 0x112   :  { %360 = vst [vmem:[%s513_s3 + $0x10] sm:$0xff] %v357_v2  }

// kernel: actor_forward.15
= control target key start
LH: loop header
LB: loop body
LE: loop exit
PB: predicated region body
PF: predicated region fallthrough
CT: control target
= control target key end

     0   :  { %s680_s12 = smov 0   ;;  %s682_s13 = smov 0   ;;  %s747_s0 = inlined_call_operand.vmem [shape: bf16[32,128], index: 0, kind: input, shape index: {}]   ;;  %s748_s1 = inlined_call_operand.vmem [shape: bf16[128,128], index: 1, kind: input, shape index: {}]   ;;  %s749_s2 = inlined_call_operand.vmem [shape: f32[1,128], index: 2, kind: input, shape index: {}]   ;;  %s750_s3 = inlined_call_operand.vmem [shape: bf16[32,128], index: 3, kind: output, shape index: {}]  }
   0x1   :  { %s684_s14 = smov 0  }
   0x2 LB: > { %s32_s15 = sadd.s32 1, %s652_s13  ;;  %p538_p0 = scmp.ge.s32.totalorder %s656_s14, 1  ;;  %s656_s14 = sphi %s684_s14, %s13_s14   ;;  %s652_s13 = sphi %s682_s13, %s752_s13   ;;  %s648_s12 = sphi %s680_s12, %s751_s12  }
   0x3   : > { %p34_p1 = scmp.ge.s32.totalorder %s32_s15, 2  ;;  %p188_p2 = scmp.lt.s32.totalorder %s656_s14, 3 }
   0x5   : > { %s754_s15 = smov (%p34_p1, %s32_s15), 0  ;;  %p189_p3 = pnand %p538_p0, %p188_p2 }
   0x6   : > { %v621_v0 = vld [vmem:[%s748_s1] sm:$0xff] (!%p189_p3)   ;;  %v658_v1 = vmov (!%p189_p3), 0.0   ;;  %v622_v2 = vld [vmem:[%s748_s1 + $0x8] sm:$0xff] (!%p189_p3)   ;;  %vm659_vm0 = vmmov (!%p189_p3), 0   ;;  %s539_s20 = sshll.u32 (!%p189_p3), %s648_s12, 1  ;;  %v623_v3 = vld [vmem:[%s748_s1 + $0x10] sm:$0xff] (!%p189_p3)  }
   0x7   : > { %192 = sbr.rel (%p189_p3) target bundleno = 276 (0x114), region = 32  ;;  %575 = vmatprep.subr.bf16.mxu0 (!%p189_p3), %v658_v1  ;;  %591 = vmatprep.mubr.msk.bf16.mxu0 (!%p189_p3), %vm659_vm0, %v658_v1  ;;  %p230_p4 = scmp.lt.s32.totalorder (!%p189_p3), %s539_s20, 3  ;;  %v624_v4 = vld [vmem:[%s748_s1 + $0x18] sm:$0xff] (!%p189_p3)   ;;  %v625_v5 = vld [vmem:[%s748_s1 + $0x20] sm:$0xff] (!%p189_p3)   ;;  %v626_v6 = vld [vmem:[%s748_s1 + $0x28] sm:$0xff] (!%p189_p3)  }
   0x8   : > { %576 = vmatpush3.bf16.msra.mxu0 (!%p189_p3), %v621_v0  ;;  %v627_v7 = vld [vmem:[%s748_s1 + $0x30] sm:$0xff] (!%p189_p3)   ;;  %v628_v8 = vld [vmem:[%s748_s1 + $0x38] sm:$0xff] (!%p189_p3)   ;;  %v552_v10 = vld [vmem:[%s749_s2] ss:$0 sm:$0xff] (!%p189_p3) }
   0x9   : > { %577 = vmatprep.subr.bf16.mxu0 (!%p189_p3), %v658_v1 }
   0xc   : > { %578 = vmatpush3.bf16.msra.mxu0 (!%p189_p3), %v622_v2 }
   0xd   : > { %579 = vmatprep.subr.bf16.mxu0 (!%p189_p3), %v658_v1 }
   0xe   : > { %s756_s20 = smov (!%p230_p4, %s539_s20), 3 }
   0xf   : > { %s540_s23 = sshll.u32 %s756_s20, 2 }
  0x10   : > { %s236_s26 = scalar_lea.vmem %s747_s0, %s540_s23  ;;  %580 = vmatpush3.bf16.msra.mxu0 %v623_v3  ;;  %s257_s17 = scalar_lea.vmem %s750_s3, %s540_s23 }
  0x11   : > { %581 = vmatprep.subr.bf16.mxu0 %v658_v1  ;;  %v629_v9 = vld [vmem:[%s236_s26] sm:$0xff]  }
  0x14   : > { %582 = vmatpush3.bf16.msra.mxu0 %v624_v4 }
  0x15   : > { %583 = vmatprep.subr.bf16.mxu0 %v658_v1 }
  0x18   : > { %584 = vmatpush3.bf16.msra.mxu0 %v625_v5 }
  0x19   : > { %585 = vmatprep.subr.bf16.mxu0 %v658_v1 }
  0x1c   : > { %586 = vmatpush3.bf16.msra.mxu0 %v626_v6 }
  0x1d   : > { %587 = vmatprep.subr.bf16.mxu0 %v658_v1 }
  0x20   : > { %588 = vmatpush3.bf16.msra.mxu0 %v627_v7 }
  0x21   : > { %589 = vmatprep.subr.bf16.mxu0 %v658_v1 }
  0x24   : > { %590 = vmatpush3.bf16.msra.mxu0 %v628_v8 }
  0x27   : > { %592 = vmatmul.mubr.bf16.vlgmr.msra.gmra.mrb[0].mxu0 %v629_v9 }
  0xfa   : > { %v374_v11 = vpop.f32.mrb[0].mxu0 }
  0xfb   : > { %v397_v12 = vadd.f32 %v552_v10, %v374_v11  ;;  %v593_v13 = vpop.f32.mrb[1].mxu0 }
  0xfc   : > { %v377_v14 = vpop.f32.mrb[2].mxu0 }
  0xfd   : > { %v401_v15 = vmin.f32 %v397_v12, 0.0  ;;  %v398_v16 = vadd.f32 %v552_v10, %v377_v14  ;;  %v594_v17 = vpop.f32.mrb[3].mxu0  ;;  %vm399_vm1 = vcmp.gt.f32.partialorder %v397_v12, 0.0 }
  0xff   : > { %v403_v18 = vmul.f32 1.442695, %v401_v15  ;;  %v402_v19 = vmin.f32 %v398_v16, 0.0  ;;  %vm400_vm2 = vcmp.gt.f32.partialorder %v398_v16, 0.0 }
 0x101   : > { %630 = vpow2.f32 %v403_v18  ;;  %v405_v20 = vmul.f32 1.442695, %v402_v19 }
 0x103   : > { %632 = vpow2.f32 %v405_v20 }
 0x10b   : > { %v631_v21 = vpop.eup %630 }
 0x10c   : > { %v553_v22 = vadd.f32 -1.0, %v631_v21 }
 0x10d   : > { %v633_v23 = vpop.eup %632 }
 0x10e   : > { %v554_v24 = vadd.f32 -1.0, %v633_v23  ;;  %v409_v25 = vsel %vm399_vm1, %v397_v12, %v553_v22 }
 0x110   : > { %v410_v26 = vsel %vm400_vm2, %v398_v16, %v554_v24 }
 0x111   : > { %v564_v27 = vpack.c.bf16 %v410_v26, %v409_v25 }
 0x113   : > { %565 = vst [vmem:[%s257_s17] sm:$0xff] %v564_v27  }
 0x114 PF: > { %s13_s14 = sadd.s32 1, %s656_s14   ;;  %s751_s12 = smov %s652_s13 }
 0x115   : > { %p10_p5 = scmp.ge.s32.totalorder %s13_s14, 4   ;;  %s752_s13 = smov %s754_s15 }
 0x117   :  { %12 = sbr.rel (!%p10_p5) target bundleno = 2 (0x2), region = 76 }

// kernel: actor_forward.16
= control target key start
LH: loop header
LB: loop body
LE: loop exit
PB: predicated region body
PF: predicated region fallthrough
CT: control target
= control target key end

     0   :  { %s362_s1 = inlined_call_operand.vmem [shape: bf16[256,128], index: 1, kind: input, shape index: {}]   ;;  %s363_s0 = inlined_call_operand.vmem [shape: bf16[8,256], index: 0, kind: input, shape index: {}]   ;;  %s364_s2 = inlined_call_operand.vmem [shape: f32[1,128], index: 2, kind: input, shape index: {}]   ;;  %s365_s3 = inlined_call_operand.vmem [shape: bf16[8,128], index: 3, kind: output, shape index: {}]  }
   0x1   :  { %v265_v0 = vld [vmem:[%s362_s1 + $0x40] sm:$0xff]   ;;  %v267_v2 = vld [vmem:[%s362_s1 + $0x48] sm:$0xff]   ;;  %v269_v4 = vld [vmem:[%s362_s1 + $0x50] sm:$0xff]  }
   0x2   :  { %v266_v1 = vld [vmem:[%s362_s1] sm:$0xff]   ;;  %243 = vmatprep.subr.bf16.mxu0 %v265_v0  ;;  %v268_v3 = vld [vmem:[%s362_s1 + $0x8] sm:$0xff]   ;;  %v270_v5 = vld [vmem:[%s362_s1 + $0x10] sm:$0xff]  }
   0x3   :  { %244 = vmatpush3.bf16.msra.mxu0 %v266_v1  ;;  %v271_v6 = vld [vmem:[%s362_s1 + $0x58] sm:$0xff]   ;;  %v273_v8 = vld [vmem:[%s362_s1 + $0x60] sm:$0xff]   ;;  %v275_v10 = vld [vmem:[%s362_s1 + $0x68] sm:$0xff]  }
   0x4   :  { %245 = vmatprep.subr.bf16.mxu0 %v267_v2  ;;  %v272_v7 = vld [vmem:[%s362_s1 + $0x18] sm:$0xff]   ;;  %v274_v9 = vld [vmem:[%s362_s1 + $0x20] sm:$0xff]   ;;  %v276_v13 = vld [vmem:[%s362_s1 + $0x28] sm:$0xff]  }
   0x5   :  { %v21_v11 = vld [vmem:[%s363_s0] sm:$0xff]  ;;  %v277_v14 = vld [vmem:[%s362_s1 + $0x70] sm:$0xff]   ;;  %v279_v16 = vld [vmem:[%s362_s1 + $0x78] sm:$0xff]  }
   0x6   :  { %v224_v12 = vcombine.high %v21_v11, %v21_v11  ;;  %v278_v15 = vld [vmem:[%s362_s1 + $0x30] sm:$0xff]   ;;  %v280_v17 = vld [vmem:[%s362_s1 + $0x38] sm:$0xff]   ;;  %v223_v18 = vcombine.low %v21_v11, %v21_v11  ;;  %v241_v21 = vld [vmem:[%s364_s2] ss:$0 sm:$0xff] }
   0x7   :  { %246 = vmatpush3.bf16.msra.mxu0 %v268_v3 }
   0x8   :  { %247 = vmatprep.subr.bf16.mxu0 %v269_v4  ;;  %189 = vmatprep.mubr.bf16.mxu0 %v224_v12 }
   0xb   :  { %248 = vmatpush3.bf16.msra.mxu0 %v270_v5 }
   0xc   :  { %249 = vmatprep.subr.bf16.mxu0 %v271_v6 }
   0xf   :  { %250 = vmatpush3.bf16.msra.mxu0 %v272_v7 }
  0x10   :  { %251 = vmatprep.subr.bf16.mxu0 %v273_v8 }
  0x13   :  { %252 = vmatpush3.bf16.msra.mxu0 %v274_v9 }
  0x14   :  { %253 = vmatprep.subr.bf16.mxu0 %v275_v10 }
  0x17   :  { %254 = vmatpush3.bf16.msra.mxu0 %v276_v13 }
  0x18   :  { %255 = vmatprep.subr.bf16.mxu0 %v277_v14 }
  0x1b   :  { %256 = vmatpush3.bf16.msra.mxu0 %v278_v15 }
  0x1c   :  { %257 = vmatprep.subr.bf16.mxu0 %v279_v16 }
  0x1f   :  { %258 = vmatpush3.bf16.msra.mxu0 %v280_v17 }
  0x22   :  { %190 = vmatmul.mubr.bf16.vlgmr.msra.gmra.mrb[0].mxu0 %v223_v18 }
  0xf5   :  { %v259_v19 = vpop.f32.mrb[0].mxu0 }
  0xf6   :  { %v260_v20 = vpop.f32.mrb[1].mxu0 }
  0xf7   :  { %v261_v22 = vadd.f32 %v260_v20, %v259_v19  ;;  %v262_v23 = vpop.f32.mrb[2].mxu0 }
  0xf8   :  { %v263_v24 = vpop.f32.mrb[3].mxu0 }
  0xf9   :  { %v210_v25 = vadd.f32 %v261_v22, %v241_v21 }
  0xfb   :  { %v212_v26 = vmin.f32 %v210_v25, 0.0  ;;  %vm211_vm0 = vcmp.gt.f32.partialorder %v210_v25, 0.0 }
  0xfd   :  { %v213_v27 = vmul.f32 1.442695, %v212_v26 }
  0xff   :  { %283 = vpow2.f32 %v213_v27 }
 0x109   :  { %v284_v28 = vpop.eup %283 }
 0x10a   :  { %v242_v29 = vadd.f32 -1.0, %v284_v28 }
 0x10c   :  { %v216_v30 = vsel %vm211_vm0, %v210_v25, %v242_v29 }
 0x10d   :  { %v217_v31 = vpack.c.bf16 %v216_v30, %v216_v30 }
 0x10f   :  { %218 = vst [vmem:[%s365_s3] sm:$0xf] %v217_v31 }

// kernel: actor_forward.17
= control target key start
LH: loop header
LB: loop body
LE: loop exit
PB: predicated region body
PF: predicated region fallthrough
CT: control target
= control target key end

     0   :  { %v203_v0 = vmov 0.0   ;;  %vm204_vm0 = vmmov 0   ;;  %s258_s1 = inlined_call_operand.vmem [shape: bf16[128,128], index: 1, kind: input, shape index: {}]   ;;  %s259_s0 = inlined_call_operand.vmem [shape: bf16[8,128], index: 0, kind: input, shape index: {}]   ;;  %s260_s2 = inlined_call_operand.vmem [shape: f32[1,128], index: 2, kind: input, shape index: {}]   ;;  %s261_s3 = inlined_call_operand.vmem [shape: bf16[8,128], index: 3, kind: output, shape index: {}]  }
   0x1   :  { %171 = vmatprep.subr.bf16.mxu0 %v203_v0  ;;  %v193_v1 = vld [vmem:[%s258_s1] sm:$0xff]   ;;  %187 = vmatprep.mubr.msk.bf16.mxu0 %vm204_vm0, %v203_v0  ;;  %v194_v2 = vld [vmem:[%s258_s1 + $0x8] sm:$0xff]   ;;  %v195_v3 = vld [vmem:[%s258_s1 + $0x10] sm:$0xff]  }
   0x2   :  { %172 = vmatpush3.bf16.msra.mxu0 %v193_v1  ;;  %v196_v4 = vld [vmem:[%s258_s1 + $0x18] sm:$0xff]   ;;  %v197_v5 = vld [vmem:[%s258_s1 + $0x20] sm:$0xff]   ;;  %v198_v6 = vld [vmem:[%s258_s1 + $0x28] sm:$0xff]  }
   0x3   :  { %173 = vmatprep.subr.bf16.mxu0 %v203_v0  ;;  %v199_v7 = vld [vmem:[%s258_s1 + $0x30] sm:$0xff]   ;;  %v200_v8 = vld [vmem:[%s258_s1 + $0x38] sm:$0xff]   ;;  %v21_v9 = vld [vmem:[%s259_s0] sm:$0xf] }
   0x4   :  { %v160_v10 = vld [vmem:[%s260_s2] ss:$0 sm:$0xff] }
   0x6   :  { %174 = vmatpush3.bf16.msra.mxu0 %v194_v2 }
   0x7   :  { %175 = vmatprep.subr.bf16.mxu0 %v203_v0 }
   0xa   :  { %176 = vmatpush3.bf16.msra.mxu0 %v195_v3 }
   0xb   :  { %177 = vmatprep.subr.bf16.mxu0 %v203_v0 }
   0xe   :  { %178 = vmatpush3.bf16.msra.mxu0 %v196_v4 }
   0xf   :  { %179 = vmatprep.subr.bf16.mxu0 %v203_v0 }
  0x12   :  { %180 = vmatpush3.bf16.msra.mxu0 %v197_v5 }
  0x13   :  { %181 = vmatprep.subr.bf16.mxu0 %v203_v0 }
  0x16   :  { %182 = vmatpush3.bf16.msra.mxu0 %v198_v6 }
  0x17   :  { %183 = vmatprep.subr.bf16.mxu0 %v203_v0 }
  0x1a   :  { %184 = vmatpush3.bf16.msra.mxu0 %v199_v7 }
  0x1b   :  { %185 = vmatprep.subr.bf16.mxu0 %v203_v0 }
  0x1e   :  { %186 = vmatpush3.bf16.msra.mxu0 %v200_v8 }
  0x21   :  { %188 = vmatmul.mubr.bf16.vlgmr.msra.gmra.mrb[0].mxu0 %v21_v9 }
  0xf4   :  { %v120_v11 = vpop.f32.mrb[0].mxu0 }
  0xf5   :  { %v139_v12 = vadd.f32 %v160_v10, %v120_v11  ;;  %v189_v13 = vpop.f32.mrb[1].mxu0 }
  0xf6   :  { %v123_v14 = vpop.f32.mrb[2].mxu0 }
  0xf7   :  { %v141_v15 = vmin.f32 %v139_v12, 0.0  ;;  %v190_v16 = vpop.f32.mrb[3].mxu0  ;;  %vm140_vm1 = vcmp.gt.f32.partialorder %v139_v12, 0.0 }
  0xf9   :  { %v142_v17 = vmul.f32 1.442695, %v141_v15 }
  0xfb   :  { %201 = vpow2.f32 %v142_v17 }
 0x105   :  { %v202_v18 = vpop.eup %201 }
 0x106   :  { %v161_v19 = vadd.f32 -1.0, %v202_v18 }
 0x108   :  { %v145_v20 = vsel %vm140_vm1, %v139_v12, %v161_v19 }
 0x109   :  { %v146_v21 = vpack.c.bf16 %v145_v20, %v145_v20 }
 0x10b   :  { %147 = vst [vmem:[%s261_s3] sm:$0xf] %v146_v21 }

// kernel: eq.1
= control target key start
LH: loop header
LB: loop body
LE: loop exit
PB: predicated region body
PF: predicated region fallthrough
CT: control target
= control target key end

     0   :  { %vm7_vm0 = vcmask 31744   ;;  %vm13_vm1 = vcmask 64544   ;;  %s39_s0 = inlined_call_operand.vmem [shape: s32[2,4], index: 0, kind: input, shape index: {}]   ;;  %s40_s1 = inlined_call_operand.vmem [shape: s32[8], index: 1, kind: output, shape index: {}]  }
   0x1   :  { %v4_v0 = vld [vmem:[%s39_s0] sm:$0x3]  ;;  %s22_s0 = smov 4  }
   0x2   :  { %5 = vst [vmem:[#allocation1] sm:$0x3] %v4_v0 }
   0x9   :  { %v10_v1 = vld [vmem:[#allocation1 + $0x1] sm:$0x1]   ;;  %v6_v2 = vld [vmem:[#allocation1] sm:$0x1]  }
   0xa   :  { %11 = vrot.lane.b32.xlu0 %v10_v1, %s22_s0  ;;  %8 = vst.msk [vmem:[#allocation0] sm:$0x1] %vm7_vm0, %v6_v2  }
  0x7c   :  { %v12_v3 = vpop.permute.xlu0 %11  }
  0x7d   :  { %14 = vst.msk [vmem:[#allocation0] sm:$0x1] %vm13_vm1, %v12_v3  }
  0x84   :  { %v18_v4 = vld [vmem:[#allocation0] sm:$0x1] }
  0x85   :  { %20 = vst [vmem:[%s40_s1] sm:$0x1] %v18_v4 }

// kernel: actor_forward.23
= control target key start
LH: loop header
LB: loop body
LE: loop exit
PB: predicated region body
PF: predicated region fallthrough
CT: control target
= control target key end

     0   :  { %s1521_s12 = smov 0   ;;  %s1523_s13 = smov 0   ;;  %s1832_s0 = inlined_call_operand.vmem [shape: bf16[8,1024], index: 0, kind: input, shape index: {}]   ;;  %s1833_s1 = inlined_call_operand.vmem [shape: bf16[1024,512], index: 1, kind: input, shape index: {}]   ;;  %s1834_s2 = inlined_call_operand.vmem [shape: f32[1,512], index: 2, kind: input, shape index: {}]   ;;  %s1835_s3 = inlined_call_operand.vmem [shape: bf16[8,512], index: 3, kind: output, shape index: {}]  }
   0x1   :  { %s1525_s14 = smov 0   ;;  %s1527_s15 = smov 0  }
   0x2   :  { %s1529_s16 = smov 0   ;;  %s1531_s17 = smov 0  }
   0x3   :  { %s1533_s18 = smov 0  }
   0x4 LB: > { %s25_s19 = sadd.s32 1, %s1490_s16  ;;  %s28_s20 = sadd.s32 1, %s1494_s17  ;;  %s1498_s18 = sphi %s1533_s18, %s13_s18   ;;  %s1494_s17 = sphi %s1531_s17, %s1841_s17   ;;  %s1490_s16 = sphi %s1529_s16, %s1840_s16   ;;  %s1486_s15 = sphi %s1527_s15, %s1839_s15   ;;  %s1482_s14 = sphi %s1525_s14, %s1838_s14   ;;  %s1478_s13 = sphi %s1523_s13, %s1837_s13   ;;  %s1474_s12 = sphi %s1521_s12, %s1836_s12  }
   0x5   : > { %p26_p0 = scmp.ge.s32.totalorder %s25_s19, 2  ;;  %p76_p1 = scmp.ne.s32.totalorder %s1478_s13, %s1474_s12 }
   0x6   : > { %p77_p2 = scmp.eq.s32.totalorder %s1498_s18, 0  ;;  %s69_s24 = sadd.s32 1, %s1478_s13 }
   0x7   : > { %s1843_s19 = smov (%p26_p0, %s25_s19), 0  ;;  %s1845_s20 = smov (!%p26_p0, %s28_s20), %s1494_s17 }
   0x8   : > { %p78_p3 = por %p77_p2, %p76_p1  ;;  %p30_p4 = scmp.ge.s32.totalorder %s1845_s20, 2 }
   0x9   : > { %s64_s21 = ssub.s32 %s1490_s16, %s1843_s19  ;;  %p1199_p6 = scmp.ge.s32.totalorder %s1498_s18, 4 }
   0xa   : > { %s1847_s20 = smov (%p30_p4, %s1845_s20), 0 }
   0xb   : > { %s65_s22 = ssub.s32 %s1494_s17, %s1847_s20  ;;  %156 = sbr.rel (%p1199_p6) target bundleno = 57 (0x39), region = 16 }
   0xc   : > { %s66_s23 = sor.u32 %s65_s22, %s64_s21 }
   0xd   : > { %p67_p5 = scmp.eq.s32.totalorder %s66_s23, 0 }
   0xf   : > { %s1572_s25 = scalar_select %p67_p5, %s1478_s13, %s69_s24  }
  0x12   : > { %172 = sbr.rel (!%p78_p3) target bundleno = 57 (0x39), region = 24  ;;  %s174_s26 = sand.u32 (%p78_p3), 1, %s1478_s13  }
  0x13   : > { %s1202_s27 = sshll.u32 (%p78_p3), %s1494_s17, 1  ;;  %s1200_s28 = sshll.u32 (%p78_p3), %s174_s26, 9 }
  0x14   : > { %s1285_s29 = sshll.u32 (%p78_p3), %s1490_s16, 8  ;;  %s1586_s8 = scalar_lea.vmem (%p78_p3), [#allocation3], %s1200_s28 }
  0x15   : > { %s180_s30 = sadd.s32 (%p78_p3), %s1285_s29, %s1202_s27 }
  0x16   : > { %s1204_s4 = sshll.u32 (%p78_p3), %s180_s30, 2 }
  0x17   : > { %s1581_s7 = scalar_lea.vmem (%p78_p3), %s1833_s1, %s1204_s4 }
  0x18   : > { %v336_v0 = vld [vmem:[%s1581_s7] sm:$0xff] (%p78_p3)  ;;  %v338_v1 = vld [vmem:[%s1581_s7 + $0x10] sm:$0xff] (%p78_p3) }
  0x19   : > { %v340_v2 = vld [vmem:[%s1581_s7 + $0x20] sm:$0xff]  ;;  %337 = vst [vmem:[%s1586_s8] sm:$0xff] %v336_v0  ;;  %339 = vst [vmem:[%s1586_s8 + $0x8] sm:$0xff] %v338_v1  ;;  %v342_v3 = vld [vmem:[%s1581_s7 + $0x30] sm:$0xff] }
  0x1a   : > { %341 = vst [vmem:[%s1586_s8 + $0x10] sm:$0xff] %v340_v2  ;;  %v344_v4 = vld [vmem:[%s1581_s7 + $0x40] sm:$0xff]  ;;  %v346_v5 = vld [vmem:[%s1581_s7 + $0x50] sm:$0xff]  ;;  %343 = vst [vmem:[%s1586_s8 + $0x18] sm:$0xff] %v342_v3 }
  0x1b   : > { %345 = vst [vmem:[%s1586_s8 + $0x20] sm:$0xff] %v344_v4  ;;  %347 = vst [vmem:[%s1586_s8 + $0x28] sm:$0xff] %v346_v5  ;;  %v348_v6 = vld [vmem:[%s1581_s7 + $0x60] sm:$0xff]  ;;  %v350_v7 = vld [vmem:[%s1581_s7 + $0x70] sm:$0xff] }
  0x1c   : > { %v352_v8 = vld [vmem:[%s1581_s7 + $0x80] sm:$0xff]  ;;  %349 = vst [vmem:[%s1586_s8 + $0x30] sm:$0xff] %v348_v6  ;;  %351 = vst [vmem:[%s1586_s8 + $0x38] sm:$0xff] %v350_v7  ;;  %v354_v9 = vld [vmem:[%s1581_s7 + $0x90] sm:$0xff] }
  0x1d   : > { %353 = vst [vmem:[%s1586_s8 + $0x40] sm:$0xff] %v352_v8  ;;  %v356_v10 = vld [vmem:[%s1581_s7 + $0xa0] sm:$0xff]  ;;  %v358_v11 = vld [vmem:[%s1581_s7 + $0xb0] sm:$0xff]  ;;  %355 = vst [vmem:[%s1586_s8 + $0x48] sm:$0xff] %v354_v9 }
  0x1e   : > { %357 = vst [vmem:[%s1586_s8 + $0x50] sm:$0xff] %v356_v10  ;;  %359 = vst [vmem:[%s1586_s8 + $0x58] sm:$0xff] %v358_v11  ;;  %v360_v12 = vld [vmem:[%s1581_s7 + $0xc0] sm:$0xff]  ;;  %v362_v13 = vld [vmem:[%s1581_s7 + $0xd0] sm:$0xff] }
  0x1f   : > { %v364_v14 = vld [vmem:[%s1581_s7 + $0xe0] sm:$0xff]  ;;  %361 = vst [vmem:[%s1586_s8 + $0x60] sm:$0xff] %v360_v12  ;;  %363 = vst [vmem:[%s1586_s8 + $0x68] sm:$0xff] %v362_v13  ;;  %v366_v15 = vld [vmem:[%s1581_s7 + $0xf0] sm:$0xff] }
  0x20   : > { %365 = vst [vmem:[%s1586_s8 + $0x70] sm:$0xff] %v364_v14  ;;  %v368_v16 = vld [vmem:[%s1581_s7 + $0x100] sm:$0xff]  ;;  %v370_v17 = vld [vmem:[%s1581_s7 + $0x110] sm:$0xff]  ;;  %367 = vst [vmem:[%s1586_s8 + $0x78] sm:$0xff] %v366_v15 }
  0x21   : > { %369 = vst [vmem:[%s1586_s8 + $0x80] sm:$0xff] %v368_v16  ;;  %371 = vst [vmem:[%s1586_s8 + $0x88] sm:$0xff] %v370_v17  ;;  %v372_v18 = vld [vmem:[%s1581_s7 + $0x120] sm:$0xff]  ;;  %v374_v19 = vld [vmem:[%s1581_s7 + $0x130] sm:$0xff] }
  0x22   : > { %v376_v20 = vld [vmem:[%s1581_s7 + $0x140] sm:$0xff]  ;;  %373 = vst [vmem:[%s1586_s8 + $0x90] sm:$0xff] %v372_v18  ;;  %375 = vst [vmem:[%s1586_s8 + $0x98] sm:$0xff] %v374_v19  ;;  %v378_v21 = vld [vmem:[%s1581_s7 + $0x150] sm:$0xff] }
  0x23   : > { %377 = vst [vmem:[%s1586_s8 + $0xa0] sm:$0xff] %v376_v20  ;;  %v380_v22 = vld [vmem:[%s1581_s7 + $0x160] sm:$0xff]  ;;  %v382_v23 = vld [vmem:[%s1581_s7 + $0x170] sm:$0xff]  ;;  %379 = vst [vmem:[%s1586_s8 + $0xa8] sm:$0xff] %v378_v21 }
  0x24   : > { %381 = vst [vmem:[%s1586_s8 + $0xb0] sm:$0xff] %v380_v22  ;;  %383 = vst [vmem:[%s1586_s8 + $0xb8] sm:$0xff] %v382_v23  ;;  %v384_v24 = vld [vmem:[%s1581_s7 + $0x180] sm:$0xff]  ;;  %v386_v25 = vld [vmem:[%s1581_s7 + $0x190] sm:$0xff] }
  0x25   : > { %v388_v26 = vld [vmem:[%s1581_s7 + $0x1a0] sm:$0xff]  ;;  %385 = vst [vmem:[%s1586_s8 + $0xc0] sm:$0xff] %v384_v24  ;;  %387 = vst [vmem:[%s1586_s8 + $0xc8] sm:$0xff] %v386_v25  ;;  %v390_v27 = vld [vmem:[%s1581_s7 + $0x1b0] sm:$0xff] }
  0x26   : > { %389 = vst [vmem:[%s1586_s8 + $0xd0] sm:$0xff] %v388_v26  ;;  %v392_v28 = vld [vmem:[%s1581_s7 + $0x1c0] sm:$0xff]  ;;  %v394_v29 = vld [vmem:[%s1581_s7 + $0x1d0] sm:$0xff]  ;;  %391 = vst [vmem:[%s1586_s8 + $0xd8] sm:$0xff] %v390_v27 }
  0x27   : > { %393 = vst [vmem:[%s1586_s8 + $0xe0] sm:$0xff] %v392_v28  ;;  %395 = vst [vmem:[%s1586_s8 + $0xe8] sm:$0xff] %v394_v29  ;;  %v396_v30 = vld [vmem:[%s1581_s7 + $0x1e0] sm:$0xff]  ;;  %v398_v31 = vld [vmem:[%s1581_s7 + $0x1f0] sm:$0xff] }
  0x28   : > { %v400_v32 = vld [vmem:[%s1581_s7 + $0x200] sm:$0xff]  ;;  %397 = vst [vmem:[%s1586_s8 + $0xf0] sm:$0xff] %v396_v30  ;;  %399 = vst [vmem:[%s1586_s8 + $0xf8] sm:$0xff] %v398_v31  ;;  %v402_v33 = vld [vmem:[%s1581_s7 + $0x210] sm:$0xff] }
  0x29   : > { %401 = vst [vmem:[%s1586_s8 + $0x100] sm:$0xff] %v400_v32  ;;  %v404_v34 = vld [vmem:[%s1581_s7 + $0x220] sm:$0xff]  ;;  %v406_v35 = vld [vmem:[%s1581_s7 + $0x230] sm:$0xff]  ;;  %403 = vst [vmem:[%s1586_s8 + $0x108] sm:$0xff] %v402_v33 }
  0x2a   : > { %405 = vst [vmem:[%s1586_s8 + $0x110] sm:$0xff] %v404_v34  ;;  %407 = vst [vmem:[%s1586_s8 + $0x118] sm:$0xff] %v406_v35  ;;  %v408_v36 = vld [vmem:[%s1581_s7 + $0x240] sm:$0xff]  ;;  %v410_v37 = vld [vmem:[%s1581_s7 + $0x250] sm:$0xff] }
  0x2b   : > { %v412_v38 = vld [vmem:[%s1581_s7 + $0x260] sm:$0xff]  ;;  %409 = vst [vmem:[%s1586_s8 + $0x120] sm:$0xff] %v408_v36  ;;  %411 = vst [vmem:[%s1586_s8 + $0x128] sm:$0xff] %v410_v37  ;;  %v414_v39 = vld [vmem:[%s1581_s7 + $0x270] sm:$0xff] }
  0x2c   : > { %413 = vst [vmem:[%s1586_s8 + $0x130] sm:$0xff] %v412_v38  ;;  %v416_v40 = vld [vmem:[%s1581_s7 + $0x280] sm:$0xff]  ;;  %v418_v41 = vld [vmem:[%s1581_s7 + $0x290] sm:$0xff]  ;;  %415 = vst [vmem:[%s1586_s8 + $0x138] sm:$0xff] %v414_v39 }
  0x2d   : > { %417 = vst [vmem:[%s1586_s8 + $0x140] sm:$0xff] %v416_v40  ;;  %419 = vst [vmem:[%s1586_s8 + $0x148] sm:$0xff] %v418_v41  ;;  %v420_v42 = vld [vmem:[%s1581_s7 + $0x2a0] sm:$0xff]  ;;  %v422_v43 = vld [vmem:[%s1581_s7 + $0x2b0] sm:$0xff] }
  0x2e   : > { %v424_v44 = vld [vmem:[%s1581_s7 + $0x2c0] sm:$0xff]  ;;  %421 = vst [vmem:[%s1586_s8 + $0x150] sm:$0xff] %v420_v42  ;;  %423 = vst [vmem:[%s1586_s8 + $0x158] sm:$0xff] %v422_v43  ;;  %v426_v45 = vld [vmem:[%s1581_s7 + $0x2d0] sm:$0xff] }
  0x2f   : > { %425 = vst [vmem:[%s1586_s8 + $0x160] sm:$0xff] %v424_v44  ;;  %v428_v46 = vld [vmem:[%s1581_s7 + $0x2e0] sm:$0xff]  ;;  %v430_v47 = vld [vmem:[%s1581_s7 + $0x2f0] sm:$0xff]  ;;  %427 = vst [vmem:[%s1586_s8 + $0x168] sm:$0xff] %v426_v45 }
  0x30   : > { %429 = vst [vmem:[%s1586_s8 + $0x170] sm:$0xff] %v428_v46  ;;  %431 = vst [vmem:[%s1586_s8 + $0x178] sm:$0xff] %v430_v47  ;;  %v432_v48 = vld [vmem:[%s1581_s7 + $0x300] sm:$0xff]  ;;  %v434_v49 = vld [vmem:[%s1581_s7 + $0x310] sm:$0xff] }
  0x31   : > { %v436_v50 = vld [vmem:[%s1581_s7 + $0x320] sm:$0xff]  ;;  %433 = vst [vmem:[%s1586_s8 + $0x180] sm:$0xff] %v432_v48  ;;  %435 = vst [vmem:[%s1586_s8 + $0x188] sm:$0xff] %v434_v49  ;;  %v438_v51 = vld [vmem:[%s1581_s7 + $0x330] sm:$0xff] }
  0x32   : > { %437 = vst [vmem:[%s1586_s8 + $0x190] sm:$0xff] %v436_v50  ;;  %v440_v52 = vld [vmem:[%s1581_s7 + $0x340] sm:$0xff]  ;;  %v442_v53 = vld [vmem:[%s1581_s7 + $0x350] sm:$0xff]  ;;  %439 = vst [vmem:[%s1586_s8 + $0x198] sm:$0xff] %v438_v51 }
  0x33   : > { %441 = vst [vmem:[%s1586_s8 + $0x1a0] sm:$0xff] %v440_v52  ;;  %443 = vst [vmem:[%s1586_s8 + $0x1a8] sm:$0xff] %v442_v53  ;;  %v444_v54 = vld [vmem:[%s1581_s7 + $0x360] sm:$0xff]  ;;  %v446_v55 = vld [vmem:[%s1581_s7 + $0x370] sm:$0xff] }
  0x34   : > { %v448_v56 = vld [vmem:[%s1581_s7 + $0x380] sm:$0xff]  ;;  %445 = vst [vmem:[%s1586_s8 + $0x1b0] sm:$0xff] %v444_v54  ;;  %447 = vst [vmem:[%s1586_s8 + $0x1b8] sm:$0xff] %v446_v55  ;;  %v450_v57 = vld [vmem:[%s1581_s7 + $0x390] sm:$0xff] }
  0x35   : > { %449 = vst [vmem:[%s1586_s8 + $0x1c0] sm:$0xff] %v448_v56  ;;  %v452_v58 = vld [vmem:[%s1581_s7 + $0x3a0] sm:$0xff]  ;;  %v454_v59 = vld [vmem:[%s1581_s7 + $0x3b0] sm:$0xff]  ;;  %451 = vst [vmem:[%s1586_s8 + $0x1c8] sm:$0xff] %v450_v57 }
  0x36   : > { %453 = vst [vmem:[%s1586_s8 + $0x1d0] sm:$0xff] %v452_v58  ;;  %455 = vst [vmem:[%s1586_s8 + $0x1d8] sm:$0xff] %v454_v59  ;;  %v456_v60 = vld [vmem:[%s1581_s7 + $0x3c0] sm:$0xff]  ;;  %v458_v61 = vld [vmem:[%s1581_s7 + $0x3d0] sm:$0xff] }
  0x37   : > { %v460_v62 = vld [vmem:[%s1581_s7 + $0x3e0] sm:$0xff]  ;;  %457 = vst [vmem:[%s1586_s8 + $0x1e0] sm:$0xff] %v456_v60  ;;  %459 = vst [vmem:[%s1586_s8 + $0x1e8] sm:$0xff] %v458_v61  ;;  %v462_v63 = vld [vmem:[%s1581_s7 + $0x3f0] sm:$0xff] }
  0x38   : > { %461 = vst [vmem:[%s1586_s8 + $0x1f0] sm:$0xff] %v460_v62  ;;  %463 = vst [vmem:[%s1586_s8 + $0x1f8] sm:$0xff] %v462_v63 }
  0x39 PF: > { %p1205_p7 = scmp.ge.s32.totalorder %s1498_s18, 1  ;;  %p476_p8 = scmp.lt.s32.totalorder %s1498_s18, 5 }
  0x3b   : > { %p477_p9 = pnand %p1205_p7, %p476_p8 }
  0x3c   : > { %s483_s9 = sand.u32 (!%p477_p9), 1, %s1474_s12   ;;  %s1207_s10 = sshll.u32 (!%p477_p9), %s1482_s14, 2 }
  0x3d   : > { %480 = sbr.rel (%p477_p9) target bundleno = 374 (0x176), region = 66  ;;  %s1206_s11 = sshll.u32 (!%p477_p9), %s483_s9, 9 }
  0x3e   : > { %p526_p10 = scmp.lt.s32.totalorder (!%p477_p9), %s1207_s10, 7  ;;  %s1209_s21 = sshll.u32 (!%p477_p9), %s1486_s15, 1 }
  0x3f   : > { %p536_p11 = scmp.lt.s32.totalorder (!%p477_p9), %s1209_s21, 3  ;;  %s1735_s5 = scalar_lea.vmem (!%p477_p9), [#allocation3], %s1206_s11 }
  0x40   : > { %p1212_p12 = scmp.ne.s32.totalorder (!%p477_p9), %s1482_s14, 0 }
  0x44   : > { %s1849_s10 = smov (!%p526_p10, %s1207_s10), 7  ;;  %s1851_s21 = smov (!%p536_p11, %s1209_s21), 3 }
  0x45   : > { %s1208_s22 = sshll.u32 %s1849_s10, 2  ;;  %s538_s12 = scalar_lea.vmem %s1834_s2, %s1851_s21  ;;  %v1500_v0 = vmov (!%p1212_p12), 0.0  }
  0x46   : > { %s1721_s26 = scalar_lea.vmem %s1832_s0, %s1208_s22  ;;  %s1211_s29 = sshll.u32 %s1851_s21, 2  ;;  %554 = vst [vmem:[#allocation2] sm:$0xff] (!%p1212_p12), %v1500_v0  ;;  %555 = vst [vmem:[#allocation2 + $0x8] sm:$0xff] (!%p1212_p12), %v1500_v0 }
  0x47   : > { %s1733_s15 = scalar_lea.vmem %s1835_s3, %s1211_s29  ;;  %553 = sbr.rel (%p1212_p12) target bundleno = 78 (0x4e), region = 74 }
  0x4e PF: > { %v1344_v1 = vld [vmem:[%s1735_s5 + $0x4] ss:$8 sps:$4 sm:$0xff]   ;;  %v1348_v3 = vld [vmem:[%s1735_s5] ss:$8 sps:$4 sm:$0xff]   ;;  %v1350_v5 = vld [vmem:[%s1735_s5 + $0x14] ss:$8 sps:$4 sm:$0xff]  }
  0x4f   : > { %v1346_v2 = vld [vmem:[%s1735_s5 + $0x104] ss:$8 sps:$4 sm:$0xff]   ;;  %958 = vmatprep.subr.bf16.mxu0 %v1344_v1  ;;  %v1349_v4 = vld [vmem:[%s1735_s5 + $0x100] ss:$8 sps:$4 sm:$0xff]   ;;  %v1352_v6 = vld [vmem:[%s1735_s5 + $0x114] ss:$8 sps:$4 sm:$0xff]  }
  0x50   : > { %999 = vmatprep.subr.bf16.mxu1 %v1346_v2  ;;  %959 = vmatpush1.bf16.msra.mxu0 %v1348_v3  ;;  %v1354_v7 = vld [vmem:[%s1735_s5 + $0x10] ss:$8 sps:$4 sm:$0xff]   ;;  %v1356_v9 = vld [vmem:[%s1735_s5 + $0x24] ss:$8 sps:$4 sm:$0xff]   ;;  %v1360_v11 = vld [vmem:[%s1735_s5 + $0x20] ss:$8 sps:$4 sm:$0xff]  }
  0x51   : > { %1000 = vmatpush1.bf16.msra.mxu1 %v1349_v4  ;;  %960 = vmatprep.subr.bf16.mxu0 %v1350_v5  ;;  %v1355_v8 = vld [vmem:[%s1735_s5 + $0x110] ss:$8 sps:$4 sm:$0xff]   ;;  %v1358_v10 = vld [vmem:[%s1735_s5 + $0x124] ss:$8 sps:$4 sm:$0xff]   ;;  %v1361_v12 = vld [vmem:[%s1735_s5 + $0x120] ss:$8 sps:$4 sm:$0xff]  }
  0x52   : > { %1001 = vmatprep.subr.bf16.mxu1 %v1352_v6  ;;  %v1362_v13 = vld [vmem:[%s1735_s5 + $0x34] ss:$8 sps:$4 sm:$0xff]   ;;  %v1366_v15 = vld [vmem:[%s1735_s5 + $0x30] ss:$8 sps:$4 sm:$0xff]   ;;  %v1368_v17 = vld [vmem:[%s1735_s5 + $0x44] ss:$8 sps:$4 sm:$0xff]  }
  0x53   : > { %v1364_v14 = vld [vmem:[%s1735_s5 + $0x134] ss:$8 sps:$4 sm:$0xff]   ;;  %v1367_v16 = vld [vmem:[%s1735_s5 + $0x130] ss:$8 sps:$4 sm:$0xff]   ;;  %v1370_v18 = vld [vmem:[%s1735_s5 + $0x144] ss:$8 sps:$4 sm:$0xff]  }
  0x54   : > { %961 = vmatpush1.bf16.msra.mxu0 %v1354_v7  ;;  %v1372_v19 = vld [vmem:[%s1735_s5 + $0x40] ss:$8 sps:$4 sm:$0xff]   ;;  %v1374_v21 = vld [vmem:[%s1735_s5 + $0x54] ss:$8 sps:$4 sm:$0xff]   ;;  %v1378_v23 = vld [vmem:[%s1735_s5 + $0x50] ss:$8 sps:$4 sm:$0xff]  }
  0x55   : > { %1002 = vmatpush1.bf16.msra.mxu1 %v1355_v8  ;;  %962 = vmatprep.subr.bf16.mxu0 %v1356_v9  ;;  %v1373_v20 = vld [vmem:[%s1735_s5 + $0x140] ss:$8 sps:$4 sm:$0xff]   ;;  %v1376_v22 = vld [vmem:[%s1735_s5 + $0x154] ss:$8 sps:$4 sm:$0xff]   ;;  %v1379_v24 = vld [vmem:[%s1735_s5 + $0x150] ss:$8 sps:$4 sm:$0xff]  }
  0x56   : > { %1003 = vmatprep.subr.bf16.mxu1 %v1358_v10  ;;  %v1380_v25 = vld [vmem:[%s1735_s5 + $0x64] ss:$8 sps:$4 sm:$0xff]   ;;  %v1384_v27 = vld [vmem:[%s1735_s5 + $0x60] ss:$8 sps:$4 sm:$0xff]   ;;  %v1386_v29 = vld [vmem:[%s1735_s5 + $0x74] ss:$8 sps:$4 sm:$0xff]  }
  0x57   : > { %v1382_v26 = vld [vmem:[%s1735_s5 + $0x164] ss:$8 sps:$4 sm:$0xff]   ;;  %v1385_v28 = vld [vmem:[%s1735_s5 + $0x160] ss:$8 sps:$4 sm:$0xff]   ;;  %v1388_v30 = vld [vmem:[%s1735_s5 + $0x174] ss:$8 sps:$4 sm:$0xff]  }
  0x58   : > { %963 = vmatpush1.bf16.msra.mxu0 %v1360_v11  ;;  %v1390_v31 = vld [vmem:[%s1735_s5 + $0x70] ss:$8 sps:$4 sm:$0xff]   ;;  %v1392_v33 = vld [vmem:[%s1735_s5 + $0x84] ss:$8 sps:$4 sm:$0xff]   ;;  %v1396_v35 = vld [vmem:[%s1735_s5 + $0x80] ss:$8 sps:$4 sm:$0xff]  }
  0x59   : > { %1004 = vmatpush1.bf16.msra.mxu1 %v1361_v12  ;;  %964 = vmatprep.subr.bf16.mxu0 %v1362_v13  ;;  %v1391_v32 = vld [vmem:[%s1735_s5 + $0x170] ss:$8 sps:$4 sm:$0xff]   ;;  %v1394_v34 = vld [vmem:[%s1735_s5 + $0x184] ss:$8 sps:$4 sm:$0xff]   ;;  %v1397_v36 = vld [vmem:[%s1735_s5 + $0x180] ss:$8 sps:$4 sm:$0xff]  }
  0x5a   : > { %1005 = vmatprep.subr.bf16.mxu1 %v1364_v14  ;;  %v1398_v37 = vld [vmem:[%s1735_s5 + $0x94] ss:$8 sps:$4 sm:$0xff]   ;;  %v1402_v39 = vld [vmem:[%s1735_s5 + $0x90] ss:$8 sps:$4 sm:$0xff]   ;;  %v1404_v41 = vld [vmem:[%s1735_s5 + $0xa4] ss:$8 sps:$4 sm:$0xff]  }
  0x5b   : > { %v1400_v38 = vld [vmem:[%s1735_s5 + $0x194] ss:$8 sps:$4 sm:$0xff]   ;;  %v1403_v40 = vld [vmem:[%s1735_s5 + $0x190] ss:$8 sps:$4 sm:$0xff]   ;;  %v1406_v42 = vld [vmem:[%s1735_s5 + $0x1a4] ss:$8 sps:$4 sm:$0xff]  }
  0x5c   : > { %965 = vmatpush1.bf16.msra.mxu0 %v1366_v15  ;;  %v1408_v43 = vld [vmem:[%s1735_s5 + $0xa0] ss:$8 sps:$4 sm:$0xff]   ;;  %v1410_v45 = vld [vmem:[%s1735_s5 + $0xb4] ss:$8 sps:$4 sm:$0xff]   ;;  %v1414_v50 = vld [vmem:[%s1735_s5 + $0xb0] ss:$8 sps:$4 sm:$0xff]  }
  0x5d   : > { %1006 = vmatpush1.bf16.msra.mxu1 %v1367_v16  ;;  %966 = vmatprep.subr.bf16.mxu0 %v1368_v17  ;;  %v1409_v44 = vld [vmem:[%s1735_s5 + $0x1a0] ss:$8 sps:$4 sm:$0xff]   ;;  %v1412_v46 = vld [vmem:[%s1735_s5 + $0x1b4] ss:$8 sps:$4 sm:$0xff]   ;;  %v1415_v51 = vld [vmem:[%s1735_s5 + $0x1b0] ss:$8 sps:$4 sm:$0xff]  }
  0x5e   : > { %1007 = vmatprep.subr.bf16.mxu1 %v1370_v18  ;;  %v558_v47 = vld [vmem:[%s1721_s26] sm:$0xff]  ;;  %v559_v49 = vld [vmem:[%s1721_s26 + $0x8] sm:$0xff]  ;;  %v1416_v53 = vld [vmem:[%s1735_s5 + $0xc4] ss:$8 sps:$4 sm:$0xff]   ;;  %p1281_p13 = scmp.ne.s32.totalorder %s1482_s14, 1 }
  0x5f   : > { %v1214_v48 = vcombine.high %v558_v47, %v558_v47  ;;  %v1216_v52 = vcombine.high %v559_v49, %v559_v49  ;;  %v1418_v54 = vld [vmem:[%s1735_s5 + $0x1c4] ss:$8 sps:$4 sm:$0xff]   ;;  %v1420_v55 = vld [vmem:[%s1735_s5 + $0xc0] ss:$8 sps:$4 sm:$0xff]   ;;  %v1422_v57 = vld [vmem:[%s1735_s5 + $0xd4] ss:$8 sps:$4 sm:$0xff]   ;;  %v1213_v5 = vcombine.low %v558_v47, %v558_v47  ;;  %v1215_v6 = vcombine.low %v559_v49, %v559_v49 }
  0x60   : > { %967 = vmatpush1.bf16.msra.mxu0 %v1372_v19  ;;  %v1421_v56 = vld [vmem:[%s1735_s5 + $0x1c0] ss:$8 sps:$4 sm:$0xff]   ;;  %v1424_v58 = vld [vmem:[%s1735_s5 + $0x1d4] ss:$8 sps:$4 sm:$0xff]   ;;  %v1426_v59 = vld [vmem:[%s1735_s5 + $0xd0] ss:$8 sps:$4 sm:$0xff]  }
  0x61   : > { %1008 = vmatpush1.bf16.msra.mxu1 %v1373_v20  ;;  %968 = vmatprep.subr.bf16.mxu0 %v1374_v21  ;;  %v1427_v60 = vld [vmem:[%s1735_s5 + $0x1d0] ss:$8 sps:$4 sm:$0xff]   ;;  %v1428_v61 = vld [vmem:[%s1735_s5 + $0xe4] ss:$8 sps:$4 sm:$0xff]   ;;  %v1432_v63 = vld [vmem:[%s1735_s5 + $0xe0] ss:$8 sps:$4 sm:$0xff]   ;;  %v1052_v21 = vlaneseq (!%p1281_p13) }
  0x62   : > { %1009 = vmatprep.subr.bf16.mxu1 %v1376_v22  ;;  %990 = vmatprep.mubr.bf16.mxu0 %v1214_v48  ;;  %v1430_v62 = vld [vmem:[%s1735_s5 + $0x1e4] ss:$8 sps:$4 sm:$0xff]   ;;  %v1433_v0 = vld [vmem:[%s1735_s5 + $0x1e0] ss:$8 sps:$4 sm:$0xff]   ;;  %v1434_v1 = vld [vmem:[%s1735_s5 + $0xf4] ss:$8 sps:$4 sm:$0xff]  }
  0x63   : > { %1031 = vmatprep.mubr.bf16.mxu1 %v1216_v52  ;;  %v1436_v2 = vld [vmem:[%s1735_s5 + $0x1f4] ss:$8 sps:$4 sm:$0xff]   ;;  %v1438_v3 = vld [vmem:[%s1735_s5 + $0xf0] ss:$8 sps:$4 sm:$0xff]   ;;  %v1053_v22 = vshrl.u32 (!%p1281_p13), %v1052_v21, 7 }
  0x64   : > { %969 = vmatpush1.bf16.msra.mxu0 %v1378_v23  ;;  %v1439_v4 = vld [vmem:[%s1735_s5 + $0x1f0] ss:$8 sps:$4 sm:$0xff]  }
  0x65   : > { %1010 = vmatpush1.bf16.msra.mxu1 %v1379_v24  ;;  %970 = vmatprep.subr.bf16.mxu0 %v1380_v25  ;;  %v556_v8 = vld [vmem:[#allocation2] sm:$0xff]  ;;  %v557_v12 = vld [vmem:[#allocation2 + $0x8] sm:$0xff]  ;;  %v1054_v24 = vsub.s32 (!%p1281_p13), 0, %v1053_v22  ;;  %v1058_v25 = vsub.s32 (!%p1281_p13), 1, %v1053_v22 }
  0x66   : > { %1011 = vmatprep.subr.bf16.mxu1 %v1382_v26  ;;  %v1050_v23 = vld [vmem:[%s538_s12] sm:$0x3] (!%p1281_p13) }
  0x68   : > { %971 = vmatpush1.bf16.msra.mxu0 %v1384_v27 }
  0x69   : > { %1012 = vmatpush1.bf16.msra.mxu1 %v1385_v28  ;;  %972 = vmatprep.subr.bf16.mxu0 %v1386_v29  ;;  %v1055_v28 = vrot.slane (!%p1281_p13), %v1050_v23, %v1054_v24  ;;  %v1059_v29 = vrot.slane (!%p1281_p13), %v1050_v23, %v1058_v25 }
  0x6a   : > { %1013 = vmatprep.subr.bf16.mxu1 %v1388_v30 }
  0x6c   : > { %973 = vmatpush1.bf16.msra.mxu0 %v1390_v31 }
  0x6d   : > { %1014 = vmatpush1.bf16.msra.mxu1 %v1391_v32  ;;  %974 = vmatprep.subr.bf16.mxu0 %v1392_v33 }
  0x6e   : > { %1015 = vmatprep.subr.bf16.mxu1 %v1394_v34 }
  0x70   : > { %975 = vmatpush1.bf16.msra.mxu0 %v1396_v35 }
  0x71   : > { %1016 = vmatpush1.bf16.msra.mxu1 %v1397_v36  ;;  %976 = vmatprep.subr.bf16.mxu0 %v1398_v37 }
  0x72   : > { %1017 = vmatprep.subr.bf16.mxu1 %v1400_v38 }
  0x74   : > { %977 = vmatpush1.bf16.msra.mxu0 %v1402_v39 }
  0x75   : > { %1018 = vmatpush1.bf16.msra.mxu1 %v1403_v40  ;;  %978 = vmatprep.subr.bf16.mxu0 %v1404_v41 }
  0x76   : > { %1019 = vmatprep.subr.bf16.mxu1 %v1406_v42 }
  0x78   : > { %979 = vmatpush1.bf16.msra.mxu0 %v1408_v43 }
  0x79   : > { %1020 = vmatpush1.bf16.msra.mxu1 %v1409_v44  ;;  %980 = vmatprep.subr.bf16.mxu0 %v1410_v45 }
  0x7a   : > { %1021 = vmatprep.subr.bf16.mxu1 %v1412_v46 }
  0x7c   : > { %981 = vmatpush1.bf16.msra.mxu0 %v1414_v50 }
  0x7d   : > { %1022 = vmatpush1.bf16.msra.mxu1 %v1415_v51  ;;  %982 = vmatprep.subr.bf16.mxu0 %v1416_v53 }
  0x7e   : > { %1023 = vmatprep.subr.bf16.mxu1 %v1418_v54 }
  0x80   : > { %983 = vmatpush1.bf16.msra.mxu0 %v1420_v55 }
  0x81   : > { %1024 = vmatpush1.bf16.msra.mxu1 %v1421_v56  ;;  %984 = vmatprep.subr.bf16.mxu0 %v1422_v57 }
  0x82   : > { %1025 = vmatprep.subr.bf16.mxu1 %v1424_v58 }
  0x84   : > { %985 = vmatpush1.bf16.msra.mxu0 %v1426_v59 }
  0x85   : > { %1026 = vmatpush1.bf16.msra.mxu1 %v1427_v60  ;;  %986 = vmatprep.subr.bf16.mxu0 %v1428_v61 }
  0x86   : > { %1027 = vmatprep.subr.bf16.mxu1 %v1430_v62 }
  0x88   : > { %987 = vmatpush1.bf16.msra.mxu0 %v1432_v63 }
  0x89   : > { %1028 = vmatpush1.bf16.msra.mxu1 %v1433_v0  ;;  %988 = vmatprep.subr.bf16.mxu0 %v1434_v1 }
  0x8a   : > { %1029 = vmatprep.subr.bf16.mxu1 %v1436_v2 }
  0x8c   : > { %989 = vmatpush1.bf16.msra.mxu0 %v1438_v3 }
  0x8d   : > { %1030 = vmatpush1.bf16.msra.mxu1 %v1439_v4 }
  0x8f   : > { %991 = vmatmul.mubr.bf16.vlgmr.msra.gmra.mrb[0].mxu0 %v1213_v5 }
  0x90   : > { %1032 = vmatmul.mubr.bf16.vlgmr.msra.gmra.mrb[0].mxu1 %v1215_v6 }
 0x162   : > { %v992_v7 = vpop.f32.mrb[0].mxu0 }
 0x163   : > { %v1033_v9 = vpop.f32.mrb[0].mxu1  ;;  %v994_v11 = vpop.f32.mrb[1].mxu0  ;;  %1047 = sbr.rel (%p1281_p13) target bundleno = 374 (0x176), region = 78 }
 0x164   : > { %v1034_v10 = vadd.f32 %v1033_v9, %v992_v7  ;;  %v1035_v13 = vpop.f32.mrb[1].mxu1  ;;  %v996_v15 = vpop.f32.mrb[2].mxu0 }
 0x165   : > { %v1036_v14 = vadd.f32 %v1035_v13, %v994_v11  ;;  %v1037_v16 = vpop.f32.mrb[2].mxu1  ;;  %v997_v18 = vpop.f32.mrb[3].mxu0 }
 0x166   : > { %v1040_v17 = vadd.f32 %v1034_v10, %v556_v8  ;;  %v1038_v19 = vpop.f32.mrb[3].mxu1 }
 0x167   : > { %v1041_v20 = vadd.f32 %v1036_v14, %v557_v12 }
 0x168   : > { %1042 = vst [vmem:[#allocation2] sm:$0xff] %v1040_v17 }
 0x169   : > { %1043 = vst [vmem:[#allocation2 + $0x8] sm:$0xff] %v1041_v20 }
 0x16f   : > { %v1048_v26 = vld [vmem:[#allocation2] sm:$0xff] }
 0x170   : > { %v1049_v27 = vld [vmem:[#allocation2 + $0x8] sm:$0xff]  ;;  %v1062_v30 = vadd.f32 %v1055_v28, %v1048_v26 }
 0x171   : > { %v1063_v31 = vadd.f32 %v1059_v29, %v1049_v27 }
 0x173   : > { %v1286_v32 = vpack.c.bf16 %v1063_v31, %v1062_v30 }
 0x175   : > { %1072 = vst [vmem:[%s1733_s15] sm:$0xff] %v1286_v32 }
 0x176 PF: > { %s13_s18 = sadd.s32 1, %s1498_s18   ;;  %s1836_s12 = smov %s1478_s13 }
 0x177   : > { %p10_p0 = scmp.ge.s32.totalorder %s13_s18, 6   ;;  %s1837_s13 = smov %s1572_s25 }
 0x178   : > { %s1838_s14 = smov %s1490_s16  ;;  %s1839_s15 = smov %s1494_s17 }
 0x179   : > { %s1840_s16 = smov %s1843_s19  ;;  %s1841_s17 = smov %s1847_s20 }
 0x17a   :  { %12 = sbr.rel (!%p10_p0) target bundleno = 4 (0x4), region = 119 }

// kernel: actor_forward.25
= control target key start
LH: loop header
LB: loop body
LE: loop exit
PB: predicated region body
PF: predicated region fallthrough
CT: control target
= control target key end

     0   :  { %v229_v1 = vmov 0.0   ;;  %vm230_vm0 = vmmov 0   ;;  %s294_s0 = inlined_call_operand.vmem [shape: bf16[8,128], index: 0, kind: input, shape index: {}]   ;;  %s295_s1 = inlined_call_operand.vmem [shape: bf16[128,128], index: 1, kind: input, shape index: {}]   ;;  %s296_s2 = inlined_call_operand.vmem [shape: f32[1,128], index: 2, kind: input, shape index: {}]   ;;  %s297_s3 = inlined_call_operand.hbm [shape: f32[8,128], index: 3, kind: output, shape index: {}]  }
   0x1   :  { %v197_v0 = vld [vmem:[%s295_s1] sm:$0xff]   ;;  %174 = vmatprep.subr.bf16.mxu0 %v229_v1  ;;  %v198_v2 = vld [vmem:[%s295_s1 + $0x8] sm:$0xff]   ;;  %190 = vmatprep.mubr.msk.bf16.mxu0 %vm230_vm0, %v229_v1  ;;  %v199_v3 = vld [vmem:[%s295_s1 + $0x10] sm:$0xff]  }
   0x2   :  { %175 = vmatpush3.bf16.msra.mxu0 %v197_v0 }
   0x3   :  { %176 = vmatprep.subr.bf16.mxu0 %v229_v1 }
   0x6   :  { %177 = vmatpush3.bf16.msra.mxu0 %v198_v2 }
   0x7   :  { %178 = vmatprep.subr.bf16.mxu0 %v229_v1 }
   0x8   :  { %8 = vsyncpa [#allocation4], 0  ;;  %v200_v4 = vld [vmem:[%s295_s1 + $0x18] sm:$0xff]   ;;  %v201_v5 = vld [vmem:[%s295_s1 + $0x20] sm:$0xff]   ;;  %s231_s5 = smov [#allocation3]  }
   0x9   :  { %v202_v6 = vld [vmem:[%s295_s1 + $0x28] sm:$0xff]   ;;  %v203_v7 = vld [vmem:[%s295_s1 + $0x30] sm:$0xff]   ;;  %v204_v8 = vld [vmem:[%s295_s1 + $0x38] sm:$0xff]   ;;  %s148_s6 = sshll.u32 %s231_s5, 4  ;;  %s149_s6 = int_to_ptr.vmem [resolvable:$true] %s148_s6 }
   0xa   :  { %179 = vmatpush3.bf16.msra.mxu0 %v199_v3  ;;  %v22_v9 = vld [vmem:[%s294_s0] sm:$0xf]  ;;  %s205_s1 = scalar_lea.vmem %s149_s6, 128  ;;  %p210_p1 = scmp.lt.s32.totalorder %s149_s6, %s149_s6 }
   0xb   :  { %180 = vmatprep.subr.bf16.mxu0 %v229_v1  ;;  %v164_v10 = vld [vmem:[%s296_s2] ss:$0 sm:$0xff]  ;;  %p206_p0 = scmp.ne.s32.totalorder %s149_s6, %s205_s1  ;;  %p211_p2 = scmp.lt.s32.totalorder %s205_s1, %s205_s1 }
   0xd   :  { %p212_p3 = por %p211_p2, %p210_p1 }
   0xe   :  { %181 = vmatpush3.bf16.msra.mxu0 %v200_v4 }
   0xf   :  { %182 = vmatprep.subr.bf16.mxu0 %v229_v1  ;;  %p213_p4 = pnand %p212_p3, %p206_p0 }
  0x12   :  { %183 = vmatpush3.bf16.msra.mxu0 %v201_v5 }
  0x13   :  { %184 = vmatprep.subr.bf16.mxu0 %v229_v1 }
  0x16   :  { %185 = vmatpush3.bf16.msra.mxu0 %v202_v6 }
  0x17   :  { %186 = vmatprep.subr.bf16.mxu0 %v229_v1 }
  0x1a   :  { %187 = vmatpush3.bf16.msra.mxu0 %v203_v7 }
  0x1b   :  { %188 = vmatprep.subr.bf16.mxu0 %v229_v1 }
  0x1e   :  { %189 = vmatpush3.bf16.msra.mxu0 %v204_v8 }
  0x21   :  { %191 = vmatmul.mubr.bf16.vlgmr.msra.gmra.mrb[0].mxu0 %v22_v9 }
  0xf4   :  { %v121_v11 = vpop.f32.mrb[0].mxu0 }
  0xf5   :  { %v140_v12 = vadd.f32 %v164_v10, %v121_v11  ;;  %v192_v13 = vpop.f32.mrb[1].mxu0 }
  0xf6   :  { %v124_v14 = vpop.f32.mrb[2].mxu0 }
  0xf7   :  { %141 = vst [vmem:[#allocation3] sm:$0xff] %v140_v12  ;;  %v193_v15 = vpop.f32.mrb[3].mxu0 }
  0xf8   :  { %216 = shalt.err (!%p213_p4)
}
  0xf9   :  { %s217_s2 = scalar_lea.hbm %s297_s3, 128 }
  0xfa   :  { %p218_p5 = scmp.ne.s32.totalorder %s297_s3, %s217_s2  ;;  %p221_p6 = scmp.lt.u32.totalorder %s217_s2, %s297_s3 }
  0xfc   :  { %p223_p7 = pnand %p221_p6, %p218_p5 }
  0xfe   :  { %226 = shalt.err (!%p223_p7)
}
  0xff   :  { %151 = dma.vmem_to_hbm [thread:$0]  %s149_s6, 128, %s297_s3, [#allocation4]  }
 0x100   :  { %227 = dma.done.wait [#allocation4], 128  }
 0x101   :  { %228 = vsyncadd [#allocation4], 4294967168 }
 0x102   :  { %155 = vsyncpa [#allocation4], 1 }

// kernel: actor_forward.24
= control target key start
LH: loop header
LB: loop body
LE: loop exit
PB: predicated region body
PF: predicated region fallthrough
CT: control target
= control target key end

     0   :  { %v3133_v1 = vmov 0   ;;  %v3134_v33 = vmov 0.0|0.0   ;;  %s3893_s1 = inlined_call_operand.vmem [shape: bf16[128,512], index: 1, kind: input, shape index: {}]   ;;  %s3894_s0 = inlined_call_operand.vmem [shape: bf16[8,4096], index: 0, kind: input, shape index: {}]   ;;  %s3895_s2 = inlined_call_operand.vmem [shape: bf16[8,1024], index: 2, kind: output, shape index: {0}]   ;;  %s3896_s4 = inlined_call_operand.vmem [shape: f32[8,128], index: 4, kind: output, shape index: {2}]   ;;  %s3897_s3 = inlined_call_operand.vmem [shape: f32[8,128], index: 3, kind: output, shape index: {1}]  }
   0x1   :  { %v3163_v0 = vld [vmem:[%s3893_s1 + $0x4] ss:$16 sps:$4 sm:$0xff]   ;;  %254 = vmatprep.mubr.bf16.mxu0 %v3133_v1  ;;  %295 = vmatprep.mubr.bf16.mxu1 %v3133_v1  ;;  %v3170_v2 = vld [vmem:[%s3893_s1] ss:$16 sps:$4 sm:$0xff]   ;;  %v3193_v6 = vld [vmem:[%s3893_s1 + $0xc] ss:$16 sps:$4 sm:$0xff]  }
   0x2   :  { %222 = vmatprep.subr.bf16.mxu0 %v3163_v0  ;;  %v3176_v3 = vld [vmem:[%s3893_s1 + $0x24] ss:$16 sps:$4 sm:$0xff]   ;;  %v3182_v4 = vld [vmem:[%s3893_s1 + $0x20] ss:$16 sps:$4 sm:$0xff]   ;;  %v3198_v7 = vld [vmem:[%s3893_s1 + $0x8] ss:$16 sps:$4 sm:$0xff]   ;;  %263 = vmatprep.subr.bf16.mxu1 %v3193_v6 }
   0x3   :  { %223 = vmatpush1.bf16.msra.mxu0 %v3170_v2  ;;  %v3188_v5 = vld [vmem:[%s3893_s1 + $0x44] ss:$16 sps:$4 sm:$0xff]   ;;  %v3204_v8 = vld [vmem:[%s3893_s1 + $0x40] ss:$16 sps:$4 sm:$0xff]   ;;  %264 = vmatpush1.bf16.msra.mxu1 %v3198_v7  ;;  %v3217_v10 = vld [vmem:[%s3893_s1 + $0x2c] ss:$16 sps:$4 sm:$0xff]  }
   0x4   :  { %224 = vmatprep.subr.bf16.mxu0 %v3176_v3  ;;  %v3211_v9 = vld [vmem:[%s3893_s1 + $0x64] ss:$16 sps:$4 sm:$0xff]   ;;  %v3222_v11 = vld [vmem:[%s3893_s1 + $0x28] ss:$16 sps:$4 sm:$0xff]   ;;  %265 = vmatprep.subr.bf16.mxu1 %v3217_v10  ;;  %v3229_v12 = vld [vmem:[%s3893_s1 + $0x60] ss:$16 sps:$4 sm:$0xff]  }
   0x5   :  { %v3234_v13 = vld [vmem:[%s3893_s1 + $0x84] ss:$16 sps:$4 sm:$0xff]   ;;  %v3239_v14 = vld [vmem:[%s3893_s1 + $0x4c] ss:$16 sps:$4 sm:$0xff]   ;;  %v3246_v15 = vld [vmem:[%s3893_s1 + $0x48] ss:$16 sps:$4 sm:$0xff]  }
   0x6   :  { %v3252_v16 = vld [vmem:[%s3893_s1 + $0x6c] ss:$16 sps:$4 sm:$0xff]   ;;  %v3258_v17 = vld [vmem:[%s3893_s1 + $0x80] ss:$16 sps:$4 sm:$0xff]   ;;  %v3264_v18 = vld [vmem:[%s3893_s1 + $0xa4] ss:$16 sps:$4 sm:$0xff]  }
   0x7   :  { %225 = vmatpush1.bf16.msra.mxu0 %v3182_v4  ;;  %266 = vmatpush1.bf16.msra.mxu1 %v3222_v11  ;;  %v3270_v19 = vld [vmem:[%s3893_s1 + $0x68] ss:$16 sps:$4 sm:$0xff]   ;;  %v3276_v20 = vld [vmem:[%s3893_s1 + $0x8c] ss:$16 sps:$4 sm:$0xff]   ;;  %v3282_v21 = vld [vmem:[%s3893_s1 + $0xa0] ss:$16 sps:$4 sm:$0xff]  }
   0x8   :  { %226 = vmatprep.subr.bf16.mxu0 %v3188_v5  ;;  %267 = vmatprep.subr.bf16.mxu1 %v3239_v14  ;;  %v3287_v22 = vld [vmem:[%s3893_s1 + $0xc4] ss:$16 sps:$4 sm:$0xff]   ;;  %v3294_v23 = vld [vmem:[%s3893_s1 + $0x88] ss:$16 sps:$4 sm:$0xff]   ;;  %v3299_v24 = vld [vmem:[%s3893_s1 + $0xc0] ss:$16 sps:$4 sm:$0xff]  }
   0x9   :  { %v3305_v25 = vld [vmem:[%s3893_s1 + $0xac] ss:$16 sps:$4 sm:$0xff]   ;;  %v3310_v26 = vld [vmem:[%s3893_s1 + $0xe4] ss:$16 sps:$4 sm:$0xff]   ;;  %v3315_v27 = vld [vmem:[%s3893_s1 + $0xa8] ss:$16 sps:$4 sm:$0xff]  }
   0xa   :  { %v3321_v28 = vld [vmem:[%s3893_s1 + $0xcc] ss:$16 sps:$4 sm:$0xff]   ;;  %v3328_v29 = vld [vmem:[%s3893_s1 + $0xe0] ss:$16 sps:$4 sm:$0xff]   ;;  %v3334_v30 = vld [vmem:[%s3893_s1 + $0xc8] ss:$16 sps:$4 sm:$0xff]  }
   0xb   :  { %227 = vmatpush1.bf16.msra.mxu0 %v3204_v8  ;;  %268 = vmatpush1.bf16.msra.mxu1 %v3246_v15  ;;  %v3340_v31 = vld [vmem:[%s3893_s1 + $0xec] ss:$16 sps:$4 sm:$0xff]   ;;  %v3350_v32 = vld [vmem:[%s3893_s1 + $0xe8] ss:$16 sps:$4 sm:$0xff]   ;;  %v23_v34 = vld [vmem:[%s3894_s0] sm:$0xff] }
   0xc   :  { %228 = vmatprep.subr.bf16.mxu0 %v3211_v9  ;;  %269 = vmatprep.subr.bf16.mxu1 %v3252_v16  ;;  %v25_v35 = vunpack.c.l.bf16 %v23_v34  ;;  %v26_v36 = vunpack.c.h.bf16 %v23_v34  ;;  %v24_v38 = vld [vmem:[%s3894_s0 + $0x8] sm:$0xff] }
   0xd   :  { %v28_v45 = vunpack.c.h.bf16 %v24_v38  ;;  %v27_v51 = vunpack.c.l.bf16 %v24_v38 }
   0xf   :  { %229 = vmatpush1.bf16.msra.mxu0 %v3229_v12  ;;  %270 = vmatpush1.bf16.msra.mxu1 %v3270_v19 }
  0x10   :  { %230 = vmatprep.subr.bf16.mxu0 %v3234_v13  ;;  %271 = vmatprep.subr.bf16.mxu1 %v3276_v20 }
  0x13   :  { %231 = vmatpush1.bf16.msra.mxu0 %v3258_v17  ;;  %272 = vmatpush1.bf16.msra.mxu1 %v3294_v23 }
  0x14   :  { %232 = vmatprep.subr.bf16.mxu0 %v3264_v18  ;;  %273 = vmatprep.subr.bf16.mxu1 %v3305_v25 }
  0x17   :  { %233 = vmatpush1.bf16.msra.mxu0 %v3282_v21  ;;  %274 = vmatpush1.bf16.msra.mxu1 %v3315_v27 }
  0x18   :  { %234 = vmatprep.subr.bf16.mxu0 %v3287_v22  ;;  %275 = vmatprep.subr.bf16.mxu1 %v3321_v28 }
  0x1b   :  { %235 = vmatpush1.bf16.msra.mxu0 %v3299_v24  ;;  %276 = vmatpush1.bf16.msra.mxu1 %v3334_v30 }
  0x1c   :  { %236 = vmatprep.subr.bf16.mxu0 %v3310_v26  ;;  %277 = vmatprep.subr.bf16.mxu1 %v3340_v31 }
  0x1f   :  { %237 = vmatpush1.bf16.msra.mxu0 %v3328_v29  ;;  %278 = vmatpush1.bf16.msra.mxu1 %v3350_v32 }
  0x20   :  { %545 = vmatprep.subr.bf16.mxu0 %v3163_v0  ;;  %586 = vmatprep.subr.bf16.mxu1 %v3193_v6 }
  0x22   :  { %255 = vmatmul.mubr.bf16.vlgmr.msra.gmra.mrb[0].mxu0 %v3134_v33  ;;  %296 = vmatmul.mubr.bf16.vlgmr.msra.gmra.mrb[0].mxu1 %v3134_v33 }
  0x23   :  { %546 = vmatpush1.bf16.msra.mxu0 %v3170_v2  ;;  %577 = vmatprep.mubr.bf16.mxu0 %v3133_v1 }
  0x24   :  { %547 = vmatprep.subr.bf16.mxu0 %v3176_v3  ;;  %587 = vmatpush1.bf16.msra.mxu1 %v3198_v7 }
  0x25   :  { %588 = vmatprep.subr.bf16.mxu1 %v3217_v10  ;;  %618 = vmatprep.mubr.bf16.mxu1 %v3133_v1 }
  0x27   :  { %548 = vmatpush1.bf16.msra.mxu0 %v3182_v4 }
  0x28   :  { %549 = vmatprep.subr.bf16.mxu0 %v3188_v5  ;;  %589 = vmatpush1.bf16.msra.mxu1 %v3222_v11 }
  0x29   :  { %590 = vmatprep.subr.bf16.mxu1 %v3239_v14 }
  0x2b   :  { %550 = vmatpush1.bf16.msra.mxu0 %v3204_v8 }
  0x2c   :  { %551 = vmatprep.subr.bf16.mxu0 %v3211_v9  ;;  %591 = vmatpush1.bf16.msra.mxu1 %v3246_v15 }
  0x2d   :  { %592 = vmatprep.subr.bf16.mxu1 %v3252_v16 }
  0x2f   :  { %552 = vmatpush1.bf16.msra.mxu0 %v3229_v12 }
  0x30   :  { %553 = vmatprep.subr.bf16.mxu0 %v3234_v13  ;;  %593 = vmatpush1.bf16.msra.mxu1 %v3270_v19 }
  0x31   :  { %594 = vmatprep.subr.bf16.mxu1 %v3276_v20 }
  0x33   :  { %554 = vmatpush1.bf16.msra.mxu0 %v3258_v17 }
  0x34   :  { %555 = vmatprep.subr.bf16.mxu0 %v3264_v18  ;;  %595 = vmatpush1.bf16.msra.mxu1 %v3294_v23 }
  0x35   :  { %596 = vmatprep.subr.bf16.mxu1 %v3305_v25 }
  0x37   :  { %556 = vmatpush1.bf16.msra.mxu0 %v3282_v21 }
  0x38   :  { %557 = vmatprep.subr.bf16.mxu0 %v3287_v22  ;;  %597 = vmatpush1.bf16.msra.mxu1 %v3315_v27 }
  0x39   :  { %598 = vmatprep.subr.bf16.mxu1 %v3321_v28 }
  0x3b   :  { %558 = vmatpush1.bf16.msra.mxu0 %v3299_v24 }
  0x3c   :  { %559 = vmatprep.subr.bf16.mxu0 %v3310_v26  ;;  %599 = vmatpush1.bf16.msra.mxu1 %v3334_v30 }
  0x3d   :  { %600 = vmatprep.subr.bf16.mxu1 %v3340_v31 }
  0x3f   :  { %560 = vmatpush1.bf16.msra.mxu0 %v3328_v29 }
  0x40   :  { %868 = vmatprep.subr.bf16.mxu0 %v3163_v0  ;;  %601 = vmatpush1.bf16.msra.mxu1 %v3350_v32 }
  0x41   :  { %909 = vmatprep.subr.bf16.mxu1 %v3193_v6 }
  0xf5   :  { %v256_v37 = vpop.f32.mrb[0].mxu0  ;;  %v297_v47 = vpop.f32.mrb[0].mxu1 }
  0xf6   :  { %v304_v39 = vadd.f32 %v256_v37, %v25_v35  ;;  %v258_v40 = vpop.f32.mrb[1].mxu0  ;;  %v299_v48 = vpop.f32.mrb[1].mxu1  ;;  %v306_v54 = vadd.f32 %v297_v47, %v27_v51 }
  0xf7   :  { %v305_v41 = vadd.f32 %v258_v40, %v26_v36  ;;  %v260_v42 = vpop.f32.mrb[2].mxu0  ;;  %v307_v49 = vadd.f32 %v299_v48, %v28_v45  ;;  %v301_v50 = vpop.f32.mrb[2].mxu1  ;;  %v347_v40 = vld [vmem:[%s3894_s0 + $0x10] sm:$0xff] }
  0xf8   :  { %v2659_v43 = vmul.f32 -1.442695, %v304_v39  ;;  %v261_v44 = vpop.f32.mrb[3].mxu0  ;;  %v302_v52 = vpop.f32.mrb[3].mxu1  ;;  %v350_v42 = vunpack.c.h.bf16 %v347_v40 }
  0xf9   :  { %v2660_v46 = vmul.f32 -1.442695, %v305_v41  ;;  %v2661_v53 = vmul.f32 -1.442695, %v307_v49  ;;  %v349_v41 = vunpack.c.l.bf16 %v347_v40 }
  0xfa   :  { %3005 = vpow2.f32 %v2659_v43 }
  0xfb   :  { %3007 = vpow2.f32 %v2660_v46  ;;  %v348_v46 = vld [vmem:[%s3894_s0 + $0x18] sm:$0xff] }
  0xfc   :  { %3009 = vpow2.f32 %v2661_v53 }
  0xfd   :  { %3011 = vtanh.f32 %v306_v54  ;;  %v352_v54 = vunpack.c.h.bf16 %v348_v46 }
 0x104   :  { %v3006_v55 = vpop.eup %3005 }
 0x105   :  { %v3008_v56 = vpop.eup %3007  ;;  %v311_v57 = vadd.f32 1.0, %v3006_v55 }
 0x106   :  { %v317_v58 = vadd.f32 1.0, %v3008_v56  ;;  %v3010_v59 = vpop.eup %3009  ;;  %v351_v56 = vunpack.c.l.bf16 %v348_v46 }
 0x107   :  { %3013 = vrcp.f32 %v311_v57  ;;  %v3012_v60 = vpop.eup %3011  ;;  %v324_v62 = vadd.f32 1.0, %v3010_v59 }
 0x108   :  { %3015 = vrcp.f32 %v317_v58 }
 0x109   :  { %3017 = vrcp.f32 %v324_v62 }
 0x111   :  { %v3014_v61 = vpop.eup %3013 }
 0x112   :  { %v3016_v63 = vpop.eup %3015  ;;  %v328_v33 = vmul.f32 %v3014_v61, %v3012_v60 }
 0x113   :  { %v327_v34 = vmul.f32 0.0, %v3016_v63  ;;  %v3018_v36 = vpop.eup %3017 }
 0x115   :  { %v3396_v35 = vadd.f32 %v328_v33, %v327_v34 }
 0x117   :  { %3019 = vtanh.f32 %v3396_v35 }
 0x121   :  { %v3020_v37 = vpop.eup %3019 }
 0x122   :  { %v3399_v38 = vmul.f32 %v3020_v37, %v3018_v36 }
 0x124   :  { %v345_v39 = vpack.c.bf16 %v3399_v38, %v3399_v38 }
 0x126   :  { %346 = vst [vmem:[%s3895_s2] sm:$0xf] %v345_v39  ;;  %578 = vmatmul.mubr.bf16.vlgmr.msra.gmra.mrb[4].mxu0 %v345_v39  ;;  %619 = vmatmul.mubr.bf16.vlgmr.msra.gmra.mrb[4].mxu1 %v345_v39 }
 0x127   :  { %869 = vmatpush1.bf16.msra.mxu0 %v3170_v2  ;;  %910 = vmatpush1.bf16.msra.mxu1 %v3198_v7 }
 0x128   :  { %870 = vmatprep.subr.bf16.mxu0 %v3176_v3  ;;  %911 = vmatprep.subr.bf16.mxu1 %v3217_v10 }
 0x129   :  { %900 = vmatprep.mubr.bf16.mxu0 %v3133_v1  ;;  %941 = vmatprep.mubr.bf16.mxu1 %v3133_v1 }
 0x12b   :  { %871 = vmatpush1.bf16.msra.mxu0 %v3182_v4  ;;  %912 = vmatpush1.bf16.msra.mxu1 %v3222_v11 }
 0x12c   :  { %872 = vmatprep.subr.bf16.mxu0 %v3188_v5  ;;  %913 = vmatprep.subr.bf16.mxu1 %v3239_v14 }
 0x12f   :  { %873 = vmatpush1.bf16.msra.mxu0 %v3204_v8  ;;  %914 = vmatpush1.bf16.msra.mxu1 %v3246_v15 }
 0x130   :  { %874 = vmatprep.subr.bf16.mxu0 %v3211_v9  ;;  %915 = vmatprep.subr.bf16.mxu1 %v3252_v16 }
 0x133   :  { %875 = vmatpush1.bf16.msra.mxu0 %v3229_v12  ;;  %916 = vmatpush1.bf16.msra.mxu1 %v3270_v19 }
 0x134   :  { %876 = vmatprep.subr.bf16.mxu0 %v3234_v13  ;;  %917 = vmatprep.subr.bf16.mxu1 %v3276_v20 }
 0x137   :  { %877 = vmatpush1.bf16.msra.mxu0 %v3258_v17  ;;  %918 = vmatpush1.bf16.msra.mxu1 %v3294_v23 }
 0x138   :  { %878 = vmatprep.subr.bf16.mxu0 %v3264_v18  ;;  %919 = vmatprep.subr.bf16.mxu1 %v3305_v25 }
 0x13b   :  { %879 = vmatpush1.bf16.msra.mxu0 %v3282_v21  ;;  %920 = vmatpush1.bf16.msra.mxu1 %v3315_v27 }
 0x13c   :  { %880 = vmatprep.subr.bf16.mxu0 %v3287_v22  ;;  %921 = vmatprep.subr.bf16.mxu1 %v3321_v28 }
 0x13f   :  { %881 = vmatpush1.bf16.msra.mxu0 %v3299_v24  ;;  %922 = vmatpush1.bf16.msra.mxu1 %v3334_v30 }
 0x140   :  { %882 = vmatprep.subr.bf16.mxu0 %v3310_v26  ;;  %923 = vmatprep.subr.bf16.mxu1 %v3340_v31 }
 0x143   :  { %883 = vmatpush1.bf16.msra.mxu0 %v3328_v29  ;;  %924 = vmatpush1.bf16.msra.mxu1 %v3350_v32 }
 0x144   :  { %1191 = vmatprep.subr.bf16.mxu0 %v3163_v0  ;;  %1232 = vmatprep.subr.bf16.mxu1 %v3193_v6 }
 0x1f9   :  { %v579_v43 = vpop.f32.mrb[4].mxu0  ;;  %v620_v44 = vpop.f32.mrb[4].mxu1 }
 0x1fa   :  { %v627_v45 = vadd.f32 %v579_v43, %v349_v41  ;;  %v581_v47 = vpop.f32.mrb[5].mxu0  ;;  %v622_v48 = vpop.f32.mrb[5].mxu1  ;;  %v629_v58 = vadd.f32 %v620_v44, %v351_v56  ;;  %v3522_v56 = vld [vmem:[%s3893_s1 + $0xc] ss:$16 sps:$4 sm:$0xff]  }
 0x1fb   :  { %v628_v49 = vadd.f32 %v581_v47, %v350_v42  ;;  %v583_v50 = vpop.f32.mrb[6].mxu0  ;;  %v624_v0 = vpop.f32.mrb[6].mxu1  ;;  %v630_v55 = vadd.f32 %v622_v48, %v352_v54 }
 0x1fc   :  { %v2694_v51 = vmul.f32 -1.442695, %v627_v45  ;;  %v584_v6 = vpop.f32.mrb[7].mxu0  ;;  %v625_v52 = vpop.f32.mrb[7].mxu1  ;;  %v666_v45 = vmul.f32 0.0, %v3399_v38 }
 0x1fd   :  { %v2695_v53 = vmul.f32 -1.442695, %v628_v49  ;;  %v2696_v57 = vmul.f32 -1.442695, %v630_v55  ;;  %v3517_v55 = vld [vmem:[%s3893_s1 + $0x4] ss:$16 sps:$4 sm:$0xff]  }
 0x1fe   :  { %3021 = vpow2.f32 %v2694_v51 }
 0x1ff   :  { %3023 = vpow2.f32 %v2695_v53 }
 0x200   :  { %3025 = vpow2.f32 %v2696_v57  ;;  %v3527_v57 = vld [vmem:[%s3893_s1] ss:$16 sps:$4 sm:$0xff]  }
 0x201   :  { %3027 = vtanh.f32 %v629_v58  ;;  %v3532_v58 = vld [vmem:[%s3893_s1 + $0x8] ss:$16 sps:$4 sm:$0xff]  }
 0x208   :  { %v3022_v59 = vpop.eup %3021 }
 0x209   :  { %v3024_v60 = vpop.eup %3023  ;;  %v634_v61 = vadd.f32 1.0, %v3022_v59  ;;  %v3541_v59 = vld [vmem:[%s3893_s1 + $0x24] ss:$16 sps:$4 sm:$0xff]  }
 0x20a   :  { %v640_v62 = vadd.f32 1.0, %v3024_v60  ;;  %v3026_v63 = vpop.eup %3025  ;;  %v3546_v60 = vld [vmem:[%s3893_s1 + $0x2c] ss:$16 sps:$4 sm:$0xff]  }
 0x20b   :  { %3029 = vrcp.f32 %v634_v61  ;;  %v3028_v33 = vpop.eup %3027  ;;  %v647_v39 = vadd.f32 1.0, %v3026_v63  ;;  %v3551_v61 = vld [vmem:[%s3893_s1 + $0x20] ss:$16 sps:$4 sm:$0xff]   ;;  %v3565_v63 = vld [vmem:[%s3893_s1 + $0x44] ss:$16 sps:$4 sm:$0xff]  }
 0x20c   :  { %3031 = vrcp.f32 %v640_v62  ;;  %v3556_v62 = vld [vmem:[%s3893_s1 + $0x28] ss:$16 sps:$4 sm:$0xff]  }
 0x20d   :  { %3033 = vrcp.f32 %v647_v39  ;;  %v3594_v39 = vld [vmem:[%s3893_s1 + $0x6c] ss:$16 sps:$4 sm:$0xff]  }
 0x215   :  { %v3030_v34 = vpop.eup %3029 }
 0x216   :  { %v3032_v36 = vpop.eup %3031  ;;  %v651_v37 = vmul.f32 %v3030_v34, %v3028_v33  ;;  %v3570_v33 = vld [vmem:[%s3893_s1 + $0x4c] ss:$16 sps:$4 sm:$0xff]   ;;  %v3575_v34 = vld [vmem:[%s3893_s1 + $0x40] ss:$16 sps:$4 sm:$0xff]  }
 0x217   :  { %v650_v40 = vmul.f32 %v3032_v36, %v3396_v35  ;;  %v3034_v42 = vpop.eup %3033  ;;  %v3580_v36 = vld [vmem:[%s3893_s1 + $0x48] ss:$16 sps:$4 sm:$0xff]  }
 0x219   :  { %v3447_v41 = vadd.f32 %v651_v37, %v650_v40  ;;  %v3589_v37 = vld [vmem:[%s3893_s1 + $0x64] ss:$16 sps:$4 sm:$0xff]   ;;  %v3599_v40 = vld [vmem:[%s3893_s1 + $0x60] ss:$16 sps:$4 sm:$0xff]  }
 0x21b   :  { %3035 = vtanh.f32 %v3447_v41 }
 0x225   :  { %v3036_v43 = vpop.eup %3035 }
 0x226   :  { %v654_v44 = vmul.f32 %v3036_v43, %v3034_v42  ;;  %v3613_v42 = vld [vmem:[%s3893_s1 + $0x80] ss:$16 sps:$4 sm:$0xff]   ;;  %v3618_v43 = vld [vmem:[%s3893_s1 + $0x84] ss:$16 sps:$4 sm:$0xff]  }
 0x228   :  { %v3451_v46 = vadd.f32 %v666_v45, %v654_v44  ;;  %v3623_v44 = vld [vmem:[%s3893_s1 + $0x88] ss:$16 sps:$4 sm:$0xff]   ;;  %v3628_v45 = vld [vmem:[%s3893_s1 + $0x8c] ss:$16 sps:$4 sm:$0xff]  }
 0x22a   :  { %v668_v47 = vpack.c.bf16 %v3451_v46, %v3451_v46 }
 0x22c   :  { %669 = vst [vmem:[%s3895_s2 + $0x4] sm:$0xf] %v668_v47  ;;  %901 = vmatmul.mubr.bf16.vlgmr.msra.gmra.mrb[8].mxu0 %v668_v47  ;;  %942 = vmatmul.mubr.bf16.vlgmr.msra.gmra.mrb[8].mxu1 %v668_v47  ;;  %v3639_v47 = vld [vmem:[%s3893_s1 + $0xac] ss:$16 sps:$4 sm:$0xff]  }
 0x22d   :  { %1192 = vmatpush1.bf16.msra.mxu0 %v3170_v2  ;;  %1233 = vmatpush1.bf16.msra.mxu1 %v3198_v7  ;;  %v670_v2 = vld [vmem:[%s3894_s0 + $0x20] sm:$0xff] }
 0x22e   :  { %1193 = vmatprep.subr.bf16.mxu0 %v3176_v3  ;;  %1234 = vmatprep.subr.bf16.mxu1 %v3217_v10  ;;  %v672_v3 = vunpack.c.l.bf16 %v670_v2 }
 0x22f   :  { %1223 = vmatprep.mubr.bf16.mxu0 %v3133_v1  ;;  %1264 = vmatprep.mubr.bf16.mxu1 %v3133_v1 }
 0x231   :  { %1194 = vmatpush1.bf16.msra.mxu0 %v3182_v4  ;;  %1235 = vmatpush1.bf16.msra.mxu1 %v3222_v11  ;;  %v673_v4 = vunpack.c.h.bf16 %v670_v2  ;;  %v3646_v2 = vld [vmem:[%s3893_s1 + $0xa0] ss:$16 sps:$4 sm:$0xff]  }
 0x232   :  { %1195 = vmatprep.subr.bf16.mxu0 %v3188_v5  ;;  %1236 = vmatprep.subr.bf16.mxu1 %v3239_v14 }
 0x235   :  { %1196 = vmatpush1.bf16.msra.mxu0 %v3204_v8  ;;  %1237 = vmatpush1.bf16.msra.mxu1 %v3246_v15 }
 0x236   :  { %1197 = vmatprep.subr.bf16.mxu0 %v3211_v9  ;;  %1238 = vmatprep.subr.bf16.mxu1 %v3252_v16  ;;  %v671_v9 = vld [vmem:[%s3894_s0 + $0x28] sm:$0xff] }
 0x239   :  { %1198 = vmatpush1.bf16.msra.mxu0 %v3229_v12  ;;  %1239 = vmatpush1.bf16.msra.mxu1 %v3270_v19  ;;  %v675_v19 = vunpack.c.h.bf16 %v671_v9 }
 0x23a   :  { %1199 = vmatprep.subr.bf16.mxu0 %v3234_v13  ;;  %1240 = vmatprep.subr.bf16.mxu1 %v3276_v20 }
 0x23d   :  { %1200 = vmatpush1.bf16.msra.mxu0 %v3258_v17  ;;  %1241 = vmatpush1.bf16.msra.mxu1 %v3294_v23 }
 0x23e   :  { %1201 = vmatprep.subr.bf16.mxu0 %v3264_v18  ;;  %1242 = vmatprep.subr.bf16.mxu1 %v3305_v25 }
 0x241   :  { %1202 = vmatpush1.bf16.msra.mxu0 %v3282_v21  ;;  %1243 = vmatpush1.bf16.msra.mxu1 %v3315_v27  ;;  %v674_v21 = vunpack.c.l.bf16 %v671_v9  ;;  %v3682_v9 = vld [vmem:[%s3893_s1 + $0xe4] ss:$16 sps:$4 sm:$0xff]  }
 0x242   :  { %1203 = vmatprep.subr.bf16.mxu0 %v3287_v22  ;;  %1244 = vmatprep.subr.bf16.mxu1 %v3321_v28 }
 0x245   :  { %1204 = vmatpush1.bf16.msra.mxu0 %v3299_v24  ;;  %1245 = vmatpush1.bf16.msra.mxu1 %v3334_v30 }
 0x246   :  { %1205 = vmatprep.subr.bf16.mxu0 %v3310_v26  ;;  %1246 = vmatprep.subr.bf16.mxu1 %v3340_v31 }
 0x249   :  { %1206 = vmatpush1.bf16.msra.mxu0 %v3328_v29  ;;  %1247 = vmatpush1.bf16.msra.mxu1 %v3350_v32  ;;  %v663_v29 = vmul.f32 0.0, %v3396_v35  ;;  %v989_v35 = vmul.f32 0.0, %v3451_v46  ;;  %v3633_v46 = vld [vmem:[%s3893_s1 + $0xa4] ss:$16 sps:$4 sm:$0xff]  }
 0x24a   :  { %1514 = vmatprep.subr.bf16.mxu0 %v3517_v55  ;;  %1555 = vmatprep.subr.bf16.mxu1 %v3522_v56 }
 0x24b   :  { %v3498_v32 = vadd.f32 %v663_v29, %v3447_v41  ;;  %v3604_v41 = vld [vmem:[%s3893_s1 + $0x68] ss:$16 sps:$4 sm:$0xff]  }
 0x2ff   :  { %v902_v5 = vpop.f32.mrb[8].mxu0  ;;  %v943_v7 = vpop.f32.mrb[8].mxu1 }
 0x300   :  { %v950_v8 = vadd.f32 %v902_v5, %v672_v3  ;;  %v904_v10 = vpop.f32.mrb[9].mxu0  ;;  %v945_v11 = vpop.f32.mrb[9].mxu1  ;;  %v952_v23 = vadd.f32 %v943_v7, %v674_v21  ;;  %v3653_v3 = vld [vmem:[%s3893_s1 + $0xa8] ss:$16 sps:$4 sm:$0xff]   ;;  %v3664_v5 = vld [vmem:[%s3893_s1 + $0xcc] ss:$16 sps:$4 sm:$0xff]  }
 0x301   :  { %v951_v12 = vadd.f32 %v904_v10, %v673_v4  ;;  %v906_v13 = vpop.f32.mrb[10].mxu0  ;;  %v947_v14 = vpop.f32.mrb[10].mxu1  ;;  %v953_v20 = vadd.f32 %v945_v11, %v675_v19  ;;  %v3658_v4 = vld [vmem:[%s3893_s1 + $0xc4] ss:$16 sps:$4 sm:$0xff]   ;;  %v3670_v7 = vld [vmem:[%s3893_s1 + $0xc0] ss:$16 sps:$4 sm:$0xff]  }
 0x302   :  { %v2729_v15 = vmul.f32 -1.442695, %v950_v8  ;;  %v907_v16 = vpop.f32.mrb[11].mxu0  ;;  %v948_v17 = vpop.f32.mrb[11].mxu1  ;;  %v3677_v8 = vld [vmem:[%s3893_s1 + $0xc8] ss:$16 sps:$4 sm:$0xff]  }
 0x303   :  { %v2730_v18 = vmul.f32 -1.442695, %v951_v12  ;;  %v2731_v22 = vmul.f32 -1.442695, %v953_v20  ;;  %v3688_v10 = vld [vmem:[%s3893_s1 + $0xec] ss:$16 sps:$4 sm:$0xff]  }
 0x304   :  { %3037 = vpow2.f32 %v2729_v15  ;;  %v3694_v11 = vld [vmem:[%s3893_s1 + $0xe0] ss:$16 sps:$4 sm:$0xff]   ;;  %v3701_v12 = vld [vmem:[%s3893_s1 + $0xe8] ss:$16 sps:$4 sm:$0xff]  }
 0x305   :  { %3039 = vpow2.f32 %v2730_v18  ;;  %v993_v13 = vld [vmem:[%s3894_s0 + $0x30] sm:$0xff]  ;;  %v994_v19 = vld [vmem:[%s3894_s0 + $0x38] sm:$0xff] }
 0x306   :  { %3041 = vpow2.f32 %v2731_v22  ;;  %v995_v14 = vunpack.c.l.bf16 %v993_v13  ;;  %v996_v15 = vunpack.c.h.bf16 %v993_v13  ;;  %v998_v29 = vunpack.c.h.bf16 %v994_v19 }
 0x307   :  { %3043 = vtanh.f32 %v952_v23 }
 0x30e   :  { %v3038_v24 = vpop.eup %3037 }
 0x30f   :  { %v3040_v25 = vpop.eup %3039  ;;  %v957_v26 = vadd.f32 1.0, %v3038_v24 }
 0x310   :  { %v963_v27 = vadd.f32 1.0, %v3040_v25  ;;  %v3042_v28 = vpop.eup %3041 }
 0x311   :  { %3045 = vrcp.f32 %v957_v26  ;;  %v3044_v30 = vpop.eup %3043  ;;  %v970_v49 = vadd.f32 1.0, %v3042_v28 }
 0x312   :  { %3047 = vrcp.f32 %v963_v27 }
 0x313   :  { %3049 = vrcp.f32 %v970_v49 }
 0x31b   :  { %v3046_v31 = vpop.eup %3045 }
 0x31c   :  { %v3048_v38 = vpop.eup %3047  ;;  %v974_v48 = vmul.f32 %v3046_v31, %v3044_v30  ;;  %v997_v31 = vunpack.c.l.bf16 %v994_v19 }
 0x31d   :  { %v973_v50 = vmul.f32 %v3048_v38, %v3498_v32  ;;  %v3050_v51 = vpop.eup %3049 }
 0x31f   :  { %v3501_v0 = vadd.f32 %v974_v48, %v973_v50 }
 0x321   :  { %3051 = vtanh.f32 %v3501_v0 }
 0x32b   :  { %v3052_v6 = vpop.eup %3051 }
 0x32c   :  { %v977_v52 = vmul.f32 %v3052_v6, %v3050_v51 }
 0x32e   :  { %v3505_v53 = vadd.f32 %v989_v35, %v977_v52  ;;  %v986_v35 = vmul.f32 0.0, %v3498_v32 }
 0x330   :  { %v991_v54 = vpack.c.bf16 %v3505_v53, %v3505_v53  ;;  %v1312_v32 = vmul.f32 0.0, %v3505_v53  ;;  %v1316_v53 = vld [vmem:[%s3894_s0 + $0x40] sm:$0xff] }
 0x332   :  { %992 = vst [vmem:[%s3895_s2 + $0x8] sm:$0xf] %v991_v54  ;;  %1224 = vmatmul.mubr.bf16.vlgmr.msra.gmra.mrb[12].mxu0 %v991_v54  ;;  %1265 = vmatmul.mubr.bf16.vlgmr.msra.gmra.mrb[12].mxu1 %v991_v54 }
 0x333   :  { %1546 = vmatprep.mubr.bf16.mxu0 %v3133_v1  ;;  %1587 = vmatprep.mubr.bf16.mxu1 %v3133_v1 }
 0x334   :  { %1515 = vmatpush1.bf16.msra.mxu0 %v3527_v57  ;;  %1556 = vmatpush1.bf16.msra.mxu1 %v3532_v58 }
 0x335   :  { %1516 = vmatprep.subr.bf16.mxu0 %v3541_v59  ;;  %1557 = vmatprep.subr.bf16.mxu1 %v3546_v60 }
 0x338   :  { %1517 = vmatpush1.bf16.msra.mxu0 %v3551_v61  ;;  %1558 = vmatpush1.bf16.msra.mxu1 %v3556_v62 }
 0x339   :  { %1518 = vmatprep.subr.bf16.mxu0 %v3565_v63  ;;  %1559 = vmatprep.subr.bf16.mxu1 %v3570_v33 }
 0x33c   :  { %1519 = vmatpush1.bf16.msra.mxu0 %v3575_v34  ;;  %1560 = vmatpush1.bf16.msra.mxu1 %v3580_v36 }
 0x33d   :  { %1520 = vmatprep.subr.bf16.mxu0 %v3589_v37  ;;  %1561 = vmatprep.subr.bf16.mxu1 %v3594_v39 }
 0x340   :  { %1521 = vmatpush1.bf16.msra.mxu0 %v3599_v40  ;;  %1562 = vmatpush1.bf16.msra.mxu1 %v3604_v41 }
 0x341   :  { %1522 = vmatprep.subr.bf16.mxu0 %v3618_v43  ;;  %1563 = vmatprep.subr.bf16.mxu1 %v3628_v45 }
 0x344   :  { %1523 = vmatpush1.bf16.msra.mxu0 %v3613_v42  ;;  %1564 = vmatpush1.bf16.msra.mxu1 %v3623_v44 }
 0x345   :  { %1524 = vmatprep.subr.bf16.mxu0 %v3633_v46  ;;  %1565 = vmatprep.subr.bf16.mxu1 %v3639_v47 }
 0x348   :  { %1525 = vmatpush1.bf16.msra.mxu0 %v3646_v2  ;;  %1566 = vmatpush1.bf16.msra.mxu1 %v3653_v3 }
 0x349   :  { %1526 = vmatprep.subr.bf16.mxu0 %v3658_v4  ;;  %1567 = vmatprep.subr.bf16.mxu1 %v3664_v5 }
 0x34c   :  { %1527 = vmatpush1.bf16.msra.mxu0 %v3670_v7  ;;  %1568 = vmatpush1.bf16.msra.mxu1 %v3677_v8 }
 0x34d   :  { %1528 = vmatprep.subr.bf16.mxu0 %v3682_v9  ;;  %1569 = vmatprep.subr.bf16.mxu1 %v3688_v10 }
 0x350   :  { %1529 = vmatpush1.bf16.msra.mxu0 %v3694_v11  ;;  %1570 = vmatpush1.bf16.msra.mxu1 %v3701_v12 }
 0x351   :  { %1837 = vmatprep.subr.bf16.mxu0 %v3517_v55  ;;  %1878 = vmatprep.subr.bf16.mxu1 %v3522_v56 }
 0x405   :  { %v1225_v16 = vpop.f32.mrb[12].mxu0  ;;  %v1266_v17 = vpop.f32.mrb[12].mxu1 }
 0x406   :  { %v1273_v18 = vadd.f32 %v1225_v16, %v995_v14  ;;  %v1227_v20 = vpop.f32.mrb[13].mxu0  ;;  %v1268_v21 = vpop.f32.mrb[13].mxu1  ;;  %v1275_v48 = vadd.f32 %v1266_v17, %v997_v31  ;;  %v3716_v14 = vadd.f32 %v986_v35, %v3501_v0 }
 0x407   :  { %v1274_v22 = vadd.f32 %v1227_v20, %v996_v15  ;;  %v1229_v23 = vpop.f32.mrb[14].mxu0  ;;  %v1270_v24 = vpop.f32.mrb[14].mxu1  ;;  %v1276_v30 = vadd.f32 %v1268_v21, %v998_v29  ;;  %v1317_v29 = vld [vmem:[%s3894_s0 + $0x48] sm:$0xff] }
 0x408   :  { %v2764_v25 = vmul.f32 -1.442695, %v1273_v18  ;;  %v1230_v26 = vpop.f32.mrb[15].mxu0  ;;  %v1271_v27 = vpop.f32.mrb[15].mxu1  ;;  %v1318_v24 = vunpack.c.l.bf16 %v1316_v53  ;;  %v1321_v35 = vunpack.c.h.bf16 %v1317_v29 }
 0x409   :  { %v2765_v28 = vmul.f32 -1.442695, %v1274_v22  ;;  %v2766_v38 = vmul.f32 -1.442695, %v1276_v30 }
 0x40a   :  { %3053 = vpow2.f32 %v2764_v25  ;;  %v1319_v25 = vunpack.c.h.bf16 %v1316_v53 }
 0x40b   :  { %3055 = vpow2.f32 %v2765_v28 }
 0x40c   :  { %3057 = vpow2.f32 %v2766_v38 }
 0x40d   :  { %3059 = vtanh.f32 %v1275_v48 }
 0x414   :  { %v3054_v49 = vpop.eup %3053 }
 0x415   :  { %v3056_v50 = vpop.eup %3055  ;;  %v1280_v51 = vadd.f32 1.0, %v3054_v49 }
 0x416   :  { %v1286_v6 = vadd.f32 1.0, %v3056_v50  ;;  %v3058_v52 = vpop.eup %3057 }
 0x417   :  { %3061 = vrcp.f32 %v1280_v51  ;;  %v3060_v54 = vpop.eup %3059  ;;  %v1293_v18 = vadd.f32 1.0, %v3058_v52 }
 0x418   :  { %3063 = vrcp.f32 %v1286_v6 }
 0x419   :  { %3065 = vrcp.f32 %v1293_v18 }
 0x421   :  { %v3062_v13 = vpop.eup %3061 }
 0x422   :  { %v3064_v15 = vpop.eup %3063  ;;  %v1297_v16 = vmul.f32 %v3062_v13, %v3060_v54  ;;  %v1320_v13 = vunpack.c.l.bf16 %v1317_v29 }
 0x423   :  { %v1296_v17 = vmul.f32 %v3064_v15, %v3716_v14  ;;  %v3066_v20 = vpop.eup %3065 }
 0x425   :  { %v3719_v19 = vadd.f32 %v1297_v16, %v1296_v17 }
 0x427   :  { %3067 = vtanh.f32 %v3719_v19 }
 0x431   :  { %v3068_v21 = vpop.eup %3067 }
 0x432   :  { %v1300_v22 = vmul.f32 %v3068_v21, %v3066_v20 }
 0x434   :  { %v3723_v23 = vadd.f32 %v1312_v32, %v1300_v22  ;;  %v1309_v32 = vmul.f32 0.0, %v3716_v14 }
 0x436   :  { %v1314_v0 = vpack.c.bf16 %v3723_v23, %v3723_v23 }
 0x438   :  { %1315 = vst [vmem:[%s3895_s2 + $0xc] sm:$0xf] %v1314_v0  ;;  %1547 = vmatmul.mubr.bf16.vlgmr.msra.gmra.mrb[16].mxu0 %v1314_v0  ;;  %1588 = vmatmul.mubr.bf16.vlgmr.msra.gmra.mrb[16].mxu1 %v1314_v0 }
 0x439   :  { %1838 = vmatpush1.bf16.msra.mxu0 %v3527_v57  ;;  %1879 = vmatpush1.bf16.msra.mxu1 %v3532_v58 }
 0x43a   :  { %1839 = vmatprep.subr.bf16.mxu0 %v3541_v59  ;;  %1880 = vmatprep.subr.bf16.mxu1 %v3546_v60 }
 0x43b   :  { %1869 = vmatprep.mubr.bf16.mxu0 %v3133_v1  ;;  %1910 = vmatprep.mubr.bf16.mxu1 %v3133_v1 }
 0x43d   :  { %1840 = vmatpush1.bf16.msra.mxu0 %v3551_v61  ;;  %1881 = vmatpush1.bf16.msra.mxu1 %v3556_v62 }
 0x43e   :  { %1841 = vmatprep.subr.bf16.mxu0 %v3565_v63  ;;  %1882 = vmatprep.subr.bf16.mxu1 %v3570_v33 }
 0x441   :  { %1842 = vmatpush1.bf16.msra.mxu0 %v3575_v34  ;;  %1883 = vmatpush1.bf16.msra.mxu1 %v3580_v36 }
 0x442   :  { %1843 = vmatprep.subr.bf16.mxu0 %v3589_v37  ;;  %1884 = vmatprep.subr.bf16.mxu1 %v3594_v39 }
 0x445   :  { %1844 = vmatpush1.bf16.msra.mxu0 %v3599_v40  ;;  %1885 = vmatpush1.bf16.msra.mxu1 %v3604_v41 }
 0x446   :  { %1845 = vmatprep.subr.bf16.mxu0 %v3618_v43  ;;  %1886 = vmatprep.subr.bf16.mxu1 %v3628_v45 }
 0x449   :  { %1846 = vmatpush1.bf16.msra.mxu0 %v3613_v42  ;;  %1887 = vmatpush1.bf16.msra.mxu1 %v3623_v44 }
 0x44a   :  { %1847 = vmatprep.subr.bf16.mxu0 %v3633_v46  ;;  %1888 = vmatprep.subr.bf16.mxu1 %v3639_v47 }
 0x44d   :  { %1848 = vmatpush1.bf16.msra.mxu0 %v3646_v2  ;;  %1889 = vmatpush1.bf16.msra.mxu1 %v3653_v3 }
 0x44e   :  { %1849 = vmatprep.subr.bf16.mxu0 %v3658_v4  ;;  %1890 = vmatprep.subr.bf16.mxu1 %v3664_v5 }
 0x451   :  { %1850 = vmatpush1.bf16.msra.mxu0 %v3670_v7  ;;  %1891 = vmatpush1.bf16.msra.mxu1 %v3677_v8 }
 0x452   :  { %1851 = vmatprep.subr.bf16.mxu0 %v3682_v9  ;;  %1892 = vmatprep.subr.bf16.mxu1 %v3688_v10 }
 0x455   :  { %1852 = vmatpush1.bf16.msra.mxu0 %v3694_v11  ;;  %1893 = vmatpush1.bf16.msra.mxu1 %v3701_v12 }
 0x456   :  { %2160 = vmatprep.subr.bf16.mxu0 %v3517_v55  ;;  %2201 = vmatprep.subr.bf16.mxu1 %v3522_v56 }
 0x50b   :  { %v1548_v26 = vpop.f32.mrb[16].mxu0  ;;  %v1589_v27 = vpop.f32.mrb[16].mxu1 }
 0x50c   :  { %v1596_v28 = vadd.f32 %v1548_v26, %v1318_v24  ;;  %v1550_v30 = vpop.f32.mrb[17].mxu0  ;;  %v1591_v31 = vpop.f32.mrb[17].mxu1  ;;  %v1598_v16 = vadd.f32 %v1589_v27, %v1320_v13  ;;  %v1310_v24 = vadd.f32 %v1309_v32, %v3719_v19  ;;  %v1640_v13 = vld [vmem:[%s3894_s0 + $0x58] sm:$0xff] }
 0x50d   :  { %v1597_v38 = vadd.f32 %v1550_v30, %v1319_v25  ;;  %v1552_v48 = vpop.f32.mrb[18].mxu0  ;;  %v1593_v49 = vpop.f32.mrb[18].mxu1  ;;  %v1599_v54 = vadd.f32 %v1591_v31, %v1321_v35  ;;  %v1644_v32 = vunpack.c.h.bf16 %v1640_v13 }
 0x50e   :  { %v2799_v50 = vmul.f32 -1.442695, %v1596_v28  ;;  %v1553_v51 = vpop.f32.mrb[19].mxu0  ;;  %v1594_v6 = vpop.f32.mrb[19].mxu1 }
 0x50f   :  { %v2800_v52 = vmul.f32 -1.442695, %v1597_v38  ;;  %v2801_v15 = vmul.f32 -1.442695, %v1599_v54 }
 0x510   :  { %3069 = vpow2.f32 %v2799_v50 }
 0x511   :  { %3071 = vpow2.f32 %v2800_v52 }
 0x512   :  { %3073 = vpow2.f32 %v2801_v15 }
 0x513   :  { %3075 = vtanh.f32 %v1598_v16 }
 0x51a   :  { %v3070_v18 = vpop.eup %3069 }
 0x51b   :  { %v3072_v17 = vpop.eup %3071  ;;  %v1603_v20 = vadd.f32 1.0, %v3070_v18 }
 0x51c   :  { %v1609_v21 = vadd.f32 1.0, %v3072_v17  ;;  %v3074_v22 = vpop.eup %3073 }
 0x51d   :  { %3077 = vrcp.f32 %v1603_v20  ;;  %v3076_v0 = vpop.eup %3075  ;;  %v1616_v28 = vadd.f32 1.0, %v3074_v22 }
 0x51e   :  { %3079 = vrcp.f32 %v1609_v21 }
 0x51f   :  { %3081 = vrcp.f32 %v1616_v28 }
 0x527   :  { %v3078_v53 = vpop.eup %3077 }
 0x528   :  { %v3080_v25 = vpop.eup %3079  ;;  %v1620_v26 = vmul.f32 %v3078_v53, %v3076_v0  ;;  %v1643_v53 = vunpack.c.l.bf16 %v1640_v13 }
 0x529   :  { %v1619_v29 = vmul.f32 %v3080_v25, %v1310_v24  ;;  %v3082_v38 = vpop.eup %3081 }
 0x52b   :  { %v1621_v27 = vadd.f32 %v1620_v26, %v1619_v29 }
 0x52d   :  { %3083 = vtanh.f32 %v1621_v27  ;;  %v1629_v30 = vmul.f32 0.0, %v1621_v27 }
 0x52f   :  { %v3772_v31 = vadd.f32 %v1629_v30, %v1310_v24 }
 0x537   :  { %v3084_v48 = vpop.eup %3083 }
 0x538   :  { %v1623_v49 = vmul.f32 %v3084_v48, %v3082_v38 }
 0x53a   :  { %v1634_v50 = vmul.f32 0.0, %v1623_v49 }
 0x53c   :  { %v3775_v14 = vadd.f32 %v1634_v50, %v3723_v23  ;;  %v1639_v23 = vld [vmem:[%s3894_s0 + $0x50] sm:$0xff] }
 0x53d   :  { %v1641_v51 = vunpack.c.l.bf16 %v1639_v23  ;;  %v1642_v6 = vunpack.c.h.bf16 %v1639_v23 }
 0x53e   :  { %v1637_v19 = vpack.c.bf16 %v3775_v14, %v3775_v14 }
 0x540   :  { %1638 = vst [vmem:[%s3895_s2 + $0x10] sm:$0xf] %v1637_v19  ;;  %1870 = vmatmul.mubr.bf16.vlgmr.msra.gmra.mrb[20].mxu0 %v1637_v19  ;;  %1911 = vmatmul.mubr.bf16.vlgmr.msra.gmra.mrb[20].mxu1 %v1637_v19 }
 0x541   :  { %2161 = vmatpush1.bf16.msra.mxu0 %v3527_v57  ;;  %2202 = vmatpush1.bf16.msra.mxu1 %v3532_v58 }
 0x542   :  { %2162 = vmatprep.subr.bf16.mxu0 %v3541_v59  ;;  %2203 = vmatprep.subr.bf16.mxu1 %v3546_v60 }
 0x543   :  { %2192 = vmatprep.mubr.bf16.mxu0 %v3133_v1  ;;  %2233 = vmatprep.mubr.bf16.mxu1 %v3133_v1 }
 0x545   :  { %2163 = vmatpush1.bf16.msra.mxu0 %v3551_v61  ;;  %2204 = vmatpush1.bf16.msra.mxu1 %v3556_v62 }
 0x546   :  { %2164 = vmatprep.subr.bf16.mxu0 %v3565_v63  ;;  %2205 = vmatprep.subr.bf16.mxu1 %v3570_v33 }
 0x549   :  { %2165 = vmatpush1.bf16.msra.mxu0 %v3575_v34  ;;  %2206 = vmatpush1.bf16.msra.mxu1 %v3580_v36 }
 0x54a   :  { %2166 = vmatprep.subr.bf16.mxu0 %v3589_v37  ;;  %2207 = vmatprep.subr.bf16.mxu1 %v3594_v39 }
 0x54d   :  { %2167 = vmatpush1.bf16.msra.mxu0 %v3599_v40  ;;  %2208 = vmatpush1.bf16.msra.mxu1 %v3604_v41 }
 0x54e   :  { %2168 = vmatprep.subr.bf16.mxu0 %v3618_v43  ;;  %2209 = vmatprep.subr.bf16.mxu1 %v3628_v45 }
 0x551   :  { %2169 = vmatpush1.bf16.msra.mxu0 %v3613_v42  ;;  %2210 = vmatpush1.bf16.msra.mxu1 %v3623_v44 }
 0x552   :  { %2170 = vmatprep.subr.bf16.mxu0 %v3633_v46  ;;  %2211 = vmatprep.subr.bf16.mxu1 %v3639_v47 }
 0x555   :  { %2171 = vmatpush1.bf16.msra.mxu0 %v3646_v2  ;;  %2212 = vmatpush1.bf16.msra.mxu1 %v3653_v3 }
 0x556   :  { %2172 = vmatprep.subr.bf16.mxu0 %v3658_v4  ;;  %2213 = vmatprep.subr.bf16.mxu1 %v3664_v5 }
 0x559   :  { %2173 = vmatpush1.bf16.msra.mxu0 %v3670_v7  ;;  %2214 = vmatpush1.bf16.msra.mxu1 %v3677_v8 }
 0x55a   :  { %2174 = vmatprep.subr.bf16.mxu0 %v3682_v9  ;;  %2215 = vmatprep.subr.bf16.mxu1 %v3688_v10 }
 0x55d   :  { %2175 = vmatpush1.bf16.msra.mxu0 %v3694_v11  ;;  %2216 = vmatpush1.bf16.msra.mxu1 %v3701_v12 }
 0x55e   :  { %2483 = vmatprep.subr.bf16.mxu0 %v3517_v55  ;;  %2524 = vmatprep.subr.bf16.mxu1 %v3522_v56 }
 0x613   :  { %v1871_v52 = vpop.f32.mrb[20].mxu0  ;;  %v1912_v35 = vpop.f32.mrb[20].mxu1 }
 0x614   :  { %v1919_v54 = vadd.f32 %v1871_v52, %v1641_v51  ;;  %v1873_v15 = vpop.f32.mrb[21].mxu0  ;;  %v1914_v16 = vpop.f32.mrb[21].mxu1  ;;  %v1921_v25 = vadd.f32 %v1912_v35, %v1643_v53  ;;  %v2285_v53 = vld [vmem:[%s3894_s0 + $0x70] sm:$0xff] }
 0x615   :  { %v1920_v18 = vadd.f32 %v1873_v15, %v1642_v6  ;;  %v1875_v17 = vpop.f32.mrb[22].mxu0  ;;  %v1916_v55 = vpop.f32.mrb[22].mxu1  ;;  %v1922_v0 = vadd.f32 %v1914_v16, %v1644_v32 }
 0x616   :  { %v2834_v20 = vmul.f32 -1.442695, %v1919_v54  ;;  %v1876_v56 = vpop.f32.mrb[23].mxu0  ;;  %v1917_v21 = vpop.f32.mrb[23].mxu1 }
 0x617   :  { %v2835_v22 = vmul.f32 -1.442695, %v1920_v18  ;;  %v2836_v24 = vmul.f32 -1.442695, %v1922_v0 }
 0x618   :  { %3085 = vpow2.f32 %v2834_v20 }
 0x619   :  { %3087 = vpow2.f32 %v2835_v22 }
 0x61a   :  { %3089 = vpow2.f32 %v2836_v24  ;;  %v2287_v24 = vunpack.c.l.bf16 %v2285_v53 }
 0x61b   :  { %3091 = vtanh.f32 %v1921_v25  ;;  %v2288_v25 = vunpack.c.h.bf16 %v2285_v53 }
 0x622   :  { %v3086_v26 = vpop.eup %3085 }
 0x623   :  { %v3088_v28 = vpop.eup %3087  ;;  %v1926_v29 = vadd.f32 1.0, %v3086_v26 }
 0x624   :  { %v1932_v27 = vadd.f32 1.0, %v3088_v28  ;;  %v3090_v30 = vpop.eup %3089 }
 0x625   :  { %3093 = vrcp.f32 %v1926_v29  ;;  %v3092_v38 = vpop.eup %3091  ;;  %v1939_v19 = vadd.f32 1.0, %v3090_v30 }
 0x626   :  { %3095 = vrcp.f32 %v1932_v27  ;;  %v2286_v27 = vld [vmem:[%s3894_s0 + $0x78] sm:$0xff] }
 0x627   :  { %3097 = vrcp.f32 %v1939_v19 }
 0x62f   :  { %v3094_v48 = vpop.eup %3093 }
 0x630   :  { %v3096_v49 = vpop.eup %3095  ;;  %v1943_v50 = vmul.f32 %v3094_v48, %v3092_v38 }
 0x631   :  { %v1942_v23 = vmul.f32 %v3096_v49, %v3772_v31  ;;  %v3098_v35 = vpop.eup %3097 }
 0x633   :  { %v1944_v51 = vadd.f32 %v1943_v50, %v1942_v23 }
 0x635   :  { %3099 = vtanh.f32 %v1944_v51  ;;  %v1952_v6 = vmul.f32 0.0, %v1944_v51 }
 0x637   :  { %v3824_v52 = vadd.f32 %v1952_v6, %v3772_v31 }
 0x63f   :  { %v3100_v54 = vpop.eup %3099 }
 0x640   :  { %v1946_v13 = vmul.f32 %v3100_v54, %v3098_v35  ;;  %v2289_v54 = vunpack.c.l.bf16 %v2286_v27 }
 0x642   :  { %v1957_v15 = vmul.f32 0.0, %v1946_v13 }
 0x644   :  { %v3827_v16 = vadd.f32 %v1957_v15, %v3775_v14 }
 0x646   :  { %v1960_v18 = vpack.c.bf16 %v3827_v16, %v3827_v16 }
 0x648   :  { %1961 = vst [vmem:[%s3895_s2 + $0x14] sm:$0xf] %v1960_v18  ;;  %2193 = vmatmul.mubr.bf16.vlgmr.msra.gmra.mrb[24].mxu0 %v1960_v18  ;;  %2234 = vmatmul.mubr.bf16.vlgmr.msra.gmra.mrb[24].mxu1 %v1960_v18 }
 0x649   :  { %2484 = vmatpush1.bf16.msra.mxu0 %v3527_v57  ;;  %2525 = vmatpush1.bf16.msra.mxu1 %v3532_v58 }
 0x64a   :  { %2485 = vmatprep.subr.bf16.mxu0 %v3541_v59  ;;  %2526 = vmatprep.subr.bf16.mxu1 %v3546_v60 }
 0x64b   :  { %2515 = vmatprep.mubr.bf16.mxu0 %v3133_v1  ;;  %2556 = vmatprep.mubr.bf16.mxu1 %v3133_v1  ;;  %v1962_v1 = vld [vmem:[%s3894_s0 + $0x60] sm:$0xff] }
 0x64c   :  { %v1964_v57 = vunpack.c.l.bf16 %v1962_v1  ;;  %v1965_v58 = vunpack.c.h.bf16 %v1962_v1 }
 0x64d   :  { %2486 = vmatpush1.bf16.msra.mxu0 %v3551_v61  ;;  %2527 = vmatpush1.bf16.msra.mxu1 %v3556_v62  ;;  %v1963_v62 = vld [vmem:[%s3894_s0 + $0x68] sm:$0xff] }
 0x64e   :  { %2487 = vmatprep.subr.bf16.mxu0 %v3565_v63  ;;  %2528 = vmatprep.subr.bf16.mxu1 %v3570_v33 }
 0x651   :  { %2488 = vmatpush1.bf16.msra.mxu0 %v3575_v34  ;;  %2529 = vmatpush1.bf16.msra.mxu1 %v3580_v36 }
 0x652   :  { %2489 = vmatprep.subr.bf16.mxu0 %v3589_v37  ;;  %2530 = vmatprep.subr.bf16.mxu1 %v3594_v39 }
 0x655   :  { %2490 = vmatpush1.bf16.msra.mxu0 %v3599_v40  ;;  %2531 = vmatpush1.bf16.msra.mxu1 %v3604_v41 }
 0x656   :  { %2491 = vmatprep.subr.bf16.mxu0 %v3618_v43  ;;  %2532 = vmatprep.subr.bf16.mxu1 %v3628_v45  ;;  %v1967_v43 = vunpack.c.h.bf16 %v1963_v62  ;;  %v1966_v45 = vunpack.c.l.bf16 %v1963_v62 }
 0x659   :  { %2492 = vmatpush1.bf16.msra.mxu0 %v3613_v42  ;;  %2533 = vmatpush1.bf16.msra.mxu1 %v3623_v44 }
 0x65a   :  { %2493 = vmatprep.subr.bf16.mxu0 %v3633_v46  ;;  %2534 = vmatprep.subr.bf16.mxu1 %v3639_v47 }
 0x65d   :  { %2494 = vmatpush1.bf16.msra.mxu0 %v3646_v2  ;;  %2535 = vmatpush1.bf16.msra.mxu1 %v3653_v3 }
 0x65e   :  { %2495 = vmatprep.subr.bf16.mxu0 %v3658_v4  ;;  %2536 = vmatprep.subr.bf16.mxu1 %v3664_v5 }
 0x661   :  { %2496 = vmatpush1.bf16.msra.mxu0 %v3670_v7  ;;  %2537 = vmatpush1.bf16.msra.mxu1 %v3677_v8 }
 0x662   :  { %2497 = vmatprep.subr.bf16.mxu0 %v3682_v9  ;;  %2538 = vmatprep.subr.bf16.mxu1 %v3688_v10 }
 0x665   :  { %2498 = vmatpush1.bf16.msra.mxu0 %v3694_v11  ;;  %2539 = vmatpush1.bf16.msra.mxu1 %v3701_v12 }
 0x71b   :  { %v2194_v59 = vpop.f32.mrb[24].mxu0  ;;  %v2235_v60 = vpop.f32.mrb[24].mxu1 }
 0x71c   :  { %v2242_v61 = vadd.f32 %v2194_v59, %v1964_v57  ;;  %v2196_v63 = vpop.f32.mrb[25].mxu0  ;;  %v2237_v33 = vpop.f32.mrb[25].mxu1  ;;  %v2244_v47 = vadd.f32 %v2235_v60, %v1966_v45 }
 0x71d   :  { %v2243_v34 = vadd.f32 %v2196_v63, %v1965_v58  ;;  %v2198_v36 = vpop.f32.mrb[26].mxu0  ;;  %v2239_v37 = vpop.f32.mrb[26].mxu1  ;;  %v2245_v44 = vadd.f32 %v2237_v33, %v1967_v43 }
 0x71e   :  { %v2869_v39 = vmul.f32 -1.442695, %v2242_v61  ;;  %v2199_v40 = vpop.f32.mrb[27].mxu0  ;;  %v2240_v41 = vpop.f32.mrb[27].mxu1 }
 0x71f   :  { %v2870_v42 = vmul.f32 -1.442695, %v2243_v34  ;;  %v2871_v46 = vmul.f32 -1.442695, %v2245_v44 }
 0x720   :  { %3101 = vpow2.f32 %v2869_v39 }
 0x721   :  { %3103 = vpow2.f32 %v2870_v42 }
 0x722   :  { %3105 = vpow2.f32 %v2871_v46 }
 0x723   :  { %3107 = vtanh.f32 %v2244_v47 }
 0x72a   :  { %v3102_v2 = vpop.eup %3101 }
 0x72b   :  { %v3104_v3 = vpop.eup %3103  ;;  %v2249_v4 = vadd.f32 1.0, %v3102_v2 }
 0x72c   :  { %v2255_v5 = vadd.f32 1.0, %v3104_v3  ;;  %v3106_v7 = vpop.eup %3105 }
 0x72d   :  { %3109 = vrcp.f32 %v2249_v4  ;;  %v3108_v8 = vpop.eup %3107  ;;  %v2262_v12 = vadd.f32 1.0, %v3106_v7 }
 0x72e   :  { %3111 = vrcp.f32 %v2255_v5 }
 0x72f   :  { %3113 = vrcp.f32 %v2262_v12 }
 0x737   :  { %v3110_v9 = vpop.eup %3109 }
 0x738   :  { %v3112_v10 = vpop.eup %3111  ;;  %v2266_v11 = vmul.f32 %v3110_v9, %v3108_v8 }
 0x739   :  { %v2265_v31 = vmul.f32 %v3112_v10, %v3824_v52  ;;  %v3114_v20 = vpop.eup %3113 }
 0x73b   :  { %v2267_v14 = vadd.f32 %v2266_v11, %v2265_v31 }
 0x73d   :  { %3115 = vtanh.f32 %v2267_v14  ;;  %v2275_v17 = vmul.f32 0.0, %v2267_v14 }
 0x73f   :  { %v2279_v55 = vadd.f32 %v2275_v17, %v3824_v52  ;;  %v2290_v52 = vunpack.c.h.bf16 %v2286_v27 }
 0x747   :  { %v3116_v56 = vpop.eup %3115 }
 0x748   :  { %v2269_v21 = vmul.f32 %v3116_v56, %v3114_v20 }
 0x74a   :  { %v2280_v22 = vmul.f32 0.0, %v2269_v21 }
 0x74c   :  { %v2282_v32 = vadd.f32 %v2280_v22, %v3827_v16 }
 0x74e   :  { %v2283_v0 = vpack.c.bf16 %v2282_v32, %v2282_v32 }
 0x750   :  { %2284 = vst [vmem:[%s3895_s2 + $0x18] sm:$0xf] %v2283_v0  ;;  %2516 = vmatmul.mubr.bf16.vlgmr.msra.gmra.mrb[28].mxu0 %v2283_v0  ;;  %2557 = vmatmul.mubr.bf16.vlgmr.msra.gmra.mrb[28].mxu1 %v2283_v0 }
 0x823   :  { %v2517_v26 = vpop.f32.mrb[28].mxu0  ;;  %v2558_v28 = vpop.f32.mrb[28].mxu1 }
 0x824   :  { %v2565_v29 = vadd.f32 %v2517_v26, %v2287_v24  ;;  %v2519_v30 = vpop.f32.mrb[29].mxu0  ;;  %v2560_v38 = vpop.f32.mrb[29].mxu1  ;;  %v2567_v15 = vadd.f32 %v2558_v28, %v2289_v54 }
 0x825   :  { %v2566_v48 = vadd.f32 %v2519_v30, %v2288_v25  ;;  %v2521_v49 = vpop.f32.mrb[30].mxu0  ;;  %v2562_v50 = vpop.f32.mrb[30].mxu1  ;;  %v2568_v35 = vadd.f32 %v2560_v38, %v2290_v52 }
 0x826   :  { %v2904_v19 = vmul.f32 -1.442695, %v2565_v29  ;;  %v2522_v23 = vpop.f32.mrb[31].mxu0  ;;  %v2563_v51 = vpop.f32.mrb[31].mxu1 }
 0x827   :  { %v2905_v6 = vmul.f32 -1.442695, %v2566_v48  ;;  %v2906_v13 = vmul.f32 -1.442695, %v2568_v35 }
 0x828   :  { %3117 = vpow2.f32 %v2904_v19 }
 0x829   :  { %3119 = vpow2.f32 %v2905_v6 }
 0x82a   :  { %3121 = vpow2.f32 %v2906_v13 }
 0x82b   :  { %3123 = vtanh.f32 %v2567_v15 }
 0x832   :  { %v3118_v16 = vpop.eup %3117 }
 0x833   :  { %v3120_v18 = vpop.eup %3119  ;;  %v2572_v1 = vadd.f32 1.0, %v3118_v16 }
 0x834   :  { %v2578_v57 = vadd.f32 1.0, %v3120_v18  ;;  %v3122_v58 = vpop.eup %3121 }
 0x835   :  { %3125 = vrcp.f32 %v2572_v1  ;;  %v3124_v59 = vpop.eup %3123  ;;  %v2585_v63 = vadd.f32 1.0, %v3122_v58 }
 0x836   :  { %3127 = vrcp.f32 %v2578_v57 }
 0x837   :  { %3129 = vrcp.f32 %v2585_v63 }
 0x83f   :  { %v3126_v60 = vpop.eup %3125 }
 0x840   :  { %v3128_v61 = vpop.eup %3127  ;;  %v2589_v62 = vmul.f32 %v3126_v60, %v3124_v59 }
 0x841   :  { %v2588_v33 = vmul.f32 %v3128_v61, %v2279_v55  ;;  %v3130_v39 = vpop.eup %3129 }
 0x843   :  { %v2590_v34 = vadd.f32 %v2589_v62, %v2588_v33 }
 0x845   :  { %3131 = vtanh.f32 %v2590_v34  ;;  %v2598_v36 = vmul.f32 0.0, %v2590_v34 }
 0x847   :  { %v2602_v37 = vadd.f32 %v2598_v36, %v2279_v55 }
 0x849   :  { %2614 = vst [vmem:[%s3896_s4] sm:$0xff] %v2602_v37 }
 0x84f   :  { %v3132_v40 = vpop.eup %3131 }
 0x850   :  { %v2592_v41 = vmul.f32 %v3132_v40, %v3130_v39 }
 0x852   :  { %v2603_v42 = vmul.f32 0.0, %v2592_v41 }
 0x854   :  { %v2605_v43 = vadd.f32 %v2603_v42, %v2282_v32 }
 0x856   :  { %v2606_v44 = vpack.c.bf16 %v2605_v43, %v2605_v43  ;;  %2613 = vst [vmem:[%s3897_s3] sm:$0xff] %v2605_v43 }
 0x858   :  { %2607 = vst [vmem:[%s3895_s2 + $0x1c] sm:$0xf] %v2606_v44 }

</bundles_post_ra>
